<compile_context>
chip_gen: v5e
topology: v5e:2x2
jax: 0.10.0
libtpu: 0.0.40
codegen_flags: <defaults>
</compile_context>

<pallas_src>
import functools

import jax
import jax.numpy as jnp
from jax import lax
from jax.experimental import pallas as pl
from jax.experimental.pallas import tpu as pltpu


# ------------------------------ fused kernel --------------------------------

def _sk_unit_kernel(x_ref, mask_ref,
                    w1_ref, b1_ref,
                    wg_ref, bg_ref,
                    wfc_ref, bfc_ref,
                    wa_ref, ba_ref,
                    w3_ref, b3_ref,
                    o_ref,
                    h1a_scr, h1b_scr,
                    *, H, Wp, PR, cmid, conv_shortcut):
    Hf = h1a_scr.shape[0]        # padded flattened length (rows of the grid)
    base = PR * Wp               # first "anchor" row of the flattened grid
    HWp = H * Wp                 # number of anchor rows (valid H x padded W)

    xf = x_ref[0]                # (Hf, cin) f32, zero-padded flattened input
    mask = mask_ref[...]         # (Hf, 1)   1.0 on interior positions, else 0

    # ---- conv1: 1x1 conv (BN scale folded into weight columns) + bias + ReLU.
    #      Halo rows/cols are re-zeroed so the dilated taps below see proper
    #      zero padding of h1.
    h1 = jnp.dot(xf.astype(jnp.bfloat16), w1_ref[...],
                 preferred_element_type=jnp.float32)
    h1 = jnp.maximum(h1 + b1_ref[...], 0.0) * mask            # (Hf, cmid) f32

    # bf16 scratch (halves the 18x re-read traffic of the im2col gather).
    # h1b is h1 shifted down by one row so every tap slice below starts at an
    # EVEN row offset (aligned to the bf16 sublane packing).
    h1a_scr[...] = h1.astype(jnp.bfloat16)
    h1b_scr[...] = h1[1:Hf - 1, :].astype(jnp.bfloat16)

    # ---- both grouped dilated 3x3 branches as ONE block-diagonal matmul:
    #      (HWp, 18*C) @ (18*C, 2*C).  Each tap is a contiguous row slice of
    #      the flattened padded h1 (Wp multiple of 8 -> row-shift taps stay
    #      sublane aligned).
    taps = []
    for dil in (1, 2):
        for ki in range(3):
            for kj in range(3):
                off = base + ((ki - 1) * Wp + (kj - 1)) * dil
                if off % 2 == 0:
                    taps.append(h1a_scr[off:off + HWp, :])
                else:
                    taps.append(h1b_scr[off - 1:off - 1 + HWp, :])
    patches = jnp.concatenate(taps, axis=-1)                   # (HWp, 18C) bf16
    f12 = jnp.dot(patches, wg_ref[...], preferred_element_type=jnp.float32)
    f12 = jnp.maximum(f12 + bg_ref[...], 0.0)                  # (HWp, 2C)
    f1 = f12[:, :cmid]
    f2 = f12[:, cmid:]

    # ---- SK attention: global MAX pool -> fc(1x1+BN+ReLU) -> fused two-head
    #      matmul -> softmax over branches -> weighted sum.
    #      Zeroing the padded columns before the max is correct because f1/f2
    #      are post-ReLU (>= 0), so zeros cannot win the max.
    valid = mask_ref[base:base + HWp, :]
    u = (f1 + f2) * valid
    s = jnp.max(u, axis=0, keepdims=True)                      # (1, cmid)
    z = jnp.dot(s, wfc_ref[...], preferred_element_type=jnp.float32)
    z = jnp.maximum(z + bfc_ref[...], 0.0)                     # (1, d)
    a = jnp.dot(z, wa_ref[...], preferred_element_type=jnp.float32) + ba_ref[...]
    a1 = a[:, :cmid]
    a2 = a[:, cmid:]
    m = jnp.maximum(a1, a2)
    e1 = jnp.exp(a1 - m)
    e2 = jnp.exp(a2 - m)
    # Approximate reciprocal (EUP slot): attention weights sum to 1 only to
    # ~1e-3; deliberate, well inside the checked tolerance.
    inv = pl.reciprocal(e1 + e2, approx=True)
    v = f1 * (e1 * inv) + f2 * (e2 * inv)                      # (HWp, cmid) f32

    # ---- conv3 (+ conv shortcut fused into one matmul when present) + ReLU.
    x_in = xf[base:base + HWp, :]
    if conv_shortcut:
        lhs = jnp.concatenate(
            [v.astype(jnp.bfloat16), x_in.astype(jnp.bfloat16)], axis=-1)
        o = jnp.dot(lhs, w3_ref[...], preferred_element_type=jnp.float32)
        o = o + b3_ref[...]
    else:
        o = jnp.dot(v.astype(jnp.bfloat16), w3_ref[...],
                    preferred_element_type=jnp.float32)
        o = o + b3_ref[...] + x_in
    o_ref[0] = jnp.maximum(o, 0.0).astype(o_ref.dtype)


def sk_unit_forward(x_nchw, p, *, M=2):
    assert M == 2, "fused SK kernel hardcodes M=2 branches"
    n, cin, h, w = x_nchw.shape
    cmid = p['w1'].shape[1]
    cout = p['w3'].shape[1]
    d = p['wfc'].shape[1]
    conv_shortcut = 'ws' in p

    # Pad ONCE at the maximum halo.  Rows get 3 (so every flattened im2col tap
    # slice stays in range); width is padded asymmetrically (left 2 = max
    # dilation, right >= 2) so Wp is a multiple of 8.
    PR, PCL = 3, 2
    Wp = -(-(w + PCL + 2) // 8) * 8
    PCR = Wp - w - PCL
    assert PCR >= 2
    Hp = h + 2 * PR
    Hf = Hp * Wp
    HWp = h * Wp

    x_nhwc = jnp.transpose(x_nchw, (0, 2, 3, 1)).astype(jnp.float32)  # NCHW->NHWC
    xp = jnp.pad(x_nhwc, ((0, 0), (PR, PR), (PCL, PCR), (0, 0)))
    xp_flat = xp.reshape(n, Hf, cin)

    ii = jnp.arange(Hp)[:, None]
    jj = jnp.arange(Wp)[None, :]
    interior = (ii >= PR) & (ii < PR + h) & (jj >= PCL) & (jj < PCL + w)
    mask = interior.astype(jnp.float32).reshape(Hf, 1)

    bf16 = jnp.bfloat16
    f32 = jnp.float32

    # ---- fold BN scales into weight columns (in f32), then cast to bf16.
    w1s = (p['w1'] * p['s1'][None, :]).astype(bf16)                  # (cin, cmid)
    b1 = p['b1'].reshape(1, cmid)

    # Block-diagonal RHS [[wg1,0],[0,wg2]] for the fused 18-tap branch matmul.
    wg_blk = jnp.zeros((18 * cmid, 2 * cmid), f32)
    wg_blk = wg_blk.at[:9 * cmid, :cmid].set(p['wg_flat'][0] * p['sg'][0][None, :])
    wg_blk = wg_blk.at[9 * cmid:, cmid:].set(p['wg_flat'][1] * p['sg'][1][None, :])
    wg_blk = wg_blk.astype(bf16)
    bg_cat = jnp.concatenate([p['bg'][0], p['bg'][1]]).reshape(1, 2 * cmid)

    wfc_s = p['wfc'] * p['sfc'][None, :]                             # (cmid, d)
    bfc = p['bfc'].reshape(1, d)
    wa_cat = jnp.concatenate([p['wa'][0], p['wa'][1]], axis=1)       # (d, 2*cmid)
    ba_cat = jnp.concatenate([p['ba'][0], p['ba'][1]]).reshape(1, 2 * cmid)

    if conv_shortcut:
        # conv3 and conv-shortcut fused into one matmul.
        w_last = jnp.concatenate(
            [p['w3'] * p['s3'][None, :], p['ws'] * p['ss'][None, :]],
            axis=0).astype(bf16)                                     # (cmid+cin, cout)
        b_last = (p['b3'] + p['bs']).reshape(1, cout)
    else:
        w_last = (p['w3'] * p['s3'][None, :]).astype(bf16)           # (cmid, cout)
        b_last = p['b3'].reshape(1, cout)

    args = [xp_flat, mask, w1s, b1, wg_blk, bg_cat, wfc_s, bfc,
            wa_cat, ba_cat, w_last, b_last]

    def full_spec(a):                       # weight/scale: same full block each step
        nd = a.ndim
        return pl.BlockSpec(a.shape, lambda b, _nd=nd: (0,) * _nd)

    in_specs = [pl.BlockSpec((1, Hf, cin), lambda b: (b, 0, 0))]
    in_specs += [full_spec(a) for a in args[1:]]

    out_flat = pl.pallas_call(
        functools.partial(_sk_unit_kernel, H=h, Wp=Wp, PR=PR, cmid=cmid,
                          conv_shortcut=conv_shortcut),
        out_shape=jax.ShapeDtypeStruct((n, HWp, cout), jnp.bfloat16),  # bf16 writeback
        grid=(n,),
        in_specs=in_specs,
        out_specs=pl.BlockSpec((1, HWp, cout), lambda b: (b, 0, 0)),
        scratch_shapes=[pltpu.VMEM((Hf, cmid), jnp.bfloat16),
                        pltpu.VMEM((Hf - 2, cmid), jnp.bfloat16)],
        compiler_params=pltpu.CompilerParams(
            dimension_semantics=("parallel",)),      # v7x: split batch over 2 TCs
    )(*args)

    # Drop the (masked) padded columns and return f32 NCHW.
    out = out_flat.reshape(n, h, Wp, cout)[:, :, PCL:PCL + w, :].astype(jnp.float32)
    return jnp.transpose(out, (0, 3, 1, 2))


# --------------------------- parameters (glue) ------------------------------

def fold_bn(key, c, eps=1e-5):
    k1, k2, k3, k4 = jax.random.split(key, 4)
    gamma = 1.0 + 0.1 * jax.random.normal(k1, (c,), jnp.float32)
    beta = 0.1 * jax.random.normal(k2, (c,), jnp.float32)
    mean = 0.1 * jax.random.normal(k3, (c,), jnp.float32)
    var = 0.5 + jax.random.uniform(k4, (c,), jnp.float32)
    scale = gamma / jnp.sqrt(var + eps)
    bias = beta - mean * scale
    return scale, bias


def make_params(key, cin, cmid, cout, M, G, r, L):
    d = max(cmid // r, L)
    cg = cmid // G
    keys = jax.random.split(key, 32)
    p = {}
    p['w1'] = 0.2 * jax.random.normal(keys[0], (cin, cmid), jnp.float32)
    p['s1'], p['b1'] = fold_bn(keys[1], cmid)

    p['wg_torch'], p['wg_flat'], p['sg'], p['bg'] = [], [], [], []
    for i in range(M):
        # PyTorch grouped-conv weight: (C_out, C_in/G, 3, 3)
        w = 0.2 * jax.random.normal(keys[2 + i], (cmid, cg, 3, 3), jnp.float32)
        p['wg_torch'].append(w)
        # Equivalent block-diagonal dense HWIO weight, flattened tap-major to
        # (9*C, C) for the single im2col matmul.  NOTE: fine for C/G=4; switch
        # to per-group matmuls if C/G ever reaches MXU width (>=128).
        wd = jnp.zeros((3, 3, cmid, cmid), jnp.float32)
        wr = w.reshape(G, cg, cg, 3, 3)                   # (g, out_j, in_c, ki, kj)
        for g in range(G):
            blk = jnp.transpose(wr[g], (2, 3, 1, 0))      # (ki, kj, in_c, out_j)
            wd = wd.at[:, :, g * cg:(g + 1) * cg, g * cg:(g + 1) * cg].set(blk)
        p['wg_flat'].append(wd.reshape(9 * cmid, cmid))
        s, b = fold_bn(keys[6 + i], cmid)
        p['sg'].append(s)
        p['bg'].append(b)

    p['wfc'] = 0.2 * jax.random.normal(keys[10], (cmid, d), jnp.float32)
    p['sfc'], p['bfc'] = fold_bn(keys[11], d)
    p['wa'] = [0.2 * jax.random.normal(keys[12 + i], (d, cmid), jnp.float32)
               for i in range(M)]
    p['ba'] = [0.1 * jax.random.normal(keys[14 + i], (cmid,), jnp.float32)
               for i in range(M)]
    p['w3'] = 0.2 * jax.random.normal(keys[16], (cmid, cout), jnp.float32)
    p['s3'], p['b3'] = fold_bn(keys[17], cout)
    if cin != cout:
        p['ws'] = 0.2 * jax.random.normal(keys[18], (cin, cout), jnp.float32)
        p['ss'], p['bs'] = fold_bn(keys[19], cout)
    return p


# ----------------------------- pure-JAX reference ---------------------------

def ref_forward(x_nchw, p, *, M=2, G=8):
    x = jnp.transpose(x_nchw, (0, 2, 3, 1)).astype(jnp.float32)
    h1 = jax.nn.relu(jnp.einsum('nhwc,cd->nhwd', x, p['w1']) * p['s1'] + p['b1'])
    feats = []
    for i in range(M):
        dil = 1 + i
        rhs = jnp.transpose(p['wg_torch'][i], (2, 3, 1, 0))  # HWIO
        y = lax.conv_general_dilated(
            h1, rhs, window_strides=(1, 1), padding=[(dil, dil), (dil, dil)],
            rhs_dilation=(dil, dil),
            dimension_numbers=('NHWC', 'HWIO', 'NHWC'),
            feature_group_count=G)
        feats.append(jax.nn.relu(y * p['sg'][i] + p['bg'][i]))
    u = feats[0] + feats[1]
    s = jnp.max(u, axis=(1, 2))                             # global max pool
    z = jax.nn.relu(s @ p['wfc'] * p['sfc'] + p['bfc'])
    a = jnp.stack([z @ p['wa'][i] + p['ba'][i] for i in range(M)], axis=1)
    att = jax.nn.softmax(a, axis=1)
    v = sum(feats[i] * att[:, i][:, None, None, :] for i in range(M))
    o3 = jnp.einsum('nhwc,cd->nhwd', v, p['w3']) * p['s3'] + p['b3']
    if 'ws' in p:
        sc = jnp.einsum('nhwc,cd->nhwd', x, p['ws']) * p['ss'] + p['bs']
    else:
        sc = x
    out = jax.nn.relu(o3 + sc)
    return jnp.transpose(out, (0, 3, 1, 2))


# --------------------------------- main --------------------------------------

if __name__ == "__main__":
    N, CIN, H, W = 2, 32, 16, 16
    CMID, COUT = 32, 64          # CIN != COUT exercises the fused conv-shortcut path
    M, G, R, L = 2, 8, 2, 16     # d = max(CMID // R, L) = 16

    key = jax.random.PRNGKey(0)
    kx, kp = jax.random.split(key)
    x = jax.random.normal(kx, (N, CIN, H, W), jnp.float32)
    params = make_params(kp, CIN, CMID, COUT, M, G, R, L)

    out = sk_unit_forward(x, params, M=M)
    out = jax.block_until_ready(out)

    ref = ref_forward(x, params, M=M, G=G)
    assert out.shape == (N, COUT, H, W)
    # bf16 MXU inputs / bf16 output (per perf guidance) -> normalized max error.
    max_err = float(jnp.max(jnp.abs(out - ref)))
    scale = float(jnp.maximum(1.0, jnp.max(jnp.abs(ref))))
    if max_err / scale > 2.5e-2:
        raise AssertionError(
            f"mismatch vs reference: max abs err {max_err} (scale {scale})")
    print("KERNEL_OK")
</pallas_src>

<mosaic_0001>
module attributes {stable_mosaic.version = 11 : i64} {
  func.func @_sk_unit_kernel(%arg0: i32, %arg1: memref<1x528x32xf32, #tpu.memory_space<vmem>>, %arg2: memref<528x1xf32, #tpu.memory_space<vmem>>, %arg3: memref<32x32xbf16, #tpu.memory_space<vmem>>, %arg4: memref<1x32xf32, #tpu.memory_space<vmem>>, %arg5: memref<576x64xbf16, #tpu.memory_space<vmem>>, %arg6: memref<1x64xf32, #tpu.memory_space<vmem>>, %arg7: memref<32x16xf32, #tpu.memory_space<vmem>>, %arg8: memref<1x16xf32, #tpu.memory_space<vmem>>, %arg9: memref<16x64xf32, #tpu.memory_space<vmem>>, %arg10: memref<1x64xf32, #tpu.memory_space<vmem>>, %arg11: memref<64x64xbf16, #tpu.memory_space<vmem>>, %arg12: memref<1x64xf32, #tpu.memory_space<vmem>>, %arg13: memref<1x384x64xbf16, #tpu.memory_space<vmem>>, %arg14: memref<528x32xbf16, #tpu.memory_space<vmem>>, %arg15: memref<526x32xbf16, #tpu.memory_space<vmem>>) attributes {dimension_semantics = [#tpu.dimension_semantics<parallel>], iteration_bounds = array<i64: 2>, scalar_prefetch = 0 : i64, scratch_operands = 2 : i64, tpu.core_type = #tpu.core_type<tc>, window_params = [{transform_indices = @transform_0, window_bounds = array<i64: 1, 528, 32>}, {pipeline_mode = #tpu.pipeline_mode<synchronous>, transform_indices = @transform_1, window_bounds = array<i64: 528, 1>}, {pipeline_mode = #tpu.pipeline_mode<synchronous>, transform_indices = @transform_2, window_bounds = array<i64: 32, 32>}, {pipeline_mode = #tpu.pipeline_mode<synchronous>, transform_indices = @transform_3, window_bounds = array<i64: 1, 32>}, {pipeline_mode = #tpu.pipeline_mode<synchronous>, transform_indices = @transform_4, window_bounds = array<i64: 576, 64>}, {pipeline_mode = #tpu.pipeline_mode<synchronous>, transform_indices = @transform_5, window_bounds = array<i64: 1, 64>}, {pipeline_mode = #tpu.pipeline_mode<synchronous>, transform_indices = @transform_6, window_bounds = array<i64: 32, 16>}, {pipeline_mode = #tpu.pipeline_mode<synchronous>, transform_indices = @transform_7, window_bounds = array<i64: 1, 16>}, {pipeline_mode = #tpu.pipeline_mode<synchronous>, transform_indices = @transform_8, window_bounds = array<i64: 16, 64>}, {pipeline_mode = #tpu.pipeline_mode<synchronous>, transform_indices = @transform_9, window_bounds = array<i64: 1, 64>}, {pipeline_mode = #tpu.pipeline_mode<synchronous>, transform_indices = @transform_10, window_bounds = array<i64: 64, 64>}, {pipeline_mode = #tpu.pipeline_mode<synchronous>, transform_indices = @transform_11, window_bounds = array<i64: 1, 64>}, {transform_indices = @transform_12, window_bounds = array<i64: 1, 384, 64>}]} {
    %c0 = arith.constant 0 : index
    %c0_0 = arith.constant 0 : index
    %c0_1 = arith.constant 0 : index
    %0 = vector.load %arg1[%c0, %c0_0, %c0_1] : memref<1x528x32xf32, #tpu.memory_space<vmem>>, vector<1x528x32xf32>
    %1 = vector.shape_cast %0 : vector<1x528x32xf32> to vector<528x32xf32>
    %c0_2 = arith.constant 0 : index
    %c0_3 = arith.constant 0 : index
    %2 = vector.load %arg2[%c0_2, %c0_3] : memref<528x1xf32, #tpu.memory_space<vmem>>, vector<528x1xf32>
    %3 = arith.truncf %1 : vector<528x32xf32> to vector<528x32xbf16>
    %c0_4 = arith.constant 0 : index
    %c0_5 = arith.constant 0 : index
    %4 = vector.load %arg3[%c0_4, %c0_5] : memref<32x32xbf16, #tpu.memory_space<vmem>>, vector<32x32xbf16>
    %cst = arith.constant dense<0.000000e+00> : vector<528x32xf32>
    %5 = tpu.matmul %3, %4, %cst {dimension_numbers = #tpu.dot_dimension_numbers<[1], [0], [0], [1], [0, 0, 1, 1], [], []>} : vector<528x32xbf16>, vector<32x32xbf16>, vector<528x32xf32> -> vector<528x32xf32>
    %c0_6 = arith.constant 0 : index
    %c0_7 = arith.constant 0 : index
    %6 = vector.load %arg4[%c0_6, %c0_7] : memref<1x32xf32, #tpu.memory_space<vmem>>, vector<1x32xf32>
    %7 = vector.broadcast %6 : vector<1x32xf32> to vector<528x32xf32>
    %8 = arith.addf %5, %7 : vector<528x32xf32>
    %cst_8 = arith.constant 0.000000e+00 : f32
    %9 = vector.broadcast %cst_8 : f32 to vector<528x32xf32>
    %10 = arith.maximumf %8, %9 : vector<528x32xf32>
    %11 = vector.broadcast %2 : vector<528x1xf32> to vector<528x32xf32>
    %12 = arith.mulf %10, %11 : vector<528x32xf32>
    %13 = arith.truncf %12 : vector<528x32xf32> to vector<528x32xbf16>
    %c0_9 = arith.constant 0 : index
    %c0_10 = arith.constant 0 : index
    %14 = vector.load %arg14[%c0_9, %c0_10] : memref<528x32xbf16, #tpu.memory_space<vmem>>, vector<528x32xbf16>
    tpu.vector_store %arg14[%c0_9, %c0_10], %13 {strides = array<i32>} : memref<528x32xbf16, #tpu.memory_space<vmem>>, vector<528x32xbf16>,
    %15 = vector.extract_strided_slice %12 {offsets = [1, 0], sizes = [526, 32], strides = [1, 1]} : vector<528x32xf32> to vector<526x32xf32>
    %16 = arith.truncf %15 : vector<526x32xf32> to vector<526x32xbf16>
    %c0_11 = arith.constant 0 : index
    %c0_12 = arith.constant 0 : index
    %17 = vector.load %arg15[%c0_11, %c0_12] : memref<526x32xbf16, #tpu.memory_space<vmem>>, vector<526x32xbf16>
    tpu.vector_store %arg15[%c0_11, %c0_12], %16 {strides = array<i32>} : memref<526x32xbf16, #tpu.memory_space<vmem>>, vector<526x32xbf16>,
    %c46 = arith.constant 46 : index
    %c0_13 = arith.constant 0 : index
    %18 = vector.load %arg15[%c46, %c0_13] : memref<526x32xbf16, #tpu.memory_space<vmem>>, vector<384x32xbf16>
    %c48 = arith.constant 48 : index
    %c0_14 = arith.constant 0 : index
    %19 = vector.load %arg14[%c48, %c0_14] : memref<528x32xbf16, #tpu.memory_space<vmem>>, vector<384x32xbf16>
    %c48_15 = arith.constant 48 : index
    %c0_16 = arith.constant 0 : index
    %20 = vector.load %arg15[%c48_15, %c0_16] : memref<526x32xbf16, #tpu.memory_space<vmem>>, vector<384x32xbf16>
    %c70 = arith.constant 70 : index
    %c0_17 = arith.constant 0 : index
    %21 = vector.load %arg15[%c70, %c0_17] : memref<526x32xbf16, #tpu.memory_space<vmem>>, vector<384x32xbf16>
    %c72 = arith.constant 72 : index
    %c0_18 = arith.constant 0 : index
    %22 = vector.load %arg14[%c72, %c0_18] : memref<528x32xbf16, #tpu.memory_space<vmem>>, vector<384x32xbf16>
    %c72_19 = arith.constant 72 : index
    %c0_20 = arith.constant 0 : index
    %23 = vector.load %arg15[%c72_19, %c0_20] : memref<526x32xbf16, #tpu.memory_space<vmem>>, vector<384x32xbf16>
    %c94 = arith.constant 94 : index
    %c0_21 = arith.constant 0 : index
    %24 = vector.load %arg15[%c94, %c0_21] : memref<526x32xbf16, #tpu.memory_space<vmem>>, vector<384x32xbf16>
    %c96 = arith.constant 96 : index
    %c0_22 = arith.constant 0 : index
    %25 = vector.load %arg14[%c96, %c0_22] : memref<528x32xbf16, #tpu.memory_space<vmem>>, vector<384x32xbf16>
    %c96_23 = arith.constant 96 : index
    %c0_24 = arith.constant 0 : index
    %26 = vector.load %arg15[%c96_23, %c0_24] : memref<526x32xbf16, #tpu.memory_space<vmem>>, vector<384x32xbf16>
    %c22 = arith.constant 22 : index
    %c0_25 = arith.constant 0 : index
    %27 = vector.load %arg14[%c22, %c0_25] : memref<528x32xbf16, #tpu.memory_space<vmem>>, vector<384x32xbf16>
    %c24 = arith.constant 24 : index
    %c0_26 = arith.constant 0 : index
    %28 = vector.load %arg14[%c24, %c0_26] : memref<528x32xbf16, #tpu.memory_space<vmem>>, vector<384x32xbf16>
    %c26 = arith.constant 26 : index
    %c0_27 = arith.constant 0 : index
    %29 = vector.load %arg14[%c26, %c0_27] : memref<528x32xbf16, #tpu.memory_space<vmem>>, vector<384x32xbf16>
    %c70_28 = arith.constant 70 : index
    %c0_29 = arith.constant 0 : index
    %30 = vector.load %arg14[%c70_28, %c0_29] : memref<528x32xbf16, #tpu.memory_space<vmem>>, vector<384x32xbf16>
    %c72_30 = arith.constant 72 : index
    %c0_31 = arith.constant 0 : index
    %31 = vector.load %arg14[%c72_30, %c0_31] : memref<528x32xbf16, #tpu.memory_space<vmem>>, vector<384x32xbf16>
    %c74 = arith.constant 74 : index
    %c0_32 = arith.constant 0 : index
    %32 = vector.load %arg14[%c74, %c0_32] : memref<528x32xbf16, #tpu.memory_space<vmem>>, vector<384x32xbf16>
    %c118 = arith.constant 118 : index
    %c0_33 = arith.constant 0 : index
    %33 = vector.load %arg14[%c118, %c0_33] : memref<528x32xbf16, #tpu.memory_space<vmem>>, vector<384x32xbf16>
    %c120 = arith.constant 120 : index
    %c0_34 = arith.constant 0 : index
    %34 = vector.load %arg14[%c120, %c0_34] : memref<528x32xbf16, #tpu.memory_space<vmem>>, vector<384x32xbf16>
    %c122 = arith.constant 122 : index
    %c0_35 = arith.constant 0 : index
    %35 = vector.load %arg14[%c122, %c0_35] : memref<528x32xbf16, #tpu.memory_space<vmem>>, vector<384x32xbf16>
    %36 = tpu.concatenate %18, %19, %20, %21, %22, %23, %24, %25, %26, %27, %28, %29, %30, %31, %32, %33 in 1 : vector<384x32xbf16>, vector<384x32xbf16>, vector<384x32xbf16>, vector<384x32xbf16>, vector<384x32xbf16>, vector<384x32xbf16>, vector<384x32xbf16>, vector<384x32xbf16>, vector<384x32xbf16>, vector<384x32xbf16>, vector<384x32xbf16>, vector<384x32xbf16>, vector<384x32xbf16>, vector<384x32xbf16>, vector<384x32xbf16>, vector<384x32xbf16> -> vector<384x512xbf16>
    %37 = tpu.concatenate %34, %35 in 1 : vector<384x32xbf16>, vector<384x32xbf16> -> vector<384x64xbf16>
    %38 = tpu.concatenate %36, %37 in 1 : vector<384x512xbf16>, vector<384x64xbf16> -> vector<384x576xbf16>
    %c0_36 = arith.constant 0 : index
    %c0_37 = arith.constant 0 : index
    %39 = vector.load %arg5[%c0_36, %c0_37] : memref<576x64xbf16, #tpu.memory_space<vmem>>, vector<576x64xbf16>
    %cst_38 = arith.constant dense<0.000000e+00> : vector<384x64xf32>
    %40 = tpu.matmul %38, %39, %cst_38 {dimension_numbers = #tpu.dot_dimension_numbers<[1], [0], [0], [1], [0, 0, 1, 1], [], []>} : vector<384x576xbf16>, vector<576x64xbf16>, vector<384x64xf32> -> vector<384x64xf32>
    %c0_39 = arith.constant 0 : index
    %c0_40 = arith.constant 0 : index
    %41 = vector.load %arg6[%c0_39, %c0_40] : memref<1x64xf32, #tpu.memory_space<vmem>>, vector<1x64xf32>
    %42 = vector.broadcast %41 : vector<1x64xf32> to vector<384x64xf32>
    %43 = arith.addf %40, %42 : vector<384x64xf32>
    %cst_41 = arith.constant 0.000000e+00 : f32
    %44 = vector.broadcast %cst_41 : f32 to vector<384x64xf32>
    %45 = arith.maximumf %43, %44 : vector<384x64xf32>
    %46 = vector.extract_strided_slice %45 {offsets = [0, 0], sizes = [384, 32], strides = [1, 1]} : vector<384x64xf32> to vector<384x32xf32>
    %47 = vector.extract_strided_slice %45 {offsets = [0, 32], sizes = [384, 32], strides = [1, 1]} : vector<384x64xf32> to vector<384x32xf32>
    %c72_42 = arith.constant 72 : index
    %c0_43 = arith.constant 0 : index
    %48 = vector.load %arg2[%c72_42, %c0_43] : memref<528x1xf32, #tpu.memory_space<vmem>>, vector<384x1xf32>
    %49 = arith.addf %46, %47 : vector<384x32xf32>
    %50 = vector.broadcast %48 : vector<384x1xf32> to vector<384x32xf32>
    %51 = arith.mulf %49, %50 : vector<384x32xf32>
    %cst_44 = arith.constant dense<0xFF800000> : vector<32xf32>
    %52 = vector.multi_reduction <maximumf>, %51, %cst_44 [0] : vector<384x32xf32> to vector<32xf32>
    %53 = vector.shape_cast %52 : vector<32xf32> to vector<1x32xf32>
    %c0_45 = arith.constant 0 : index
    %c0_46 = arith.constant 0 : index
    %54 = vector.load %arg7[%c0_45, %c0_46] : memref<32x16xf32, #tpu.memory_space<vmem>>, vector<32x16xf32>
    %cst_47 = arith.constant dense<0.000000e+00> : vector<1x16xf32>
    %55 = tpu.matmul %53, %54, %cst_47 {dimension_numbers = #tpu.dot_dimension_numbers<[1], [0], [0], [1], [0, 0, 1, 1], [], []>} : vector<1x32xf32>, vector<32x16xf32>, vector<1x16xf32> -> vector<1x16xf32>
    %c0_48 = arith.constant 0 : index
    %c0_49 = arith.constant 0 : index
    %56 = vector.load %arg8[%c0_48, %c0_49] : memref<1x16xf32, #tpu.memory_space<vmem>>, vector<1x16xf32>
    %57 = arith.addf %55, %56 : vector<1x16xf32>
    %cst_50 = arith.constant 0.000000e+00 : f32
    %58 = vector.broadcast %cst_50 : f32 to vector<1x16xf32>
    %59 = arith.maximumf %57, %58 : vector<1x16xf32>
    %c0_51 = arith.constant 0 : index
    %c0_52 = arith.constant 0 : index
    %60 = vector.load %arg9[%c0_51, %c0_52] : memref<16x64xf32, #tpu.memory_space<vmem>>, vector<16x64xf32>
    %cst_53 = arith.constant dense<0.000000e+00> : vector<1x64xf32>
    %61 = tpu.matmul %59, %60, %cst_53 {dimension_numbers = #tpu.dot_dimension_numbers<[1], [0], [0], [1], [0, 0, 1, 1], [], []>} : vector<1x16xf32>, vector<16x64xf32>, vector<1x64xf32> -> vector<1x64xf32>
    %c0_54 = arith.constant 0 : index
    %c0_55 = arith.constant 0 : index
    %62 = vector.load %arg10[%c0_54, %c0_55] : memref<1x64xf32, #tpu.memory_space<vmem>>, vector<1x64xf32>
    %63 = arith.addf %61, %62 : vector<1x64xf32>
    %64 = vector.extract_strided_slice %63 {offsets = [0, 0], sizes = [1, 32], strides = [1, 1]} : vector<1x64xf32> to vector<1x32xf32>
    %65 = vector.extract_strided_slice %63 {offsets = [0, 32], sizes = [1, 32], strides = [1, 1]} : vector<1x64xf32> to vector<1x32xf32>
    %66 = arith.maximumf %64, %65 : vector<1x32xf32>
    %67 = arith.subf %64, %66 : vector<1x32xf32>
    %68 = math.exp %67 : vector<1x32xf32>
    %69 = arith.subf %65, %66 : vector<1x32xf32>
    %70 = math.exp %69 : vector<1x32xf32>
    %71 = arith.addf %68, %70 : vector<1x32xf32>
    %72 = tpu.reciprocal %71 {approx = true} : vector<1x32xf32> -> vector<1x32xf32>
    %73 = arith.mulf %68, %72 : vector<1x32xf32>
    %74 = vector.broadcast %73 : vector<1x32xf32> to vector<384x32xf32>
    %75 = arith.mulf %46, %74 : vector<384x32xf32>
    %76 = arith.mulf %70, %72 : vector<1x32xf32>
    %77 = vector.broadcast %76 : vector<1x32xf32> to vector<384x32xf32>
    %78 = arith.mulf %47, %77 : vector<384x32xf32>
    %79 = arith.addf %75, %78 : vector<384x32xf32>
    %80 = vector.extract_strided_slice %1 {offsets = [72, 0], sizes = [384, 32], strides = [1, 1]} : vector<528x32xf32> to vector<384x32xf32>
    %81 = arith.truncf %79 : vector<384x32xf32> to vector<384x32xbf16>
    %82 = arith.truncf %80 : vector<384x32xf32> to vector<384x32xbf16>
    %83 = tpu.concatenate %81, %82 in 1 : vector<384x32xbf16>, vector<384x32xbf16> -> vector<384x64xbf16>
    %c0_56 = arith.constant 0 : index
    %c0_57 = arith.constant 0 : index
    %84 = vector.load %arg11[%c0_56, %c0_57] : memref<64x64xbf16, #tpu.memory_space<vmem>>, vector<64x64xbf16>
    %cst_58 = arith.constant dense<0.000000e+00> : vector<384x64xf32>
    %85 = tpu.matmul %83, %84, %cst_58 {dimension_numbers = #tpu.dot_dimension_numbers<[1], [0], [0], [1], [0, 0, 1, 1], [], []>} : vector<384x64xbf16>, vector<64x64xbf16>, vector<384x64xf32> -> vector<384x64xf32>
    %c0_59 = arith.constant 0 : index
    %c0_60 = arith.constant 0 : index
    %86 = vector.load %arg12[%c0_59, %c0_60] : memref<1x64xf32, #tpu.memory_space<vmem>>, vector<1x64xf32>
    %87 = vector.broadcast %86 : vector<1x64xf32> to vector<384x64xf32>
    %88 = arith.addf %85, %87 : vector<384x64xf32>
    %cst_61 = arith.constant 0.000000e+00 : f32
    %89 = vector.broadcast %cst_61 : f32 to vector<384x64xf32>
    %90 = arith.maximumf %88, %89 : vector<384x64xf32>
    %91 = arith.truncf %90 : vector<384x64xf32> to vector<384x64xbf16>
    %c0_62 = arith.constant 0 : index
    %c0_63 = arith.constant 0 : index
    %c0_64 = arith.constant 0 : index
    %92 = vector.load %arg13[%c0_62, %c0_63, %c0_64] : memref<1x384x64xbf16, #tpu.memory_space<vmem>>, vector<1x384x64xbf16>
    %93 = vector.shape_cast %92 : vector<1x384x64xbf16> to vector<384x64xbf16>
    %94 = vector.shape_cast %91 : vector<384x64xbf16> to vector<1x384x64xbf16>
    tpu.vector_store %arg13[%c0_62, %c0_63, %c0_64], %94 {strides = array<i32>} : memref<1x384x64xbf16, #tpu.memory_space<vmem>>, vector<1x384x64xbf16>,
    return
  }
  func.func @transform_0(%arg0: i32) -> (i32, i32, i32) {
    %c0_i32 = arith.constant 0 : i32
    %c0_i32_0 = arith.constant 0 : i32
    %c0_i32_1 = arith.constant 0 : i32
    return %arg0, %c0_i32, %c0_i32_0 : i32, i32, i32
  }
  func.func @transform_1(%arg0: i32) -> (i32, i32) {
    %c0_i32 = arith.constant 0 : i32
    %c0_i32_0 = arith.constant 0 : i32
    %c0_i32_1 = arith.constant 0 : i32
    return %c0_i32, %c0_i32_0 : i32, i32
  }
  func.func @transform_2(%arg0: i32) -> (i32, i32) {
    %c0_i32 = arith.constant 0 : i32
    %c0_i32_0 = arith.constant 0 : i32
    %c0_i32_1 = arith.constant 0 : i32
    return %c0_i32, %c0_i32_0 : i32, i32
  }
  func.func @transform_3(%arg0: i32) -> (i32, i32) {
    %c0_i32 = arith.constant 0 : i32
    %c0_i32_0 = arith.constant 0 : i32
    %c0_i32_1 = arith.constant 0 : i32
    return %c0_i32, %c0_i32_0 : i32, i32
  }
  func.func @transform_4(%arg0: i32) -> (i32, i32) {
    %c0_i32 = arith.constant 0 : i32
    %c0_i32_0 = arith.constant 0 : i32
    %c0_i32_1 = arith.constant 0 : i32
    return %c0_i32, %c0_i32_0 : i32, i32
  }
  func.func @transform_5(%arg0: i32) -> (i32, i32) {
    %c0_i32 = arith.constant 0 : i32
    %c0_i32_0 = arith.constant 0 : i32
    %c0_i32_1 = arith.constant 0 : i32
    return %c0_i32, %c0_i32_0 : i32, i32
  }
  func.func @transform_6(%arg0: i32) -> (i32, i32) {
    %c0_i32 = arith.constant 0 : i32
    %c0_i32_0 = arith.constant 0 : i32
    %c0_i32_1 = arith.constant 0 : i32
    return %c0_i32, %c0_i32_0 : i32, i32
  }
  func.func @transform_7(%arg0: i32) -> (i32, i32) {
    %c0_i32 = arith.constant 0 : i32
    %c0_i32_0 = arith.constant 0 : i32
    %c0_i32_1 = arith.constant 0 : i32
    return %c0_i32, %c0_i32_0 : i32, i32
  }
  func.func @transform_8(%arg0: i32) -> (i32, i32) {
    %c0_i32 = arith.constant 0 : i32
    %c0_i32_0 = arith.constant 0 : i32
    %c0_i32_1 = arith.constant 0 : i32
    return %c0_i32, %c0_i32_0 : i32, i32
  }
  func.func @transform_9(%arg0: i32) -> (i32, i32) {
    %c0_i32 = arith.constant 0 : i32
    %c0_i32_0 = arith.constant 0 : i32
    %c0_i32_1 = arith.constant 0 : i32
    return %c0_i32, %c0_i32_0 : i32, i32
  }
  func.func @transform_10(%arg0: i32) -> (i32, i32) {
    %c0_i32 = arith.constant 0 : i32
    %c0_i32_0 = arith.constant 0 : i32
    %c0_i32_1 = arith.constant 0 : i32
    return %c0_i32, %c0_i32_0 : i32, i32
  }
  func.func @transform_11(%arg0: i32) -> (i32, i32) {
    %c0_i32 = arith.constant 0 : i32
    %c0_i32_0 = arith.constant 0 : i32
    %c0_i32_1 = arith.constant 0 : i32
    return %c0_i32, %c0_i32_0 : i32, i32
  }
  func.func @transform_12(%arg0: i32) -> (i32, i32, i32) {
    %c0_i32 = arith.constant 0 : i32
    %c0_i32_0 = arith.constant 0 : i32
    %c0_i32_1 = arith.constant 0 : i32
    return %arg0, %c0_i32, %c0_i32_0 : i32, i32, i32
  }
}

</mosaic_0001>

<bundles_post_ra>
// kernel: tpu_custom_call.1
= control target key start
LH: loop header
LB: loop body
LE: loop exit
PB: predicated region body
PF: predicated region fallthrough
CT: control target
= control target key end

     0   :  { %s9254_s21 = smov 0   ;;  %s15362_s0 = inlined_call_operand.vmem [shape: f32[2,528,32], index: 0, kind: input, shape index: {}]   ;;  %s15363_s1 = inlined_call_operand.vmem [shape: f32[528,1], index: 1, kind: input, shape index: {}]   ;;  %s15364_s2 = inlined_call_operand.vmem [shape: bf16[32,32], index: 2, kind: input, shape index: {}]   ;;  %s15365_s3 = inlined_call_operand.vmem [shape: f32[1,32], index: 3, kind: input, shape index: {}]   ;;  %s15366_s4 = inlined_call_operand.vmem [shape: bf16[576,64], index: 4, kind: input, shape index: {}]   ;;  %s15367_s5 = inlined_call_operand.vmem [shape: f32[1,64], index: 5, kind: input, shape index: {}]   ;;  %s15368_s6 = inlined_call_operand.vmem [shape: f32[32,16], index: 6, kind: input, shape index: {}]   ;;  %s15369_s7 = inlined_call_operand.vmem [shape: f32[1,16], index: 7, kind: input, shape index: {}]   ;;  %s15370_s8 = inlined_call_operand.vmem [shape: f32[16,64], index: 8, kind: input, shape index: {}]   ;;  %s15371_s9 = inlined_call_operand.vmem [shape: f32[1,64], index: 9, kind: input, shape index: {}]   ;;  %s15372_s10 = inlined_call_operand.vmem [shape: bf16[64,64], index: 10, kind: input, shape index: {}]   ;;  %s15373_s11 = inlined_call_operand.vmem [shape: f32[1,64], index: 11, kind: input, shape index: {}]   ;;  %s15374_s12 = inlined_call_operand.vmem [shape: bf16[2,384,64], index: 12, kind: output, shape index: {}]  }
   0x1 LB: > { %s8066_s22 = sadd.s32 4294967295, %s9183_s21   ;;  %p8070_p0 = scmp.ge.s32.totalorder %s9183_s21, 1  ;;  %s9183_s21 = sphi %s9254_s21, %s22_s21  }
   0x2   : > { %p362_p1 = scmp.lt.s32.totalorder %s9183_s21, 3 }
   0x4   : > { %p363_p2 = pnand %p8070_p0, %p362_p1 }
   0x6   : > { %366 = sbr.rel (%p363_p2) target bundleno = 3188 (0xc74), region = 68 }
   0xb   : > { %v496_v0 = vld [vmem:[%s15363_s1 + $0x78] sm:$0xff]  ;;  %v494_v1 = vld [vmem:[%s15363_s1 + $0x68] sm:$0xff]  ;;  %p404_p3 = scmp.lt.s32.totalorder %s8066_s22, 1  ;;  %v9185_v3 = vmov 0   ;;  %v8326_v5 = vld [vmem:[%s15364_s2] sm:$0xff]  ;;  %vm600_vm0 = vcmask 261120  }
   0xc   : > { %v8327_v2 = vld [vmem:[%s15364_s2 + $0x8] sm:$0xff]  ;;  %8999 = vset.pattern.permute.xlu1 %v9185_v3  ;;  %8998 = vset.pattern.permute.xlu0 %v9185_v3  ;;  %v497_v6 = vld [vmem:[%s15363_s1 + $0x80] sm:$0xff]  ;;  %v495_v7 = vld [vmem:[%s15363_s1 + $0x70] sm:$0xff]  ;;  %vm1402_vm1 = vcmask 257024   ;;  %vm1469_vm2 = vsmask.f32 3328 }
   0xd   : > { %v498_v4 = vld [vmem:[%s15363_s1 + $0x88] sm:$0xff]  ;;  %1017 = vperm.xlu1 %8999, %v496_v0   ;;  %1007 = vperm.xlu0 %8998, %v494_v1   ;;  %s16278_s22 = smov (!%p404_p3, %s8066_s22), 1  ;;  %v499_v11 = vld [vmem:[%s15363_s1 + $0x90] sm:$0xff]  ;;  %v501_v12 = vld [vmem:[%s15363_s1 + $0xa0] sm:$0xff]  ;;  %vm1470_vm3 = vsmask.f32 7440 }
   0xe   : > { %706 = vmatpush.bf16.msra.mxu0 %v8327_v2  ;;  %9000 = vset.pattern.permute.xlu2 %v9185_v3  ;;  %s8984_s15 = smul.u32 528, %s16278_s22  ;;  %v500_v13 = vld [vmem:[%s15363_s1 + $0x98] sm:$0xff]  ;;  %v491_v14 = vld [vmem:[%s15363_s1 + $0x50] sm:$0xff]  ;;  %v493_v17 = vld [vmem:[%s15363_s1 + $0x60] sm:$0xff]  ;;  %vm2639_vm5 = vcmask 1042432   ;;  %s9187_s16 = smov 32  }
   0xf   : > { %1027 = vperm.xlu2 %9000, %v498_v4   ;;  %v492_v18 = vld [vmem:[%s15363_s1 + $0x58] sm:$0xff]  ;;  %v502_v20 = vld [vmem:[%s15363_s1 + $0xa8] sm:$0xff]  ;;  %v503_v22 = vld [vmem:[%s15363_s1 + $0xb0] sm:$0xff]  ;;  %vm3363_vm6 = vcmask 1041408   ;;  %s9188_s17 = smov 96   ;;  %vm4359_vm7 = vcmask 1046528  }
  0x10   : > { %s9286_s20 = scalar_lea.vmem %s15362_s0, %s8984_s15  ;;  %v504_v21 = vld [vmem:[%s15363_s1 + $0xb8] sm:$0xff]  ;;  %v505_v23 = vld [vmem:[%s15363_s1 + $0xc0] sm:$0xff]  ;;  %v507_v26 = vld [vmem:[%s15363_s1 + $0xd0] sm:$0xff]  ;;  %s9186_s15 = smov 64   ;;  %vm3721_vm8 = vcmask 523264   ;;  %vm3772_vm9 = vcmask 785408  }
  0x11   : > { %v415_v8 = vld [vmem:[%s9286_s20] sm:$0xff]  ;;  %v416_v9 = vld [vmem:[%s9286_s20 + $0x8] sm:$0xff]  ;;  %v417_v15 = vld [vmem:[%s9286_s20 + $0x10] sm:$0xff]  ;;  %vm4776_vm10 = vcmask 1044480   ;;  %vm6808_vm11 = vcmask 130048   ;;  %vm7962_vm12 = vcmask 519168  }
  0x12   : > { %707 = vmatpush.bf16.msra.mxu0 %v8326_v5  ;;  %v547_v10 = vpack.c.bf16 %v416_v9, %v415_v8  ;;  %v418_v16 = vld [vmem:[%s9286_s20 + $0x18] sm:$0xff]  ;;  %v419_v24 = vld [vmem:[%s9286_s20 + $0x20] sm:$0xff]  ;;  %v420_v25 = vld [vmem:[%s9286_s20 + $0x28] sm:$0xff] }
  0x13   : > { %v548_v19 = vpack.c.bf16 %v418_v16, %v417_v15  ;;  %v506_v27 = vld [vmem:[%s15363_s1 + $0xc8] sm:$0xff]  ;;  %v549_v28 = vpack.c.bf16 %v420_v25, %v419_v24  ;;  %v508_v29 = vld [vmem:[%s15363_s1 + $0xd8] sm:$0xff]  ;;  %v509_v31 = vld [vmem:[%s15363_s1 + $0xe0] sm:$0xff] }
  0x14   : > { %v510_v30 = vld [vmem:[%s15363_s1 + $0xe8] sm:$0xff]  ;;  %v511_v32 = vld [vmem:[%s15363_s1 + $0xf0] sm:$0xff]  ;;  %v422_v34 = vld [vmem:[%s9286_s20 + $0x38] sm:$0xff] }
  0x15   : > { %1022 = vperm.xlu1 %8999, %v497_v6   ;;  %1012 = vperm.xlu0 %8998, %v495_v7   ;;  %v421_v33 = vld [vmem:[%s9286_s20 + $0x30] sm:$0xff]  ;;  %v513_v35 = vld [vmem:[%s15363_s1 + $0x100] sm:$0xff]  ;;  %v512_v36 = vld [vmem:[%s15363_s1 + $0xf8] sm:$0xff] }
  0x16   : > { %8081 = vmatmul.msk.bf16.vlgmr.msra.gmra.mxu0 %vm600_vm0, %v547_v10  ;;  %v550_v37 = vpack.c.bf16 %v422_v34, %v421_v33  ;;  %v514_v38 = vld [vmem:[%s15363_s1 + $0x108] sm:$0xff]  ;;  %v516_v39 = vld [vmem:[%s15363_s1 + $0x118] sm:$0xff]  ;;  %v515_v40 = vld [vmem:[%s15363_s1 + $0x110] sm:$0xff] }
  0x17   : > { %1032 = vperm.xlu2 %9000, %v499_v11   ;;  %v517_v41 = vld [vmem:[%s15363_s1 + $0x120] sm:$0xff]  ;;  %v424_v43 = vld [vmem:[%s9286_s20 + $0x48] sm:$0xff]  ;;  %v519_v44 = vld [vmem:[%s15363_s1 + $0x130] sm:$0xff] }
  0x18   : > { %v423_v42 = vld [vmem:[%s9286_s20 + $0x40] sm:$0xff]  ;;  %v518_v45 = vld [vmem:[%s15363_s1 + $0x128] sm:$0xff]  ;;  %v520_v47 = vld [vmem:[%s15363_s1 + $0x138] sm:$0xff] }
  0x19   : > { %v551_v46 = vpack.c.bf16 %v424_v43, %v423_v42  ;;  %v522_v48 = vld [vmem:[%s15363_s1 + $0x148] sm:$0xff]  ;;  %v521_v49 = vld [vmem:[%s15363_s1 + $0x140] sm:$0xff]  ;;  %v523_v50 = vld [vmem:[%s15363_s1 + $0x150] sm:$0xff] }
  0x1a   : > { %v425_v51 = vld [vmem:[%s9286_s20 + $0x50] sm:$0xff]  ;;  %v426_v52 = vld [vmem:[%s9286_s20 + $0x58] sm:$0xff]  ;;  %v525_v53 = vld [vmem:[%s15363_s1 + $0x160] sm:$0xff] }
  0x1b   : > { %v524_v54 = vld [vmem:[%s15363_s1 + $0x158] sm:$0xff]  ;;  %v552_v55 = vpack.c.bf16 %v426_v52, %v425_v51  ;;  %v526_v56 = vld [vmem:[%s15363_s1 + $0x168] sm:$0xff]  ;;  %v527_v58 = vld [vmem:[%s15363_s1 + $0x170] sm:$0xff] }
  0x1c   : > { %v528_v57 = vld [vmem:[%s15363_s1 + $0x178] sm:$0xff]  ;;  %v529_v59 = vld [vmem:[%s15363_s1 + $0x180] sm:$0xff]  ;;  %v428_v61 = vld [vmem:[%s9286_s20 + $0x68] sm:$0xff] }
  0x1d   : > { %1042 = vperm.xlu1 %8999, %v501_v12   ;;  %1037 = vperm.xlu0 %8998, %v500_v13   ;;  %v427_v60 = vld [vmem:[%s9286_s20 + $0x60] sm:$0xff]  ;;  %v531_v62 = vld [vmem:[%s15363_s1 + $0x190] sm:$0xff]  ;;  %v530_v63 = vld [vmem:[%s15363_s1 + $0x188] sm:$0xff] }
  0x1e   : > { %v553_v0 = vpack.c.bf16 %v428_v61, %v427_v60  ;;  %v532_v1 = vld [vmem:[%s15363_s1 + $0x198] sm:$0xff]  ;;  %v533_v2 = vld [vmem:[%s15363_s1 + $0x1a0] sm:$0xff]  ;;  %v535_v3 = vld [vmem:[%s15363_s1 + $0x1b0] sm:$0xff] }
  0x1f   : > { %992 = vperm.xlu2 %9000, %v491_v14   ;;  %v534_v4 = vld [vmem:[%s15363_s1 + $0x1a8] sm:$0xff]  ;;  %v429_v7 = vld [vmem:[%s9286_s20 + $0x70] sm:$0xff]  ;;  %v430_v8 = vld [vmem:[%s9286_s20 + $0x78] sm:$0xff] }
  0x20   : > { %v536_v9 = vld [vmem:[%s15363_s1 + $0x1b8] sm:$0xff]  ;;  %v541_v10 = vld [vmem:[%s15363_s1 + $0x1e0] sm:$0xff]  ;;  %v554_v11 = vpack.c.bf16 %v430_v8, %v429_v7  ;;  %v539_v15 = vld [vmem:[%s15363_s1 + $0x1d0] sm:$0xff] }
  0x21   : > { %v537_v12 = vld [vmem:[%s15363_s1 + $0x1c0] sm:$0xff]  ;;  %v540_v25 = vld [vmem:[%s15363_s1 + $0x1d8] sm:$0xff]  ;;  %v440_v61 = vld [vmem:[%s9286_s20 + $0xc8] sm:$0xff] }
  0x22   : > { %v489_v16 = vld [vmem:[%s15363_s1 + $0x40] sm:$0xff]  ;;  %v441_v8 = vld [vmem:[%s9286_s20 + $0xd0] sm:$0xff]  ;;  %vm9575_vm4 = vmor %vm1469_vm2, %vm1470_vm3 }
  0x23   : > { %v439_v60 = vld [vmem:[%s9286_s20 + $0xc0] sm:$0xff] }
  0x25   : > { %1002 = vperm.xlu1 %8999, %v493_v17   ;;  %997 = vperm.xlu0 %8998, %v492_v18   ;;  %v538_v17 = vld [vmem:[%s15363_s1 + $0x1c8] sm:$0xff] }
  0x26   : > { %8082 = vmatmul.msk.bf16.gmra.mxu0 %vm600_vm0, %v548_v19 }
  0x27   : > { %1047 = vperm.xlu2 %9000, %v502_v20   ;;  %v431_v20 = vld [vmem:[%s9286_s20 + $0x80] sm:$0xff] }
  0x2d   : > { %1057 = vperm.xlu1 %8999, %v504_v21   ;;  %1052 = vperm.xlu0 %8998, %v503_v22   ;;  %v432_v21 = vld [vmem:[%s9286_s20 + $0x88] sm:$0xff] }
  0x2e   : > { %v490_v22 = vld [vmem:[%s15363_s1 + $0x48] sm:$0xff] }
  0x2f   : > { %1062 = vperm.xlu2 %9000, %v505_v23   ;;  %v555_v23 = vpack.c.bf16 %v432_v21, %v431_v20 }
  0x35   : > { %1072 = vperm.xlu1 %8999, %v507_v26   ;;  %1067 = vperm.xlu0 %8998, %v506_v27  }
  0x36   : > { %8083 = vmatmul.msk.bf16.gmra.mxu0 %vm600_vm0, %v549_v28 }
  0x37   : > { %1077 = vperm.xlu2 %9000, %v508_v29  }
  0x3d   : > { %1087 = vperm.xlu1 %8999, %v510_v30   ;;  %1082 = vperm.xlu0 %8998, %v509_v31   ;;  %v433_v31 = vld [vmem:[%s9286_s20 + $0x90] sm:$0xff] }
  0x3f   : > { %1092 = vperm.xlu2 %9000, %v511_v32   ;;  %v434_v32 = vld [vmem:[%s9286_s20 + $0x98] sm:$0xff] }
  0x40   : > { %v556_v33 = vpack.c.bf16 %v434_v32, %v433_v31 }
  0x45   : > { %1102 = vperm.xlu1 %8999, %v513_v35   ;;  %1097 = vperm.xlu0 %8998, %v512_v36  }
  0x46   : > { %8084 = vmatmul.msk.bf16.gmra.mxu0 %vm600_vm0, %v550_v37 }
  0x47   : > { %1107 = vperm.xlu2 %9000, %v514_v38  }
  0x4d   : > { %1117 = vperm.xlu1 %8999, %v516_v39   ;;  %1112 = vperm.xlu0 %8998, %v515_v40   ;;  %v435_v40 = vld [vmem:[%s9286_s20 + $0xa0] sm:$0xff] }
  0x4f   : > { %1122 = vperm.xlu2 %9000, %v517_v41   ;;  %v436_v41 = vld [vmem:[%s9286_s20 + $0xa8] sm:$0xff] }
  0x50   : > { %v557_v42 = vpack.c.bf16 %v436_v41, %v435_v40 }
  0x55   : > { %1132 = vperm.xlu1 %8999, %v519_v44   ;;  %1127 = vperm.xlu0 %8998, %v518_v45  }
  0x56   : > { %8085 = vmatmul.msk.bf16.gmra.mxu0 %vm600_vm0, %v551_v46 }
  0x57   : > { %1137 = vperm.xlu2 %9000, %v520_v47  }
  0x5d   : > { %1147 = vperm.xlu1 %8999, %v522_v48   ;;  %1142 = vperm.xlu0 %8998, %v521_v49   ;;  %v437_v49 = vld [vmem:[%s9286_s20 + $0xb0] sm:$0xff] }
  0x5f   : > { %1152 = vperm.xlu2 %9000, %v523_v50   ;;  %v438_v50 = vld [vmem:[%s9286_s20 + $0xb8] sm:$0xff] }
  0x60   : > { %v558_v51 = vpack.c.bf16 %v438_v50, %v437_v49  ;;  %v443_v50 = vld [vmem:[%s9286_s20 + $0xe0] sm:$0xff] }
  0x65   : > { %1162 = vperm.xlu1 %8999, %v525_v53   ;;  %1157 = vperm.xlu0 %8998, %v524_v54  }
  0x66   : > { %8086 = vmatmul.msk.bf16.gmra.mxu0 %vm600_vm0, %v552_v55 }
  0x67   : > { %1167 = vperm.xlu2 %9000, %v526_v56  }
  0x69   : > { %v9516_v53 = vpop.permute.xlu2 %1027 }
  0x6d   : > { %1177 = vperm.xlu1 %8999, %v528_v57   ;;  %1172 = vperm.xlu0 %8998, %v527_v58  }
  0x6f   : > { %1182 = vperm.xlu2 %9000, %v529_v59  }
  0x71   : > { %v9525_v57 = vpop.permute.xlu2 %1032 }
  0x75   : > { %1192 = vperm.xlu1 %8999, %v531_v62   ;;  %1187 = vperm.xlu0 %8998, %v530_v63   ;;  %v559_v62 = vpack.c.bf16 %v440_v61, %v439_v60 }
  0x76   : > { %8087 = vmatmul.msk.bf16.gmra.mxu0 %vm600_vm0, %v553_v0 }
  0x77   : > { %1197 = vperm.xlu2 %9000, %v532_v1  }
  0x7d   : > { %1202 = vperm.xlu1 %8999, %v533_v2   ;;  %1212 = vperm.xlu0 %8998, %v535_v3   ;;  %v993_v2 = vpop.permute.xlu2 %992 }
  0x7f   : > { %v9432_v5 = vpop.permute.xlu1 %1017  ;;  %v9434_v6 = vpop.permute.xlu0 %1007  ;;  %1207 = vperm.xlu2 %9000, %v534_v4  }
  0x85   : > { %1217 = vperm.xlu1 %8999, %v536_v9   ;;  %1242 = vperm.xlu0 %8998, %v541_v10   ;;  %v442_v9 = vld [vmem:[%s9286_s20 + $0xd8] sm:$0xff]  ;;  %v9546_v10 = vpop.permute.xlu2 %1047 }
  0x86   : > { %8088 = vmatmul.msk.bf16.gmra.mxu0 %vm600_vm0, %v554_v11  ;;  %v9551_v11 = vld [vmem:[%s15365_s3] ss:$0 sm:$0xff] }
  0x87   : > { %v9448_v13 = vpop.permute.xlu1 %1022  ;;  %v9450_v14 = vpop.permute.xlu0 %1012  ;;  %1222 = vperm.xlu2 %9000, %v537_v12   ;;  %v560_v12 = vpack.c.bf16 %v442_v9, %v441_v8 }
  0x8d   : > { %1232 = vperm.xlu1 %8999, %v539_v15   ;;  %982 = vperm.xlu0 %8998, %v489_v16  }
  0x8f   : > { %v9461_v18 = vpop.permute.xlu1 %1042  ;;  %v9463_v19 = vpop.permute.xlu0 %1037  ;;  %1227 = vperm.xlu2 %9000, %v538_v17  }
  0x93   : > { %v709_v24 = vpop.f32.mrf.mxu0 }
  0x95   : > { %987 = vperm.xlu1 %8999, %v490_v22  }
  0x96   : > { %8089 = vmatmul.msk.bf16.gmra.mxu0 %vm600_vm0, %v555_v23 }
  0x97   : > { %v9474_v26 = vpop.permute.xlu1 %1002  ;;  %v9476_v27 = vpop.permute.xlu0 %997  ;;  %1237 = vperm.xlu2 %9000, %v540_v25  }
  0x98   : > { %v9559_v25 = vpop.permute.xlu2 %1062 }
  0x9b   : > { %v711_v28 = vpop.f32.mrf.mxu0 }
  0x9f   : > { %v9478_v29 = vpop.permute.xlu1 %1057  ;;  %v9480_v30 = vpop.permute.xlu0 %1052 }
  0xa3   : > { %v9484_v34 = vpop.f32.mrf.mxu0 }
  0xa4   : > { %15619 = vst [vmem:[#allocation4_spill] sm:$0xff] %v9484_v34 }
  0xa6   : > { %8090 = vmatmul.msk.bf16.gmra.mxu0 %vm600_vm0, %v556_v33 }
  0xa7   : > { %v9487_v35 = vpop.permute.xlu1 %1072  ;;  %v9489_v36 = vpop.permute.xlu0 %1067 }
  0xab   : > { %v9491_v37 = vpop.f32.mrf.mxu0 }
  0xac   : > { %15620 = vst [vmem:[#allocation5_spill] sm:$0xff] %v9491_v37 }
  0xaf   : > { %v9493_v38 = vpop.permute.xlu1 %1087  ;;  %v9495_v39 = vpop.permute.xlu0 %1082 }
  0xb3   : > { %v9499_v43 = vpop.f32.mrf.mxu0 }
  0xb4   : > { %15621 = vst [vmem:[#allocation6_spill] sm:$0xff] %v9499_v43 }
  0xb6   : > { %8091 = vmatmul.msk.bf16.gmra.mxu0 %vm600_vm0, %v557_v42 }
  0xb7   : > { %v9502_v44 = vpop.permute.xlu1 %1102  ;;  %v9504_v45 = vpop.permute.xlu0 %1097 }
  0xbb   : > { %v9506_v46 = vpop.f32.mrf.mxu0 }
  0xbc   : > { %15622 = vst [vmem:[#allocation7_spill] sm:$0xff] %v9506_v46 }
  0xbf   : > { %v9508_v47 = vpop.permute.xlu1 %1117  ;;  %v9510_v48 = vpop.permute.xlu0 %1112 }
  0xc3   : > { %v9514_v52 = vpop.f32.mrf.mxu0 }
  0xc4   : > { %15623 = vst [vmem:[#allocation8_spill] sm:$0xff] %v9514_v52 }
  0xc6   : > { %8092 = vmatmul.msk.bf16.gmra.mxu0 %vm600_vm0, %v558_v51  ;;  %v444_v51 = vld [vmem:[%s9286_s20 + $0xe8] sm:$0xff] }
  0xc7   : > { %v9519_v54 = vpop.permute.xlu1 %1132  ;;  %v9521_v55 = vpop.permute.xlu0 %1127 }
  0xcb   : > { %v9523_v56 = vpop.f32.mrf.mxu0 }
  0xcc   : > { %15624 = vst [vmem:[#allocation9_spill] sm:$0xff] %v9523_v56 }
  0xcf   : > { %v9527_v58 = vpop.permute.xlu1 %1147  ;;  %v9529_v59 = vpop.permute.xlu0 %1142 }
  0xd3   : > { %v729_v63 = vpop.f32.mrf.mxu0 }
  0xd6   : > { %8093 = vmatmul.msk.bf16.gmra.mxu0 %vm600_vm0, %v559_v62 }
  0xd7   : > { %v9534_v0 = vpop.permute.xlu1 %1162  ;;  %v9536_v1 = vpop.permute.xlu0 %1157 }
  0xdb   : > { %v9538_v3 = vpop.f32.mrf.mxu0 }
  0xdf   : > { %v9540_v4 = vpop.permute.xlu1 %1177  ;;  %v9542_v7 = vpop.permute.xlu0 %1172 }
  0xe3   : > { %v734_v15 = vpop.f32.mrf.mxu0 }
  0xe4   : > { %v735_v16 = vadd.f32 %v9551_v11, %v734_v15 }
  0xe6   : > { %v884_v17 = vmax.f32 %v735_v16, 0.0  ;;  %8094 = vmatmul.msk.bf16.gmra.mxu0 %vm600_vm0, %v560_v12 }
  0xe7   : > { %v9555_v20 = vpop.permute.xlu1 %1192  ;;  %v9557_v21 = vpop.permute.xlu0 %1187 }
  0xe8   : > { %v1280_v22 = vmul.f32 %v993_v2, %v884_v17  ;;  %v561_v2 = vpack.c.bf16 %v444_v51, %v443_v50 }
  0xea   : > { %v1346_v23 = vpack.c.bf16 %v1280_v22, %v1280_v22  ;;  %v9579_v22 = vpop.permute.xlu2 %1077 }
  0xeb   : > { %v736_v24 = vpop.f32.mrf.mxu0 }
  0xec   : > { %1413 = vst.msk [vmem:[#allocation2 + $0x28] sm:$0xf] %vm1402_vm1, %v1346_v23  ;;  %v1572_v28 = vshll.u32 %v1346_v23, 16  ;;  %v1576_v31 = vshrl.u32 %v1346_v23, 16  ;;  %v737_v32 = vadd.f32 %v9551_v11, %v736_v24 }
  0xee   : > { %v9563_v33 = vrot.slane %v1572_v28, 5  ;;  %v1578_v40 = vrot.slane %v1576_v31, 4  ;;  %v885_v41 = vmax.f32 %v737_v32, 0.0 }
  0xef   : > { %v9565_v42 = vpop.permute.xlu1 %1202  ;;  %v9567_v49 = vpop.permute.xlu0 %1212 }
  0xf0   : > { %v1579_v60 = vor.u32 %v1578_v40, %v9563_v33  ;;  %v1281_v61 = vmul.f32 %v9476_v27, %v885_v41  ;;  %v730_v41 = vadd.f32 %v9551_v11, %v729_v63 }
  0xf2   : > { %v1347_v62 = vpack.c.bf16 %v1281_v61, %v1281_v61  ;;  %v1580_v9 = vrot.slane %v1579_v60, 4  ;;  %v9597_v43 = vpop.permute.xlu2 %1092 }
  0xf3   : > { %v739_v8 = vpop.f32.mrf.mxu0 }
  0xf4   : > { %1414 = vst.msk [vmem:[#allocation2 + $0x2c] sm:$0xf] %vm1402_vm1, %v1347_v62  ;;  %v1582_v12 = vshll.u32 %v1347_v62, 16  ;;  %v1586_v15 = vshrl.u32 %v1347_v62, 16  ;;  %v740_v16 = vadd.f32 %v9551_v11, %v739_v8  ;;  %v882_v8 = vmax.f32 %v730_v41, 0.0 }
  0xf5   : > { %v732_v41 = vadd.f32 %v9551_v11, %v9538_v3 }
  0xf6   : > { %v1584_v23 = vrot.slane %v1582_v12, 5  ;;  %v1588_v27 = vrot.slane %v1586_v15, 4  ;;  %v886_v24 = vmax.f32 %v740_v16, 0.0  ;;  %8095 = vmatmul.msk.bf16.gmra.mxu0 %vm600_vm0, %v561_v2 }
  0xf7   : > { %v9582_v28 = vpop.permute.xlu1 %1217  ;;  %v9584_v31 = vpop.permute.xlu0 %1242 }
  0xf8   : > { %15627 = vst [vmem:[#allocation10_spill] sm:$0xff] %v9584_v31  ;;  %v1585_v32 = vsel %vm9575_vm4, %v1580_v9, %v1584_v23  ;;  %v1282_v40 = vmul.f32 %v9474_v26, %v886_v24  ;;  %v1589_v50 = vor.u32 %v1588_v27, %v1584_v23  ;;  %v445_v24 = vld [vmem:[%s9286_s20 + $0xf0] sm:$0xff] }
  0xf9   : > { %2207 = vst.msk [vmem:[#allocation3 + $0x28] sm:$0xf] %vm1402_vm1, %v1585_v32  ;;  %v446_v32 = vld [vmem:[%s9286_s20 + $0xf8] sm:$0xff] }
  0xfa   : > { %v1348_v51 = vpack.c.bf16 %v1282_v40, %v1282_v40  ;;  %v1590_v12 = vrot.slane %v1589_v50, 4 }
  0xfb   : > { %v741_v60 = vpop.f32.mrf.mxu0 }
  0xfc   : > { %1415 = vst.msk [vmem:[#allocation2 + $0x30] sm:$0xf] %vm1402_vm1, %v1348_v51  ;;  %v1592_v61 = vshll.u32 %v1348_v51, 16  ;;  %v1596_v62 = vshrl.u32 %v1348_v51, 16  ;;  %v742_v2 = vadd.f32 %v9551_v11, %v741_v60 }
  0xfe   : > { %v1594_v9 = vrot.slane %v1592_v61, 5  ;;  %v1598_v15 = vrot.slane %v1596_v62, 4  ;;  %v887_v26 = vmax.f32 %v742_v2, 0.0  ;;  %v562_v61 = vpack.c.bf16 %v446_v32, %v445_v24 }
  0xff   : > { %v9593_v16 = vpop.permute.xlu1 %1232  ;;  %v983_v63 = vpop.permute.xlu0 %982 }
 0x100   : > { %15628 = vst [vmem:[#allocation11_spill] sm:$0xff] %v9593_v16  ;;  %v1595_v23 = vsel %vm9575_vm4, %v1590_v12, %v1594_v9  ;;  %v1283_v27 = vmul.f32 %v9434_v6, %v887_v26  ;;  %v1278_v40 = vmul.f32 %v983_v63, %v882_v8  ;;  %v1599_v50 = vor.u32 %v1598_v15, %v1594_v9 }
 0x101   : > { %2208 = vst.msk [vmem:[#allocation3 + $0x2c] sm:$0xf] %vm1402_vm1, %v1595_v23  ;;  %v883_v12 = vmax.f32 %v732_v41, 0.0 }
 0x102   : > { %v1349_v51 = vpack.c.bf16 %v1283_v27, %v1283_v27  ;;  %v1344_v60 = vpack.c.bf16 %v1278_v40, %v1278_v40  ;;  %v1600_v8 = vrot.slane %v1599_v50, 4  ;;  %v9615_v40 = vpop.permute.xlu2 %1107 }
 0x103   : > { %v744_v62 = vpop.f32.mrf.mxu0 }
 0x104   : > { %1416 = vst.msk [vmem:[#allocation2 + $0x34] sm:$0xf] %vm1402_vm1, %v1349_v51  ;;  %v1602_v2 = vshll.u32 %v1349_v51, 16  ;;  %v1606_v37 = vshrl.u32 %v1349_v51, 16  ;;  %v1552_v34 = vshll.u32 %v1344_v60, 16  ;;  %v1556_v46 = vshrl.u32 %v1344_v60, 16 }
 0x105   : > { %1411 = vst.msk [vmem:[#allocation2 + $0x20] sm:$0xf] %vm1402_vm1, %v1344_v60  ;;  %v745_v6 = vadd.f32 %v9551_v11, %v744_v62 }
 0x106   : > { %v1604_v3 = vrot.slane %v1602_v2, 5  ;;  %v9608_v26 = vrot.slane %v1552_v34, 5  ;;  %v1558_v9 = vrot.slane %v1556_v46, 4  ;;  %8096 = vmatmul.msk.bf16.gmra.mxu0 %vm600_vm0, %v562_v61  ;;  %v1608_v15 = vrot.slane %v1606_v37, 4 }
 0x107   : > { %v888_v63 = vmax.f32 %v745_v6, 0.0  ;;  %v988_v24 = vpop.permute.xlu1 %987 }
 0x108   : > { %15629 = vst [vmem:[#allocation12_spill] sm:$0xff] %v9608_v26  ;;  %v1605_v32 = vsel %vm9575_vm4, %v1600_v8, %v1604_v3  ;;  %v1279_v23 = vmul.f32 %v988_v24, %v883_v12  ;;  %v1559_v41 = vor.u32 %v1558_v9, %v9608_v26  ;;  %v1609_v50 = vor.u32 %v1608_v15, %v1604_v3  ;;  %v448_v24 = vld [vmem:[%s9286_s20 + $0x108] sm:$0xff] }
 0x109   : > { %2209 = vst.msk [vmem:[#allocation3 + $0x30] sm:$0xf] %vm1402_vm1, %v1605_v32  ;;  %v1284_v27 = vmul.f32 %v9450_v14, %v888_v63  ;;  %v447_v63 = vld [vmem:[%s9286_s20 + $0x100] sm:$0xff] }
 0x10a   : > { %v1345_v34 = vpack.c.bf16 %v1279_v23, %v1279_v23  ;;  %v1560_v2 = vrot.slane %v1559_v41, 4  ;;  %v1610_v9 = vrot.slane %v1609_v50, 4 }
 0x10b   : > { %v1350_v46 = vpack.c.bf16 %v1284_v27, %v1284_v27  ;;  %v746_v51 = vpop.f32.mrf.mxu0 }
 0x10c   : > { %1412 = vst.msk [vmem:[#allocation2 + $0x24] sm:$0xf] %vm1402_vm1, %v1345_v34  ;;  %v1562_v37 = vshll.u32 %v1345_v34, 16  ;;  %v1566_v60 = vshrl.u32 %v1345_v34, 16  ;;  %v747_v61 = vadd.f32 %v9551_v11, %v746_v51  ;;  %v563_v51 = vpack.c.bf16 %v448_v24, %v447_v63 }
 0x10d   : > { %1417 = vst.msk [vmem:[#allocation2 + $0x38] sm:$0xf] %vm1402_vm1, %v1350_v46  ;;  %v1612_v62 = vshll.u32 %v1350_v46, 16  ;;  %v1616_v14 = vshrl.u32 %v1350_v46, 16 }
 0x10e   : > { %v1564_v12 = vrot.slane %v1562_v37, 5  ;;  %v1568_v6 = vrot.slane %v1566_v60, 4  ;;  %v889_v8 = vmax.f32 %v747_v61, 0.0  ;;  %v9630_v37 = vld [vmem:[#allocation2 + $0x28] sm:$0xff]  }
 0x10f   : > { %v1614_v3 = vrot.slane %v1612_v62, 5  ;;  %v1618_v15 = vrot.slane %v1616_v14, 4  ;;  %15630 = vst [vmem:[#allocation13_spill] sm:$0xff] %v9630_v37  ;;  %v9634_v14 = vpop.permute.xlu2 %1122 }
 0x110   : > { %v1565_v32 = vsel %vm9575_vm4, %v1560_v2, %v1564_v12  ;;  %v1569_v23 = vor.u32 %v1568_v6, %v1564_v12  ;;  %v1285_v27 = vmul.f32 %v9432_v5, %v889_v8  ;;  %v8470_v8 = vunpack.c.l.b16 %v9630_v37 }
 0x111   : > { %v1615_v34 = vsel %vm9575_vm4, %v1610_v9, %v1614_v3  ;;  %2205 = vst.msk [vmem:[#allocation3 + $0x20] sm:$0xf] %vm1402_vm1, %v1565_v32  ;;  %v1619_v41 = vor.u32 %v1618_v15, %v1614_v3  ;;  %v9644_v15 = vld [vmem:[#allocation2 + $0x2c] sm:$0xff]  }
 0x112   : > { %2210 = vst.msk [vmem:[#allocation3 + $0x34] sm:$0xf] %vm1402_vm1, %v1615_v34  ;;  %v1570_v46 = vrot.slane %v1569_v23, 4  ;;  %v1351_v50 = vpack.c.bf16 %v1285_v27, %v1285_v27 }
 0x113   : > { %v749_v60 = vpop.f32.mrf.mxu0  ;;  %v2387_v61 = vld [vmem:[#allocation2 + $0x24] sm:$0xe]  ;;  %v1620_v63 = vrot.slane %v1619_v41, 4 }
 0x114   : > { %v9632_v62 = vld [vmem:[#allocation2 + $0x20] sm:$0xff]   ;;  %v1575_v5 = vsel %vm9575_vm4, %v1570_v46, %v9563_v33  ;;  %1418 = vst.msk [vmem:[#allocation2 + $0x3c] sm:$0xf] %vm1402_vm1, %v1351_v50  ;;  %v1622_v2 = vshll.u32 %v1351_v50, 16  ;;  %v1626_v12 = vshrl.u32 %v1351_v50, 16  ;;  %v750_v6 = vadd.f32 %v9551_v11, %v749_v60 }
 0x115   : > { %15631 = vst [vmem:[#allocation14_spill] sm:$0xff] %v9632_v62  ;;  %v3521_v9 = vunpack.c.l.b16 %v2387_v61  ;;  %v15375_v3 = vunpack.c.h.b16 %v9632_v62  ;;  %v15376_v60 = vrot.slane %v9644_v15, 5  ;;  %v9659_v61 = vld [vmem:[#allocation2 + $0x34] sm:$0xff]  }
 0x116   : > { %2206 = vst.msk [vmem:[#allocation3 + $0x24] sm:$0xf] %vm1402_vm1, %v1575_v5  ;;  %v1624_v24 = vrot.slane %v1622_v2, 5  ;;  %v1628_v32 = vrot.slane %v1626_v12, 4  ;;  %v890_v23 = vmax.f32 %v750_v6, 0.0  ;;  %8097 = vmatmul.msk.bf16.gmra.mxu0 %vm600_vm0, %v563_v51 }
 0x117   : > { %v3523_v33 = vpack.c.b16 %v8470_v8, %v3521_v9  ;;  %v9649_v27 = vpack.c.b16 %v8470_v8, %v15375_v3 }
 0x118   : > { %v1625_v34 = vsel %vm9575_vm4, %v1620_v63, %v1624_v24  ;;  %v1286_v46 = vmul.f32 %v9448_v13, %v890_v23  ;;  %v1629_v51 = vor.u32 %v1628_v32, %v1624_v24  ;;  %v9675_v63 = vpop.permute.xlu2 %1137 }
 0x119   : > { %15632 = vst [vmem:[#allocation15_spill] sm:$0xff] %v9649_v27  ;;  %v3525_v50 = vrot.slane %v3523_v33, 6  ;;  %v9656_v41 = vrot.slane %v9649_v27, 5 }
 0x11a   : > { %2211 = vst.msk [vmem:[#allocation3 + $0x38] sm:$0xf] %vm1402_vm1, %v1625_v34  ;;  %v1352_v5 = vpack.c.bf16 %v1286_v46, %v1286_v46  ;;  %v1630_v24 = vrot.slane %v1629_v51, 4  ;;  %v449_v34 = vld [vmem:[%s9286_s20 + $0x110] sm:$0xff]  ;;  %v450_v46 = vld [vmem:[%s9286_s20 + $0x118] sm:$0xff] }
 0x11b   : > { %15633 = vst [vmem:[#allocation16_spill] sm:$0xff] %v9656_v41  ;;  %v751_v2 = vpop.f32.mrf.mxu0  ;;  %3535 = vrot.lane.b32.xlu0 %v3525_v50, %s9186_s15  ;;  %3469 = vrot.lane.b32.xlu1 %v9656_v41, %s9187_s16  ;;  %v9668_v13 = vsel %vm2639_vm5, %v9656_v41, %v15376_v60 }
 0x11c   : > { %15634 = vst [vmem:[#allocation17_spill] sm:$0xff] %v9668_v13  ;;  %v1632_v12 = vshll.u32 %v1352_v5, 16  ;;  %v1636_v6 = vshrl.u32 %v1352_v5, 16  ;;  %v752_v8 = vadd.f32 %v9551_v11, %v751_v2  ;;  %3471 = vrot.lane.b32.xlu2 %v9668_v13, %s9187_s16  ;;  %v3371_v2 = vrot.slane %v9644_v15, 6 }
 0x11d   : > { %1419 = vst.msk [vmem:[#allocation2 + $0x40] sm:$0xf] %vm1402_vm1, %v1352_v5  ;;  %v15635_v13 = vrot.slane %v9659_v61, 6 }
 0x11e   : > { %v1634_v32 = vrot.slane %v1632_v12, 5  ;;  %v1638_v23 = vrot.slane %v1636_v6, 4  ;;  %v891_v33 = vmax.f32 %v752_v8, 0.0  ;;  %v3526_v12 = vsel %vm3363_vm6, %v3525_v50, %v3371_v2  ;;  %v8606_v6 = vld [vmem:[#allocation2 + $0x30] sm:$0xff]  }
 0x11f   : > { %v3374_v51 = vsel %vm3363_vm6, %v3371_v2, %v15635_v13  ;;  %v564_v8 = vpack.c.bf16 %v450_v46, %v449_v34 }
 0x120   : > { %v1635_v3 = vsel %vm9575_vm4, %v1630_v24, %v1634_v32  ;;  %v1287_v5 = vmul.f32 %v9516_v53, %v891_v33  ;;  %v1639_v60 = vor.u32 %v1638_v23, %v1634_v32  ;;  %v15381_v32 = vrot.slane %v9649_v27, 6 }
 0x121   : > { %2212 = vst.msk [vmem:[#allocation3 + $0x3c] sm:$0xf] %vm1402_vm1, %v1635_v3  ;;  %v9694_v23 = vrot.slane %v8606_v6, 5 }
 0x122   : > { %v1353_v9 = vpack.c.bf16 %v1287_v5, %v1287_v5  ;;  %v1640_v13 = vrot.slane %v1639_v60, 4  ;;  %v9700_v46 = vsel %vm3363_vm6, %v15381_v32, %v3371_v2 }
 0x123   : > { %v754_v41 = vpop.f32.mrf.mxu0  ;;  %3539 = vrot.lane.b32.xlu0 %v3374_v51, %s9186_s15  ;;  %3537 = vrot.lane.b32.xlu1 %v3526_v12, %s9186_s15  ;;  %15636 = vst [vmem:[#allocation18_spill] sm:$0xff] %v9694_v23  ;;  %v15382_v12 = vrot.slane %v9630_v37, 5 }
 0x124   : > { %1420 = vst.msk [vmem:[#allocation2 + $0x44] sm:$0xf] %vm1402_vm1, %v1353_v9  ;;  %v1642_v53 = vshll.u32 %v1353_v9, 16  ;;  %v1646_v24 = vshrl.u32 %v1353_v9, 16  ;;  %v755_v3 = vadd.f32 %v9551_v11, %v754_v41  ;;  %3258 = vrot.lane.b32.xlu2 %v8606_v6, %s9187_s16  ;;  %v15383_v9 = vrot.slane %v9659_v61, 5  ;;  %v9703_v41 = vpop.permute.xlu2 %1152 }
 0x125   : > { %15637 = vst [vmem:[#allocation19_spill] sm:$0xff] %v9700_v46  ;;  %v2646_v2 = vsel %vm2639_vm5, %v15382_v12, %v9694_v23  ;;  %v451_v12 = vld [vmem:[%s9286_s20 + $0x120] sm:$0xff] }
 0x126   : > { %v1644_v50 = vrot.slane %v1642_v53, 5  ;;  %v1648_v33 = vrot.slane %v1646_v24, 4  ;;  %v892_v34 = vmax.f32 %v755_v3, 0.0  ;;  %8098 = vmatmul.msk.bf16.gmra.mxu0 %vm600_vm0, %v564_v8  ;;  %v8583_v53 = vld [vmem:[#allocation3 + $0x30] sm:$0xff]  }
 0x128   : > { %v1645_v5 = vsel %vm9575_vm4, %v1640_v13, %v1644_v50  ;;  %v1288_v60 = vmul.f32 %v9525_v57, %v892_v34  ;;  %v1649_v6 = vor.u32 %v1648_v33, %v1644_v50  ;;  %v15638_v57 = vrot.slane %v9644_v15, 5  ;;  %v9729_v34 = vld [vmem:[#allocation3 + $0x28] sm:$0xff]  }
 0x129   : > { %2213 = vst.msk [vmem:[#allocation3 + $0x40] sm:$0xf] %vm1402_vm1, %v1645_v5  ;;  %v9731_v5 = vrot.slane %v8583_v53, 5  ;;  %v15385_v46 = vrot.slane %v9729_v34, 5 }
 0x12a   : > { %v1354_v8 = vpack.c.bf16 %v1288_v60, %v1288_v60  ;;  %v9721_v3 = vsel %vm2639_vm5, %v15638_v57, %v15383_v9  ;;  %15640 = vst [vmem:[#allocation21_spill] sm:$0xff] %v9729_v34  ;;  %v1650_v15 = vrot.slane %v1649_v6, 4  ;;  %v452_v9 = vld [vmem:[%s9286_s20 + $0x128] sm:$0xff] }
 0x12b   : > { %v756_v24 = vpop.f32.mrf.mxu0  ;;  %3423 = vrot.lane.b32.xlu0 %v3374_v51, %s9188_s17  ;;  %2693 = vrot.lane.b32.xlu1 %v2646_v2, %s9187_s16  ;;  %15639 = vst [vmem:[#allocation20_spill] sm:$0xff] %v9721_v3  ;;  %v9727_v51 = vld [vmem:[#allocation2 + $0x38] sm:$0xff]   ;;  %v9749_v32 = vld [vmem:[#allocation2 + $0x40] sm:$0xff]  }
 0x12c   : > { %1421 = vst.msk [vmem:[#allocation2 + $0x48] sm:$0xf] %vm1402_vm1, %v1354_v8  ;;  %v1652_v13 = vshll.u32 %v1354_v8, 16  ;;  %v1656_v50 = vshrl.u32 %v1354_v8, 16  ;;  %v757_v33 = vadd.f32 %v9551_v11, %v756_v24  ;;  %3473 = vrot.lane.b32.xlu2 %v9721_v3, %s9187_s16  ;;  %v9741_v27 = vpop.permute.xlu2 %1167 }
 0x12d   : > { %15641 = vst [vmem:[#allocation22_spill] sm:$0xff] %v9731_v5 }
 0x12e   : > { %v1654_v60 = vrot.slane %v1652_v13, 5  ;;  %v1658_v2 = vrot.slane %v1656_v50, 4  ;;  %v893_v57 = vmax.f32 %v757_v33, 0.0  ;;  %v2769_v13 = vsel %vm2639_vm5, %v15385_v46, %v9731_v5  ;;  %v9747_v33 = vld [vmem:[#allocation3 + $0x38] sm:$0xff]  }
 0x12f   : > { %v565_v50 = vpack.c.bf16 %v452_v9, %v451_v12 }
 0x130   : > { %v1655_v8 = vsel %vm9575_vm4, %v1650_v15, %v1654_v60  ;;  %v1289_v24 = vmul.f32 %v9463_v19, %v893_v57  ;;  %v1659_v53 = vor.u32 %v1658_v2, %v1654_v60  ;;  %v15642_v19 = vrot.slane %v9727_v51, 5 }
 0x131   : > { %2214 = vst.msk [vmem:[#allocation3 + $0x44] sm:$0xf] %vm1402_vm1, %v1655_v8  ;;  %v8479_v8 = vunpack.c.h.b16 %v9727_v51 }
 0x132   : > { %v1355_v6 = vpack.c.bf16 %v1289_v24, %v1289_v24  ;;  %v9758_v60 = vsel %vm2639_vm5, %v9694_v23, %v15642_v19  ;;  %v2389_v24 = vld [vmem:[#allocation2 + $0x38] sm:$0x8]  ;;  %v1660_v46 = vrot.slane %v1659_v53, 4  ;;  %v15645_v53 = vrot.slane %v9747_v33, 5 }
 0x133   : > { %v759_v15 = vpop.f32.mrf.mxu0  ;;  %2816 = vrot.lane.b32.xlu0 %v2769_v13, %s9186_s15  ;;  %3317 = vrot.lane.b32.xlu1 %v9721_v3, %s9186_s15  ;;  %15643 = vst [vmem:[#allocation23_spill] sm:$0xff] %v9758_v60  ;;  %v15391_v13 = vunpack.c.l.b16 %v9749_v32  ;;  %v3589_v34 = vunpack.c.l.b16 %v2389_v24 }
 0x134   : > { %1422 = vst.msk [vmem:[#allocation2 + $0x4c] sm:$0xf] %vm1402_vm1, %v1355_v6  ;;  %v1662_v2 = vshll.u32 %v1355_v6, 16  ;;  %v1666_v9 = vshrl.u32 %v1355_v6, 16  ;;  %v760_v12 = vadd.f32 %v9551_v11, %v759_v15  ;;  %2695 = vrot.lane.b32.xlu2 %v9758_v60, %s9187_s16 }
 0x135   : > { %v9774_v57 = vpack.c.b16 %v15391_v13, %v8479_v8 }
 0x136   : > { %v1664_v3 = vrot.slane %v1662_v2, 5  ;;  %v1668_v19 = vrot.slane %v1666_v9, 4  ;;  %v894_v23 = vmax.f32 %v760_v12, 0.0  ;;  %8099 = vmatmul.msk.bf16.gmra.mxu0 %vm600_vm0, %v565_v50  ;;  %v9780_v2 = vsel %vm2639_vm5, %v9731_v5, %v15645_v53  ;;  %v455_v5 = vld [vmem:[%s9286_s20 + $0x140] sm:$0xff] }
 0x137   : > { %15644 = vst [vmem:[#allocation24_spill] sm:$0xff] %v9774_v57  ;;  %v3593_v50 = vpack.c.b16 %v8479_v8, %v3589_v34  ;;  %v15393_v34 = vrot.slane %v9774_v57, 6 }
 0x138   : > { %v1665_v6 = vsel %vm9575_vm4, %v1660_v46, %v1664_v3  ;;  %v1290_v15 = vmul.f32 %v9461_v18, %v894_v23  ;;  %v1669_v60 = vor.u32 %v1668_v19, %v1664_v3  ;;  %15646 = vst [vmem:[#allocation25_spill] sm:$0xff] %v9780_v2  ;;  %v9786_v18 = vpop.permute.xlu2 %1182 }
 0x139   : > { %2215 = vst.msk [vmem:[#allocation3 + $0x48] sm:$0xf] %vm1402_vm1, %v1665_v6  ;;  %v453_v6 = vld [vmem:[%s9286_s20 + $0x130] sm:$0xff] }
 0x13a   : > { %v1356_v37 = vpack.c.bf16 %v1290_v15, %v1290_v15  ;;  %v1670_v12 = vrot.slane %v1669_v60, 4  ;;  %v454_v15 = vld [vmem:[%s9286_s20 + $0x138] sm:$0xff] }
 0x13b   : > { %v761_v46 = vpop.f32.mrf.mxu0  ;;  %3260 = vrot.lane.b32.xlu0 %v9727_v51, %s9187_s16  ;;  %2818 = vrot.lane.b32.xlu1 %v9780_v2, %s9186_s15 }
 0x13c   : > { %1423 = vst.msk [vmem:[#allocation2 + $0x50] sm:$0xf] %vm1402_vm1, %v1356_v37  ;;  %v1672_v23 = vshll.u32 %v1356_v37, 16  ;;  %v1676_v3 = vshrl.u32 %v1356_v37, 16  ;;  %v762_v9 = vadd.f32 %v9551_v11, %v761_v46  ;;  %3596 = vrot.lane.b32.xlu2 %v3593_v50, %s9188_s17  ;;  %v15647_v50 = vrot.slane %v9659_v61, 6 }
 0x13d   : > { %v566_v46 = vpack.c.bf16 %v454_v15, %v453_v6  ;;  %v2956_v6 = vrot.slane %v9774_v57, 5 }
 0x13e   : > { %v1674_v8 = vrot.slane %v1672_v23, 5  ;;  %v1678_v24 = vrot.slane %v1676_v3, 4  ;;  %v895_v19 = vmax.f32 %v762_v9, 0.0  ;;  %v3376_v60 = vsel %vm3363_vm6, %v15647_v50, %v15393_v34  ;;  %v9818_v50 = vld [vmem:[#allocation2 + $0x44] sm:$0xff]  }
 0x140   : > { %v1675_v53 = vsel %vm9575_vm4, %v1670_v12, %v1674_v8  ;;  %v1291_v13 = vmul.f32 %v9546_v10, %v895_v19  ;;  %v1679_v37 = vor.u32 %v1678_v24, %v1674_v8 }
 0x141   : > { %2216 = vst.msk [vmem:[#allocation3 + $0x4c] sm:$0xf] %vm1402_vm1, %v1675_v53  ;;  %v2394_v53 = vld [vmem:[#allocation2 + $0x3c] sm:$0xe] }
 0x142   : > { %v1357_v2 = vpack.c.bf16 %v1291_v13, %v1291_v13  ;;  %v9810_v13 = vpop.permute.xlu2 %1197  ;;  %v1680_v12 = vrot.slane %v1679_v37, 4 }
 0x143   : > { %v764_v23 = vpop.f32.mrf.mxu0  ;;  %3598 = vrot.lane.b32.xlu0 %v9749_v32, %s9188_s17  ;;  %3541 = vrot.lane.b32.xlu1 %v3376_v60, %s9186_s15 }
 0x144   : > { %1424 = vst.msk [vmem:[#allocation2 + $0x54] sm:$0xf] %vm1402_vm1, %v1357_v2  ;;  %v1682_v10 = vshll.u32 %v1357_v2, 16  ;;  %v1686_v3 = vshrl.u32 %v1357_v2, 16  ;;  %v765_v9 = vadd.f32 %v9551_v11, %v764_v23  ;;  %2877 = vrot.lane.b32.xlu2 %v9747_v33, %s9188_s17 }
 0x146   : > { %v1684_v8 = vrot.slane %v1682_v10, 5  ;;  %v1688_v24 = vrot.slane %v1686_v3, 4  ;;  %v896_v19 = vmax.f32 %v765_v9, 0.0  ;;  %8100 = vmatmul.msk.bf16.gmra.mxu0 %vm600_vm0, %v566_v46  ;;  %v15648_v46 = vrot.slane %v9659_v61, 5 }
 0x147   : > { %v15649_v61 = vunpack.c.l.b16 %v9749_v32 }
 0x148   : > { %v1685_v15 = vsel %vm9575_vm4, %v1680_v12, %v1684_v8  ;;  %v1292_v2 = vmul.f32 %v9480_v30, %v896_v19  ;;  %v1689_v23 = vor.u32 %v1688_v24, %v1684_v8  ;;  %v9826_v10 = vsel %vm2639_vm5, %v15648_v46, %v2956_v6 }
 0x149   : > { %2217 = vst.msk [vmem:[#allocation3 + $0x50] sm:$0xf] %vm1402_vm1, %v1685_v15  ;;  %v4355_v30 = vunpack.c.l.b16 %v2394_v53 }
 0x14a   : > { %v1358_v34 = vpack.c.bf16 %v1292_v2, %v1292_v2  ;;  %v1690_v19 = vrot.slane %v1689_v23, 4  ;;  %v9839_v26 = vpop.permute.xlu2 %1207  ;;  %v15651_v23 = vrot.slane %v9727_v51, 5  ;;  %v15653_v51 = vrot.slane %v9818_v50, 1 }
 0x14b   : > { %v766_v37 = vpop.f32.mrf.mxu0  ;;  %3262 = vrot.lane.b32.xlu0 %v9749_v32, %s9187_s16  ;;  %3425 = vrot.lane.b32.xlu1 %v3376_v60, %s9188_s17  ;;  %v15396_v60 = vrot.slane %v9818_v50, 5  ;;  %v4357_v24 = vpack.c.b16 %v15649_v61, %v4355_v30  ;;  %v15650_v30 = vrot.slane %v9749_v32, 5 }
 0x14c   : > { %1425 = vst.msk [vmem:[#allocation2 + $0x58] sm:$0xf] %vm1402_vm1, %v1358_v34  ;;  %v1692_v3 = vshll.u32 %v1358_v34, 16  ;;  %v1696_v9 = vshrl.u32 %v1358_v34, 16  ;;  %v767_v12 = vadd.f32 %v9551_v11, %v766_v37  ;;  %3319 = vrot.lane.b32.xlu2 %v9826_v10, %s9186_s15  ;;  %v456_v34 = vld [vmem:[%s9286_s20 + $0x148] sm:$0xff] }
 0x14d   : > { %v9855_v46 = vsel %vm2639_vm5, %v2956_v6, %v15396_v60 }
 0x14e   : > { %v1694_v15 = vrot.slane %v1692_v3, 5  ;;  %v1698_v2 = vrot.slane %v1696_v9, 4  ;;  %v897_v53 = vmax.f32 %v767_v12, 0.0  ;;  %v9850_v3 = vsel %vm2639_vm5, %v15651_v23, %v15650_v30 }
 0x14f   : > { %15652 = vst [vmem:[#allocation26_spill] sm:$0xff] %v9850_v3  ;;  %v4360_v9 = vrot.slane %v4357_v24, 1 }
 0x150   : > { %v1695_v37 = vsel %vm9575_vm4, %v1690_v19, %v1694_v15  ;;  %v1293_v8 = vmul.f32 %v9478_v29, %v897_v53  ;;  %v1699_v12 = vor.u32 %v1698_v2, %v1694_v15  ;;  %v567_v19 = vpack.c.bf16 %v456_v34, %v455_v5 }
 0x151   : > { %2218 = vst.msk [vmem:[#allocation3 + $0x54] sm:$0xf] %vm1402_vm1, %v1695_v37  ;;  %v4362_v53 = vsel %vm4359_vm7, %v4360_v9, %v15653_v51  ;;  %v15397_v37 = vrot.slane %v9818_v50, 6  ;;  %v9873_v9 = vld [vmem:[#allocation3 + $0x3c] sm:$0xff]  }
 0x152   : > { %v1359_v61 = vpack.c.bf16 %v1293_v8, %v1293_v8  ;;  %v1700_v5 = vrot.slane %v1699_v12, 4  ;;  %v9877_v51 = vld [vmem:[#allocation3 + $0x40] sm:$0xff]  }
 0x153   : > { %v769_v29 = vpop.f32.mrf.mxu0  ;;  %2697 = vrot.lane.b32.xlu0 %v9850_v3, %s9187_s16  ;;  %3477 = vrot.lane.b32.xlu1 %v9855_v46, %s9187_s16  ;;  %v458_v3 = vld [vmem:[%s9286_s20 + $0x158] sm:$0xff] }
 0x154   : > { %1426 = vst.msk [vmem:[#allocation2 + $0x5c] sm:$0xf] %vm1402_vm1, %v1359_v61  ;;  %v1702_v8 = vshll.u32 %v1359_v61, 16  ;;  %v1706_v24 = vshrl.u32 %v1359_v61, 16  ;;  %v770_v15 = vadd.f32 %v9551_v11, %v769_v29  ;;  %4409 = vrot.lane.b32.xlu2 %v4362_v53, %s9187_s16  ;;  %v9875_v61 = vpop.permute.xlu2 %1222 }
 0x156   : > { %v1704_v6 = vrot.slane %v1702_v8, 5  ;;  %v1708_v2 = vrot.slane %v1706_v24, 4  ;;  %v898_v34 = vmax.f32 %v770_v15, 0.0  ;;  %8101 = vmatmul.msk.bf16.gmra.mxu0 %vm600_vm0, %v567_v19  ;;  %v9888_v8 = vld [vmem:[#allocation3 + $0x34] sm:$0xff]  }
 0x157   : > { %15655 = vst [vmem:[#allocation27_spill] sm:$0xff] %v9888_v8 }
 0x158   : > { %v1705_v30 = vsel %vm9575_vm4, %v1700_v5, %v1704_v6  ;;  %v1294_v23 = vmul.f32 %v9559_v25, %v898_v34  ;;  %v1709_v29 = vor.u32 %v1708_v2, %v1704_v6  ;;  %v15654_v25 = vrot.slane %v9774_v57, 6 }
 0x159   : > { %2219 = vst.msk [vmem:[#allocation3 + $0x58] sm:$0xf] %vm1402_vm1, %v1705_v30  ;;  %v15403_v6 = vrot.slane %v9873_v9, 5  ;;  %v15401_v2 = vrot.slane %v9877_v51, 5 }
 0x15a   : > { %v1360_v12 = vpack.c.bf16 %v1294_v23, %v1294_v23  ;;  %v3378_v19 = vsel %vm3363_vm6, %v15654_v25, %v15397_v37  ;;  %v1710_v34 = vrot.slane %v1709_v29, 4  ;;  %v15400_v25 = vrot.slane %v9888_v8, 5  ;;  %v457_v37 = vld [vmem:[%s9286_s20 + $0x150] sm:$0xff] }
 0x15b   : > { %v771_v53 = vpop.f32.mrf.mxu0  ;;  %3475 = vrot.lane.b32.xlu0 %v9826_v10, %s9187_s16  ;;  %3321 = vrot.lane.b32.xlu1 %v9855_v46, %s9186_s15 }
 0x15c   : > { %1427 = vst.msk [vmem:[#allocation2 + $0x60] sm:$0xf] %vm1402_vm1, %v1360_v12  ;;  %v1712_v24 = vshll.u32 %v1360_v12, 16  ;;  %v1716_v15 = vshrl.u32 %v1360_v12, 16  ;;  %v772_v5 = vadd.f32 %v9551_v11, %v771_v53  ;;  %3543 = vrot.lane.b32.xlu2 %v3378_v19, %s9186_s15  ;;  %v3008_v29 = vsel %vm2639_vm5, %v15400_v25, %v15403_v6 }
 0x15d   : > { %v15660_v6 = vrot.slane %v9818_v50, 1 }
 0x15e   : > { %v1714_v30 = vrot.slane %v1712_v24, 5  ;;  %v1718_v23 = vrot.slane %v1716_v15, 4  ;;  %v899_v60 = vmax.f32 %v772_v5, 0.0  ;;  %v15656_v15 = vrot.slane %v9747_v33, 5  ;;  %v9922_v33 = vld [vmem:[#allocation2 + $0x48] sm:$0xff]  }
 0x160   : > { %v1715_v57 = vsel %vm9575_vm4, %v1710_v34, %v1714_v30  ;;  %v1295_v12 = vmul.f32 %v9489_v36, %v899_v60  ;;  %v1719_v53 = vor.u32 %v1718_v23, %v1714_v30  ;;  %v9912_v5 = vsel %vm2639_vm5, %v15656_v15, %v15401_v2  ;;  %v9917_v36 = vpop.permute.xlu2 %1227  ;;  %v459_v2 = vld [vmem:[%s9286_s20 + $0x160] sm:$0xff] }
 0x161   : > { %2220 = vst.msk [vmem:[#allocation3 + $0x5c] sm:$0xf] %vm1402_vm1, %v1715_v57  ;;  %v568_v34 = vpack.c.bf16 %v458_v3, %v457_v37 }
 0x162   : > { %v1361_v24 = vpack.c.bf16 %v1295_v12, %v1295_v12  ;;  %15657 = vst [vmem:[#allocation28_spill] sm:$0xff] %v9912_v5  ;;  %v1720_v23 = vrot.slane %v1719_v53, 4 }
 0x163   : > { %v774_v56 = vpop.f32.mrf.mxu0  ;;  %3055 = vrot.lane.b32.xlu0 %v3008_v29, %s9187_s16  ;;  %2820 = vrot.lane.b32.xlu1 %v9912_v5, %s9186_s15  ;;  %v15402_v29 = vrot.slane %v9922_v33, 5 }
 0x164   : > { %1428 = vst.msk [vmem:[#allocation2 + $0x64] sm:$0xf] %vm1402_vm1, %v1361_v24  ;;  %v1722_v57 = vshll.u32 %v1361_v24, 16  ;;  %v1726_v60 = vshrl.u32 %v1361_v24, 16  ;;  %v775_v30 = vadd.f32 %v9551_v11, %v774_v56  ;;  %3427 = vrot.lane.b32.xlu2 %v3378_v19, %s9188_s17  ;;  %v9930_v56 = vld [vmem:[#allocation2 + $0x4c] sm:$0xff]  }
 0x166   : > { %v1724_v3 = vrot.slane %v1722_v57, 5  ;;  %v1728_v37 = vrot.slane %v1726_v60, 4  ;;  %v900_v12 = vmax.f32 %v775_v30, 0.0  ;;  %8102 = vmatmul.msk.bf16.gmra.mxu0 %vm600_vm0, %v568_v34  ;;  %v15658_v34 = vrot.slane %v9749_v32, 5  ;;  %v460_v32 = vld [vmem:[%s9286_s20 + $0x168] sm:$0xff] }
 0x167   : > { %v15405_v30 = vrot.slane %v9930_v56, 1 }
 0x168   : > { %v1725_v15 = vsel %vm9575_vm4, %v1720_v23, %v1724_v3  ;;  %v1296_v25 = vmul.f32 %v9487_v35, %v900_v12  ;;  %v1729_v19 = vor.u32 %v1728_v37, %v1724_v3  ;;  %v2652_v35 = vsel %vm2639_vm5, %v15658_v34, %v15402_v29  ;;  %v9945_v23 = vpop.permute.xlu2 %1237 }
 0x169   : > { %2221 = vst.msk [vmem:[#allocation3 + $0x60] sm:$0xf] %vm1402_vm1, %v1725_v15 }
 0x16a   : > { %v1362_v24 = vpack.c.bf16 %v1296_v25, %v1296_v25  ;;  %15659 = vst [vmem:[#allocation29_spill] sm:$0xff] %v9945_v23  ;;  %v1730_v3 = vrot.slane %v1729_v19, 4  ;;  %v4364_v19 = vsel %vm4359_vm7, %v15660_v6, %v15405_v30  ;;  %v15404_v6 = vrot.slane %v9930_v56, 6  ;;  %v462_v30 = vld [vmem:[%s9286_s20 + $0x178] sm:$0xff] }
 0x16b   : > { %v776_v53 = vpop.f32.mrf.mxu0  ;;  %2879 = vrot.lane.b32.xlu0 %v9877_v51, %s9188_s17  ;;  %3600 = vrot.lane.b32.xlu1 %v9922_v33, %s9188_s17 }
 0x16c   : > { %1429 = vst.msk [vmem:[#allocation2 + $0x68] sm:$0xf] %vm1402_vm1, %v1362_v24  ;;  %v1732_v57 = vshll.u32 %v1362_v24, 16  ;;  %v1736_v60 = vshrl.u32 %v1362_v24, 16  ;;  %v777_v25 = vadd.f32 %v9551_v11, %v776_v53  ;;  %2699 = vrot.lane.b32.xlu2 %v2652_v35, %s9187_s16 }
 0x16e   : > { %v1734_v37 = vrot.slane %v1732_v57, 5  ;;  %v1738_v12 = vrot.slane %v1736_v60, 4  ;;  %v901_v15 = vmax.f32 %v777_v25, 0.0  ;;  %v9958_v57 = vld [vmem:[#allocation3 + $0x44] sm:$0xff]   ;;  %v569_v60 = vpack.c.bf16 %v460_v32, %v459_v2 }
 0x170   : > { %v1735_v34 = vsel %vm9575_vm4, %v1730_v3, %v1734_v37  ;;  %v1297_v29 = vmul.f32 %v9579_v22, %v901_v15  ;;  %v1739_v24 = vor.u32 %v1738_v12, %v1734_v37 }
 0x171   : > { %2222 = vst.msk [vmem:[#allocation3 + $0x64] sm:$0xf] %vm1402_vm1, %v1735_v34 }
 0x172   : > { %v1363_v53 = vpack.c.bf16 %v1297_v29, %v1297_v29  ;;  %v1740_v37 = vrot.slane %v1739_v24, 4  ;;  %v15662_v24 = vrot.slane %v9818_v50, 6 }
 0x173   : > { %v779_v25 = vpop.f32.mrf.mxu0  ;;  %4411 = vrot.lane.b32.xlu0 %v4364_v19, %s9187_s16  ;;  %3264 = vrot.lane.b32.xlu1 %v9922_v33, %s9187_s16 }
 0x174   : > { %1430 = vst.msk [vmem:[#allocation2 + $0x6c] sm:$0xf] %vm1402_vm1, %v1363_v53  ;;  %v1742_v22 = vshll.u32 %v1363_v53, 16  ;;  %v1746_v3 = vshrl.u32 %v1363_v53, 16  ;;  %v780_v29 = vadd.f32 %v9551_v11, %v779_v25  ;;  %3116 = vrot.lane.b32.xlu2 %v9958_v57, %s9186_s15 }
 0x176   : > { %v1744_v12 = vrot.slane %v1742_v22, 5  ;;  %v1748_v2 = vrot.slane %v1746_v3, 4  ;;  %v902_v15 = vmax.f32 %v780_v29, 0.0  ;;  %8103 = vmatmul.msk.bf16.gmra.mxu0 %vm600_vm0, %v569_v60  ;;  %v9969_v32 = vpop.permute.xlu2 %3471  ;;  %v3380_v22 = vsel %vm3363_vm6, %v15662_v24, %v15404_v6  ;;  %v9982_v60 = vld [vmem:[#allocation3 + $0x48] sm:$0xff]  }
 0x177   : > { %15661 = vst [vmem:[#allocation30_spill] sm:$0xff] %v9969_v32  ;;  %v461_v6 = vld [vmem:[%s9286_s20 + $0x170] sm:$0xff] }
 0x178   : > { %v1745_v34 = vsel %vm9575_vm4, %v1740_v37, %v1744_v12  ;;  %v1298_v53 = vmul.f32 %v9495_v39, %v902_v15  ;;  %v1749_v19 = vor.u32 %v1748_v2, %v1744_v12  ;;  %v15409_v12 = vrot.slane %v9958_v57, 5 }
 0x179   : > { %2223 = vst.msk [vmem:[#allocation3 + $0x68] sm:$0xf] %vm1402_vm1, %v1745_v34 }
 0x17a   : > { %v1364_v25 = vpack.c.bf16 %v1298_v53, %v1298_v53  ;;  %v1750_v2 = vrot.slane %v1749_v19, 4  ;;  %v15663_v19 = vrot.slane %v9873_v9, 5 }
 0x17b   : > { %v781_v3 = vpop.f32.mrf.mxu0  ;;  %3545 = vrot.lane.b32.xlu0 %v3380_v22, %s9186_s15  ;;  %3181 = vrot.lane.b32.xlu1 %v2652_v35, %s9188_s17 }
 0x17c   : > { %1431 = vst.msk [vmem:[#allocation2 + $0x70] sm:$0xf] %vm1402_vm1, %v1364_v25  ;;  %v1752_v39 = vshll.u32 %v1364_v25, 16  ;;  %v1756_v29 = vshrl.u32 %v1364_v25, 16  ;;  %v782_v37 = vadd.f32 %v9551_v11, %v781_v3  ;;  %2881 = vrot.lane.b32.xlu2 %v9982_v60, %s9188_s17 }
 0x17e   : > { %v1754_v15 = vrot.slane %v1752_v39, 5  ;;  %v1758_v34 = vrot.slane %v1756_v29, 4  ;;  %v903_v53 = vmax.f32 %v782_v37, 0.0  ;;  %v9989_v24 = vpop.permute.xlu2 %3258  ;;  %v3010_v39 = vsel %vm2639_vm5, %v15663_v19, %v15409_v12  ;;  %v10003_v37 = vld [vmem:[#allocation2 + $0x50] sm:$0xff]  }
 0x17f   : > { %v570_v29 = vpack.c.bf16 %v462_v30, %v461_v6  ;;  %v15407_v6 = vrot.slane %v9982_v60, 5 }
 0x180   : > { %v1755_v25 = vsel %vm9575_vm4, %v1750_v2, %v1754_v15  ;;  %v1299_v3 = vmul.f32 %v9493_v38, %v903_v53  ;;  %v1759_v5 = vor.u32 %v1758_v34, %v1754_v15  ;;  %v15664_v38 = vrot.slane %v9930_v56, 5 }
 0x181   : > { %2224 = vst.msk [vmem:[#allocation3 + $0x6c] sm:$0xf] %vm1402_vm1, %v1755_v25  ;;  %v15665_v2 = vrot.slane %v9818_v50, 5 }
 0x182   : > { %v1365_v32 = vpack.c.bf16 %v1299_v3, %v1299_v3  ;;  %v1760_v53 = vrot.slane %v1759_v5, 4 }
 0x183   : > { %v784_v35 = vpop.f32.mrf.mxu0  ;;  %3429 = vrot.lane.b32.xlu0 %v3380_v22, %s9188_s17  ;;  %3057 = vrot.lane.b32.xlu1 %v3010_v39, %s9187_s16  ;;  %v10012_v15 = vsel %vm2639_vm5, %v15665_v2, %v15664_v38  ;;  %v15408_v22 = vrot.slane %v10003_v37, 5  ;;  %v15669_v2 = vrot.slane %v9922_v33, 5 }
 0x184   : > { %1432 = vst.msk [vmem:[#allocation2 + $0x74] sm:$0xf] %vm1402_vm1, %v1365_v32  ;;  %v1762_v9 = vshll.u32 %v1365_v32, 16  ;;  %v1766_v34 = vshrl.u32 %v1365_v32, 16  ;;  %v785_v30 = vadd.f32 %v9551_v11, %v784_v35  ;;  %3479 = vrot.lane.b32.xlu2 %v10012_v15, %s9187_s16  ;;  %v8351_v32 = vld [vmem:[%s15366_s4 + $0xb8] sm:$0xff] }
 0x185   : > { %8931 = vmatpush.bf16.msra.mxu3 %v8351_v32 }
 0x186   : > { %v1764_v25 = vrot.slane %v1762_v9, 5  ;;  %v1768_v3 = vrot.slane %v1766_v34, 4  ;;  %v904_v50 = vmax.f32 %v785_v30, 0.0  ;;  %8104 = vmatmul.msk.bf16.gmra.mxu0 %vm600_vm0, %v570_v29  ;;  %v10021_v19 = vpop.permute.xlu2 %3473  ;;  %v15667_v29 = vrot.slane %v9877_v51, 5  ;;  %v10055_v30 = vld [vmem:[%s15365_s3] ss:$0 sm:$0xff] }
 0x187   : > { %15666 = vst [vmem:[#allocation31_spill] sm:$0xff] %v10021_v19  ;;  %v10042_v9 = vsel %vm2639_vm5, %v15669_v2, %v15408_v22  ;;  %v463_v2 = vld [vmem:[%s9286_s20 + $0x180] sm:$0xff] }
 0x188   : > { %v1765_v11 = vsel %vm9575_vm4, %v1760_v53, %v1764_v25  ;;  %v1300_v35 = vmul.f32 %v9597_v43, %v904_v50  ;;  %v1769_v5 = vor.u32 %v1768_v3, %v1764_v25  ;;  %v10035_v38 = vsel %vm2639_vm5, %v15667_v29, %v15407_v6  ;;  %v8350_v43 = vld [vmem:[%s15366_s4 + $0xb0] sm:$0xff]  ;;  %v8349_v29 = vld [vmem:[%s15366_s4 + $0xa8] sm:$0xff] }
 0x189   : > { %2225 = vst.msk [vmem:[#allocation3 + $0x70] sm:$0xf] %vm1402_vm1, %v1765_v11  ;;  %8932 = vmatpush.bf16.msra.mxu3 %v8350_v43 }
 0x18a   : > { %v1366_v39 = vpack.c.bf16 %v1300_v35, %v1300_v35  ;;  %15668 = vst [vmem:[#allocation32_spill] sm:$0xff] %v10035_v38  ;;  %v1770_v50 = vrot.slane %v1769_v5, 4  ;;  %v10075_v5 = vld [vmem:[#allocation3 + $0x4c] sm:$0xff]  }
 0x18b   : > { %v786_v34 = vpop.f32.mrf.mxu0  ;;  %2822 = vrot.lane.b32.xlu0 %v10035_v38, %s9186_s15  ;;  %2701 = vrot.lane.b32.xlu1 %v10042_v9, %s9187_s16  ;;  %v8348_v38 = vld [vmem:[%s15366_s4 + $0xa0] sm:$0xff] }
 0x18c   : > { %1433 = vst.msk [vmem:[#allocation2 + $0x78] sm:$0xf] %vm1402_vm1, %v1366_v39  ;;  %v1772_v51 = vshll.u32 %v1366_v39, 16  ;;  %v1776_v33 = vshrl.u32 %v1366_v39, 16  ;;  %v787_v53 = vadd.f32 %v10055_v30, %v786_v34  ;;  %3323 = vrot.lane.b32.xlu2 %v10012_v15, %s9186_s15  ;;  %v464_v34 = vld [vmem:[%s9286_s20 + $0x188] sm:$0xff] }
 0x18d   : > { %v10060_v25 = vpop.permute.xlu0 %3535  ;;  %v10062_v3 = vpop.permute.xlu1 %3469  ;;  %8933 = vmatpush.bf16.msra.mxu3 %v8349_v29  ;;  %v571_v12 = vpack.c.bf16 %v464_v34, %v463_v2 }
 0x18e   : > { %15670 = vst [vmem:[#allocation33_spill] sm:$0xff] %v10060_v25  ;;  %v1774_v32 = vrot.slane %v1772_v51, 5  ;;  %v1778_v11 = vrot.slane %v1776_v33, 4  ;;  %v905_v35 = vmax.f32 %v787_v53, 0.0  ;;  %v10064_v39 = vpop.permute.xlu2 %2695  ;;  %v10077_v51 = vld [vmem:[#allocation2 + $0x54] sm:$0xff]  }
 0x18f   : > { %15671 = vst [vmem:[#allocation34_spill] sm:$0xff] %v10062_v3  ;;  %v10079_v33 = vld [vmem:[#allocation3 + $0x50] sm:$0xff]   ;;  %v15412_v29 = vrot.slane %v10077_v51, 1 }
 0x190   : > { %v1775_v6 = vsel %vm9575_vm4, %v1770_v50, %v1774_v32  ;;  %v1301_v43 = vmul.f32 %v9504_v45, %v905_v35  ;;  %v1779_v53 = vor.u32 %v1778_v11, %v1774_v32  ;;  %v15411_v35 = vrot.slane %v10077_v51, 5 }
 0x191   : > { %2226 = vst.msk [vmem:[#allocation3 + $0x74] sm:$0xf] %vm1402_vm1, %v1775_v6  ;;  %8934 = vmatpush.bf16.msra.mxu3 %v8348_v38 }
 0x192   : > { %v1367_v22 = vpack.c.bf16 %v1301_v43, %v1301_v43  ;;  %v1780_v2 = vrot.slane %v1779_v53, 4 }
 0x193   : > { %v789_v19 = vpop.f32.mrf.mxu0  ;;  %3118 = vrot.lane.b32.xlu0 %v10075_v5, %s9186_s15  ;;  %2883 = vrot.lane.b32.xlu1 %v10079_v33, %s9188_s17 }
 0x194   : > { %1434 = vst.msk [vmem:[#allocation2 + $0x7c] sm:$0xf] %vm1402_vm1, %v1367_v22  ;;  %v1782_v45 = vshll.u32 %v1367_v22, 16  ;;  %v1786_v6 = vshrl.u32 %v1367_v22, 16  ;;  %v790_v50 = vadd.f32 %v10055_v30, %v789_v19  ;;  %3602 = vrot.lane.b32.xlu2 %v10003_v37, %s9188_s17  ;;  %v8347_v19 = vld [vmem:[%s15366_s4 + $0x98] sm:$0xff] }
 0x195   : > { %v10092_v32 = vpop.permute.xlu0 %3539  ;;  %v10094_v11 = vpop.permute.xlu1 %3537  ;;  %8935 = vmatpush.bf16.msra.mxu3 %v8347_v19 }
 0x196   : > { %15672 = vst [vmem:[#allocation35_spill] sm:$0xff] %v10092_v32  ;;  %v1784_v34 = vrot.slane %v1782_v45, 5  ;;  %v1788_v43 = vrot.slane %v1786_v6, 4  ;;  %v906_v25 = vmax.f32 %v790_v50, 0.0  ;;  %8105 = vmatmul.msk.bf16.gmra.mxu0 %vm600_vm0, %v571_v12  ;;  %v10099_v22 = vpop.permute.xlu2 %3596  ;;  %v15675_v12 = vrot.slane %v9930_v56, 5 }
 0x197   : > { %15673 = vst [vmem:[#allocation36_spill] sm:$0xff] %v10094_v11  ;;  %v15676_v50 = vrot.slane %v9930_v56, 1 }
 0x198   : > { %15674 = vst [vmem:[#allocation37_spill] sm:$0xff] %v10099_v22  ;;  %v1785_v38 = vsel %vm9575_vm4, %v1780_v2, %v1784_v34  ;;  %v1302_v32 = vmul.f32 %v9502_v44, %v906_v25  ;;  %v1789_v53 = vor.u32 %v1788_v43, %v1784_v34  ;;  %v10113_v6 = vsel %vm2639_vm5, %v15675_v12, %v15411_v35  ;;  %v8346_v44 = vld [vmem:[%s15366_s4 + $0x90] sm:$0xff] }
 0x199   : > { %2227 = vst.msk [vmem:[#allocation3 + $0x78] sm:$0xf] %vm1402_vm1, %v1785_v38  ;;  %v4366_v2 = vsel %vm4359_vm7, %v15676_v50, %v15412_v29  ;;  %8936 = vmatpush.bf16.msra.mxu3 %v8346_v44  ;;  %v15414_v12 = vrot.slane %v10077_v51, 6  ;;  %v466_v44 = vld [vmem:[%s9286_s20 + $0x198] sm:$0xff] }
 0x19a   : > { %v1368_v45 = vpack.c.bf16 %v1302_v32, %v1302_v32  ;;  %v1790_v50 = vrot.slane %v1789_v53, 4 }
 0x19b   : > { %v791_v25 = vpop.f32.mrf.mxu0  ;;  %3481 = vrot.lane.b32.xlu0 %v10113_v6, %s9187_s16  ;;  %4413 = vrot.lane.b32.xlu1 %v4366_v2, %s9187_s16 }
 0x19c   : > { %1435 = vst.msk [vmem:[#allocation2 + $0x80] sm:$0xf] %vm1402_vm1, %v1368_v45  ;;  %v1792_v32 = vshll.u32 %v1368_v45, 16  ;;  %v1796_v34 = vshrl.u32 %v1368_v45, 16  ;;  %v792_v43 = vadd.f32 %v10055_v30, %v791_v25  ;;  %3183 = vrot.lane.b32.xlu2 %v10042_v9, %s9188_s17  ;;  %v8345_v45 = vld [vmem:[%s15366_s4 + $0x88] sm:$0xff]  ;;  %v465_v9 = vld [vmem:[%s9286_s20 + $0x190] sm:$0xff] }
 0x19d   : > { %v10130_v19 = vpop.permute.xlu0 %3423  ;;  %v10132_v38 = vpop.permute.xlu1 %2693  ;;  %8937 = vmatpush.bf16.msra.mxu3 %v8345_v45  ;;  %v572_v62 = vpack.c.bf16 %v466_v44, %v465_v9 }
 0x19e   : > { %v1794_v2 = vrot.slane %v1792_v32, 5  ;;  %v1798_v35 = vrot.slane %v1796_v34, 4  ;;  %v907_v29 = vmax.f32 %v792_v43, 0.0  ;;  %v10135_v22 = vpop.permute.xlu2 %2877  ;;  %v10147_v34 = vld [vmem:[#allocation2 + $0x58] sm:$0xff]   ;;  %v15677_v43 = vrot.slane %v9930_v56, 6 }
 0x19f   : > { %v15415_v44 = vrot.slane %v10147_v34, 5 }
 0x1a0   : > { %v1795_v11 = vsel %vm9575_vm4, %v1790_v50, %v1794_v2  ;;  %v1303_v3 = vmul.f32 %v9615_v40, %v907_v29  ;;  %v1799_v53 = vor.u32 %v1798_v35, %v1794_v2  ;;  %v10154_v25 = vsel %vm3363_vm6, %v15677_v43, %v15414_v12  ;;  %v8344_v50 = vld [vmem:[%s15366_s4 + $0x80] sm:$0xff] }
 0x1a1   : > { %2228 = vst.msk [vmem:[#allocation3 + $0x7c] sm:$0xf] %vm1402_vm1, %v1795_v11  ;;  %v15680_v11 = vrot.slane %v9958_v57, 5  ;;  %8938 = vmatpush.bf16.msra.mxu3 %v8344_v50  ;;  %v15416_v50 = vrot.slane %v10079_v33, 5 }
 0x1a2   : > { %v1369_v32 = vpack.c.bf16 %v1303_v3, %v1303_v3  ;;  %15678 = vst [vmem:[#allocation38_spill] sm:$0xff] %v10154_v25  ;;  %v15679_v3 = vrot.slane %v10075_v5, 5  ;;  %v1800_v43 = vrot.slane %v1799_v53, 4  ;;  %v10187_v53 = vld [vmem:[#allocation3 + $0x54] sm:$0xff]  }
 0x1a3   : > { %v794_v40 = vpop.f32.mrf.mxu0  ;;  %3604 = vrot.lane.b32.xlu0 %v10147_v34, %s9188_s17  ;;  %3547 = vrot.lane.b32.xlu1 %v10154_v25, %s9186_s15  ;;  %v468_v25 = vld [vmem:[%s9286_s20 + $0x1a8] sm:$0xff] }
 0x1a4   : > { %v3012_v56 = vsel %vm2639_vm5, %v15680_v11, %v15679_v3  ;;  %1436 = vst.msk [vmem:[#allocation2 + $0x84] sm:$0xf] %vm1402_vm1, %v1369_v32  ;;  %v1802_v35 = vshll.u32 %v1369_v32, 16  ;;  %v1806_v29 = vshrl.u32 %v1369_v32, 16  ;;  %v795_v2 = vadd.f32 %v10055_v30, %v794_v40  ;;  %v8335_v32 = vld [vmem:[%s15366_s4 + $0x38] sm:$0xff] }
 0x1a5   : > { %3059 = vrot.lane.b32.xlu2 %v3012_v56, %s9187_s16  ;;  %v10171_v45 = vpop.permute.xlu0 %2816  ;;  %v10173_v9 = vpop.permute.xlu1 %3317  ;;  %8915 = vmatpush.bf16.msra.mxu1 %v8335_v32 }
 0x1a6   : > { %v1804_v12 = vrot.slane %v1802_v35, 5  ;;  %v1808_v57 = vrot.slane %v1806_v29, 4  ;;  %v908_v52 = vmax.f32 %v795_v2, 0.0  ;;  %8106 = vmatmul.msk.bf16.gmra.mxu0 %vm600_vm0, %v572_v62  ;;  %v10177_v3 = vpop.permute.xlu2 %3319  ;;  %v15681_v35 = vrot.slane %v10003_v37, 5  ;;  %v8334_v2 = vld [vmem:[%s15366_s4 + $0x30] sm:$0xff] }
 0x1a7   : > { %5406 = vmatpush.bf16.msrb.mxu0 %v8335_v32 }
 0x1a8   : > { %v1805_v40 = vsel %vm9575_vm4, %v1800_v43, %v1804_v12  ;;  %v1304_v11 = vmul.f32 %v9510_v48, %v908_v52  ;;  %v1809_v62 = vor.u32 %v1808_v57, %v1804_v12  ;;  %v2656_v29 = vsel %vm2639_vm5, %v15681_v35, %v15415_v44  ;;  %v10206_v12 = vld [vmem:[#allocation2 + $0x5c] sm:$0xff]  }
 0x1a9   : > { %2229 = vst.msk [vmem:[#allocation3 + $0x80] sm:$0xf] %vm1402_vm1, %v1805_v40  ;;  %v15682_v48 = vrot.slane %v9982_v60, 5  ;;  %8916 = vmatpush.bf16.msra.mxu1 %v8334_v2 }
 0x1aa   : > { %v1370_v56 = vpack.c.bf16 %v1304_v11, %v1304_v11  ;;  %v1810_v35 = vrot.slane %v1809_v62, 4  ;;  %v8588_v62 = vld [vmem:[#allocation3 + $0x58] sm:$0xff]  }
 0x1ab   : > { %v796_v43 = vpop.f32.mrf.mxu0  ;;  %2703 = vrot.lane.b32.xlu0 %v2656_v29, %s9187_s16  ;;  %3185 = vrot.lane.b32.xlu1 %v2656_v29, %s9188_s17  ;;  %v10204_v52 = vsel %vm2639_vm5, %v15682_v48, %v15416_v50 }
 0x1ac   : > { %15683 = vst [vmem:[#allocation39_spill] sm:$0xff] %v10204_v52  ;;  %v1812_v37 = vshll.u32 %v1370_v56, 16  ;;  %v1816_v57 = vshrl.u32 %v1370_v56, 16  ;;  %v797_v32 = vadd.f32 %v10055_v30, %v796_v43  ;;  %5407 = vmatpush.bf16.msrb.mxu0 %v8334_v2  ;;  %v15686_v43 = vrot.slane %v10075_v5, 5 }
 0x1ad   : > { %1437 = vst.msk [vmem:[#allocation2 + $0x88] sm:$0xf] %vm1402_vm1, %v1370_v56  ;;  %2824 = vrot.lane.b32.xlu2 %v10204_v52, %s9186_s15  ;;  %v3261_v40 = vpop.permute.xlu0 %3260  ;;  %v10212_v11 = vpop.permute.xlu1 %2818  ;;  %v8333_v56 = vld [vmem:[%s15366_s4 + $0x28] sm:$0xff]  ;;  %v467_v52 = vld [vmem:[%s9286_s20 + $0x1a0] sm:$0xff]  ;;  %v2778_v5 = vrot.slane %v8588_v62, 5 }
 0x1ae   : > { %v1814_v29 = vrot.slane %v1812_v37, 5  ;;  %v1818_v48 = vrot.slane %v1816_v57, 4  ;;  %v909_v44 = vmax.f32 %v797_v32, 0.0  ;;  %v10215_v50 = vpop.permute.xlu2 %4409  ;;  %8917 = vmatpush.bf16.msra.mxu1 %v8333_v56  ;;  %v10227_v57 = vld [vmem:[#allocation3 + $0x60] sm:$0xff]   ;;  %v15685_v32 = vrot.slane %v10187_v53, 5 }
 0x1af   : > { %15684 = vst [vmem:[#allocation40_spill] sm:$0xff] %v10215_v50  ;;  %v573_v23 = vpack.c.bf16 %v468_v25, %v467_v52 }
 0x1b0   : > { %v1815_v31 = vsel %vm9575_vm4, %v1810_v35, %v1814_v29  ;;  %v1305_v60 = vmul.f32 %v9508_v47, %v909_v44  ;;  %5408 = vmatpush.bf16.msrb.mxu0 %v8333_v56  ;;  %v1819_v2 = vor.u32 %v1818_v48, %v1814_v29  ;;  %v3014_v50 = vsel %vm2639_vm5, %v15686_v43, %v15685_v32  ;;  %v8332_v47 = vld [vmem:[%s15366_s4 + $0x20] sm:$0xff] }
 0x1b1   : > { %2230 = vst.msk [vmem:[#allocation3 + $0x84] sm:$0xf] %vm1402_vm1, %v1815_v31  ;;  %v15687_v31 = vrot.slane %v10206_v12, 1  ;;  %v15419_v43 = vrot.slane %v10206_v12, 5  ;;  %v15692_v48 = vrot.slane %v10079_v33, 5 }
 0x1b2   : > { %v1371_v37 = vpack.c.bf16 %v1305_v60, %v1305_v60  ;;  %v15688_v60 = vrot.slane %v10077_v51, 1  ;;  %8918 = vmatpush.bf16.msra.mxu1 %v8332_v47  ;;  %v1820_v32 = vrot.slane %v1819_v2, 4 }
 0x1b3   : > { %v799_v44 = vpop.f32.mrf.mxu0  ;;  %3120 = vrot.lane.b32.xlu0 %v10187_v53, %s9186_s15  ;;  %3061 = vrot.lane.b32.xlu1 %v3014_v50, %s9187_s16 }
 0x1b4   : > { %v4368_v35 = vsel %vm4359_vm7, %v15688_v60, %v15687_v31  ;;  %1438 = vst.msk [vmem:[#allocation2 + $0x8c] sm:$0xf] %vm1402_vm1, %v1371_v37  ;;  %v1822_v25 = vshll.u32 %v1371_v37, 16  ;;  %v1826_v52 = vshrl.u32 %v1371_v37, 16  ;;  %v800_v29 = vadd.f32 %v10055_v30, %v799_v44  ;;  %5409 = vmatpush.bf16.msrb.mxu0 %v8332_v47  ;;  %v8331_v44 = vld [vmem:[%s15366_s4 + $0x18] sm:$0xff] }
 0x1b5   : > { %4415 = vrot.lane.b32.xlu2 %v4368_v35, %s9187_s16  ;;  %v10249_v56 = vpop.permute.xlu0 %3598  ;;  %v10251_v50 = vpop.permute.xlu1 %3541  ;;  %v15420_v35 = vrot.slane %v10206_v12, 6 }
 0x1b6   : > { %15689 = vst [vmem:[#allocation41_spill] sm:$0xff] %v10249_v56  ;;  %v1824_v31 = vrot.slane %v1822_v25, 5  ;;  %v1828_v60 = vrot.slane %v1826_v52, 4  ;;  %v910_v16 = vmax.f32 %v800_v29, 0.0  ;;  %8107 = vmatmul.msk.bf16.gmra.mxu0 %vm600_vm0, %v573_v23  ;;  %v10255_v37 = vpop.permute.xlu2 %3543  ;;  %8919 = vmatpush.bf16.msra.mxu1 %v8331_v44  ;;  %v15693_v25 = vrot.slane %v10227_v57, 5  ;;  %v472_v56 = vld [vmem:[%s9286_s20 + $0x1c8] sm:$0xff] }
 0x1b7   : > { %15690 = vst [vmem:[#allocation42_spill] sm:$0xff] %v10251_v50  ;;  %v10264_v50 = vsel %vm2639_vm5, %v15692_v48, %v2778_v5  ;;  %v15694_v52 = vrot.slane %v10077_v51, 5 }
 0x1b8   : > { %15691 = vst [vmem:[#allocation43_spill] sm:$0xff] %v10255_v37  ;;  %v1825_v2 = vsel %vm9575_vm4, %v1820_v32, %v1824_v31  ;;  %v1306_v47 = vmul.f32 %v9634_v14, %v910_v16  ;;  %v4015_v23 = vsel %vm600_vm0, %v10264_v50, %v9989_v24  ;;  %v10276_v33 = vsel %vm2639_vm5, %v2778_v5, %v15693_v25  ;;  %v10289_v32 = vld [vmem:[#allocation2 + $0x60] sm:$0xff]   ;;  %v8330_v5 = vld [vmem:[%s15366_s4 + $0x10] sm:$0xff]  ;;  %v470_v37 = vld [vmem:[%s9286_s20 + $0x1b8] sm:$0xff] }
 0x1b9   : > { %2231 = vst.msk [vmem:[#allocation3 + $0x88] sm:$0xf] %vm1402_vm1, %v1825_v2  ;;  %v10283_v29 = vsel %vm2639_vm5, %v15694_v52, %v15419_v43  ;;  %5410 = vmatpush.bf16.msrb.mxu0 %v8331_v44  ;;  %v4084_v16 = vsel %vm3721_vm8, %v4015_v23, %v10173_v9  ;;  %v1829_v14 = vor.u32 %v1828_v60, %v1824_v31  ;;  %v15695_v9 = vrot.slane %v10077_v51, 6 }
 0x1ba   : > { %v4018_v24 = vsel %vm600_vm0, %v10276_v33, %v3261_v40  ;;  %v1372_v48 = vpack.c.bf16 %v1306_v47, %v1306_v47  ;;  %8920 = vmatpush.bf16.msra.mxu1 %v8330_v5  ;;  %v15423_v25 = vrot.slane %v10289_v32, 5 }
 0x1bb   : > { %v801_v2 = vpop.f32.mrf.mxu0  ;;  %2885 = vrot.lane.b32.xlu0 %v8588_v62, %s9188_s17  ;;  %3483 = vrot.lane.b32.xlu1 %v10283_v29, %s9187_s16  ;;  %v10302_v31 = vsel %vm3363_vm6, %v15695_v9, %v15420_v35  ;;  %v10310_v62 = vsel %vm3772_vm9, %v4084_v16, %v10130_v19  ;;  %v4086_v23 = vsel %vm3721_vm8, %v4018_v24, %v10177_v3  ;;  %v1830_v52 = vrot.slane %v1829_v14, 4  ;;  %v8329_v19 = vld [vmem:[%s15366_s4 + $0x8] sm:$0xff]  ;;  %v469_v35 = vld [vmem:[%s9286_s20 + $0x1b0] sm:$0xff] }
 0x1bc   : > { %15696 = vst [vmem:[#allocation44_spill] sm:$0xff] %v10302_v31  ;;  %v1832_v40 = vshll.u32 %v1372_v48, 16  ;;  %v1836_v60 = vshrl.u32 %v1372_v48, 16  ;;  %v802_v44 = vadd.f32 %v10055_v30, %v801_v2  ;;  %v15421_v3 = vrot.slane %v10310_v62, 3 }
 0x1bd   : > { %1439 = vst.msk [vmem:[#allocation2 + $0x90] sm:$0xf] %vm1402_vm1, %v1372_v48  ;;  %3549 = vrot.lane.b32.xlu2 %v10302_v31, %s9186_s15  ;;  %v10312_v51 = vpop.permute.xlu0 %3262  ;;  %v3426_v47 = vpop.permute.xlu1 %3425  ;;  %5411 = vmatpush.bf16.msrb.mxu0 %v8330_v5 }
 0x1be   : > { %15697 = vst [vmem:[#allocation45_spill] sm:$0xff] %v10310_v62  ;;  %v1834_v48 = vrot.slane %v1832_v40, 5  ;;  %v1838_v2 = vrot.slane %v1836_v60, 4  ;;  %v911_v9 = vmax.f32 %v802_v44, 0.0  ;;  %v10317_v43 = vpop.permute.xlu2 %3427  ;;  %v10323_v16 = vsel %vm3772_vm9, %v4086_v23, %v3426_v47  ;;  %8921 = vmatpush.bf16.msra.mxu1 %v8329_v19  ;;  %v10338_v44 = vld [vmem:[#allocation3 + $0x5c] sm:$0xff]  }
 0x1bf   : > { %v15422_v5 = vrot.slane %v10323_v16, 3  ;;  %v15698_v40 = vrot.slane %v10147_v34, 5 }
 0x1c0   : > { %v1835_v24 = vsel %vm9575_vm4, %v1830_v52, %v1834_v48  ;;  %v1307_v14 = vmul.f32 %v9521_v55, %v911_v9  ;;  %v1839_v47 = vor.u32 %v1838_v2, %v1834_v48  ;;  %v574_v52 = vpack.c.bf16 %v470_v37, %v469_v35  ;;  %v8328_v9 = vld [vmem:[%s15366_s4] sm:$0xff]  ;;  %v10354_v37 = vld [vmem:[#allocation3 + $0x68] sm:$0xff]  }
 0x1c1   : > { %2232 = vst.msk [vmem:[#allocation3 + $0x8c] sm:$0xf] %vm1402_vm1, %v1835_v24  ;;  %v2658_v60 = vsel %vm2639_vm5, %v15698_v40, %v15423_v25  ;;  %5412 = vmatpush.bf16.msrb.mxu0 %v8329_v19  ;;  %v4837_v55 = vsel %vm4776_vm10, %v15421_v3, %v15422_v5  ;;  %v10369_v25 = vld [vmem:[#allocation2 + $0x64] sm:$0xff]  }
 0x1c2   : > { %v1373_v23 = vpack.c.bf16 %v1307_v14, %v1307_v14  ;;  %5697 = vmatmul.bf16.vlgmr.msra.gmra.mxu3 %v4837_v55  ;;  %v15424_v14 = vrot.slane %v10338_v44, 5  ;;  %8922 = vmatpush.bf16.msra.mxu1 %v8328_v9  ;;  %v1840_v40 = vrot.slane %v1839_v47, 4 }
 0x1c3   : > { %v804_v34 = vpop.f32.mrf.mxu0  ;;  %3187 = vrot.lane.b32.xlu0 %v2658_v60, %s9188_s17  ;;  %2826 = vrot.lane.b32.xlu1 %v10264_v50, %s9186_s15 }
 0x1c4   : > { %1440 = vst.msk [vmem:[#allocation2 + $0x94] sm:$0xf] %vm1402_vm1, %v1373_v23  ;;  %v1842_v19 = vshll.u32 %v1373_v23, 16  ;;  %v1846_v48 = vshrl.u32 %v1373_v23, 16  ;;  %v805_v2 = vadd.f32 %v10055_v30, %v804_v34 }
 0x1c5   : > { %2705 = vrot.lane.b32.xlu2 %v2658_v60, %s9187_s16  ;;  %v10356_v35 = vpop.permute.xlu0 %2697  ;;  %v10358_v24 = vpop.permute.xlu1 %3477  ;;  %5413 = vmatpush.bf16.msrb.mxu0 %v8328_v9  ;;  %v15425_v60 = vrot.slane %v10354_v37, 5 }
 0x1c6   : > { %15699 = vst [vmem:[#allocation46_spill] sm:$0xff] %v10358_v24  ;;  %v1844_v55 = vrot.slane %v1842_v19, 5  ;;  %v1848_v23 = vrot.slane %v1846_v48, 4  ;;  %v912_v3 = vmax.f32 %v805_v2, 0.0  ;;  %8108 = vmatmul.msk.bf16.gmra.mxu0 %vm600_vm0, %v574_v52  ;;  %v10362_v34 = vpop.permute.xlu2 %2699  ;;  %v15700_v19 = vrot.slane %v10187_v53, 5  ;;  %v10390_v53 = vld [vmem:[#allocation2 + $0x68] sm:$0xff]  }
 0x1c7   : > { %v15701_v2 = vrot.slane %v10227_v57, 5  ;;  %v471_v24 = vld [vmem:[%s9286_s20 + $0x1c0] sm:$0xff] }
 0x1c8   : > { %v1845_v50 = vsel %vm9575_vm4, %v1840_v40, %v1844_v55  ;;  %v1308_v5 = vmul.f32 %v9519_v54, %v912_v3  ;;  %v1849_v9 = vor.u32 %v1848_v23, %v1844_v55  ;;  %v3016_v52 = vsel %vm2639_vm5, %v15700_v19, %v15424_v14 }
 0x1c9   : > { %2233 = vst.msk [vmem:[#allocation3 + $0x90] sm:$0xf] %vm1402_vm1, %v1845_v50  ;;  %v10382_v54 = vsel %vm2639_vm5, %v15701_v2, %v15425_v60 }
 0x1ca   : > { %v1374_v47 = vpack.c.bf16 %v1308_v5, %v1308_v5  ;;  %v4021_v55 = vsel %vm600_vm0, %v10382_v54, %v10312_v51  ;;  %v1850_v19 = vrot.slane %v1849_v9, 4  ;;  %v8343_v51 = vld [vmem:[%s15366_s4 + $0x78] sm:$0xff] }
 0x1cb   : > { %v806_v48 = vpop.f32.mrf.mxu0  ;;  %3063 = vrot.lane.b32.xlu0 %v3016_v52, %s9187_s16  ;;  %3606 = vrot.lane.b32.xlu1 %v10289_v32, %s9188_s17 }
 0x1cc   : > { %1441 = vst.msk [vmem:[#allocation2 + $0x98] sm:$0xf] %vm1402_vm1, %v1374_v47  ;;  %v1852_v3 = vshll.u32 %v1374_v47, 16  ;;  %v1856_v5 = vshrl.u32 %v1374_v47, 16  ;;  %v807_v40 = vadd.f32 %v10055_v30, %v806_v48  ;;  %v15431_v47 = vrot.slane %v10369_v25, 1  ;;  %8923 = vmatpush.bf16.msra.mxu2 %v8343_v51  ;;  %5535 = vmatpush.bf16.msra.mxu0 %v8343_v51 }
 0x1cd   : > { %3122 = vrot.lane.b32.xlu2 %v10338_v44, %s9186_s15  ;;  %v10395_v23 = vpop.permute.xlu0 %3475  ;;  %v3322_v50 = vpop.permute.xlu1 %3321 }
 0x1ce   : > { %15702 = vst [vmem:[#allocation47_spill] sm:$0xff] %v10395_v23  ;;  %v1854_v52 = vrot.slane %v1852_v3, 5  ;;  %v1858_v48 = vrot.slane %v1856_v5, 4  ;;  %v913_v2 = vmax.f32 %v807_v40, 0.0  ;;  %v10398_v14 = vpop.permute.xlu2 %3116  ;;  %v4088_v60 = vsel %vm3721_vm8, %v4021_v55, %v3322_v50  ;;  %v10414_v5 = vld [vmem:[#allocation3 + $0x30] sm:$0xff]  }
 0x1cf   : > { %v10412_v3 = vsel %vm3772_vm9, %v4088_v60, %v10317_v43  ;;  %15703 = vst [vmem:[#allocation48_spill] sm:$0xff] %v10414_v5  ;;  %v575_v43 = vpack.c.bf16 %v472_v56, %v471_v24  ;;  %v9012_v60 = vld [vmem:[#allocation3 + $0x28] sm:$0xff]   ;;  %v15706_v40 = vrot.slane %v10289_v32, 5  ;;  %v15708_v32 = vunpack.c.l.b16 %v10414_v5 }
 0x1d0   : > { %v1855_v23 = vsel %vm9575_vm4, %v1850_v19, %v1854_v52  ;;  %v1309_v9 = vmul.f32 %v9675_v63, %v913_v2  ;;  %v15428_v55 = vrot.slane %v10412_v3, 3  ;;  %v1859_v50 = vor.u32 %v1858_v48, %v1854_v52  ;;  %v8342_v56 = vld [vmem:[%s15366_s4 + $0x70] sm:$0xff] }
 0x1d1   : > { %2234 = vst.msk [vmem:[#allocation3 + $0x94] sm:$0xf] %vm1402_vm1, %v1855_v23  ;;  %v15704_v63 = vrot.slane %v10206_v12, 1  ;;  %v8379_v2 = vunpack.c.h.b16 %v9012_v60  ;;  %v15705_v23 = vrot.slane %v10390_v53, 5  ;;  %v15707_v52 = vrot.slane %v10323_v16, 3  ;;  %8924 = vmatpush.bf16.msra.mxu2 %v8342_v56  ;;  %5536 = vmatpush.bf16.msra.mxu0 %v8342_v56 }
 0x1d2   : > { %v1375_v62 = vpack.c.bf16 %v1309_v9, %v1309_v9  ;;  %v15429_v60 = vrot.slane %v10369_v25, 6  ;;  %v15710_v56 = vrot.slane %v10206_v12, 6 }
 0x1d3   : > { %v4370_v19 = vsel %vm4359_vm7, %v15704_v63, %v15431_v47  ;;  %v809_v31 = vpop.f32.mrf.mxu0  ;;  %v10430_v51 = vsel %vm2639_vm5, %v15706_v40, %v15705_v23  ;;  %v4847_v48 = vsel %vm4776_vm10, %v15707_v52, %v15428_v55  ;;  %v10446_v40 = vpack.c.b16 %v15708_v32, %v8379_v2 }
 0x1d4   : > { %4417 = vrot.lane.b32.xlu0 %v4370_v19, %s9187_s16  ;;  %1442 = vst.msk [vmem:[#allocation2 + $0x9c] sm:$0xf] %vm1402_vm1, %v1375_v62  ;;  %v1862_v24 = vshll.u32 %v1375_v62, 16  ;;  %v1866_v9 = vshrl.u32 %v1375_v62, 16  ;;  %v810_v63 = vadd.f32 %v10055_v30, %v809_v31  ;;  %2707 = vrot.lane.b32.xlu1 %v10430_v51, %s9187_s16  ;;  %v1860_v62 = vrot.slane %v1859_v50, 4 }
 0x1d5   : > { %5702 = vmatmul.bf16.gmra.mxu3 %v4847_v48  ;;  %15709 = vst [vmem:[#allocation49_spill] sm:$0xff] %v10446_v40  ;;  %2887 = vrot.lane.b32.xlu2 %v10227_v57, %s9188_s17  ;;  %v10450_v16 = vpop.permute.xlu0 %3055  ;;  %v10452_v19 = vpop.permute.xlu1 %2820  ;;  %v15430_v2 = vrot.slane %v10369_v25, 5  ;;  %v8341_v57 = vld [vmem:[%s15366_s4 + $0x68] sm:$0xff]  ;;  %v3657_v32 = vsel %vm600_vm0, %v10446_v40, %v10132_v38  ;;  %v10476_v55 = vsel %vm3363_vm6, %v15710_v56, %v15429_v60 }
 0x1d6   : > { %v1864_v31 = vrot.slane %v1862_v24, 5  ;;  %v1868_v23 = vrot.slane %v1866_v9, 4  ;;  %v914_v52 = vmax.f32 %v810_v63, 0.0  ;;  %8109 = vmatmul.msk.bf16.gmra.mxu0 %vm600_vm0, %v575_v43  ;;  %v10456_v48 = vpop.permute.xlu2 %2881  ;;  %v3729_v43 = vsel %vm3721_vm8, %v3657_v32, %v10171_v45  ;;  %8925 = vmatpush.bf16.msra.mxu2 %v8341_v57  ;;  %v10478_v38 = vld [vmem:[#allocation3 + $0x64] sm:$0xff]  }
 0x1d7   : > { %v15711_v45 = vrot.slane %v10206_v12, 5  ;;  %5537 = vmatpush.bf16.msra.mxu0 %v8341_v57  ;;  %v3017_v5 = vrot.slane %v10478_v38, 5 }
 0x1d8   : > { %v1865_v50 = vsel %vm9575_vm4, %v1860_v62, %v1864_v31  ;;  %v1310_v24 = vmul.f32 %v9529_v59, %v914_v52  ;;  %v1869_v9 = vor.u32 %v1868_v23, %v1864_v31  ;;  %v3660_v59 = vsel %vm600_vm0, %v9888_v8, %v10064_v39  ;;  %v8340_v23 = vld [vmem:[%s15366_s4 + $0x60] sm:$0xff] }
 0x1d9   : > { %2235 = vst.msk [vmem:[#allocation3 + $0x98] sm:$0xf] %vm1402_vm1, %v1865_v50  ;;  %v10490_v31 = vsel %vm2639_vm5, %v15711_v45, %v15430_v2  ;;  %v10497_v52 = vsel %vm3772_vm9, %v3729_v43, %v10135_v22  ;;  %v3731_v12 = vsel %vm3721_vm8, %v3660_v59, %v10212_v11  ;;  %v474_v59 = vld [vmem:[%s9286_s20 + $0x1d8] sm:$0xff] }
 0x1da   : > { %v1376_v63 = vpack.c.bf16 %v1310_v24, %v1310_v24  ;;  %15712 = vst [vmem:[#allocation50_spill] sm:$0xff] %v10497_v52  ;;  %v1870_v24 = vrot.slane %v1869_v9, 4  ;;  %8926 = vmatpush.bf16.msra.mxu2 %v8340_v23  ;;  %v15433_v60 = vrot.slane %v10497_v52, 3  ;;  %v473_v9 = vld [vmem:[%s9286_s20 + $0x1d0] sm:$0xff]  ;;  %v8339_v2 = vld [vmem:[%s15366_s4 + $0x58] sm:$0xff] }
 0x1db   : > { %v811_v62 = vpop.f32.mrf.mxu0  ;;  %5538 = vmatpush.bf16.msra.mxu0 %v8340_v23  ;;  %v576_v47 = vpack.c.bf16 %v474_v59, %v473_v9  ;;  %v10532_v23 = vld [vmem:[#allocation2 + $0x6c] sm:$0xff]  }
 0x1dc   : > { %3551 = vrot.lane.b32.xlu0 %v10476_v55, %s9186_s15  ;;  %1443 = vst.msk [vmem:[#allocation2 + $0xa0] sm:$0xf] %vm1402_vm1, %v1376_v63  ;;  %v1872_v39 = vshll.u32 %v1376_v63, 16  ;;  %v1876_v32 = vshrl.u32 %v1376_v63, 16  ;;  %v812_v50 = vadd.f32 %v10055_v30, %v811_v62  ;;  %3124 = vrot.lane.b32.xlu1 %v10478_v38, %s9186_s15 }
 0x1dd   : > { %3485 = vrot.lane.b32.xlu2 %v10490_v31, %s9187_s16  ;;  %v2880_v22 = vpop.permute.xlu0 %2879  ;;  %v10507_v57 = vpop.permute.xlu1 %3600 }
 0x1de   : > { %v1874_v43 = vrot.slane %v1872_v39, 5  ;;  %v1878_v63 = vrot.slane %v1876_v32, 4  ;;  %v915_v56 = vmax.f32 %v812_v50, 0.0  ;;  %v10510_v62 = vsel %vm3772_vm9, %v3731_v12, %v2880_v22  ;;  %v10512_v45 = vpop.permute.xlu2 %3479  ;;  %8927 = vmatpush.bf16.msra.mxu2 %v8339_v2 }
 0x1df   : > { %15713 = vst [vmem:[#allocation51_spill] sm:$0xff] %v10512_v45  ;;  %v15434_v11 = vrot.slane %v10510_v62, 3  ;;  %5539 = vmatpush.bf16.msra.mxu0 %v8339_v2 }
 0x1e0   : > { %v1875_v39 = vsel %vm9575_vm4, %v1870_v24, %v1874_v43  ;;  %v1311_v32 = vmul.f32 %v9527_v58, %v915_v56  ;;  %v1879_v12 = vor.u32 %v1878_v63, %v1874_v43  ;;  %v8338_v58 = vld [vmem:[%s15366_s4 + $0x50] sm:$0xff] }
 0x1e1   : > { %2236 = vst.msk [vmem:[#allocation3 + $0x9c] sm:$0xf] %vm1402_vm1, %v1875_v39  ;;  %v4813_v50 = vsel %vm4776_vm10, %v15433_v60, %v15434_v11  ;;  %v10560_v11 = vld [vmem:[#allocation3 + $0x70] sm:$0xff]  }
 0x1e2   : > { %v1377_v22 = vpack.c.bf16 %v1311_v32, %v1311_v32  ;;  %5429 = vmatmul.bf16.vlgmr.msra.gmra.mxu1 %v4813_v50  ;;  %8928 = vmatpush.bf16.msra.mxu2 %v8338_v58  ;;  %v1880_v9 = vrot.slane %v1879_v12, 4  ;;  %v8337_v50 = vld [vmem:[%s15366_s4 + $0x48] sm:$0xff] }
 0x1e3   : > { %v814_v8 = vpop.f32.mrf.mxu0  ;;  %5540 = vmatpush.bf16.msra.mxu0 %v8338_v58  ;;  %v10562_v58 = vld [vmem:[#allocation2 + $0x70] sm:$0xff]  }
 0x1e4   : > { %2828 = vrot.lane.b32.xlu0 %v10276_v33, %s9186_s15  ;;  %1444 = vst.msk [vmem:[#allocation2 + $0xa4] sm:$0xf] %vm1402_vm1, %v1377_v22  ;;  %v1882_v24 = vshll.u32 %v1377_v22, 16  ;;  %v1886_v56 = vshrl.u32 %v1377_v22, 16  ;;  %v815_v43 = vadd.f32 %v10055_v30, %v814_v8  ;;  %2889 = vrot.lane.b32.xlu1 %v10354_v37, %s9188_s17  ;;  %v9013_v22 = vld [vmem:[#allocation3 + $0x3c] sm:$0xff]  }
 0x1e5   : > { %3608 = vrot.lane.b32.xlu2 %v10390_v53, %s9188_s17  ;;  %v10543_v33 = vpop.permute.xlu0 %4411  ;;  %v3265_v63 = vpop.permute.xlu1 %3264  ;;  %v3663_v60 = vsel %vm600_vm0, %v9013_v22, %v10356_v35  ;;  %v15715_v35 = vrot.slane %v10532_v23, 1  ;;  %v476_v22 = vld [vmem:[%s9286_s20 + $0x1e8] sm:$0xff] }
 0x1e6   : > { %15714 = vst [vmem:[#allocation52_spill] sm:$0xff] %v10543_v33  ;;  %v1884_v59 = vrot.slane %v1882_v24, 5  ;;  %v1888_v39 = vrot.slane %v1886_v56, 4  ;;  %v916_v2 = vmax.f32 %v815_v43, 0.0  ;;  %8110 = vmatmul.msk.bf16.gmra.mxu0 %vm600_vm0, %v576_v47  ;;  %v10546_v32 = vpop.permute.xlu2 %3323  ;;  %v3733_v47 = vsel %vm3721_vm8, %v3663_v60, %v10452_v19  ;;  %8929 = vmatpush.bf16.msra.mxu2 %v8337_v50  ;;  %v8336_v19 = vld [vmem:[%s15366_s4 + $0x40] sm:$0xff] }
 0x1e7   : > { %5541 = vmatpush.bf16.msra.mxu0 %v8337_v50  ;;  %v10576_v60 = vsel %vm3772_vm9, %v3733_v47, %v10456_v48  ;;  %v11498_v33 = vld [vmem:[#allocation2 + $0x9c] sm:$0xff]  }
 0x1e8   : > { %v1885_v12 = vsel %vm9575_vm4, %v1880_v9, %v1884_v59  ;;  %v1312_v24 = vmul.f32 %v9703_v41, %v916_v2  ;;  %v1889_v56 = vor.u32 %v1888_v39, %v1884_v59  ;;  %v15716_v41 = vrot.slane %v10369_v25, 1 }
 0x1e9   : > { %2237 = vst.msk [vmem:[#allocation3 + $0xa0] sm:$0xf] %vm1402_vm1, %v1885_v12 }
 0x1ea   : > { %v1378_v43 = vpack.c.bf16 %v1312_v24, %v1312_v24  ;;  %v4372_v9 = vsel %vm4359_vm7, %v15716_v41, %v15715_v35  ;;  %8930 = vmatpush.bf16.msra.mxu2 %v8336_v19  ;;  %v1890_v24 = vrot.slane %v1889_v56, 4  ;;  %v15718_v56 = vrot.slane %v10560_v11, 5 }
 0x1eb   : > { %v816_v8 = vpop.f32.mrf.mxu0  ;;  %5542 = vmatpush.bf16.msra.mxu0 %v8336_v19  ;;  %v15720_v19 = vrot.slane %v10510_v62, 3 }
 0x1ec   : > { %3610 = vrot.lane.b32.xlu0 %v10562_v58, %s9188_s17  ;;  %1445 = vst.msk [vmem:[#allocation2 + $0xa8] sm:$0xf] %vm1402_vm1, %v1378_v43  ;;  %v1892_v59 = vshll.u32 %v1378_v43, 16  ;;  %v1896_v39 = vshrl.u32 %v1378_v43, 16  ;;  %v817_v2 = vadd.f32 %v10055_v30, %v816_v8  ;;  %4419 = vrot.lane.b32.xlu1 %v4372_v9, %s9187_s16  ;;  %v4822_v8 = vrot.slane %v10576_v60, 3  ;;  %v475_v9 = vld [vmem:[%s9286_s20 + $0x1e0] sm:$0xff] }
 0x1ed   : > { %3189 = vrot.lane.b32.xlu2 %v10430_v51, %s9188_s17  ;;  %v10584_v50 = vpop.permute.xlu0 %3545  ;;  %v10586_v12 = vpop.permute.xlu1 %3181  ;;  %v10739_v60 = vld [vmem:[%s15365_s3] ss:$0 sm:$0xff] }
 0x1ee   : > { %15717 = vst [vmem:[#allocation53_spill] sm:$0xff] %v10584_v50  ;;  %v1894_v47 = vrot.slane %v1892_v59, 5  ;;  %v1898_v43 = vrot.slane %v1896_v39, 4  ;;  %v917_v35 = vmax.f32 %v817_v2, 0.0  ;;  %v10589_v41 = vpop.permute.xlu2 %3602  ;;  %v15719_v59 = vrot.slane %v10354_v37, 5 }
 0x1ef   : > { %v4823_v2 = vsel %vm4776_vm10, %v15720_v19, %v4822_v8 }
 0x1f0   : > { %v1895_v51 = vsel %vm9575_vm4, %v1890_v24, %v1894_v47  ;;  %v1313_v52 = vmul.f32 %v9536_v1, %v917_v35  ;;  %v1899_v48 = vor.u32 %v1898_v43, %v1894_v47  ;;  %v10604_v39 = vsel %vm2639_vm5, %v15719_v59, %v15718_v56 }
 0x1f1   : > { %2238 = vst.msk [vmem:[#allocation3 + $0xa4] sm:$0xf] %vm1402_vm1, %v1895_v51  ;;  %v4024_v1 = vsel %vm600_vm0, %v10604_v39, %v3265_v63  ;;  %v15721_v24 = vrot.slane %v10562_v58, 5  ;;  %v15722_v47 = vrot.slane %v10390_v53, 5  ;;  %v577_v43 = vpack.c.bf16 %v476_v22, %v475_v9  ;;  %v10619_v51 = vld [vmem:[#allocation3 + $0x6c] sm:$0xff]  }
 0x1f2   : > { %v1379_v38 = vpack.c.bf16 %v1313_v52, %v1313_v52  ;;  %5434 = vmatmul.bf16.gmra.mxu1 %v4823_v2  ;;  %v15723_v52 = vrot.slane %v10338_v44, 5  ;;  %v1900_v59 = vrot.slane %v1899_v48, 4  ;;  %v4090_v22 = vsel %vm3721_vm8, %v4024_v1, %v10546_v32 }
 0x1f3   : > { %v2662_v37 = vsel %vm2639_vm5, %v15722_v47, %v15721_v24  ;;  %v819_v35 = vpop.f32.mrf.mxu0  ;;  %v3019_v48 = vrot.slane %v10619_v51, 5 }
 0x1f4   : > { %2709 = vrot.lane.b32.xlu0 %v2662_v37, %s9187_s16  ;;  %1446 = vst.msk [vmem:[#allocation2 + $0xac] sm:$0xf] %vm1402_vm1, %v1379_v38  ;;  %v1902_v62 = vshll.u32 %v1379_v38, 16  ;;  %v1906_v56 = vshrl.u32 %v1379_v38, 16  ;;  %v820_v63 = vadd.f32 %v10055_v30, %v819_v35  ;;  %3191 = vrot.lane.b32.xlu1 %v2662_v37, %s9188_s17  ;;  %v3018_v53 = vsel %vm2639_vm5, %v15723_v52, %v3017_v5 }
 0x1f5   : > { %3065 = vrot.lane.b32.xlu2 %v3018_v53, %s9187_s16  ;;  %v3430_v9 = vpop.permute.xlu0 %3429  ;;  %v3058_v19 = vpop.permute.xlu1 %3057  ;;  %v15724_v35 = vrot.slane %v10412_v3, 3  ;;  %v3020_v52 = vsel %vm2639_vm5, %v3017_v5, %v3019_v48 }
 0x1f6   : > { %v1904_v2 = vrot.slane %v1902_v62, 5  ;;  %v1908_v24 = vrot.slane %v1906_v56, 4  ;;  %v918_v47 = vmax.f32 %v820_v63, 0.0  ;;  %v10631_v38 = vsel %vm3772_vm9, %v4090_v22, %v3430_v9  ;;  %8111 = vmatmul.msk.bf16.gmra.mxu0 %vm600_vm0, %v577_v43  ;;  %v3184_v37 = vpop.permute.xlu2 %3183 }
 0x1f7   : > { %v15438_v44 = vrot.slane %v10631_v38, 3 }
 0x1f8   : > { %v1905_v32 = vsel %vm9575_vm4, %v1900_v59, %v1904_v2  ;;  %v1314_v1 = vmul.f32 %v9534_v0, %v918_v47  ;;  %v1909_v56 = vor.u32 %v1908_v24, %v1904_v2  ;;  %v10650_v0 = vld [vmem:[#allocation2 + $0x74] sm:$0xff]  }
 0x1f9   : > { %2239 = vst.msk [vmem:[#allocation3 + $0xa8] sm:$0xf] %vm1402_vm1, %v1905_v32  ;;  %v4857_v62 = vsel %vm4776_vm10, %v15724_v35, %v15438_v44 }
 0x1fa   : > { %v1380_v43 = vpack.c.bf16 %v1314_v1, %v1314_v1  ;;  %5707 = vmatmul.bf16.gmra.mxu3 %v4857_v62  ;;  %v1910_v2 = vrot.slane %v1909_v56, 4  ;;  %v4373_v1 = vrot.slane %v10650_v0, 1 }
 0x1fb   : > { %v821_v63 = vpop.f32.mrf.mxu0 }
 0x1fc   : > { %3126 = vrot.lane.b32.xlu0 %v10619_v51, %s9186_s15  ;;  %1447 = vst.msk [vmem:[#allocation2 + $0xb0] sm:$0xf] %vm1402_vm1, %v1380_v43  ;;  %v1912_v53 = vshll.u32 %v1380_v43, 16  ;;  %v1916_v59 = vshrl.u32 %v1380_v43, 16  ;;  %v822_v3 = vadd.f32 %v10055_v30, %v821_v63  ;;  %3067 = vrot.lane.b32.xlu1 %v3020_v52, %s9187_s16  ;;  %v10665_v43 = vld [vmem:[#allocation2 + $0x78] sm:$0xff]   ;;  %v9014_v52 = vld [vmem:[#allocation3 + $0x44] sm:$0xff]  }
 0x1fd   : > { %2830 = vrot.lane.b32.xlu2 %v10382_v54, %s9186_s15  ;;  %v2823_v22 = vpop.permute.xlu0 %2822  ;;  %v10657_v9 = vpop.permute.xlu1 %2701  ;;  %v3834_v54 = vsel %vm600_vm0, %v9826_v10, %v10450_v16  ;;  %v2663_v10 = vrot.slane %v10665_v43, 5 }
 0x1fe   : > { %v1914_v24 = vrot.slane %v1912_v53, 5  ;;  %v1918_v47 = vrot.slane %v1916_v59, 4  ;;  %v919_v5 = vmax.f32 %v822_v3, 0.0  ;;  %v3666_v53 = vsel %vm600_vm0, %v9014_v52, %v10362_v34 }
 0x1ff   : > { %v10659_v32 = vpop.permute.xlu2 %3059  ;;  %v3905_v16 = vsel %vm3721_vm8, %v3834_v54, %v10398_v14  ;;  %v3735_v14 = vsel %vm3721_vm8, %v3666_v53, %v2823_v22 }
 0x200   : > { %v1915_v35 = vsel %vm9575_vm4, %v1910_v2, %v1914_v24  ;;  %v1315_v62 = vmul.f32 %v9741_v27, %v919_v5  ;;  %v1919_v63 = vor.u32 %v1918_v47, %v1914_v24  ;;  %v15725_v27 = vrot.slane %v10532_v23, 1  ;;  %v10687_v47 = vld [vmem:[#allocation2 + $0x80] sm:$0xff]  }
 0x201   : > { %2240 = vst.msk [vmem:[#allocation3 + $0xac] sm:$0xf] %vm1402_vm1, %v1915_v35  ;;  %v10691_v23 = vsel %vm3772_vm9, %v3905_v16, %v10586_v12  ;;  %v3837_v35 = vsel %vm600_vm0, %v9855_v46, %v3058_v19  ;;  %v15442_v46 = vrot.slane %v10687_v47, 5 }
 0x202   : > { %v1381_v56 = vpack.c.bf16 %v1315_v62, %v1315_v62  ;;  %v4374_v3 = vsel %vm4359_vm7, %v15725_v27, %v4373_v1  ;;  %15726 = vst [vmem:[#allocation54_spill] sm:$0xff] %v10691_v23  ;;  %v1920_v5 = vrot.slane %v1919_v63, 4  ;;  %v15437_v19 = vrot.slane %v10691_v23, 3 }
 0x203   : > { %v824_v59 = vpop.f32.mrf.mxu0 }
 0x204   : > { %2891 = vrot.lane.b32.xlu0 %v10560_v11, %s9188_s17  ;;  %1448 = vst.msk [vmem:[#allocation2 + $0xb4] sm:$0xf] %vm1402_vm1, %v1381_v56  ;;  %v1922_v2 = vshll.u32 %v1381_v56, 16  ;;  %v1926_v24 = vshrl.u32 %v1381_v56, 16  ;;  %v825_v34 = vadd.f32 %v10055_v30, %v824_v59  ;;  %2832 = vrot.lane.b32.xlu1 %v10604_v39, %s9186_s15 }
 0x205   : > { %4421 = vrot.lane.b32.xlu2 %v4374_v3, %s9187_s16  ;;  %v3119_v62 = vpop.permute.xlu0 %3118  ;;  %v2884_v54 = vpop.permute.xlu1 %2883 }
 0x206   : > { %v1924_v30 = vrot.slane %v1922_v2, 5  ;;  %v1928_v56 = vrot.slane %v1926_v24, 4  ;;  %v920_v52 = vmax.f32 %v825_v34, 0.0  ;;  %v3907_v39 = vsel %vm3721_vm8, %v3837_v35, %v3119_v62 }
 0x207   : > { %v10698_v59 = vpop.permute.xlu2 %2824  ;;  %v10701_v12 = vsel %vm3772_vm9, %v3907_v39, %v3184_v37  ;;  %v10704_v63 = vsel %vm3772_vm9, %v3735_v14, %v2884_v54  ;;  %v10714_v37 = vld [vmem:[#allocation3 + $0x74] sm:$0xff]   ;;  %v15727_v24 = vrot.slane %v10562_v58, 5  ;;  %v10733_v58 = vsel %vm2639_vm5, %v2663_v10, %v15442_v46 }
 0x208   : > { %v1925_v22 = vsel %vm9575_vm4, %v1920_v5, %v1924_v30  ;;  %v1316_v53 = vmul.f32 %v9542_v7, %v920_v52  ;;  %v15441_v27 = vrot.slane %v10701_v12, 3  ;;  %v15439_v3 = vrot.slane %v10704_v63, 3 }
 0x209   : > { %2241 = vst.msk [vmem:[#allocation3 + $0xb0] sm:$0xf] %vm1402_vm1, %v1925_v22  ;;  %v1929_v16 = vor.u32 %v1928_v56, %v1924_v30  ;;  %v2664_v34 = vsel %vm2639_vm5, %v15727_v24, %v2663_v10  ;;  %v15440_v30 = vrot.slane %v10714_v37, 5 }
 0x20a   : > { %v1382_v2 = vpack.c.bf16 %v1316_v53, %v1316_v53  ;;  %v4815_v7 = vsel %vm4776_vm10, %v15437_v19, %v15441_v27  ;;  %v4833_v5 = vsel %vm4776_vm10, %v4822_v8, %v15439_v3 }
 0x20b   : > { %v826_v35 = vpop.f32.mrf.mxu0  ;;  %5558 = vmatmul.bf16.vlgmr.msra.gmra.mxu2 %v4815_v7  ;;  %5439 = vmatmul.bf16.gmra.mxu1 %v4833_v5  ;;  %v1930_v56 = vrot.slane %v1929_v16, 4  ;;  %v3022_v16 = vsel %vm2639_vm5, %v3019_v48, %v15440_v30  ;;  %v10786_v30 = vld [vmem:[#allocation3 + $0x78] sm:$0xff]  }
 0x20c   : > { %3193 = vrot.lane.b32.xlu0 %v2664_v34, %s9188_s17  ;;  %1449 = vst.msk [vmem:[#allocation2 + $0xb8] sm:$0xf] %vm1402_vm1, %v1382_v2  ;;  %v1932_v14 = vshll.u32 %v1382_v2, 16  ;;  %v1936_v62 = vshrl.u32 %v1382_v2, 16  ;;  %v827_v8 = vadd.f32 %v10739_v60, %v826_v35  ;;  %2713 = vrot.lane.b32.xlu1 %v10733_v58, %s9187_s16  ;;  %v10763_v35 = vld [vmem:[#allocation3 + $0x7c] sm:$0xff]   ;;  %v15734_v40 = vrot.slane %v10786_v30, 5 }
 0x20d   : > { %2711 = vrot.lane.b32.xlu2 %v2664_v34, %s9187_s16  ;;  %v10745_v10 = vpop.permute.xlu0 %3481  ;;  %v10747_v54 = vpop.permute.xlu1 %4413  ;;  %v10756_v34 = vld [vmem:[#allocation2 + $0x7c] sm:$0xff]  }
 0x20e   : > { %15728 = vst [vmem:[#allocation55_spill] sm:$0xff] %v10745_v10  ;;  %v1934_v52 = vrot.slane %v1932_v14, 5  ;;  %v1938_v39 = vrot.slane %v1936_v62, 4  ;;  %v921_v22 = vmax.f32 %v827_v8, 0.0 }
 0x20f   : > { %15729 = vst [vmem:[#allocation56_spill] sm:$0xff] %v10747_v54  ;;  %v10750_v53 = vpop.permute.xlu2 %4415 }
 0x210   : > { %15730 = vst [vmem:[#allocation57_spill] sm:$0xff] %v10750_v53  ;;  %v1935_v2 = vsel %vm9575_vm4, %v1930_v56, %v1934_v52  ;;  %v1317_v24 = vmul.f32 %v9540_v4, %v921_v22  ;;  %v1939_v7 = vor.u32 %v1938_v39, %v1934_v52  ;;  %v4375_v52 = vrot.slane %v10756_v34, 1 }
 0x211   : > { %2242 = vst.msk [vmem:[#allocation3 + $0xb4] sm:$0xf] %vm1402_vm1, %v1935_v2 }
 0x212   : > { %v1383_v5 = vpack.c.bf16 %v1317_v24, %v1317_v24  ;;  %v1940_v39 = vrot.slane %v1939_v7, 4  ;;  %v4376_v3 = vsel %vm4359_vm7, %v4373_v1, %v4375_v52 }
 0x213   : > { %v829_v14 = vpop.f32.mrf.mxu0 }
 0x214   : > { %3069 = vrot.lane.b32.xlu0 %v3022_v16, %s9187_s16  ;;  %1450 = vst.msk [vmem:[#allocation2 + $0xbc] sm:$0xf] %vm1402_vm1, %v1383_v5  ;;  %v1942_v4 = vshll.u32 %v1383_v5, 16  ;;  %v1946_v62 = vshrl.u32 %v1383_v5, 16  ;;  %v830_v8 = vadd.f32 %v10739_v60, %v829_v14  ;;  %3130 = vrot.lane.b32.xlu1 %v10763_v35, %s9186_s15 }
 0x215   : > { %3128 = vrot.lane.b32.xlu2 %v10714_v37, %s9186_s15  ;;  %v10772_v56 = vpop.permute.xlu0 %3604  ;;  %v10774_v48 = vpop.permute.xlu1 %3547 }
 0x216   : > { %15731 = vst [vmem:[#allocation58_spill] sm:$0xff] %v10772_v56  ;;  %v1944_v22 = vrot.slane %v1942_v4, 5  ;;  %v1948_v2 = vrot.slane %v1946_v62, 4  ;;  %v922_v24 = vmax.f32 %v830_v8, 0.0  ;;  %v10789_v4 = vld [vmem:[#allocation3 + $0x80] sm:$0xff]  }
 0x217   : > { %15732 = vst [vmem:[#allocation59_spill] sm:$0xff] %v10774_v48  ;;  %v10777_v16 = vpop.permute.xlu2 %3549  ;;  %v10791_v62 = vld [vmem:[#allocation2 + $0x84] sm:$0xff]  }
 0x218   : > { %15733 = vst [vmem:[#allocation60_spill] sm:$0xff] %v10777_v16  ;;  %v1945_v5 = vsel %vm9575_vm4, %v1940_v39, %v1944_v22  ;;  %v1318_v14 = vmul.f32 %v9786_v18, %v922_v24  ;;  %v1949_v19 = vor.u32 %v1948_v2, %v1944_v22  ;;  %v3023_v16 = vrot.slane %v10763_v35, 5 }
 0x219   : > { %2243 = vst.msk [vmem:[#allocation3 + $0xb8] sm:$0xf] %vm1402_vm1, %v1945_v5 }
 0x21a   : > { %v1384_v44 = vpack.c.bf16 %v1318_v14, %v1318_v14  ;;  %v1950_v2 = vrot.slane %v1949_v19, 4  ;;  %v15735_v19 = vrot.slane %v10560_v11, 5 }
 0x21b   : > { %v831_v7 = vpop.f32.mrf.mxu0 }
 0x21c   : > { %4423 = vrot.lane.b32.xlu0 %v4376_v3, %s9187_s16  ;;  %1451 = vst.msk [vmem:[#allocation2 + $0xc0] sm:$0xf] %vm1402_vm1, %v1384_v44  ;;  %v1952_v18 = vshll.u32 %v1384_v44, 16  ;;  %v1956_v8 = vshrl.u32 %v1384_v44, 16  ;;  %v832_v39 = vadd.f32 %v10739_v60, %v831_v7  ;;  %2895 = vrot.lane.b32.xlu1 %v10789_v4, %s9188_s17  ;;  %v15446_v44 = vrot.slane %v10791_v62, 1 }
 0x21d   : > { %2893 = vrot.lane.b32.xlu2 %v10786_v30, %s9188_s17  ;;  %v10800_v22 = vpop.permute.xlu0 %2703  ;;  %v3186_v3 = vpop.permute.xlu1 %3185 }
 0x21e   : > { %v1954_v24 = vrot.slane %v1952_v18, 5  ;;  %v1958_v5 = vrot.slane %v1956_v8, 4  ;;  %v923_v14 = vmax.f32 %v832_v39, 0.0  ;;  %v10814_v18 = vsel %vm2639_vm5, %v15735_v19, %v15734_v40  ;;  %v10816_v8 = vld [vmem:[#allocation2 + $0x88] sm:$0xff]  }
 0x21f   : > { %v10802_v27 = vpop.permute.xlu2 %2705  ;;  %v3840_v40 = vsel %vm600_vm0, %v10012_v15, %v10659_v32 }
 0x220   : > { %v1955_v7 = vsel %vm9575_vm4, %v1950_v2, %v1954_v24  ;;  %v1319_v46 = vmul.f32 %v9557_v21, %v923_v14  ;;  %v1959_v1 = vor.u32 %v1958_v5, %v1954_v24  ;;  %v4378_v21 = vsel %vm4359_vm7, %v4375_v52, %v15446_v44 }
 0x221   : > { %2244 = vst.msk [vmem:[#allocation3 + $0xbc] sm:$0xf] %vm1402_vm1, %v1955_v7  ;;  %v15447_v52 = vrot.slane %v10816_v8, 5 }
 0x222   : > { %v1385_v23 = vpack.c.bf16 %v1319_v46, %v1319_v46  ;;  %v1960_v11 = vrot.slane %v1959_v1, 4 }
 0x223   : > { %v834_v39 = vpop.f32.mrf.mxu0 }
 0x224   : > { %2834 = vrot.lane.b32.xlu0 %v10814_v18, %s9186_s15  ;;  %1452 = vst.msk [vmem:[#allocation2 + $0xc4] sm:$0xf] %vm1402_vm1, %v1385_v23  ;;  %v1962_v46 = vshll.u32 %v1385_v23, 16  ;;  %v1966_v2 = vshrl.u32 %v1385_v23, 16  ;;  %v835_v24 = vadd.f32 %v10739_v60, %v834_v39  ;;  %4425 = vrot.lane.b32.xlu1 %v4378_v21, %s9187_s16 }
 0x225   : > { %3195 = vrot.lane.b32.xlu2 %v10733_v58, %s9188_s17  ;;  %v3121_v5 = vpop.permute.xlu0 %3120  ;;  %v3062_v14 = vpop.permute.xlu1 %3061 }
 0x226   : > { %v1964_v7 = vrot.slane %v1962_v46, 5  ;;  %v1968_v19 = vrot.slane %v1966_v2, 4  ;;  %v924_v44 = vmax.f32 %v835_v24, 0.0  ;;  %v3909_v23 = vsel %vm3721_vm8, %v3840_v40, %v3121_v5  ;;  %v10856_v5 = vld [vmem:[#allocation3 + $0x84] sm:$0xff]  }
 0x227   : > { %v3123_v39 = vpop.permute.xlu2 %3122  ;;  %v10834_v21 = vsel %vm3772_vm9, %v3909_v23, %v3186_v3  ;;  %v15736_v2 = vrot.slane %v10687_v47, 5  ;;  %v15737_v24 = vrot.slane %v10701_v12, 3 }
 0x228   : > { %v1965_v15 = vsel %vm9575_vm4, %v1960_v11, %v1964_v7  ;;  %v1320_v32 = vmul.f32 %v9555_v20, %v924_v44  ;;  %v4824_v58 = vrot.slane %v10834_v21, 3  ;;  %v1969_v1 = vor.u32 %v1968_v19, %v1964_v7  ;;  %v9016_v7 = vld [vmem:[#allocation3 + $0x4c] sm:$0xff]  }
 0x229   : > { %2245 = vst.msk [vmem:[#allocation3 + $0xc0] sm:$0xf] %vm1402_vm1, %v1965_v15  ;;  %v2668_v3 = vsel %vm2639_vm5, %v15736_v2, %v15447_v52  ;;  %v15738_v20 = vrot.slane %v10714_v37, 5  ;;  %v3669_v47 = vsel %vm600_vm0, %v9016_v7, %v10657_v9  ;;  %v2788_v52 = vrot.slane %v10789_v4, 5 }
 0x22a   : > { %v1386_v46 = vpack.c.bf16 %v1320_v32, %v1320_v32  ;;  %v4825_v40 = vsel %vm4776_vm10, %v15737_v24, %v4824_v58  ;;  %v3737_v15 = vsel %vm3721_vm8, %v3669_v47, %v10698_v59  ;;  %v1970_v32 = vrot.slane %v1969_v1, 4 }
 0x22b   : > { %v836_v11 = vpop.f32.mrf.mxu0  ;;  %5563 = vmatmul.bf16.gmra.mxu2 %v4825_v40  ;;  %v3024_v44 = vsel %vm2639_vm5, %v15738_v20, %v3023_v16  ;;  %v15740_v47 = vrot.slane %v10704_v63, 3 }
 0x22c   : > { %2715 = vrot.lane.b32.xlu0 %v2668_v3, %s9187_s16  ;;  %1453 = vst.msk [vmem:[#allocation2 + $0xc8] sm:$0xf] %vm1402_vm1, %v1386_v46  ;;  %v1972_v19 = vshll.u32 %v1386_v46, 16  ;;  %v1976_v12 = vshrl.u32 %v1386_v46, 16  ;;  %v837_v23 = vadd.f32 %v10739_v60, %v836_v11  ;;  %3197 = vrot.lane.b32.xlu1 %v2668_v3, %s9188_s17  ;;  %v15448_v3 = vrot.slane %v10856_v5, 5 }
 0x22d   : > { %3071 = vrot.lane.b32.xlu2 %v3024_v44, %s9187_s16  ;;  %v2886_v2 = vpop.permute.xlu0 %2885  ;;  %v10866_v24 = vpop.permute.xlu1 %3483 }
 0x22e   : > { %15739 = vst [vmem:[#allocation61_spill] sm:$0xff] %v10866_v24  ;;  %v1974_v40 = vrot.slane %v1972_v19, 5  ;;  %v1978_v20 = vrot.slane %v1976_v12, 4  ;;  %v925_v9 = vmax.f32 %v837_v23, 0.0  ;;  %v10869_v7 = vsel %vm3772_vm9, %v3737_v15, %v2886_v2 }
 0x22f   : > { %v4842_v46 = vrot.slane %v10869_v7, 3  ;;  %v2888_v11 = vpop.permute.xlu2 %2887  ;;  %v3843_v12 = vsel %vm600_vm0, %v10113_v6, %v3062_v14  ;;  %v15741_v14 = vrot.slane %v10786_v30, 5 }
 0x230   : > { %v1975_v59 = vsel %vm9575_vm4, %v1970_v32, %v1974_v40  ;;  %v1321_v1 = vmul.f32 %v9810_v13, %v925_v9  ;;  %v1979_v44 = vor.u32 %v1978_v20, %v1974_v40  ;;  %v3026_v13 = vsel %vm2639_vm5, %v3023_v16, %v15448_v3  ;;  %v10898_v40 = vld [vmem:[#allocation3 + $0x88] sm:$0xff]   ;;  %v9017_v20 = vld [vmem:[#allocation3 + $0x54] sm:$0xff]   ;;  %v11331_v10 = vld [vmem:[#allocation3 + $0xbc] sm:$0xff]  }
 0x231   : > { %2246 = vst.msk [vmem:[#allocation3 + $0xc4] sm:$0xf] %vm1402_vm1, %v1975_v59  ;;  %v4843_v19 = vsel %vm4776_vm10, %v15740_v47, %v4842_v46  ;;  %v10896_v2 = vsel %vm2639_vm5, %v15741_v14, %v2788_v52  ;;  %v3672_v9 = vsel %vm600_vm0, %v9017_v20, %v10800_v22  ;;  %v3911_v59 = vsel %vm3721_vm8, %v3843_v12, %v3123_v39  ;;  %v8618_v47 = vld [vmem:[#allocation2 + $0x90] sm:$0xff]  }
 0x232   : > { %v1387_v23 = vpack.c.bf16 %v1321_v1, %v1321_v1  ;;  %5444 = vmatmul.bf16.gmra.mxu1 %v4843_v19  ;;  %v1980_v16 = vrot.slane %v1979_v44, 4  ;;  %v15453_v39 = vrot.slane %v10898_v40, 5 }
 0x233   : > { %v839_v4 = vpop.f32.mrf.mxu0 }
 0x234   : > { %3132 = vrot.lane.b32.xlu0 %v10856_v5, %s9186_s15  ;;  %1454 = vst.msk [vmem:[#allocation2 + $0xcc] sm:$0xf] %vm1402_vm1, %v1387_v23  ;;  %v1982_v15 = vshll.u32 %v1387_v23, 16  ;;  %v1986_v32 = vshrl.u32 %v1387_v23, 16  ;;  %v840_v63 = vadd.f32 %v10739_v60, %v839_v4  ;;  %3073 = vrot.lane.b32.xlu1 %v3026_v13, %s9187_s16 }
 0x235   : > { %2836 = vrot.lane.b32.xlu2 %v10896_v2, %s9186_s15  ;;  %v3188_v1 = vpop.permute.xlu0 %3187  ;;  %v2827_v13 = vpop.permute.xlu1 %2826 }
 0x236   : > { %v1984_v19 = vrot.slane %v1982_v15, 5  ;;  %v1988_v23 = vrot.slane %v1986_v32, 4  ;;  %v926_v30 = vmax.f32 %v840_v63, 0.0  ;;  %v10906_v4 = vsel %vm3772_vm9, %v3911_v59, %v3188_v1  ;;  %v10939_v1 = vld [vmem:[#allocation2 + $0x98] sm:$0xff]  }
 0x237   : > { %v15452_v14 = vrot.slane %v10906_v4, 3  ;;  %v3739_v3 = vsel %vm3721_vm8, %v3672_v9, %v2827_v13  ;;  %v10910_v22 = vpop.permute.xlu2 %3485  ;;  %v2669_v15 = vrot.slane %v8618_v47, 5 }
 0x238   : > { %15742 = vst [vmem:[#allocation62_spill] sm:$0xff] %v10910_v22  ;;  %v1985_v44 = vsel %vm9575_vm4, %v1980_v16, %v1984_v19  ;;  %v1322_v12 = vmul.f32 %v9565_v42, %v926_v30  ;;  %v1989_v63 = vor.u32 %v1988_v23, %v1984_v19  ;;  %v10923_v9 = vsel %vm3772_vm9, %v3739_v3, %v2888_v11 }
 0x239   : > { %2247 = vst.msk [vmem:[#allocation3 + $0xc8] sm:$0xf] %vm1402_vm1, %v1985_v44  ;;  %v4835_v32 = vsel %vm4776_vm10, %v4824_v58, %v15452_v14  ;;  %v10930_v42 = vsel %vm2639_vm5, %v2788_v52, %v15453_v39  ;;  %v15744_v11 = vrot.slane %v10816_v8, 5  ;;  %v15450_v47 = vrot.slane %v10923_v9, 3 }
 0x23a   : > { %v1388_v20 = vpack.c.bf16 %v1322_v12, %v1322_v12  ;;  %15743 = vst [vmem:[#allocation63_spill] sm:$0xff] %v10930_v42  ;;  %v1990_v19 = vrot.slane %v1989_v63, 4 }
 0x23b   : > { %v841_v59 = vpop.f32.mrf.mxu0  ;;  %5568 = vmatmul.bf16.gmra.mxu2 %v4835_v32  ;;  %v2670_v3 = vsel %vm2639_vm5, %v15744_v11, %v2669_v15  ;;  %v15449_v32 = vrot.slane %v10939_v1, 5  ;;  %v4853_v63 = vsel %vm4776_vm10, %v4842_v46, %v15450_v47  ;;  %v15748_v47 = vrot.slane %v10856_v5, 5 }
 0x23c   : > { %2897 = vrot.lane.b32.xlu0 %v10898_v40, %s9188_s17  ;;  %1455 = vst.msk [vmem:[#allocation2 + $0xd0] sm:$0xf] %vm1402_vm1, %v1388_v20  ;;  %v1992_v21 = vshll.u32 %v1388_v20, 16  ;;  %v1996_v16 = vshrl.u32 %v1388_v20, 16  ;;  %v842_v58 = vadd.f32 %v10739_v60, %v841_v59  ;;  %2838 = vrot.lane.b32.xlu1 %v10930_v42, %s9186_s15  ;;  %v10957_v59 = vld [vmem:[#allocation3 + $0x8c] sm:$0xff]  }
 0x23d   : > { %2717 = vrot.lane.b32.xlu2 %v2670_v3, %s9187_s16  ;;  %v3064_v52 = vpop.permute.xlu0 %3063  ;;  %v10943_v44 = vpop.permute.xlu1 %3606 }
 0x23e   : > { %v1994_v23 = vrot.slane %v1992_v21, 5  ;;  %v1998_v30 = vrot.slane %v1996_v16, 4  ;;  %v927_v13 = vmax.f32 %v842_v58, 0.0  ;;  %15745 = vst [vmem:[#allocation64_spill] sm:$0xff] %v10943_v44 }
 0x23f   : > { %v10945_v12 = vpop.permute.xlu2 %3608 }
 0x240   : > { %15746 = vst [vmem:[#allocation65_spill] sm:$0xff] %v10945_v12  ;;  %v1995_v8 = vsel %vm9575_vm4, %v1990_v19, %v1994_v23  ;;  %v1323_v20 = vmul.f32 %v9839_v26, %v927_v13  ;;  %v1999_v21 = vor.u32 %v1998_v30, %v1994_v23  ;;  %v10963_v26 = vsel %vm2639_vm5, %v2669_v15, %v15449_v32 }
 0x241   : > { %2248 = vst.msk [vmem:[#allocation3 + $0xcc] sm:$0xf] %vm1402_vm1, %v1995_v8  ;;  %v15766_v12 = vrot.slane %v10369_v25, 5 }
 0x242   : > { %v1389_v16 = vpack.c.bf16 %v1323_v20, %v1323_v20  ;;  %5449 = vmatmul.bf16.gmra.mxu1 %v4853_v63  ;;  %v2000_v23 = vrot.slane %v1999_v21, 4 }
 0x243   : > { %v844_v58 = vpop.f32.mrf.mxu0 }
 0x244   : > { %3199 = vrot.lane.b32.xlu0 %v2670_v3, %s9188_s17  ;;  %1456 = vst.msk [vmem:[#allocation2 + $0xd4] sm:$0xf] %vm1402_vm1, %v1389_v16  ;;  %v2002_v11 = vshll.u32 %v1389_v16, 16  ;;  %v2006_v19 = vshrl.u32 %v1389_v16, 16  ;;  %v845_v7 = vadd.f32 %v10739_v60, %v844_v58  ;;  %2719 = vrot.lane.b32.xlu1 %v10963_v26, %s9187_s16  ;;  %v15451_v3 = vrot.slane %v10957_v59, 5 }
 0x245   : > { %3134 = vrot.lane.b32.xlu2 %v10957_v59, %s9186_s15 }
 0x246   : > { %v10971_v46 = vpop.permute.xlu0 %4417  ;;  %v2004_v30 = vrot.slane %v2002_v11, 5  ;;  %v2008_v15 = vrot.slane %v2006_v19, 4  ;;  %v928_v13 = vmax.f32 %v845_v7, 0.0  ;;  %v10974_v8 = vpop.permute.xlu1 %2707  ;;  %v3028_v21 = vsel %vm2639_vm5, %v15748_v47, %v15451_v3  ;;  %v10985_v11 = vld [vmem:[#allocation3 + $0x94] sm:$0xff]  }
 0x247   : > { %15747 = vst [vmem:[#allocation66_spill] sm:$0xff] %v10971_v46  ;;  %v3190_v20 = vpop.permute.xlu2 %3189  ;;  %v8595_v19 = vld [vmem:[#allocation3 + $0x90] sm:$0xff]  }
 0x248   : > { %v2005_v63 = vsel %vm9575_vm4, %v2000_v23, %v2004_v30  ;;  %v1324_v16 = vmul.f32 %v9567_v49, %v928_v13  ;;  %v2009_v58 = vor.u32 %v2008_v15, %v2004_v30  ;;  %v3846_v30 = vsel %vm600_vm0, %v10283_v29, %v3064_v52 }
 0x249   : > { %2249 = vst.msk [vmem:[#allocation3 + $0xd0] sm:$0xf] %vm1402_vm1, %v2005_v63  ;;  %v2792_v15 = vrot.slane %v8595_v19, 5 }
 0x24a   : > { %v1390_v32 = vpack.c.bf16 %v1324_v16, %v1324_v16  ;;  %v2010_v63 = vrot.slane %v2009_v58, 4 }
 0x24b   : > { %v846_v7 = vpop.f32.mrf.mxu0 }
 0x24c   : > { %3075 = vrot.lane.b32.xlu0 %v3028_v21, %s9187_s16  ;;  %1457 = vst.msk [vmem:[#allocation2 + $0xd8] sm:$0xf] %vm1402_vm1, %v1390_v32  ;;  %v2012_v23 = vshll.u32 %v1390_v32, 16  ;;  %v2016_v49 = vshrl.u32 %v1390_v32, 16  ;;  %v847_v13 = vadd.f32 %v10739_v60, %v846_v7  ;;  %3136 = vrot.lane.b32.xlu1 %v10985_v11, %s9186_s15 }
 0x24d   : > { %2899 = vrot.lane.b32.xlu2 %v8595_v19, %s9188_s17 }
 0x24e   : > { %v10995_v47 = vpop.permute.xlu0 %3551  ;;  %v2014_v16 = vrot.slane %v2012_v23, 5  ;;  %v2018_v21 = vrot.slane %v2016_v49, 4  ;;  %v929_v3 = vmax.f32 %v847_v13, 0.0  ;;  %v3125_v14 = vpop.permute.xlu1 %3124  ;;  %v15750_v49 = vrot.slane %v10898_v40, 5  ;;  %v11013_v13 = vld [vmem:[#allocation3 + $0x98] sm:$0xff]  }
 0x24f   : > { %15749 = vst [vmem:[#allocation67_spill] sm:$0xff] %v10995_v47  ;;  %v3913_v32 = vsel %vm3721_vm8, %v3846_v30, %v3125_v14  ;;  %v10998_v39 = vpop.permute.xlu2 %3065 }
 0x250   : > { %v2015_v7 = vsel %vm9575_vm4, %v2010_v63, %v2014_v16  ;;  %v1325_v22 = vmul.f32 %v9582_v28, %v929_v3  ;;  %v11004_v52 = vsel %vm3772_vm9, %v3913_v32, %v3190_v20  ;;  %v2019_v19 = vor.u32 %v2018_v21, %v2014_v16  ;;  %v8620_v63 = vld [vmem:[#allocation2 + $0xa0] sm:$0xff]  }
 0x251   : > { %2250 = vst.msk [vmem:[#allocation3 + $0xd4] sm:$0xf] %vm1402_vm1, %v2015_v7  ;;  %v15454_v58 = vrot.slane %v11004_v52, 3  ;;  %v11011_v14 = vsel %vm2639_vm5, %v15750_v49, %v2792_v15  ;;  %v15752_v28 = vrot.slane %v10906_v4, 3  ;;  %v9018_v16 = vld [vmem:[#allocation3 + $0x5c] sm:$0xff]   ;;  %v15456_v4 = vrot.slane %v11013_v13, 5 }
 0x252   : > { %v1391_v23 = vpack.c.bf16 %v1325_v22, %v1325_v22  ;;  %15751 = vst [vmem:[#allocation68_spill] sm:$0xff] %v11011_v14  ;;  %v3675_v21 = vsel %vm600_vm0, %v9018_v16, %v10802_v27  ;;  %v2020_v32 = vrot.slane %v2019_v19, 4  ;;  %v2673_v24 = vrot.slane %v8620_v63, 5 }
 0x253   : > { %v849_v30 = vpop.f32.mrf.mxu0  ;;  %v4845_v3 = vsel %vm4776_vm10, %v15752_v28, %v15454_v58  ;;  %v15754_v63 = vrot.slane %v10923_v9, 3  ;;  %v15756_v9 = vrot.slane %v10957_v59, 5 }
 0x254   : > { %2840 = vrot.lane.b32.xlu0 %v11011_v14, %s9186_s15  ;;  %1458 = vst.msk [vmem:[#allocation2 + $0xdc] sm:$0xf] %vm1402_vm1, %v1391_v23  ;;  %v2022_v22 = vshll.u32 %v1391_v23, 16  ;;  %v2026_v20 = vshrl.u32 %v1391_v23, 16  ;;  %v850_v40 = vadd.f32 %v10739_v60, %v849_v30  ;;  %2901 = vrot.lane.b32.xlu1 %v11013_v13, %s9188_s17 }
 0x255   : > { %5573 = vmatmul.bf16.gmra.mxu2 %v4845_v3  ;;  %3201 = vrot.lane.b32.xlu2 %v10963_v26, %s9188_s17 }
 0x256   : > { %v2829_v7 = vpop.permute.xlu0 %2828  ;;  %v2024_v49 = vrot.slane %v2022_v22, 5  ;;  %v2028_v23 = vrot.slane %v2026_v20, 4  ;;  %v930_v28 = vmax.f32 %v850_v40, 0.0  ;;  %v2890_v58 = vpop.permute.xlu1 %2889  ;;  %v3029_v22 = vrot.slane %v10985_v11, 5 }
 0x257   : > { %v3741_v30 = vsel %vm3721_vm8, %v3675_v21, %v2829_v7  ;;  %v11035_v47 = vpop.permute.xlu2 %2830  ;;  %v15755_v21 = vrot.slane %v10939_v1, 5  ;;  %v11067_v1 = vld [vmem:[#allocation2 + $0xa8] sm:$0xff]  }
 0x258   : > { %v11033_v3 = vsel %vm3772_vm9, %v3741_v30, %v2890_v58  ;;  %v2025_v27 = vsel %vm9575_vm4, %v2020_v32, %v2024_v49  ;;  %v1326_v19 = vmul.f32 %v9875_v61, %v930_v28  ;;  %v2029_v20 = vor.u32 %v2028_v23, %v2024_v49 }
 0x259   : > { %v15455_v26 = vrot.slane %v11033_v3, 3  ;;  %2251 = vst.msk [vmem:[#allocation3 + $0xd8] sm:$0xf] %vm1402_vm1, %v2025_v27  ;;  %v11046_v58 = vsel %vm2639_vm5, %v2792_v15, %v15456_v4  ;;  %v2674_v32 = vsel %vm2639_vm5, %v15755_v21, %v2673_v24  ;;  %v3030_v23 = vsel %vm2639_vm5, %v15756_v9, %v3029_v22 }
 0x25a   : > { %v1392_v40 = vpack.c.bf16 %v1326_v19, %v1326_v19  ;;  %15753 = vst [vmem:[#allocation69_spill] sm:$0xff] %v11046_v58  ;;  %v2030_v30 = vrot.slane %v2029_v20, 4  ;;  %v15457_v9 = vrot.slane %v11067_v1, 5 }
 0x25b   : > { %v4863_v16 = vsel %vm4776_vm10, %v15754_v63, %v15455_v26  ;;  %v851_v61 = vpop.f32.mrf.mxu0  ;;  %v11484_v45 = vld [vmem:[#allocation2 + $0xdc] sm:$0xf] }
 0x25c   : > { %2842 = vrot.lane.b32.xlu0 %v11046_v58, %s9186_s15  ;;  %5454 = vmatmul.bf16.gmra.mxu1 %v4863_v16  ;;  %1459 = vst.msk [vmem:[#allocation2 + $0xe0] sm:$0xf] %vm1402_vm1, %v1392_v40  ;;  %v2032_v7 = vshll.u32 %v1392_v40, 16  ;;  %v2036_v15 = vshrl.u32 %v1392_v40, 16  ;;  %v852_v49 = vadd.f32 %v10739_v60, %v851_v61 }
 0x25d   : > { %3203 = vrot.lane.b32.xlu1 %v2674_v32, %s9188_s17  ;;  %3077 = vrot.lane.b32.xlu2 %v3030_v23, %s9187_s16  ;;  %v11078_v23 = vld [vmem:[#allocation3 + $0x9c] sm:$0xff]  }
 0x25e   : > { %v11065_v28 = vpop.permute.xlu0 %3610  ;;  %v2034_v27 = vrot.slane %v2032_v7, 5  ;;  %v2038_v19 = vrot.slane %v2036_v15, 4  ;;  %v931_v63 = vmax.f32 %v852_v49, 0.0  ;;  %v11069_v16 = vpop.permute.xlu1 %4419  ;;  %v11080_v7 = vld [vmem:[#allocation3 + $0xa0] sm:$0xff]  }
 0x25f   : > { %15757 = vst [vmem:[#allocation70_spill] sm:$0xff] %v11065_v28  ;;  %v11071_v40 = vpop.permute.xlu2 %4421  ;;  %v15760_v28 = vld [vmem:[#allocation11_spill] sm:$0xff] }
 0x260   : > { %15758 = vst [vmem:[#allocation71_spill] sm:$0xff] %v11069_v16  ;;  %v2035_v61 = vsel %vm9575_vm4, %v2030_v30, %v2034_v27  ;;  %v1327_v21 = vmul.f32 %v9917_v36, %v931_v63  ;;  %v2039_v26 = vor.u32 %v2038_v19, %v2034_v27  ;;  %v2676_v63 = vsel %vm2639_vm5, %v2673_v24, %v15457_v9 }
 0x261   : > { %15759 = vst [vmem:[#allocation72_spill] sm:$0xff] %v11071_v40  ;;  %v15459_v19 = vrot.slane %v11080_v7, 5 }
 0x262   : > { %2252 = vst.msk [vmem:[#allocation3 + $0xdc] sm:$0xf] %vm1402_vm1, %v2035_v61  ;;  %v1393_v20 = vpack.c.bf16 %v1327_v21, %v1327_v21  ;;  %v2040_v61 = vrot.slane %v2039_v26, 4  ;;  %v15761_v26 = vrot.slane %v11013_v13, 5  ;;  %v3849_v13 = vsel %vm600_vm0, %v10490_v31, %v10998_v39 }
 0x263   : > { %v854_v15 = vpop.f32.mrf.mxu0 }
 0x264   : > { %3138 = vrot.lane.b32.xlu0 %v11078_v23, %s9186_s15  ;;  %1460 = vst.msk [vmem:[#allocation2 + $0xe4] sm:$0xf] %vm1402_vm1, %v1393_v20  ;;  %v2042_v49 = vshll.u32 %v1393_v20, 16  ;;  %v2046_v30 = vshrl.u32 %v1393_v20, 16  ;;  %v855_v36 = vadd.f32 %v10739_v60, %v854_v15  ;;  %v15460_v15 = vrot.slane %v11078_v23, 5 }
 0x265   : > { %2721 = vrot.lane.b32.xlu1 %v2674_v32, %s9187_s16  ;;  %2723 = vrot.lane.b32.xlu2 %v2676_v63, %s9187_s16 }
 0x266   : > { %v11091_v27 = vpop.permute.xlu0 %2709  ;;  %v2044_v21 = vrot.slane %v2042_v49, 5  ;;  %v2048_v4 = vrot.slane %v2046_v30, 4  ;;  %v932_v40 = vmax.f32 %v855_v36, 0.0  ;;  %v3192_v16 = vpop.permute.xlu1 %3191  ;;  %v11106_v49 = vsel %vm2639_vm5, %v15761_v26, %v15459_v19 }
 0x267   : > { %v11094_v20 = vpop.permute.xlu2 %2711  ;;  %15762 = vst [vmem:[#allocation11_spill] sm:$0xff] %v11106_v49  ;;  %v3032_v36 = vsel %vm2639_vm5, %v3029_v22, %v15460_v15 }
 0x268   : > { %v2045_v32 = vsel %vm9575_vm4, %v2040_v61, %v2044_v21  ;;  %v1328_v24 = vmul.f32 %v15760_v28, %v932_v40  ;;  %v2049_v9 = vor.u32 %v2048_v4, %v2044_v21  ;;  %v11113_v28 = vld [vmem:[#allocation3 + $0xa4] sm:$0xff]  }
 0x269   : > { %2253 = vst.msk [vmem:[#allocation3 + $0xe0] sm:$0xf] %vm1402_vm1, %v2045_v32 }
 0x26a   : > { %v1394_v58 = vpack.c.bf16 %v1328_v24, %v1328_v24  ;;  %v2050_v21 = vrot.slane %v2049_v9, 4 }
 0x26b   : > { %v856_v30 = vpop.f32.mrf.mxu0 }
 0x26c   : > { %2844 = vrot.lane.b32.xlu0 %v11106_v49, %s9186_s15  ;;  %1461 = vst.msk [vmem:[#allocation2 + $0xe8] sm:$0xf] %vm1402_vm1, %v1394_v58  ;;  %v2052_v4 = vshll.u32 %v1394_v58, 16  ;;  %v2056_v40 = vshrl.u32 %v1394_v58, 16  ;;  %v857_v61 = vadd.f32 %v10739_v60, %v856_v30  ;;  %v15763_v49 = vld [vmem:[#allocation29_spill] sm:$0xff] }
 0x26d   : > { %3079 = vrot.lane.b32.xlu1 %v3032_v36, %s9187_s16  ;;  %3140 = vrot.lane.b32.xlu2 %v11113_v28, %s9186_s15 }
 0x26e   : > { %v3127_v32 = vpop.permute.xlu0 %3126  ;;  %v2054_v22 = vrot.slane %v2052_v4, 5  ;;  %v2058_v24 = vrot.slane %v2056_v40, 4  ;;  %v933_v26 = vmax.f32 %v857_v61, 0.0  ;;  %v3068_v15 = vpop.permute.xlu1 %3067  ;;  %v15764_v40 = vrot.slane %v11004_v52, 3 }
 0x26f   : > { %v3915_v19 = vsel %vm3721_vm8, %v3849_v13, %v3127_v32  ;;  %v3129_v30 = vpop.permute.xlu2 %3128  ;;  %v9019_v13 = vld [vmem:[#allocation3 + $0x64] sm:$0xff]  }
 0x270   : > { %v11125_v58 = vsel %vm3772_vm9, %v3915_v19, %v3192_v16  ;;  %v2055_v36 = vsel %vm9575_vm4, %v2050_v21, %v2054_v22  ;;  %v1329_v39 = vmul.f32 %v15763_v49, %v933_v26  ;;  %v2059_v46 = vor.u32 %v2058_v24, %v2054_v22  ;;  %v11138_v19 = vld [vmem:[#allocation3 + $0xac] sm:$0xff]   ;;  %v11148_v24 = vld [vmem:[#allocation2 + $0x6c] sm:$0xff]  }
 0x271   : > { %v15462_v9 = vrot.slane %v11125_v58, 3  ;;  %2254 = vst.msk [vmem:[#allocation3 + $0xe4] sm:$0xf] %vm1402_vm1, %v2055_v36  ;;  %v3678_v49 = vsel %vm600_vm0, %v9019_v13, %v10974_v8  ;;  %v2968_v26 = vrot.slane %v11148_v24, 5  ;;  %v3033_v36 = vrot.slane %v11113_v28, 5 }
 0x272   : > { %v1395_v4 = vpack.c.bf16 %v1329_v39, %v1329_v39  ;;  %v3743_v52 = vsel %vm3721_vm8, %v3678_v49, %v11035_v47  ;;  %v15765_v47 = vld [vmem:[#allocation10_spill] sm:$0xff] }
 0x273   : > { %v4855_v61 = vsel %vm4776_vm10, %v15764_v40, %v15462_v9  ;;  %v859_v16 = vpop.f32.mrf.mxu0  ;;  %v15465_v9 = vrot.slane %v11138_v19, 5 }
 0x274   : > { %3205 = vrot.lane.b32.xlu0 %v2676_v63, %s9188_s17  ;;  %5578 = vmatmul.bf16.gmra.mxu2 %v4855_v61  ;;  %1462 = vst.msk [vmem:[#allocation2 + $0xec] sm:$0xf] %vm1402_vm1, %v1395_v4  ;;  %v2062_v21 = vshll.u32 %v1395_v4, 16  ;;  %v2066_v32 = vshrl.u32 %v1395_v4, 16  ;;  %v860_v22 = vadd.f32 %v10739_v60, %v859_v16  ;;  %v2060_v63 = vrot.slane %v2059_v46, 4 }
 0x275   : > { %2903 = vrot.lane.b32.xlu1 %v11080_v7, %s9188_s17  ;;  %3142 = vrot.lane.b32.xlu2 %v11138_v19, %s9186_s15 }
 0x276   : > { %v2892_v8 = vpop.permute.xlu0 %2891  ;;  %v2064_v39 = vrot.slane %v2062_v21, 5  ;;  %v2068_v4 = vrot.slane %v2066_v32, 4  ;;  %v934_v60 = vmax.f32 %v860_v22, 0.0  ;;  %v2833_v61 = vpop.permute.xlu1 %2832  ;;  %v11163_v21 = vsel %vm2639_vm5, %v15766_v12, %v2968_v26 }
 0x277   : > { %v3794_v40 = vsel %vm3772_vm9, %v3743_v52, %v2892_v8  ;;  %v2894_v13 = vpop.permute.xlu2 %2893  ;;  %v15767_v32 = vrot.slane %v11033_v3, 3  ;;  %v3852_v8 = vsel %vm600_vm0, %v11163_v21, %v3068_v15  ;;  %v3036_v3 = vsel %vm2639_vm5, %v3033_v36, %v15465_v9 }
 0x278   : > { %v4872_v16 = vrot.slane %v3794_v40, 3  ;;  %v2065_v46 = vsel %vm9575_vm4, %v2060_v63, %v2064_v39  ;;  %v1330_v49 = vmul.f32 %v15765_v47, %v934_v60  ;;  %v2069_v52 = vor.u32 %v2068_v4, %v2064_v39 }
 0x279   : > { %2255 = vst.msk [vmem:[#allocation3 + $0xe8] sm:$0xf] %vm1402_vm1, %v2065_v46  ;;  %v15768_v60 = vrot.slane %v11078_v23, 5  ;;  %v11173_v46 = vld [vmem:[#allocation3 + $0xa8] sm:$0xff]   ;;  %v3681_v15 = vsel %vm600_vm0, %v10619_v51, %v11091_v27  ;;  %v3917_v39 = vsel %vm3721_vm8, %v3852_v8, %v3129_v30  ;;  %v15769_v8 = vrot.slane %v11125_v58, 3 }
 0x27a   : > { %v4873_v22 = vsel %vm4776_vm10, %v15767_v32, %v4872_v16  ;;  %v1396_v63 = vpack.c.bf16 %v1330_v49, %v1330_v49  ;;  %v2798_v47 = vrot.slane %v11173_v46, 5  ;;  %v11188_v49 = vld [vmem:[#allocation2 + $0xb8] sm:$0xff]   ;;  %v2070_v32 = vrot.slane %v2069_v52, 4  ;;  %v8622_v51 = vld [vmem:[#allocation2 + $0xb0] sm:$0xff]  }
 0x27b   : > { %5459 = vmatmul.bf16.gmra.mxu1 %v4873_v22  ;;  %v3034_v40 = vsel %vm2639_vm5, %v15768_v60, %v3033_v36  ;;  %v3745_v36 = vsel %vm3721_vm8, %v3681_v15, %v2833_v61  ;;  %v15464_v30 = vrot.slane %v11188_v49, 5  ;;  %v15770_v61 = vrot.slane %v11080_v7, 5 }
 0x27c   : > { %3081 = vrot.lane.b32.xlu0 %v3034_v40, %s9187_s16  ;;  %1463 = vst.msk [vmem:[#allocation2 + $0xf0] sm:$0xf] %vm1402_vm1, %v1396_v63  ;;  %v2072_v12 = vshll.u32 %v1396_v63, 16 }
 0x27d   : > { %3612 = vrot.lane.b32.xlu1 %v10665_v43, %s9188_s17  ;;  %3083 = vrot.lane.b32.xlu2 %v3036_v3, %s9187_s16  ;;  %v3796_v3 = vsel %vm3772_vm9, %v3745_v36, %v2894_v13  ;;  %v11206_v15 = vsel %vm2639_vm5, %v15770_v61, %v2798_v47  ;;  %v15772_v61 = vrot.slane %v11067_v1, 5 }
 0x27e   : > { %v3194_v4 = vpop.permute.xlu0 %3193  ;;  %v2074_v22 = vrot.slane %v2072_v12, 5  ;;  %v11191_v63 = vpop.permute.xlu1 %2713  ;;  %v15463_v12 = vrot.slane %v10650_v0, 5  ;;  %15771 = vst [vmem:[#allocation29_spill] sm:$0xff] %v11206_v15 }
 0x27f   : > { %v3967_v43 = vsel %vm3772_vm9, %v3917_v39, %v3194_v4  ;;  %v3196_v40 = vpop.permute.xlu2 %3195  ;;  %v2677_v39 = vrot.slane %v8622_v51, 5  ;;  %v4882_v4 = vrot.slane %v3796_v3, 3 }
 0x280   : > { %v4864_v60 = vrot.slane %v3967_v43, 3  ;;  %v2075_v27 = vsel %vm9575_vm4, %v2070_v32, %v2074_v22  ;;  %v11219_v7 = vsel %vm2639_vm5, %v2968_v26, %v15463_v12  ;;  %v11223_v43 = vld [vmem:[#allocation3 + $0xe8] sm:$0xf]  ;;  %v11238_v12 = vld [vmem:[#allocation3 + $0xe0] sm:$0xff]  }
 0x281   : > { %2256 = vst.msk [vmem:[#allocation3 + $0xec] sm:$0xf] %vm1402_vm1, %v2075_v27  ;;  %v2680_v58 = vsel %vm2639_vm5, %v2677_v39, %v15464_v30  ;;  %v4883_v26 = vsel %vm4776_vm10, %v4872_v16, %v4882_v4  ;;  %v8599_v30 = vld [vmem:[#allocation3 + $0xb0] sm:$0xff]  }
 0x282   : > { %v4865_v52 = vsel %vm4776_vm10, %v15769_v8, %v4864_v60  ;;  %v11231_v8 = vld [vmem:[%s15367_s5] ss:$0 sm:$0xff]  ;;  %15773 = vst [vmem:[#allocation10_spill] sm:$0xff] %v11238_v12  ;;  %v2800_v9 = vrot.slane %v8599_v30, 5 }
 0x284   : > { %2846 = vrot.lane.b32.xlu0 %v11206_v15, %s9186_s15  ;;  %5583 = vmatmul.bf16.gmra.mxu2 %v4865_v52  ;;  %v15466_v52 = vunpack.c.l.b16 %v11223_v43 }
 0x285   : > { %2905 = vrot.lane.b32.xlu1 %v11173_v46, %s9188_s17  ;;  %2727 = vrot.lane.b32.xlu2 %v2680_v58, %s9187_s16  ;;  %v5430_v46 = vpop.f32.mrf.mxu1 }
 0x286   : > { %v3070_v13 = vpop.permute.xlu0 %3069  ;;  %v3131_v22 = vpop.permute.xlu1 %3130  ;;  %v5431_v1 = vadd.f32 %v11231_v8, %v5430_v46 }
 0x287   : > { %v3855_v32 = vsel %vm600_vm0, %v11219_v7, %v3070_v13  ;;  %v11225_v36 = vpop.permute.xlu2 %3071  ;;  %v2678_v13 = vsel %vm2639_vm5, %v15772_v61, %v2677_v39 }
 0x288   : > { %v3919_v51 = vsel %vm3721_vm8, %v3855_v32, %v3131_v22  ;;  %v2377_v27 = vld [vmem:[#allocation3 + $0xec] sm:$0xf]  ;;  %v11244_v22 = vld [vmem:[#allocation3 + $0xb4] sm:$0xff]  }
 0x289   : > { %v3226_v3 = vunpack.c.l.b16 %v2377_v27  ;;  %v11241_v32 = vsel %vm3772_vm9, %v3919_v51, %v3196_v40  ;;  %v15469_v40 = vrot.slane %v11238_v12, 5 }
 0x28a   : > { %v4874_v27 = vrot.slane %v11241_v32, 3 }
 0x28b   : > { %5464 = vmatmul.bf16.gmra.mxu1 %v4883_v26  ;;  %v11248_v16 = vpack.c.b16 %v3226_v3, %v15466_v52 }
 0x28c   : > { %3207 = vrot.lane.b32.xlu0 %v2678_v13, %s9188_s17  ;;  %v4875_v32 = vsel %vm4776_vm10, %v4864_v60, %v4874_v27 }
 0x28d   : > { %15774 = vst [vmem:[#allocation73_spill] sm:$0xff] %v11248_v16  ;;  %2725 = vrot.lane.b32.xlu1 %v2678_v13, %s9187_s16  ;;  %3144 = vrot.lane.b32.xlu2 %v11244_v22, %s9186_s15  ;;  %v15468_v51 = vrot.slane %v11248_v16, 5  ;;  %v15471_v13 = vrot.slane %v11244_v22, 5  ;;  %v11269_v15 = vpop.f32.mrf.mxu1 }
 0x28e   : > { %v11254_v39 = vpop.permute.xlu0 %4423  ;;  %v2896_v26 = vpop.permute.xlu1 %2895  ;;  %15778 = vst [vmem:[#allocation77_spill] sm:$0xff] %v11269_v15 }
 0x28f   : > { %15775 = vst [vmem:[#allocation74_spill] sm:$0xff] %v11254_v39  ;;  %v5559_v61 = vpop.f32.mrf.mxu2  ;;  %v2837_v52 = vpop.permute.xlu2 %2836  ;;  %v11266_v46 = vsel %vm2639_vm5, %v15469_v40, %v15468_v51  ;;  %v11272_v39 = vsel %vm2639_vm5, %v2798_v47, %v2800_v9  ;;  %v3684_v51 = vsel %vm600_vm0, %v10714_v37, %v11094_v20  ;;  %v8624_v37 = vld [vmem:[#allocation2 + $0xc0] sm:$0xff]   ;;  %v11296_v20 = vld [vmem:[#allocation3 + $0xc0] sm:$0xff]  }
 0x290   : > { %v11259_v3 = vadd.f32 %v5559_v61, %v5431_v1  ;;  %15777 = vst [vmem:[#allocation76_spill] sm:$0xff] %v11266_v46  ;;  %v15780_v1 = vrot.slane %v11138_v19, 5 }
 0x291   : > { %15779 = vst [vmem:[#allocation78_spill] sm:$0xff] %v11272_v39 }
 0x292   : > { %15776 = vst [vmem:[#allocation75_spill] sm:$0xff] %v11259_v3  ;;  %v3038_v61 = vsel %vm2639_vm5, %v15780_v1, %v15471_v13  ;;  %v8600_v1 = vld [vmem:[#allocation3 + $0xb8] sm:$0xff]  }
 0x294   : > { %2848 = vrot.lane.b32.xlu0 %v11272_v39, %s9186_s15  ;;  %5588 = vmatmul.bf16.gmra.mxu2 %v4875_v32  ;;  %v15784_v39 = vrot.slane %v10650_v0, 5 }
 0x295   : > { %2907 = vrot.lane.b32.xlu1 %v8599_v30, %s9188_s17  ;;  %3085 = vrot.lane.b32.xlu2 %v3038_v61, %s9187_s16  ;;  %v5435_v16 = vpop.f32.mrf.mxu1 }
 0x296   : > { %v2835_v47 = vpop.permute.xlu0 %2834  ;;  %v11288_v40 = vpop.permute.xlu1 %4425 }
 0x297   : > { %v3747_v60 = vsel %vm3721_vm8, %v3684_v51, %v2835_v47  ;;  %15781 = vst [vmem:[#allocation79_spill] sm:$0xff] %v11288_v40  ;;  %v11291_v30 = vpop.permute.xlu2 %2717  ;;  %v2681_v47 = vrot.slane %v8624_v37, 5  ;;  %v11327_v0 = vpop.f32.mrf.mxu2 }
 0x298   : > { %v3798_v32 = vsel %vm3772_vm9, %v3747_v60, %v2896_v26  ;;  %v11300_v26 = vld [vmem:[#allocation2 + $0xc8] sm:$0xff]   ;;  %v2802_v60 = vrot.slane %v8600_v1, 5  ;;  %15786 = vst [vmem:[#allocation82_spill] sm:$0xff] %v11327_v0  ;;  %v3039_v0 = vrot.slane %v11331_v10, 5 }
 0x299   : > { %v4892_v15 = vrot.slane %v3798_v32, 3  ;;  %v2972_v32 = vrot.slane %v10756_v34, 5 }
 0x29a   : > { %v11309_v46 = vsel %vm2639_vm5, %v2800_v9, %v2802_v60 }
 0x29b   : > { %v4893_v3 = vsel %vm4776_vm10, %v4882_v4, %v4892_v15  ;;  %15783 = vst [vmem:[#allocation80_spill] sm:$0xff] %v11309_v46  ;;  %v11314_v40 = vsel %vm2639_vm5, %v15784_v39, %v2972_v32 }
 0x29c   : > { %3209 = vrot.lane.b32.xlu0 %v2680_v58, %s9188_s17  ;;  %5469 = vmatmul.bf16.gmra.mxu1 %v4893_v3  ;;  %v15474_v58 = vrot.slane %v11300_v26, 5  ;;  %v15782_v3 = vrot.slane %v11188_v49, 5 }
 0x29d   : > { %2909 = vrot.lane.b32.xlu1 %v8600_v1, %s9188_s17  ;;  %2911 = vrot.lane.b32.xlu2 %v11296_v20, %s9188_s17  ;;  %v11321_v49 = vpop.f32.mrf.mxu1  ;;  %v3858_v1 = vsel %vm600_vm0, %v11314_v40, %v11225_v36  ;;  %v11336_v36 = vld [vmem:[#allocation3 + $0xc4] sm:$0xff]  }
 0x29e   : > { %v2716_v51 = vpop.permute.xlu0 %2715  ;;  %v3198_v61 = vpop.permute.xlu1 %3197  ;;  %v2682_v13 = vsel %vm2639_vm5, %v15782_v3, %v2681_v47  ;;  %v2684_v34 = vsel %vm2639_vm5, %v2681_v47, %v15474_v58  ;;  %15785 = vst [vmem:[#allocation81_spill] sm:$0xff] %v11321_v49  ;;  %v3687_v58 = vsel %vm600_vm0, %v10763_v35, %v11191_v63  ;;  %v2804_v35 = vrot.slane %v11296_v20, 5 }
 0x29f   : > { %v3135_v4 = vpop.permute.xlu2 %3134 }
 0x2a0   : > { %v11364_v20 = vsel %vm2639_vm5, %v2802_v60, %v2804_v35 }
 0x2a1   : > { %15789 = vst [vmem:[#allocation84_spill] sm:$0xff] %v11364_v20 }
 0x2a4   : > { %2729 = vrot.lane.b32.xlu0 %v2682_v13, %s9187_s16 }
 0x2a5   : > { %2850 = vrot.lane.b32.xlu1 %v11309_v46, %s9186_s15  ;;  %2731 = vrot.lane.b32.xlu2 %v2684_v34, %s9187_s16 }
 0x2a6   : > { %v3133_v9 = vpop.permute.xlu0 %3132  ;;  %v3074_v37 = vpop.permute.xlu1 %3073 }
 0x2a7   : > { %v3921_v39 = vsel %vm3721_vm8, %v3858_v1, %v3133_v9  ;;  %v2900_v46 = vpop.permute.xlu2 %2899  ;;  %v5440_v1 = vpop.f32.mrf.mxu1  ;;  %v3749_v9 = vsel %vm3721_vm8, %v3687_v58, %v2837_v52  ;;  %v15476_v52 = vrot.slane %v11336_v36, 5 }
 0x2a8   : > { %v3971_v3 = vsel %vm3772_vm9, %v3921_v39, %v3198_v61  ;;  %v5436_v61 = vadd.f32 %v11231_v8, %v5435_v16  ;;  %v2974_v39 = vrot.slane %v10791_v62, 5 }
 0x2a9   : > { %v4884_v48 = vrot.slane %v3971_v3, 3 }
 0x2aa   : > { %v11354_v58 = vsel %vm2639_vm5, %v2972_v32, %v2974_v39  ;;  %v8626_v32 = vld [vmem:[#allocation2 + $0xd0] sm:$0xff]  }
 0x2ab   : > { %v4885_v47 = vsel %vm4776_vm10, %v4874_v27, %v4884_v48 }
 0x2ac   : > { %3146 = vrot.lane.b32.xlu0 %v11331_v10, %s9186_s15  ;;  %5593 = vmatmul.bf16.gmra.mxu2 %v4885_v47 }
 0x2ad   : > { %3211 = vrot.lane.b32.xlu1 %v2682_v13, %s9188_s17  ;;  %3148 = vrot.lane.b32.xlu2 %v11336_v36, %s9186_s15 }
 0x2ae   : > { %v2898_v27 = vpop.permute.xlu0 %2897  ;;  %v2839_v47 = vpop.permute.xlu1 %2838 }
 0x2af   : > { %v3800_v3 = vsel %vm3772_vm9, %v3749_v9, %v2898_v27  ;;  %v5564_v49 = vpop.f32.mrf.mxu2  ;;  %v3202_v16 = vpop.permute.xlu2 %3201  ;;  %v3861_v9 = vsel %vm600_vm0, %v11354_v58, %v3074_v37  ;;  %v15788_v27 = vrot.slane %v11244_v22, 5  ;;  %v11373_v37 = vld [vmem:[#allocation2 + $0x8c] sm:$0xff]  }
 0x2b0   : > { %v4902_v63 = vrot.slane %v3800_v3, 3  ;;  %v11350_v13 = vadd.f32 %v5564_v49, %v5436_v61  ;;  %v3923_v49 = vsel %vm3721_vm8, %v3861_v9, %v3135_v4  ;;  %v2976_v4 = vrot.slane %v11373_v37, 5 }
 0x2b1   : > { %v3040_v53 = vsel %vm2639_vm5, %v15788_v27, %v3039_v0  ;;  %v11382_v27 = vpop.f32.mrf.mxu1 }
 0x2b2   : > { %15787 = vst [vmem:[#allocation83_spill] sm:$0xff] %v11350_v13  ;;  %v4903_v14 = vsel %vm4776_vm10, %v4892_v15, %v4902_v63  ;;  %v3042_v15 = vsel %vm2639_vm5, %v3039_v0, %v15476_v52  ;;  %v11387_v13 = vrot.slane %v8626_v32, 5  ;;  %v11401_v32 = vld [vmem:[#allocation3 + $0xd4] sm:$0xf] }
 0x2b3   : > { %5474 = vmatmul.bf16.gmra.mxu1 %v4903_v14  ;;  %15791 = vst [vmem:[#allocation86_spill] sm:$0xff] %v11382_v27 }
 0x2b4   : > { %3087 = vrot.lane.b32.xlu0 %v3040_v53, %s9187_s16  ;;  %v3690_v53 = vsel %vm600_vm0, %v10856_v5, %v2716_v51  ;;  %v15792_v51 = vrot.slane %v11300_v26, 5  ;;  %v11408_v26 = vsel %vm2639_vm5, %v2974_v39, %v2976_v4 }
 0x2b5   : > { %2852 = vrot.lane.b32.xlu1 %v11364_v20, %s9186_s15  ;;  %3089 = vrot.lane.b32.xlu2 %v3042_v15, %s9187_s16  ;;  %v3751_v0 = vsel %vm3721_vm8, %v3690_v53, %v2839_v47  ;;  %v11397_v47 = vld [vmem:[#allocation3 + $0xc8] sm:$0xff]   ;;  %v11399_v53 = vld [vmem:[#allocation3 + $0xd0] sm:$0xff]   ;;  %15793 = vst [vmem:[#allocation87_spill] sm:$0xff] %v11408_v26 }
 0x2b6   : > { %v3200_v14 = vpop.permute.xlu0 %3199  ;;  %v11378_v61 = vpop.permute.xlu1 %2719  ;;  %v3802_v5 = vsel %vm3772_vm9, %v3751_v0, %v2900_v46  ;;  %v15478_v0 = vrot.slane %v11397_v47, 5 }
 0x2b7   : > { %v3973_v60 = vsel %vm3772_vm9, %v3923_v49, %v3200_v14  ;;  %v11380_v3 = vpop.f32.mrf.mxu2  ;;  %v11385_v15 = vpop.permute.xlu2 %3077  ;;  %v2686_v14 = vsel %vm2639_vm5, %v15792_v51, %v11387_v13  ;;  %v9173_v49 = vld [vmem:[#allocation3 + $0xcc] sm:$0xf]  ;;  %v4912_v46 = vrot.slane %v3802_v5, 3 }
 0x2b8   : > { %15790 = vst [vmem:[#allocation85_spill] sm:$0xff] %v11380_v3  ;;  %v4894_v52 = vrot.slane %v3973_v60, 3  ;;  %v9175_v60 = vld [vmem:[#allocation3 + $0xcc] sm:$0xf0]   ;;  %v11422_v39 = vsel %vm2639_vm5, %v2804_v35, %v15478_v0  ;;  %v8627_v0 = vld [vmem:[#allocation3 + $0xd8] sm:$0xff]  }
 0x2b9   : > { %v5445_v27 = vpop.f32.mrf.mxu1  ;;  %v4913_v5 = vsel %vm4776_vm10, %v4902_v63, %v4912_v46  ;;  %15795 = vst [vmem:[#allocation89_spill] sm:$0xff] %v11422_v39  ;;  %v3693_v63 = vsel %vm600_vm0, %v10957_v59, %v11291_v30  ;;  %v11447_v59 = vld [vmem:[#allocation2 + $0x94] sm:$0xff]  }
 0x2ba   : > { %v4895_v9 = vsel %vm4776_vm10, %v4884_v48, %v4894_v52  ;;  %v5441_v48 = vadd.f32 %v11231_v8, %v5440_v1 }
 0x2bc   : > { %3213 = vrot.lane.b32.xlu0 %v2684_v34, %s9188_s17  ;;  %5598 = vmatmul.bf16.gmra.mxu2 %v4895_v9 }
 0x2bd   : > { %3215 = vrot.lane.b32.xlu1 %v2686_v14, %s9188_s17  ;;  %2913 = vrot.lane.b32.xlu2 %v11397_v47, %s9188_s17 }
 0x2be   : > { %v3076_v34 = vpop.permute.xlu0 %3075  ;;  %v3137_v51 = vpop.permute.xlu1 %3136 }
 0x2bf   : > { %v3864_v9 = vsel %vm600_vm0, %v11408_v26, %v3076_v34  ;;  %v5569_v3 = vpop.f32.mrf.mxu2  ;;  %v11415_v44 = vpop.permute.xlu2 %2723 }
 0x2c0   : > { %v11413_v20 = vadd.f32 %v5569_v3, %v5441_v48  ;;  %v3925_v1 = vsel %vm3721_vm8, %v3864_v9, %v3137_v51  ;;  %v11439_v51 = vor.u32 %v9175_v60, %v9173_v49 }
 0x2c1   : > { %v3975_v50 = vsel %vm3772_vm9, %v3925_v1, %v3202_v16  ;;  %v11437_v16 = vpop.f32.mrf.mxu1 }
 0x2c2   : > { %15794 = vst [vmem:[#allocation88_spill] sm:$0xff] %v11413_v20  ;;  %v4904_v48 = vrot.slane %v3975_v50, 3  ;;  %v15797_v50 = vld [vmem:[#allocation38_spill] sm:$0xff] }
 0x2c3   : > { %5479 = vmatmul.bf16.gmra.mxu1 %v4913_v5  ;;  %15796 = vst [vmem:[#allocation90_spill] sm:$0xff] %v11437_v16  ;;  %v9176_v16 = vld [vmem:[#allocation3 + $0xd4] sm:$0xf0]   ;;  %v11476_v20 = vld [vmem:[#allocation2 + $0xe4] sm:$0xf] }
 0x2c4   : > { %2854 = vrot.lane.b32.xlu0 %v11422_v39, %s9186_s15  ;;  %v4905_v5 = vsel %vm4776_vm10, %v4894_v52, %v4904_v48  ;;  %v11474_v39 = vld [vmem:[#allocation2 + $0xe0] sm:$0xff]   ;;  %15802 = vst [vmem:[#allocation93_spill] sm:$0xff] %v11476_v20 }
 0x2c5   : > { %2915 = vrot.lane.b32.xlu1 %v11399_v53, %s9188_s17  ;;  %2735 = vrot.lane.b32.xlu2 %v11387_v13, %s9187_s16  ;;  %15801 = vst [vmem:[#allocation92_spill] sm:$0xff] %v11474_v39 }
 0x2c6   : > { %v2841_v3 = vpop.permute.xlu0 %2840  ;;  %v2902_v34 = vpop.permute.xlu1 %2901 }
 0x2c7   : > { %v3753_v35 = vsel %vm3721_vm8, %v3693_v63, %v2841_v3  ;;  %v11435_v9 = vpop.permute.xlu2 %3140  ;;  %v3043_v3 = vrot.slane %v11439_v51, 5  ;;  %v11456_v63 = vpop.f32.mrf.mxu2 }
 0x2c8   : > { %v11442_v1 = vsel %vm3772_vm9, %v3753_v35, %v2902_v34  ;;  %15798 = vst [vmem:[#allocation38_spill] sm:$0xff] %v11456_v63  ;;  %v2978_v34 = vrot.slane %v11447_v59, 5 }
 0x2c9   : > { %v15480_v30 = vrot.slane %v11442_v1, 3 }
 0x2ca   : > { %v11471_v63 = vsel %vm2639_vm5, %v2976_v4, %v2978_v34  ;;  %v5446_v4 = vadd.f32 %v11231_v8, %v5445_v27  ;;  %v9158_v27 = vor.u32 %v9176_v16, %v11401_v32 }
 0x2cb   : > { %v4923_v35 = vsel %vm4776_vm10, %v4912_v46, %v15480_v30  ;;  %15800 = vst [vmem:[#allocation91_spill] sm:$0xff] %v11471_v63  ;;  %v11478_v46 = vld [vmem:[#allocation2 + $0xdc] sm:$0xf0]   ;;  %v8628_v30 = vld [vmem:[#allocation2 + $0xd8] sm:$0xff]  }
 0x2cc   : > { %3150 = vrot.lane.b32.xlu0 %v11439_v51, %s9186_s15  ;;  %5603 = vmatmul.bf16.gmra.mxu2 %v4905_v5  ;;  %v15799_v5 = vrot.slane %v11336_v36, 5  ;;  %v3045_v16 = vrot.slane %v9158_v27, 5 }
 0x2cd   : > { %3431 = vrot.lane.b32.xlu1 %v15797_v50, %s9188_s17  ;;  %2733 = vrot.lane.b32.xlu2 %v2686_v14, %s9187_s16  ;;  %v11467_v50 = vpop.f32.mrf.mxu1 }
 0x2ce   : > { %v11453_v49 = vpop.permute.xlu0 %2842  ;;  %v3044_v14 = vsel %vm2639_vm5, %v15799_v5, %v3043_v3  ;;  %v9021_v5 = vld [vmem:[#allocation2 + $0x50] sm:$0xff]  }
 0x2cf   : > { %v3204_v60 = vpop.permute.xlu1 %3203  ;;  %v11458_v52 = vpop.permute.xlu2 %3142 }
 0x2d3   : > { %5484 = vmatmul.bf16.gmra.mxu1 %v4923_v35  ;;  %v3867_v35 = vsel %vm600_vm0, %v11471_v63, %v11385_v15  ;;  %v3169_v63 = vrot.slane %v8628_v30, 5  ;;  %v15487_v30 = vrot.slane %v11498_v33, 5 }
 0x2d4   : > { %3091 = vrot.lane.b32.xlu0 %v3044_v14, %s9187_s16 }
 0x2d5   : > { %2917 = vrot.lane.b32.xlu1 %v8627_v0, %s9188_s17  ;;  %3266 = vrot.lane.b32.xlu2 %v9021_v5, %s9187_s16  ;;  %v11496_v5 = vrot.slane %v11399_v53, 5 }
 0x2d6   : > { %v3139_v14 = vpop.permute.xlu0 %3138 }
 0x2d7   : > { %v3927_v0 = vsel %vm3721_vm8, %v3867_v35, %v3139_v14  ;;  %v11488_v54 = vpop.permute.xlu1 %2721  ;;  %v11491_v42 = vpop.permute.xlu2 %3083  ;;  %15804 = vst [vmem:[#allocation95_spill] sm:$0xff] %v11496_v5  ;;  %v11517_v14 = vsel %vm2639_vm5, %v2978_v34, %v15487_v30  ;;  %v3046_v34 = vsel %vm2639_vm5, %v3043_v3, %v3045_v16 }
 0x2d8   : > { %v3977_v20 = vsel %vm3772_vm9, %v3927_v0, %v3204_v60  ;;  %v5574_v56 = vpop.f32.mrf.mxu2 }
 0x2d9   : > { %v4914_v26 = vrot.slane %v3977_v20, 3  ;;  %v11493_v15 = vadd.f32 %v5574_v56, %v5446_v4  ;;  %v3170_v56 = vsel %vm2639_vm5, %v11387_v13, %v3169_v63  ;;  %v11507_v20 = vpop.f32.mrf.mxu1  ;;  %v15806_v4 = vrot.slane %v11397_v47, 5 }
 0x2da   : > { %15805 = vst [vmem:[#allocation96_spill] sm:$0xff] %v11507_v20  ;;  %v8983_v20 = vld [vmem:[#allocation3 + $0xdc] sm:$0xff]  }
 0x2db   : > { %15803 = vst [vmem:[#allocation94_spill] sm:$0xff] %v11493_v15  ;;  %v4915_v35 = vsel %vm4776_vm10, %v4904_v48, %v4914_v26  ;;  %v15486_v48 = vrot.slane %v11474_v39, 5  ;;  %v11525_v0 = vsel %vm2639_vm5, %v15806_v4, %v11496_v5 }
 0x2dc   : > { %2858 = vrot.lane.b32.xlu0 %v11496_v5, %s9186_s15  ;;  %5608 = vmatmul.bf16.gmra.mxu2 %v4915_v35  ;;  %15807 = vst [vmem:[#allocation97_spill] sm:$0xff] %v11525_v0  ;;  %v2365_v35 = vld [vmem:[#allocation3 + $0xe0] sm:$0x7] }
 0x2dd   : > { %3152 = vrot.lane.b32.xlu1 %v9158_v27, %s9186_s15  ;;  %3217 = vrot.lane.b32.xlu2 %v3170_v56, %s9188_s17  ;;  %v3172_v27 = vsel %vm2639_vm5, %v3169_v63, %v15486_v48  ;;  %v3696_v56 = vsel %vm600_vm0, %v10985_v11, %v11378_v61  ;;  %v2867_v3 = vunpack.c.l.b16 %v2365_v35  ;;  %v3047_v35 = vrot.slane %v8983_v20, 5 }
 0x2de   : > { %v2845_v53 = vpop.permute.xlu0 %2844  ;;  %v3755_v63 = vsel %vm3721_vm8, %v3696_v56, %v11453_v49 }
 0x2df   : > { %v3080_v60 = vpop.permute.xlu1 %3079  ;;  %v11511_v32 = vpop.permute.xlu2 %2727  ;;  %v2870_v49 = vpack.c.b16 %v2867_v3, %v2867_v3  ;;  %v3699_v3 = vsel %vm600_vm0, %v11078_v23, %v11488_v54  ;;  %v487_v54 = vld [vmem:[%s15363_s1 + $0x30] sm:$0xff]  ;;  %v15490_v23 = vrot.slane %v11373_v37, 1 }
 0x2e0   : > { %v3870_v13 = vsel %vm600_vm0, %v11517_v14, %v3080_v60  ;;  %v11559_v56 = vpop.f32.mrf.mxu2 }
 0x2e1   : > { %v11537_v47 = vpop.f32.mrf.mxu1  ;;  %v3929_v4 = vsel %vm3721_vm8, %v3870_v13, %v11435_v9  ;;  %v15808_v9 = vrot.slane %v11442_v1, 3  ;;  %15809 = vst [vmem:[#allocation98_spill] sm:$0xff] %v11559_v56 }
 0x2e4   : > { %2856 = vrot.lane.b32.xlu0 %v11525_v0, %s9186_s15 }
 0x2e5   : > { %3219 = vrot.lane.b32.xlu1 %v3172_v27, %s9188_s17  ;;  %3093 = vrot.lane.b32.xlu2 %v3046_v34, %s9187_s16 }
 0x2e6   : > { %v3206_v60 = vpop.permute.xlu0 %3205 }
 0x2e7   : > { %v11545_v48 = vsel %vm3772_vm9, %v3929_v4, %v3206_v60  ;;  %v2904_v27 = vpop.permute.xlu1 %2903  ;;  %v11549_v61 = vpop.permute.xlu2 %3144  ;;  %v8630_v4 = vld [vmem:[#allocation2 + $0xe8] sm:$0xff]  }
 0x2e8   : > { %v4924_v30 = vrot.slane %v11545_v48, 3  ;;  %v3806_v11 = vsel %vm3772_vm9, %v3755_v63, %v2904_v27  ;;  %v11567_v63 = vld [vmem:[#allocation2 + $0xa4] sm:$0xff]   ;;  %v3173_v27 = vrot.slane %v8630_v4, 5 }
 0x2e9   : > { %v4932_v34 = vrot.slane %v3806_v11, 3  ;;  %v2982_v11 = vrot.slane %v11567_v63, 5 }
 0x2ea   : > { %v4925_v5 = vsel %vm4776_vm10, %v4914_v26, %v4924_v30  ;;  %v11563_v26 = vpop.f32.mrf.mxu1 }
 0x2eb   : > { %v4933_v13 = vsel %vm4776_vm10, %v15808_v9, %v4932_v34  ;;  %15810 = vst [vmem:[#allocation99_spill] sm:$0xff] %v11563_v26 }
 0x2ec   : > { %5489 = vmatmul.bf16.gmra.mxu1 %v4933_v13  ;;  %3325 = vrot.lane.b32.xlu0 %v10113_v6, %s9186_s15  ;;  %v3048_v6 = vsel %vm2639_vm5, %v3045_v16, %v3047_v35  ;;  %v3757_v13 = vsel %vm3721_vm8, %v3699_v3, %v2845_v53 }
 0x2ed   : > { %2919 = vrot.lane.b32.xlu1 %v2870_v49, %s9188_s17  ;;  %5613 = vmatmul.bf16.gmra.mxu2 %v4925_v5  ;;  %v5451_v5 = vadd.f32 %v11231_v8, %v11467_v50 }
 0x2ee   : > { %3097 = vrot.lane.b32.xlu2 %v3047_v35, %s9187_s16  ;;  %v3082_v48 = vpop.permute.xlu0 %3081 }
 0x2ef   : > { %v11561_v60 = vpop.permute.xlu1 %3612  ;;  %v11565_v1 = vpop.permute.xlu2 %3085 }
 0x2f4   : > { %3154 = vrot.lane.b32.xlu0 %v8983_v20, %s9186_s15 }
 0x2f5   : > { %3223 = vrot.lane.b32.xlu1 %v3173_v27, %s9188_s17 }
 0x2f6   : > { %3095 = vrot.lane.b32.xlu2 %v3048_v6, %s9187_s16  ;;  %v2847_v9 = vpop.permute.xlu0 %2846  ;;  %v15812_v6 = vrot.slane %v11498_v33, 5 }
 0x2f7   : > { %v2906_v49 = vpop.permute.xlu1 %2905  ;;  %v5579_v20 = vpop.f32.mrf.mxu2 }
 0x2f8   : > { %v3808_v4 = vsel %vm3772_vm9, %v3757_v13, %v2906_v49  ;;  %v11581_v26 = vadd.f32 %v5579_v20, %v5451_v5  ;;  %v11583_v16 = vpop.permute.xlu2 %2911  ;;  %v11585_v50 = vpop.f32.mrf.mxu1  ;;  %v11594_v53 = vsel %vm2639_vm5, %v15812_v6, %v2982_v11  ;;  %v15813_v13 = vrot.slane %v11474_v39, 5 }
 0x2f9   : > { %v4942_v35 = vrot.slane %v3808_v4, 3  ;;  %v3873_v5 = vsel %vm600_vm0, %v11594_v53, %v3082_v48  ;;  %v15814_v20 = vrot.slane %v10791_v62, 1 }
 0x2fa   : > { %15811 = vst [vmem:[#allocation100_spill] sm:$0xff] %v11581_v26  ;;  %v3174_v49 = vsel %vm2639_vm5, %v15813_v13, %v3173_v27  ;;  %v15489_v27 = vrot.slane %v11148_v24, 6 }
 0x2fb   : > { %v4943_v3 = vsel %vm4776_vm10, %v4932_v34, %v4942_v35  ;;  %v4380_v4 = vsel %vm4359_vm7, %v15814_v20, %v15490_v23  ;;  %v3931_v34 = vsel %vm3721_vm8, %v3873_v5, %v11458_v52  ;;  %v488_v20 = vld [vmem:[%s15363_s1 + $0x38] sm:$0xff]  ;;  %v15817_v52 = vrot.slane %v10369_v25, 6 }
 0x2fc   : > { %5494 = vmatmul.bf16.gmra.mxu1 %v4943_v3  ;;  %972 = vperm.xlu0 %8998, %v487_v54  }
 0x2fd   : > { %3221 = vrot.lane.b32.xlu1 %v3174_v49, %s9188_s17  ;;  %v11628_v5 = vsel %vm3363_vm6, %v15817_v52, %v15489_v27 }
 0x2fe   : > { %4427 = vrot.lane.b32.xlu2 %v4380_v4, %s9187_s16  ;;  %v3208_v6 = vpop.permute.xlu0 %3207  ;;  %v11630_v4 = vld [vmem:[#allocation2 + $0xac] sm:$0xff]  }
 0x2ff   : > { %v3981_v48 = vsel %vm3772_vm9, %v3931_v34, %v3208_v6  ;;  %v2726_v54 = vpop.permute.xlu1 %2725  ;;  %v11612_v3 = vpop.f32.mrf.mxu2  ;;  %v5456_v6 = vadd.f32 %v11231_v8, %v11537_v47  ;;  %v2984_v52 = vrot.slane %v11630_v4, 5 }
 0x300   : > { %15815 = vst [vmem:[#allocation101_spill] sm:$0xff] %v11612_v3  ;;  %v4934_v13 = vrot.slane %v3981_v48, 3  ;;  %v11615_v49 = vpop.permute.xlu2 %2731  ;;  %v11617_v56 = vpop.f32.mrf.mxu1 }
 0x301   : > { %15816 = vst [vmem:[#allocation102_spill] sm:$0xff] %v11617_v56  ;;  %v15818_v56 = vunpack.c.l.b16 %v11223_v43  ;;  %v11655_v0 = vsel %vm2639_vm5, %v2982_v11, %v2984_v52 }
 0x302   : > { %v4935_v62 = vsel %vm4776_vm10, %v4924_v30, %v4934_v13  ;;  %v3702_v30 = vsel %vm600_vm0, %v11113_v28, %v11415_v44  ;;  %v8567_v44 = vunpack.c.h.b16 %v11238_v12 }
 0x303   : > { %5618 = vmatmul.bf16.gmra.mxu2 %v4935_v62  ;;  %v3759_v34 = vsel %vm3721_vm8, %v3702_v30, %v2847_v9  ;;  %v2373_v30 = vld [vmem:[#allocation3 + $0xec] sm:$0x7] }
 0x304   : > { %3553 = vrot.lane.b32.xlu0 %v11628_v5, %s9186_s15  ;;  %v3108_v3 = vpack.c.b16 %v15818_v56, %v8567_v44  ;;  %v11667_v56 = vld [vmem:[#allocation2 + $0x58] sm:$0xff]   ;;  %v15493_v44 = vrot.slane %v11447_v59, 1 }
 0x305   : > { %977 = vperm.xlu1 %8999, %v488_v20  }
 0x306   : > { %3487 = vrot.lane.b32.xlu2 %v11163_v21, %s9187_s16  ;;  %v2849_v25 = vpop.permute.xlu0 %2848 }
 0x307   : > { %v2908_v48 = vpop.permute.xlu1 %2907  ;;  %v5584_v62 = vpop.f32.mrf.mxu2 }
 0x308   : > { %v3810_v27 = vsel %vm3772_vm9, %v3759_v34, %v2908_v48  ;;  %v11644_v20 = vadd.f32 %v5584_v62, %v5456_v6  ;;  %v11646_v23 = vpop.permute.xlu2 %3148  ;;  %v11649_v47 = vpop.f32.mrf.mxu1  ;;  %v3876_v6 = vsel %vm600_vm0, %v11655_v0, %v11491_v42  ;;  %v11661_v34 = vld [vmem:[#allocation2 + $0x80] sm:$0xff]  }
 0x309   : > { %v4952_v28 = vrot.slane %v3810_v27, 3  ;;  %v3933_v43 = vsel %vm3721_vm8, %v3876_v6, %v11549_v61  ;;  %v3705_v61 = vsel %vm600_vm0, %v11138_v19, %v2726_v54  ;;  %v15822_v19 = vrot.slane %v11373_v37, 1 }
 0x30a   : > { %v3761_v12 = vsel %vm3721_vm8, %v3705_v61, %v2849_v25 }
 0x30b   : > { %v4953_v9 = vsel %vm4776_vm10, %v4942_v35, %v4952_v28  ;;  %v3106_v35 = vunpack.c.l.b16 %v2373_v30  ;;  %v4382_v54 = vsel %vm4359_vm7, %v15822_v19, %v15493_v44  ;;  %v11732_v44 = vld [vmem:[#allocation2 + $0xbc] sm:$0xff]  }
 0x30c   : > { %5499 = vmatmul.bf16.gmra.mxu1 %v4953_v9  ;;  %3156 = vrot.lane.b32.xlu0 %v3108_v3, %s9186_s15 }
 0x30d   : > { %3614 = vrot.lane.b32.xlu1 %v11661_v34, %s9188_s17  ;;  %v3109_v6 = vpack.c.b16 %v3106_v35, %v3106_v35 }
 0x30e   : > { %3268 = vrot.lane.b32.xlu2 %v11667_v56, %s9187_s16  ;;  %v3210_v11 = vpop.permute.xlu0 %3209 }
 0x30f   : > { %v3983_v3 = vsel %vm3772_vm9, %v3933_v43, %v3210_v11  ;;  %v2910_v27 = vpop.permute.xlu1 %2909  ;;  %v11672_v48 = vpop.f32.mrf.mxu2  ;;  %v11685_v11 = vld [vmem:[#allocation2 + $0xb4] sm:$0xff]  }
 0x310   : > { %15819 = vst [vmem:[#allocation103_spill] sm:$0xff] %v11672_v48  ;;  %v4944_v42 = vrot.slane %v3983_v3, 3  ;;  %v11674_v62 = vpop.permute.xlu2 %3089  ;;  %v3812_v30 = vsel %vm3772_vm9, %v3761_v12, %v2910_v27  ;;  %v11682_v43 = vpop.f32.mrf.mxu1  ;;  %v15821_v3 = vld [vmem:[#allocation44_spill] sm:$0xff] }
 0x311   : > { %15820 = vst [vmem:[#allocation104_spill] sm:$0xff] %v11682_v43  ;;  %v4962_v25 = vrot.slane %v3812_v30, 3  ;;  %v2986_v43 = vrot.slane %v11685_v11, 5 }
 0x312   : > { %v4945_v9 = vsel %vm4776_vm10, %v4934_v13, %v4944_v42  ;;  %v5461_v13 = vadd.f32 %v11231_v8, %v11585_v50  ;;  %v15823_v50 = vrot.slane %v11148_v24, 6 }
 0x313   : > { %5623 = vmatmul.bf16.gmra.mxu2 %v4945_v9  ;;  %v4963_v37 = vsel %vm4776_vm10, %v4952_v28, %v4962_v25  ;;  %v11711_v19 = vsel %vm2639_vm5, %v2984_v52, %v2986_v43  ;;  %v3708_v52 = vsel %vm600_vm0, %v11244_v22, %v11511_v32  ;;  %v2988_v22 = vrot.slane %v11732_v44, 5 }
 0x314   : > { %3158 = vrot.lane.b32.xlu0 %v3109_v6, %s9186_s15  ;;  %v9024_v6 = vld [vmem:[#allocation2 + $0x74] sm:$0xff]  }
 0x315   : > { %3433 = vrot.lane.b32.xlu1 %v15821_v3, %s9188_s17  ;;  %v3389_v3 = vrot.slane %v9024_v6, 6 }
 0x316   : > { %4429 = vrot.lane.b32.xlu2 %v4382_v54, %s9187_s16  ;;  %v2730_v12 = vpop.permute.xlu0 %2729  ;;  %v3879_v54 = vsel %vm600_vm0, %v11711_v19, %v11565_v1 }
 0x317   : > { %v2851_v35 = vpop.permute.xlu1 %2850  ;;  %v5589_v27 = vpop.f32.mrf.mxu2  ;;  %v11708_v30 = vsel %vm3363_vm6, %v15823_v50, %v3389_v3 }
 0x318   : > { %v11697_v61 = vadd.f32 %v5589_v27, %v5461_v13  ;;  %v11699_v9 = vpop.permute.xlu2 %2913  ;;  %v11720_v13 = vld [vmem:[#allocation2 + $0x88] sm:$0xff]   ;;  %v3763_v1 = vsel %vm3721_vm8, %v3708_v52, %v2851_v35 }
 0x319   : > { %v11718_v28 = vpop.f32.mrf.mxu1  ;;  %v3814_v39 = vsel %vm3772_vm9, %v3763_v1, %v11583_v16 }
 0x31a   : > { %v4972_v35 = vrot.slane %v3814_v39, 3  ;;  %v11759_v39 = vld [vmem:[#allocation2 + $0x60] sm:$0xff]  }
 0x31c   : > { %5504 = vmatmul.bf16.gmra.mxu1 %v4963_v37  ;;  %3327 = vrot.lane.b32.xlu0 %v10283_v29, %s9186_s15 }
 0x31d   : > { %3555 = vrot.lane.b32.xlu1 %v11708_v30, %s9186_s15 }
 0x31e   : > { %3616 = vrot.lane.b32.xlu2 %v11720_v13, %s9188_s17  ;;  %v3147_v29 = vpop.permute.xlu0 %3146 }
 0x31f   : > { %v3935_v24 = vsel %vm3721_vm8, %v3879_v54, %v3147_v29  ;;  %v3212_v27 = vpop.permute.xlu1 %3211  ;;  %v11744_v54 = vpop.f32.mrf.mxu2 }
 0x320   : > { %v3985_v6 = vsel %vm3772_vm9, %v3935_v24, %v3212_v27  ;;  %v11729_v37 = vpop.permute.xlu2 %2735  ;;  %15824 = vst [vmem:[#allocation44_spill] sm:$0xff] %v11744_v54  ;;  %v11750_v24 = vld [vmem:[#allocation2 + $0x7c] sm:$0xff]  }
 0x321   : > { %v4954_v50 = vrot.slane %v3985_v6, 3  ;;  %v11746_v29 = vpop.f32.mrf.mxu1 }
 0x322   : > { %15825 = vst [vmem:[#allocation105_spill] sm:$0xff] %v11746_v29  ;;  %v4383_v29 = vrot.slane %v11498_v33, 1  ;;  %v15828_v33 = vrot.slane %v11447_v59, 1 }
 0x323   : > { %v4955_v48 = vsel %vm4776_vm10, %v4944_v42, %v4954_v50 }
 0x324   : > { %3489 = vrot.lane.b32.xlu0 %v11219_v7, %s9187_s16  ;;  %5628 = vmatmul.bf16.gmra.mxu2 %v4955_v48  ;;  %v15495_v48 = vrot.slane %v11750_v24, 6 }
 0x325   : > { %3329 = vrot.lane.b32.xlu1 %v10490_v31, %s9186_s15  ;;  %v11754_v31 = vsel %vm2639_vm5, %v2986_v43, %v2988_v22  ;;  %v5466_v43 = vadd.f32 %v11231_v8, %v11649_v47 }
 0x326   : > { %3435 = vrot.lane.b32.xlu2 %v10476_v55, %s9188_s17  ;;  %v3088_v32 = vpop.permute.xlu0 %3087  ;;  %15826 = vst [vmem:[#allocation106_spill] sm:$0xff] %v11754_v31  ;;  %v4973_v55 = vsel %vm4776_vm10, %v4962_v25, %v4972_v35  ;;  %v11768_v52 = vsel %vm3363_vm6, %v3389_v3, %v15495_v48  ;;  %v3711_v3 = vsel %vm600_vm0, %v11331_v10, %v2730_v12  ;;  %v11799_v12 = vld [vmem:[#allocation2 + $0xc4] sm:$0xff]  }
 0x327   : > { %v2853_v42 = vpop.permute.xlu1 %2852  ;;  %v3882_v27 = vsel %vm600_vm0, %v11754_v31, %v3088_v32 }
 0x328   : > { %v11748_v16 = vpop.permute.xlu2 %2733  ;;  %v3937_v6 = vsel %vm3721_vm8, %v3882_v27, %v11646_v23  ;;  %v3765_v31 = vsel %vm3721_vm8, %v3711_v3, %v2853_v42  ;;  %v486_v23 = vld [vmem:[%s15363_s1 + $0x28] sm:$0xff] }
 0x329   : > { %v11796_v10 = vsel %vm3772_vm9, %v3765_v31, %v11699_v9  ;;  %v11801_v42 = vld [vmem:[#allocation2 + $0x68] sm:$0xff]   ;;  %v11811_v9 = vrot.slane %v11799_v12, 5  ;;  %v15498_v31 = vrot.slane %v11567_v63, 1 }
 0x32a   : > { %v4982_v59 = vrot.slane %v11796_v10, 3  ;;  %v5471_v10 = vadd.f32 %v11231_v8, %v11718_v28 }
 0x32b   : > { %15831 = vst [vmem:[#allocation110_spill] sm:$0xff] %v11811_v9 }
 0x32c   : > { %5509 = vmatmul.bf16.gmra.mxu1 %v4973_v55  ;;  %3270 = vrot.lane.b32.xlu0 %v11759_v39, %s9187_s16  ;;  %v4983_v3 = vsel %vm4776_vm10, %v4972_v35, %v4982_v59  ;;  %v8363_v35 = vld [vmem:[%s15366_s4 + $0x118] sm:$0xff] }
 0x32d   : > { %3491 = vrot.lane.b32.xlu1 %v11314_v40, %s9187_s16  ;;  %5926 = vmatpush.bf16.msrb.mxu2 %v8363_v35  ;;  %v8358_v35 = vld [vmem:[%s15366_s4 + $0xf0] sm:$0xff] }
 0x32e   : > { %3557 = vrot.lane.b32.xlu2 %v11768_v52, %s9186_s15  ;;  %v3214_v25 = vpop.permute.xlu0 %3213 }
 0x32f   : > { %v3987_v1 = vsel %vm3772_vm9, %v3937_v6, %v3214_v25  ;;  %v3216_v32 = vpop.permute.xlu1 %3215  ;;  %v5594_v55 = vpop.f32.mrf.mxu2  ;;  %v4384_v25 = vsel %vm4359_vm7, %v15828_v33, %v4383_v29  ;;  %v4386_v33 = vsel %vm4359_vm7, %v4383_v29, %v15498_v31 }
 0x330   : > { %v4964_v48 = vrot.slane %v3987_v1, 3  ;;  %v11780_v54 = vadd.f32 %v5594_v55, %v5466_v43  ;;  %v11782_v47 = vpop.permute.xlu2 %3266  ;;  %v11784_v26 = vpop.f32.mrf.mxu1 }
 0x332   : > { %15827 = vst [vmem:[#allocation107_spill] sm:$0xff] %v11780_v54  ;;  %v4965_v27 = vsel %vm4776_vm10, %v4954_v50, %v4964_v48 }
 0x334   : > { %4431 = vrot.lane.b32.xlu0 %v4384_v25, %s9187_s16  ;;  %5633 = vmatmul.bf16.gmra.mxu2 %v4965_v27  ;;  %v11823_v27 = vsel %vm2639_vm5, %v2988_v22, %v11811_v9  ;;  %v8359_v25 = vld [vmem:[%s15366_s4 + $0xf8] sm:$0xff] }
 0x335   : > { %967 = vperm.xlu1 %8999, %v486_v23   ;;  %v11817_v23 = vld [vmem:[#allocation2 + $0x90] sm:$0xff]   ;;  %15832 = vst [vmem:[#allocation111_spill] sm:$0xff] %v11823_v27  ;;  %v3885_v22 = vsel %vm600_vm0, %v11823_v27, %v11674_v62  ;;  %5793 = vmatpush.bf16.msrb.mxu1 %v8359_v25  ;;  %v11851_v27 = vld [vmem:[#allocation2 + $0x84] sm:$0xff]  }
 0x336   : > { %3272 = vrot.lane.b32.xlu2 %v11801_v42, %s9187_s16  ;;  %v2855_v50 = vpop.permute.xlu0 %2854  ;;  %v15501_v28 = vrot.slane %v11851_v27, 6 }
 0x337   : > { %v2916_v43 = vpop.permute.xlu1 %2915  ;;  %v11806_v6 = vpop.f32.mrf.mxu2 }
 0x338   : > { %15829 = vst [vmem:[#allocation108_spill] sm:$0xff] %v11806_v6  ;;  %v11808_v1 = vpop.f32.mrf.mxu1  ;;  %v11814_v55 = vpop.permute.xlu2 %3217 }
 0x339   : > { %15830 = vst [vmem:[#allocation109_spill] sm:$0xff] %v11808_v1  ;;  %v3714_v1 = vsel %vm600_vm0, %v11336_v36, %v11615_v49  ;;  %5794 = vmatpush.bf16.msrb.mxu1 %v8358_v35 }
 0x33c   : > { %5514 = vmatmul.bf16.gmra.mxu1 %v4983_v3  ;;  %3618 = vrot.lane.b32.xlu0 %v11817_v23, %s9188_s17 }
 0x33d   : > { %3437 = vrot.lane.b32.xlu1 %v11628_v5, %s9188_s17 }
 0x33e   : > { %4433 = vrot.lane.b32.xlu2 %v4386_v33, %s9187_s16  ;;  %v3151_v5 = vpop.permute.xlu0 %3150  ;;  %v3767_v33 = vsel %vm3721_vm8, %v3714_v1, %v2855_v50 }
 0x33f   : > { %v3939_v29 = vsel %vm3721_vm8, %v3885_v22, %v3151_v5  ;;  %v11843_v3 = vpop.permute.xlu1 %3431  ;;  %v5599_v31 = vpop.f32.mrf.mxu2  ;;  %v3818_v36 = vsel %vm3772_vm9, %v3767_v33, %v2916_v43  ;;  %v11878_v43 = vld [vmem:[#allocation2 + $0xcc] sm:$0xff]  }
 0x340   : > { %v3989_v6 = vsel %vm3772_vm9, %v3939_v29, %v3216_v32  ;;  %v11849_v62 = vadd.f32 %v5599_v31, %v5471_v10  ;;  %v11858_v25 = vpop.f32.mrf.mxu1  ;;  %v11862_v49 = vpop.permute.xlu2 %3093  ;;  %v15834_v32 = vrot.slane %v11750_v24, 6  ;;  %v4992_v1 = vrot.slane %v3818_v36, 3  ;;  %v8356_v29 = vld [vmem:[%s15366_s4 + $0xe0] sm:$0xff] }
 0x341   : > { %v4974_v22 = vrot.slane %v3989_v6, 3  ;;  %v9031_v6 = vld [vmem:[#allocation2 + $0x98] sm:$0xff]   ;;  %v15502_v10 = vrot.slane %v11878_v43, 5  ;;  %v5476_v36 = vadd.f32 %v11231_v8, %v11784_v26 }
 0x342   : > { %15833 = vst [vmem:[#allocation112_spill] sm:$0xff] %v11849_v62  ;;  %v11871_v50 = vsel %vm3363_vm6, %v15834_v32, %v15501_v28  ;;  %v4993_v33 = vsel %vm4776_vm10, %v4982_v59, %v4992_v1 }
 0x343   : > { %v4975_v5 = vsel %vm4776_vm10, %v4964_v48, %v4974_v22  ;;  %v8357_v48 = vld [vmem:[%s15366_s4 + $0xe8] sm:$0xff]  ;;  %v11903_v59 = vsel %vm2639_vm5, %v11811_v9, %v15502_v10  ;;  %v15854_v9 = vld [vmem:[#allocation30_spill] sm:$0xff] }
 0x344   : > { %3331 = vrot.lane.b32.xlu0 %v11163_v21, %s9186_s15  ;;  %5638 = vmatmul.bf16.gmra.mxu2 %v4975_v5  ;;  %v8355_v5 = vld [vmem:[%s15366_s4 + $0xd8] sm:$0xff]  ;;  %15837 = vst [vmem:[#allocation115_spill] sm:$0xff] %v11903_v59 }
 0x345   : > { %3559 = vrot.lane.b32.xlu1 %v11871_v50, %s9186_s15  ;;  %5795 = vmatpush.bf16.msrb.mxu1 %v8357_v48 }
 0x346   : > { %3620 = vrot.lane.b32.xlu2 %v9031_v6, %s9188_s17  ;;  %v3092_v21 = vpop.permute.xlu0 %3091 }
 0x347   : > { %v2918_v31 = vpop.permute.xlu1 %2917  ;;  %v11881_v24 = vpop.f32.mrf.mxu2  ;;  %v3888_v48 = vsel %vm600_vm0, %v11903_v59, %v3092_v21  ;;  %v8354_v21 = vld [vmem:[%s15366_s4 + $0xd0] sm:$0xff]  ;;  %v15855_v59 = vld [vmem:[#allocation34_spill] sm:$0xff] }
 0x348   : > { %15835 = vst [vmem:[#allocation113_spill] sm:$0xff] %v11881_v24  ;;  %v11888_v35 = vpop.f32.mrf.mxu1  ;;  %v11905_v32 = vpop.permute.xlu2 %3097 }
 0x349   : > { %15836 = vst [vmem:[#allocation114_spill] sm:$0xff] %v11888_v35  ;;  %5796 = vmatpush.bf16.msrb.mxu1 %v8356_v29  ;;  %v11919_v35 = vld [vmem:[#allocation2 + $0x70] sm:$0xff]  }
 0x34c   : > { %5519 = vmatmul.bf16.gmra.mxu1 %v4993_v33  ;;  %3493 = vrot.lane.b32.xlu0 %v11354_v58, %s9187_s16 }
 0x34d   : > { %3333 = vrot.lane.b32.xlu1 %v11219_v7, %s9186_s15  ;;  %5797 = vmatpush.bf16.msrb.mxu1 %v8355_v5 }
 0x34e   : > { %3439 = vrot.lane.b32.xlu2 %v11708_v30, %s9188_s17  ;;  %v2859_v7 = vpop.permute.xlu0 %2858 }
 0x34f   : > { %v3153_v6 = vpop.permute.xlu1 %3152  ;;  %v5604_v29 = vpop.f32.mrf.mxu2 }
 0x350   : > { %v3941_v33 = vsel %vm3721_vm8, %v3888_v48, %v3153_v6  ;;  %v11912_v26 = vadd.f32 %v5604_v29, %v5476_v36  ;;  %v5485_v36 = vpop.f32.mrf.mxu1  ;;  %v15503_v29 = vrot.slane %v11630_v4, 1 }
 0x351   : > { %v11916_v28 = vsel %vm3772_vm9, %v3941_v33, %v11814_v55  ;;  %v3717_v55 = vsel %vm600_vm0, %v11439_v51, %v11748_v16  ;;  %5798 = vmatpush.bf16.msrb.mxu1 %v8354_v21  ;;  %v8353_v33 = vld [vmem:[%s15366_s4 + $0xc8] sm:$0xff]  ;;  %v15840_v16 = vrot.slane %v11567_v63, 1  ;;  %v5481_v63 = vadd.f32 %v11231_v8, %v11858_v25 }
 0x352   : > { %15838 = vst [vmem:[#allocation116_spill] sm:$0xff] %v11912_v26  ;;  %v4984_v10 = vrot.slane %v11916_v28, 3  ;;  %v11938_v26 = vpop.permute.xlu2 %3095 }
 0x353   : > { %v4388_v21 = vsel %vm4359_vm7, %v15840_v16, %v15503_v29 }
 0x354   : > { %3274 = vrot.lane.b32.xlu0 %v11919_v35, %s9187_s16  ;;  %v4985_v30 = vsel %vm4776_vm10, %v4974_v22, %v4984_v10 }
 0x355   : > { %5643 = vmatmul.bf16.gmra.mxu2 %v4985_v30  ;;  %v2312_v30 = vld [vmem:[#allocation3 + $0xd4] sm:$0x7]  ;;  %5799 = vmatpush.bf16.msrb.mxu1 %v8353_v33 }
 0x356   : > { %v2857_v5 = vpop.permute.xlu0 %2856 }
 0x357   : > { %v3769_v28 = vsel %vm3721_vm8, %v3717_v55, %v2857_v5  ;;  %v3220_v48 = vpop.permute.xlu1 %3219  ;;  %v11931_v6 = vpop.f32.mrf.mxu2  ;;  %v2493_v5 = vunpack.c.l.b16 %v2312_v30 }
 0x358   : > { %15839 = vst [vmem:[#allocation117_spill] sm:$0xff] %v11931_v6  ;;  %v3820_v22 = vsel %vm3772_vm9, %v3769_v28, %v2918_v31  ;;  %v8352_v31 = vld [vmem:[%s15366_s4 + $0xc0] sm:$0xff]  ;;  %v11950_v28 = vld [vmem:[#allocation2 + $0xd4] sm:$0xff]   ;;  %v11965_v24 = vpop.f32.mrf.mxu1 }
 0x359   : > { %v5002_v51 = vrot.slane %v3820_v22, 3  ;;  %v4027_v22 = vsel %vm600_vm0, %v10814_v18, %v11782_v47  ;;  %5800 = vmatpush.bf16.msrb.mxu1 %v8352_v31  ;;  %v15505_v6 = vrot.slane %v11950_v28, 5  ;;  %15842 = vst [vmem:[#allocation119_spill] sm:$0xff] %v11965_v24 }
 0x35a   : > { %v11971_v25 = vpop.permute.xlu2 %4427 }
 0x35b   : > { %v5003_v55 = vsel %vm4776_vm10, %v4992_v1, %v5002_v51 }
 0x35c   : > { %4435 = vrot.lane.b32.xlu0 %v4388_v21, %s9187_s16  ;;  %5524 = vmatmul.bf16.gmra.mxu1 %v5003_v55  ;;  %v2518_v21 = vpack.c.b16 %v2493_v5, %v2493_v5 }
 0x35e   : > { %v3326_v33 = vpop.permute.xlu0 %3325  ;;  %v3720_v8 = vsel %vm600_vm0, %v2518_v21, %v11729_v37  ;;  %v12000_v21 = vld [vmem:[%s15365_s3] ss:$0 sm:$0xff] }
 0x35f   : > { %v4092_v1 = vsel %vm3721_vm8, %v4027_v22, %v3326_v33  ;;  %v2920_v30 = vpop.permute.xlu1 %2919  ;;  %v5609_v16 = vpop.f32.mrf.mxu2  ;;  %v3771_v47 = vsel %vm3721_vm8, %v3720_v8, %v2859_v7  ;;  %v15844_v22 = vrot.slane %v11878_v43, 5  ;;  %15847 = vst [vmem:[#allocation122_spill] sm:$0xff] %v12000_v21  ;;  %v15848_v8 = vld [vmem:[#allocation8_spill] sm:$0xff] }
 0x360   : > { %v11960_v55 = vsel %vm3772_vm9, %v4092_v1, %v11843_v3  ;;  %v11962_v29 = vadd.f32 %v5609_v16, %v5481_v63  ;;  %v15843_v3 = vrot.slane %v10631_v38, 3  ;;  %v3822_v31 = vsel %vm3772_vm9, %v3771_v47, %v2920_v30 }
 0x361   : > { %v15504_v18 = vrot.slane %v11960_v55, 3  ;;  %v11984_v63 = vsel %vm2639_vm5, %v15844_v22, %v15505_v6  ;;  %v5012_v33 = vrot.slane %v3822_v31, 3  ;;  %v725_v47 = vadd.f32 %v12000_v21, %v15848_v8  ;;  %v12016_v8 = vld [vmem:[%s15367_s5] ss:$0 sm:$0xff] }
 0x362   : > { %15841 = vst [vmem:[#allocation118_spill] sm:$0xff] %v11962_v29  ;;  %v3891_v37 = vsel %vm600_vm0, %v11984_v63, %v11862_v49  ;;  %v9035_v29 = vld [vmem:[#allocation2 + $0x28] sm:$0xff]  }
 0x363   : > { %v4867_v5 = vsel %vm4776_vm10, %v15843_v3, %v15504_v18  ;;  %15845 = vst [vmem:[#allocation120_spill] sm:$0xff] %v11984_v63  ;;  %v5013_v31 = vsel %vm4776_vm10, %v5002_v51, %v5012_v33  ;;  %v880_v22 = vmax.f32 %v725_v47, 0.0  ;;  %v5486_v18 = vadd.f32 %v12016_v8, %v5485_v36  ;;  %v15849_v33 = vld [vmem:[#allocation14_spill] sm:$0xff] }
 0x364   : > { %5712 = vmatmul.bf16.gmra.mxu3 %v4867_v5  ;;  %v2385_v5 = vld [vmem:[#allocation2 + $0x20] sm:$0x8]  ;;  %v15850_v24 = vunpack.c.h.b16 %v15849_v33  ;;  %v4178_v63 = vsel %vm600_vm0, %v9035_v29, %v15854_v9  ;;  %v15858_v33 = vld [vmem:[#allocation33_spill] sm:$0xff]  ;;  %v12042_v9 = vor.u32 %v11484_v45, %v11478_v46 }
 0x366   : > { %v3155_v7 = vpop.permute.xlu0 %3154 }
 0x367   : > { %v3943_v38 = vsel %vm3721_vm8, %v3891_v37, %v3155_v7  ;;  %v11990_v1 = vpop.permute.xlu1 %3223  ;;  %v11992_v16 = vpop.f32.mrf.mxu2  ;;  %v3465_v7 = vunpack.c.l.b16 %v2385_v5  ;;  %v15853_v5 = vld [vmem:[#allocation9_spill] sm:$0xff] }
 0x368   : > { %15846 = vst [vmem:[#allocation121_spill] sm:$0xff] %v11992_v16  ;;  %v11995_v30 = vsel %vm3772_vm9, %v3943_v38, %v3220_v48  ;;  %v12011_v37 = vpop.permute.xlu2 %3487 }
 0x369   : > { %v15506_v49 = vrot.slane %v11995_v30, 3  ;;  %v12005_v3 = vpop.f32.mrf.mxu1  ;;  %v3467_v16 = vpack.c.b16 %v15850_v24, %v3465_v7  ;;  %15859 = vst [vmem:[#allocation9_spill] sm:$0xff] %v12042_v9 }
 0x36b   : > { %v4995_v48 = vsel %vm4776_vm10, %v4984_v10, %v15506_v49  ;;  %v727_v49 = vadd.f32 %v12000_v21, %v15853_v5  ;;  %v4175_v36 = vsel %vm600_vm0, %v3467_v16, %v15855_v59  ;;  %v15860_v59 = vld [vmem:[#allocation37_spill] sm:$0xff] }
 0x36c   : > { %5529 = vmatmul.bf16.gmra.mxu1 %v5013_v31  ;;  %5648 = vmatmul.bf16.gmra.mxu2 %v4995_v48 }
 0x36d   : > { %v881_v29 = vmax.f32 %v727_v49, 0.0 }
 0x36e   : > { %v973_v38 = vpop.permute.xlu0 %972 }
 0x36f   : > { %v1276_v6 = vmul.f32 %v973_v38, %v880_v22  ;;  %v3222_v51 = vpop.permute.xlu1 %3221  ;;  %v15856_v22 = vld [vmem:[#allocation36_spill] sm:$0xff] }
 0x370   : > { %v5614_v10 = vpop.f32.mrf.mxu2  ;;  %v4251_v38 = vsel %vm3721_vm8, %v4178_v63, %v15856_v22 }
 0x371   : > { %v1342_v31 = vpack.c.bf16 %v1276_v6, %v1276_v6  ;;  %v12021_v48 = vadd.f32 %v5614_v10, %v5486_v18  ;;  %v12023_v47 = vpop.f32.mrf.mxu1  ;;  %v15857_v18 = vld [vmem:[#allocation41_spill] sm:$0xff]  ;;  %v4249_v10 = vsel %vm3721_vm8, %v4175_v36, %v15858_v33  ;;  %v12054_v33 = vrot.slane %v12042_v9, 5 }
 0x372   : > { %15852 = vst [vmem:[#allocation14_spill] sm:$0xff] %v12023_v47  ;;  %v12036_v7 = vsel %vm3772_vm9, %v4251_v38, %v15857_v18  ;;  %v4299_v16 = vsel %vm3772_vm9, %v4249_v10, %v15860_v59  ;;  %v12051_v38 = vpop.permute.xlu2 %3268  ;;  %v8361_v59 = vld [vmem:[%s15366_s4 + $0x108] sm:$0xff] }
 0x373   : > { %15851 = vst [vmem:[#allocation8_spill] sm:$0xff] %v12021_v48  ;;  %v1532_v24 = vshll.u32 %v1342_v31, 16  ;;  %v1536_v6 = vshrl.u32 %v1342_v31, 16  ;;  %v4786_v36 = vrot.slane %v4299_v16, 3 }
 0x374   : > { %1409 = vst.msk [vmem:[#allocation2 + $0x18] sm:$0xf] %vm1402_vm1, %v1342_v31  ;;  %v15510_v31 = vrot.slane %v12036_v7, 3 }
 0x375   : > { %v12046_v63 = vrot.slane %v1532_v24, 5  ;;  %v1538_v5 = vrot.slane %v1536_v6, 4  ;;  %15861 = vst [vmem:[#allocation30_spill] sm:$0xff] %v12054_v33  ;;  %v8362_v24 = vld [vmem:[%s15366_s4 + $0x110] sm:$0xff] }
 0x376   : > { %v12048_v22 = vpop.permute.xlu0 %3553  ;;  %v4788_v6 = vsel %vm4776_vm10, %v4786_v36, %v15510_v31  ;;  %5927 = vmatpush.bf16.msrb.mxu2 %v8362_v24 }
 0x377   : > { %v978_v18 = vpop.permute.xlu1 %977  ;;  %v1539_v46 = vor.u32 %v1538_v5, %v12046_v63 }
 0x378   : > { %v1277_v47 = vmul.f32 %v978_v18, %v881_v29 }
 0x379   : > { %v12056_v45 = vpop.f32.mrf.mxu1  ;;  %v1540_v18 = vrot.slane %v1539_v46, 4 }
 0x37a   : > { %v1343_v49 = vpack.c.bf16 %v1277_v47, %v1277_v47  ;;  %v15862_v47 = vrot.slane %v11950_v28, 5  ;;  %5928 = vmatpush.bf16.msrb.mxu2 %v8361_v59  ;;  %v12088_v9 = vpop.permute.xlu2 %4429 }
 0x37b   : > { %15865 = vst [vmem:[#allocation41_spill] sm:$0xff] %v12088_v9 }
 0x37c   : > { %1410 = vst.msk [vmem:[#allocation2 + $0x1c] sm:$0xf] %vm1402_vm1, %v1343_v49  ;;  %v1542_v10 = vshll.u32 %v1343_v49, 16  ;;  %v1546_v29 = vshrl.u32 %v1343_v49, 16  ;;  %5801 = vmatmul.bf16.vlgmr.msrb.gmra.mxu1 %v4788_v6  ;;  %v12073_v16 = vsel %vm2639_vm5, %v15862_v47, %v12054_v33  ;;  %v12078_v49 = vpop.f32.mrf.mxu2 }
 0x37d   : > { %15863 = vst [vmem:[#allocation34_spill] sm:$0xff] %v12073_v16  ;;  %v3894_v5 = vsel %vm600_vm0, %v12073_v16, %v11938_v26 }
 0x37e   : > { %v1544_v36 = vrot.slane %v1542_v10, 5  ;;  %v1548_v31 = vrot.slane %v1546_v29, 4  ;;  %15864 = vst [vmem:[#allocation36_spill] sm:$0xff] %v12078_v49  ;;  %v3157_v24 = vpop.permute.xlu0 %3156  ;;  %v9036_v10 = vld [vmem:[#allocation2 + $0x30] sm:$0xff]   ;;  %v15867_v29 = vld [vmem:[#allocation31_spill] sm:$0xff] }
 0x37f   : > { %v3945_v6 = vsel %vm3721_vm8, %v3894_v5, %v3157_v24  ;;  %v12081_v48 = vpop.permute.xlu1 %3614  ;;  %v4181_v5 = vsel %vm600_vm0, %v9036_v10, %v15867_v29  ;;  %v12111_v29 = vld [vmem:[#allocation2 + $0x20] sm:$0xff]  }
 0x380   : > { %v1545_v15 = vsel %vm9575_vm4, %v1540_v18, %v1544_v36  ;;  %v1549_v62 = vor.u32 %v1548_v31, %v1544_v36  ;;  %v12086_v47 = vsel %vm3772_vm9, %v3945_v6, %v3222_v51  ;;  %v8360_v31 = vld [vmem:[%s15366_s4 + $0x100] sm:$0xff]  ;;  %v15868_v51 = vld [vmem:[#allocation35_spill] sm:$0xff]  ;;  %v15869_v18 = vrot.slane %v11995_v30, 3 }
 0x381   : > { %2203 = vst.msk [vmem:[#allocation3 + $0x18] sm:$0xf] %vm1402_vm1, %v1545_v15  ;;  %v5004_v26 = vrot.slane %v12086_v47, 3  ;;  %v12092_v46 = vpop.f32.mrf.mxu1  ;;  %v4253_v59 = vsel %vm3721_vm8, %v4181_v5, %v15868_v51  ;;  %v15870_v47 = vld [vmem:[#allocation12_spill] sm:$0xff]  ;;  %v5491_v30 = vadd.f32 %v12016_v8, %v12005_v3  ;;  %5929 = vmatpush.bf16.msrb.mxu2 %v8360_v31  ;;  %v12121_v51 = vld [vmem:[#allocation3 + $0x20] sm:$0xff]   ;;  %v3897_v3 = vsel %vm600_vm0, %v12054_v33, %v11905_v32 }
 0x382   : > { %15866 = vst [vmem:[#allocation33_spill] sm:$0xff] %v12092_v46  ;;  %v1550_v24 = vrot.slane %v1549_v62, 4  ;;  %v12106_v6 = vsel %vm3772_vm9, %v4253_v59, %v10507_v57  ;;  %v15513_v46 = vrot.slane %v12111_v29, 5  ;;  %v2362_v31 = vld [vmem:[#allocation3 + $0x20] sm:$0x8] }
 0x383   : > { %v5005_v15 = vsel %vm4776_vm10, %v15869_v18, %v5004_v26  ;;  %v8603_v36 = vld [vmem:[#allocation2 + $0x18] sm:$0xff]   ;;  %v4798_v59 = vrot.slane %v12106_v6, 3  ;;  %v15872_v6 = vrot.slane %v12036_v7, 3 }
 0x384   : > { %v1555_v62 = vsel %vm9575_vm4, %v1550_v24, %v15870_v47  ;;  %5653 = vmatmul.bf16.gmra.mxu2 %v5005_v15  ;;  %v2640_v10 = vrot.slane %v8603_v36, 5 }
 0x385   : > { %2204 = vst.msk [vmem:[#allocation3 + $0x1c] sm:$0xf] %vm1402_vm1, %v1555_v62  ;;  %v15515_v62 = vunpack.c.h.b16 %v12121_v51 }
 0x386   : > { %2687 = vrot.lane.b32.xlu1 %v2640_v10, %s9187_s16  ;;  %v3159_v57 = vpop.permute.xlu0 %3158  ;;  %v5619_v5 = vpop.f32.mrf.mxu2  ;;  %v2642_v24 = vsel %vm2639_vm5, %v2640_v10, %v15513_v46 }
 0x387   : > { %v3434_v18 = vpop.permute.xlu1 %3433  ;;  %v12124_v15 = vadd.f32 %v5619_v5, %v5491_v30  ;;  %2689 = vrot.lane.b32.xlu2 %v2642_v24, %s9187_s16  ;;  %v3947_v36 = vsel %vm3721_vm8, %v3897_v3, %v3159_v57  ;;  %v12134_v10 = vpop.permute.xlu2 %3616  ;;  %v4799_v30 = vsel %vm4776_vm10, %v15872_v6, %v4798_v59  ;;  %v2864_v5 = vunpack.c.l.b16 %v2362_v31 }
 0x388   : > { %v3997_v24 = vsel %vm3772_vm9, %v3947_v36, %v11990_v1  ;;  %v15517_v3 = vrot.slane %v12121_v51, 5  ;;  %v15874_v36 = vld [vmem:[#allocation47_spill] sm:$0xff] }
 0x389   : > { %15871 = vst [vmem:[#allocation37_spill] sm:$0xff] %v12124_v15  ;;  %v12131_v47 = vpop.f32.mrf.mxu1  ;;  %v2868_v57 = vpack.c.b16 %v15515_v62, %v2864_v5  ;;  %v4030_v15 = vsel %vm600_vm0, %v10896_v2, %v12051_v38  ;;  %v5014_v6 = vrot.slane %v3997_v24, 3  ;;  %v15876_v24 = vld [vmem:[#allocation42_spill] sm:$0xff]  ;;  %v15877_v62 = vrot.slane %v11960_v55, 3 }
 0x38c   : > { %5806 = vmatmul.bf16.gmra.mxu1 %v4799_v30  ;;  %v8580_v46 = vld [vmem:[#allocation3 + $0x18] sm:$0xff]  }
 0x38d   : > { %v2763_v32 = vrot.slane %v8580_v46, 5  ;;  %v9038_v46 = vld [vmem:[#allocation2 + $0x38] sm:$0xff]  }
 0x38e   : > { %v3328_v49 = vpop.permute.xlu0 %3327  ;;  %v12147_v7 = vpop.f32.mrf.mxu2  ;;  %v4184_v2 = vsel %vm600_vm0, %v9038_v46, %v15874_v36 }
 0x38f   : > { %15873 = vst [vmem:[#allocation31_spill] sm:$0xff] %v12147_v7  ;;  %v4094_v31 = vsel %vm3721_vm8, %v4030_v15, %v3328_v49  ;;  %v12150_v33 = vpop.permute.xlu1 %3555  ;;  %2810 = vrot.lane.b32.xlu0 %v2763_v32, %s9186_s15  ;;  %2871 = vrot.lane.b32.xlu2 %v2868_v57, %s9188_s17  ;;  %v2765_v1 = vsel %vm2639_vm5, %v2763_v32, %v15517_v3  ;;  %v12163_v15 = vld [vmem:[#allocation2 + $0x8c] sm:$0xff]   ;;  %v12230_v7 = vld [vmem:[#allocation2 + $0x78] sm:$0xff]  }
 0x390   : > { %v4144_v38 = vsel %vm3772_vm9, %v4094_v31, %v3434_v18  ;;  %2812 = vrot.lane.b32.xlu1 %v2765_v1, %s9186_s15  ;;  %v15516_v5 = vrot.slane %v12163_v15, 6  ;;  %v4255_v57 = vsel %vm3721_vm8, %v4184_v2, %v15876_v24  ;;  %v5015_v32 = vsel %vm4776_vm10, %v5004_v26, %v5014_v6  ;;  %v9040_v31 = vld [vmem:[#allocation2 + $0x44] sm:$0xff]   ;;  %v15878_v1 = vld [vmem:[#allocation52_spill] sm:$0xff] }
 0x391   : > { %v4876_v30 = vrot.slane %v4144_v38, 3  ;;  %v12161_v49 = vpop.f32.mrf.mxu1  ;;  %v12174_v18 = vsel %vm3772_vm9, %v4255_v57, %v10589_v41  ;;  %v12178_v36 = vsel %vm600_vm0, %v9040_v31, %v15878_v1  ;;  %v5496_v2 = vadd.f32 %v12016_v8, %v12056_v45  ;;  %v3436_v38 = vpop.permute.xlu2 %3435  ;;  %v15880_v6 = vld [vmem:[#allocation40_spill] sm:$0xff]  ;;  %v15883_v1 = vld [vmem:[#allocation87_spill] sm:$0xff] }
 0x392   : > { %15875 = vst [vmem:[#allocation35_spill] sm:$0xff] %v12161_v49  ;;  %v15881_v24 = vld [vmem:[#allocation24_spill] sm:$0xff]  ;;  %v15885_v3 = vld [vmem:[#allocation63_spill] sm:$0xff]  ;;  %v15914_v17 = vrot.slane %v12163_v15, 6 }
 0x393   : > { %v4877_v46 = vsel %vm4776_vm10, %v15877_v62, %v4876_v30  ;;  %v15879_v62 = vrot.slane %v11851_v27, 6  ;;  %v4459_v57 = vsel %vm600_vm0, %v15881_v24, %v15880_v6  ;;  %v12197_v45 = vld [vmem:[#allocation3 + $0x28] sm:$0xff]   ;;  %v4554_v27 = vrot.slane %v12178_v36, 5 }
 0x394   : > { %5658 = vmatmul.bf16.gmra.mxu2 %v5015_v32  ;;  %5717 = vmatmul.bf16.gmra.mxu3 %v4877_v46  ;;  %v4808_v32 = vrot.slane %v12174_v18, 3  ;;  %v4553_v6 = vrot.slane %v4459_v57, 5  ;;  %v15887_v57 = vld [vmem:[#allocation46_spill] sm:$0xff] }
 0x395   : > { %v12189_v41 = vsel %vm3363_vm6, %v15879_v62, %v15516_v5 }
 0x396   : > { %v12182_v26 = vpop.permute.xlu0 %3489  ;;  %v5624_v55 = vpop.f32.mrf.mxu2  ;;  %v4809_v18 = vsel %vm4776_vm10, %v4798_v59, %v4808_v32  ;;  %v9043_v59 = vld [vmem:[#allocation2 + $0x40] sm:$0xff]  }
 0x397   : > { %v3330_v46 = vpop.permute.xlu1 %3329  ;;  %v12195_v31 = vadd.f32 %v5624_v55, %v5496_v2  ;;  %2873 = vrot.lane.b32.xlu0 %v12197_v45, %s9188_s17  ;;  %3561 = vrot.lane.b32.xlu2 %v12189_v41, %s9186_s15  ;;  %v12210_v2 = vsel %vm2639_vm5, %v4553_v6, %v4554_v27 }
 0x398   : > { %3495 = vrot.lane.b32.xlu1 %v15883_v1, %s9187_s16 }
 0x399   : > { %15882 = vst [vmem:[#allocation12_spill] sm:$0xff] %v12195_v31  ;;  %v12206_v62 = vpop.f32.mrf.mxu1  ;;  %v12219_v31 = vld [vmem:[#allocation2 + $0xa0] sm:$0xff]  }
 0x39a   : > { %15886 = vst [vmem:[#allocation42_spill] sm:$0xff] %v12219_v31 }
 0x39c   : > { %5811 = vmatmul.bf16.gmra.mxu1 %v4809_v18  ;;  %v4187_v18 = vsel %vm600_vm0, %v9043_v59, %v15887_v57  ;;  %v15890_v57 = vld [vmem:[#allocation43_spill] sm:$0xff] }
 0x39e   : > { %v3271_v55 = vpop.permute.xlu0 %3270  ;;  %v12212_v24 = vpop.f32.mrf.mxu2 }
 0x39f   : > { %15884 = vst [vmem:[#allocation47_spill] sm:$0xff] %v12212_v24  ;;  %v4033_v36 = vsel %vm600_vm0, %v15885_v3, %v3271_v55  ;;  %v12217_v49 = vpop.permute.xlu1 %3491  ;;  %3622 = vrot.lane.b32.xlu0 %v12219_v31, %s9188_s17  ;;  %3335 = vrot.lane.b32.xlu2 %v11314_v40, %s9186_s15  ;;  %v12227_v24 = vpop.permute.xlu2 %3557  ;;  %v4789_v3 = vrot.slane %v4553_v6, 3  ;;  %v15889_v40 = vld [vmem:[#allocation7_spill] sm:$0xff]  ;;  %v4257_v31 = vsel %vm3721_vm8, %v4187_v18, %v15890_v57  ;;  %v15892_v6 = vld [vmem:[#allocation58_spill] sm:$0xff] }
 0x3a0   : > { %v4096_v5 = vsel %vm3721_vm8, %v4033_v36, %v3330_v46  ;;  %3276 = vrot.lane.b32.xlu1 %v12230_v7, %s9187_s16  ;;  %v722_v54 = vadd.f32 %v12000_v21, %v15889_v40  ;;  %v15891_v46 = vrot.slane %v12210_v2, 3  ;;  %v15893_v40 = vld [vmem:[#allocation56_spill] sm:$0xff] }
 0x3a1   : > { %v12234_v55 = vpop.f32.mrf.mxu1  ;;  %v12237_v16 = vsel %vm3772_vm9, %v4096_v5, %v3436_v38  ;;  %v9045_v38 = vld [vmem:[#allocation2 + $0x4c] sm:$0xff]  }
 0x3a2   : > { %15888 = vst [vmem:[#allocation52_spill] sm:$0xff] %v12234_v55  ;;  %v15520_v59 = vrot.slane %v12237_v16, 3  ;;  %v4791_v36 = vsel %vm4776_vm10, %v4789_v3, %v15891_v46  ;;  %v12250_v55 = vsel %vm3772_vm9, %v4257_v31, %v15892_v6  ;;  %v12258_v18 = vsel %vm600_vm0, %v9045_v38, %v15893_v40  ;;  %v15895_v31 = vld [vmem:[#allocation13_spill] sm:$0xff] }
 0x3a3   : > { %v879_v57 = vmax.f32 %v722_v54, 0.0  ;;  %v5501_v3 = vadd.f32 %v12016_v8, %v12131_v47  ;;  %v15896_v6 = vrot.slane %v15895_v31, 5  ;;  %v15899_v47 = vrot.slane %v11630_v4, 1 }
 0x3a4   : > { %8258 = vmatmul.msk.bf16.vlgmr.msrb.gmra.mxu2 %vm3721_vm8, %v4791_v36  ;;  %v4887_v5 = vsel %vm4776_vm10, %v4876_v30, %v15520_v59  ;;  %v15897_v36 = vrot.slane %v12111_v29, 5  ;;  %v15521_v30 = vrot.slane %v12250_v55, 3  ;;  %v4556_v40 = vrot.slane %v12258_v18, 5 }
 0x3a5   : > { %5722 = vmatmul.bf16.gmra.mxu3 %v4887_v5  ;;  %v15898_v5 = vrot.slane %v11685_v11, 1 }
 0x3a6   : > { %v12262_v46 = vpop.permute.xlu0 %4431  ;;  %v2644_v9 = vsel %vm2639_vm5, %v15897_v36, %v15896_v6 }
 0x3a7   : > { %15894 = vst [vmem:[#allocation40_spill] sm:$0xff] %v12262_v46  ;;  %v968_v59 = vpop.permute.xlu1 %967  ;;  %3441 = vrot.lane.b32.xlu0 %v11768_v52, %s9188_s17  ;;  %2691 = vrot.lane.b32.xlu2 %v2644_v9, %s9187_s16  ;;  %v5629_v54 = vpop.f32.mrf.mxu2  ;;  %v4390_v38 = vsel %vm4359_vm7, %v15899_v47, %v15898_v5  ;;  %v4819_v9 = vsel %vm4776_vm10, %v4808_v32, %v15521_v30  ;;  %v15903_v47 = vrot.slane %v12121_v51, 5  ;;  %v15908_v30 = vld [vmem:[#allocation51_spill] sm:$0xff] }
 0x3a8   : > { %v1275_v29 = vmul.f32 %v968_v59, %v879_v57  ;;  %v12279_v31 = vadd.f32 %v5629_v54, %v5501_v3  ;;  %4437 = vrot.lane.b32.xlu1 %v4390_v38, %s9187_s16  ;;  %v3273_v36 = vpop.permute.xlu2 %3272  ;;  %v12288_v46 = vsel %vm2639_vm5, %v4554_v27, %v4556_v40  ;;  %v15901_v54 = vld [vmem:[#allocation21_spill] sm:$0xff]  ;;  %v15905_v27 = vld [vmem:[#allocation91_spill] sm:$0xff] }
 0x3a9   : > { %v12282_v6 = vpop.f32.mrf.mxu1  ;;  %v15902_v5 = vrot.slane %v15901_v54, 5  ;;  %v4800_v32 = vrot.slane %v12288_v46, 3  ;;  %v9047_v54 = vld [vmem:[#allocation2 + $0x48] sm:$0xff]  }
 0x3aa   : > { %15900 = vst [vmem:[#allocation24_spill] sm:$0xff] %v12279_v31  ;;  %v1341_v52 = vpack.c.bf16 %v1275_v29, %v1275_v29  ;;  %v12299_v29 = vpop.f32.mrf.mxu3  ;;  %v15909_v31 = vld [vmem:[#allocation53_spill] sm:$0xff] }
 0x3ab   : > { %v2767_v38 = vsel %vm2639_vm5, %v15903_v47, %v15902_v5  ;;  %15904 = vst [vmem:[#allocation87_spill] sm:$0xff] %v12299_v29  ;;  %v4190_v5 = vsel %vm600_vm0, %v9047_v54, %v15908_v30  ;;  %v12311_v47 = vld [vmem:[#allocation2 + $0x94] sm:$0xff]  }
 0x3ac   : > { %1408 = vst.msk [vmem:[#allocation2 + $0x14] sm:$0xf] %vm1402_vm1, %v1341_v52  ;;  %v1522_v4 = vshll.u32 %v1341_v52, 16  ;;  %v1526_v18 = vshrl.u32 %v1341_v52, 16  ;;  %5816 = vmatmul.bf16.gmra.mxu1 %v4819_v9  ;;  %v4259_v29 = vsel %vm3721_vm8, %v4190_v5, %v15909_v31  ;;  %v15912_v54 = vld [vmem:[#allocation57_spill] sm:$0xff] }
 0x3ae   : > { %v1524_v59 = vrot.slane %v1522_v4, 5  ;;  %v1528_v57 = vrot.slane %v1526_v18, 4  ;;  %v12291_v3 = vpop.permute.xlu0 %3618  ;;  %v9046_v4 = vld [vmem:[#allocation3 + $0x30] sm:$0xff]  }
 0x3af   : > { %2814 = vrot.lane.b32.xlu0 %v2767_v38, %s9186_s15  ;;  %3497 = vrot.lane.b32.xlu2 %v15905_v27, %s9187_s16  ;;  %v12304_v52 = vpop.f32.mrf.mxu2  ;;  %v15524_v38 = vrot.slane %v12311_v47, 6  ;;  %v3438_v21 = vpop.permute.xlu1 %3437 }
 0x3b0   : > { %15906 = vst [vmem:[#allocation63_spill] sm:$0xff] %v12304_v52  ;;  %v1529_v9 = vor.u32 %v1528_v57, %v1524_v59  ;;  %2875 = vrot.lane.b32.xlu1 %v9046_v4, %s9188_s17  ;;  %v15910_v59 = vrot.slane %v12210_v2, 3  ;;  %v15911_v4 = vld [vmem:[#allocation64_spill] sm:$0xff]  ;;  %v12323_v52 = vpop.permute.xlu2 %4433 }
 0x3b1   : > { %v12307_v18 = vpop.f32.mrf.mxu1  ;;  %v15913_v2 = vld [vmem:[#allocation68_spill] sm:$0xff] }
 0x3b2   : > { %15907 = vst [vmem:[#allocation46_spill] sm:$0xff] %v12307_v18  ;;  %v1530_v46 = vrot.slane %v1529_v9, 4  ;;  %v4801_v57 = vsel %vm4776_vm10, %v15910_v59, %v4800_v32  ;;  %v12321_v18 = vsel %vm3772_vm9, %v4259_v29, %v15911_v4  ;;  %v9049_v9 = vld [vmem:[#allocation2 + $0x54] sm:$0xff]   ;;  %v4036_v5 = vsel %vm600_vm0, %v15913_v2, %v3273_v36 }
 0x3b3   : > { %v12331_v31 = vsel %vm600_vm0, %v9049_v9, %v15912_v54  ;;  %v5506_v29 = vadd.f32 %v12016_v8, %v12206_v62  ;;  %v12355_v9 = vld [vmem:[#allocation2 + $0xa8] sm:$0xff]  }
 0x3b4   : > { %v1535_v30 = vsel %vm9575_vm4, %v1530_v46, %v12046_v63  ;;  %8259 = vmatmul.msk.bf16.gmra.mxu2 %vm3721_vm8, %v4801_v57  ;;  %v12343_v63 = vsel %vm3363_vm6, %v15914_v17, %v15524_v38  ;;  %v4828_v46 = vrot.slane %v12321_v18, 3  ;;  %v4558_v62 = vrot.slane %v12331_v31, 5  ;;  %15916 = vst [vmem:[#allocation43_spill] sm:$0xff] %v12355_v9  ;;  %v12359_v18 = vpop.f32.mrf.mxu3  ;;  %v15926_v38 = vld [vmem:[#allocation65_spill] sm:$0xff] }
 0x3b5   : > { %2202 = vst.msk [vmem:[#allocation3 + $0x14] sm:$0xf] %vm1402_vm1, %v1535_v30 }
 0x3b6   : > { %v3332_v59 = vpop.permute.xlu0 %3331  ;;  %15917 = vst [vmem:[#allocation58_spill] sm:$0xff] %v12359_v18 }
 0x3b7   : > { %v4098_v57 = vsel %vm3721_vm8, %v4036_v5, %v3332_v59  ;;  %3563 = vrot.lane.b32.xlu0 %v12343_v63, %s9186_s15  ;;  %3278 = vrot.lane.b32.xlu2 %v11661_v34, %s9187_s16  ;;  %v5634_v36 = vpop.f32.mrf.mxu2  ;;  %v15523_v5 = vrot.slane %v11732_v44, 1  ;;  %v15918_v34 = vrot.slane %v12237_v16, 3  ;;  %v12371_v59 = vsel %vm2639_vm5, %v4556_v40, %v4558_v62  ;;  %v12373_v17 = vpop.permute.xlu1 %3559 }
 0x3b8   : > { %v4148_v4 = vsel %vm3772_vm9, %v4098_v57, %v3438_v21  ;;  %v12353_v30 = vadd.f32 %v5634_v36, %v5506_v29  ;;  %3624 = vrot.lane.b32.xlu1 %v12355_v9, %s9188_s17  ;;  %v15919_v21 = vrot.slane %v12250_v55, 3  ;;  %v12375_v57 = vpop.permute.xlu2 %3620  ;;  %v15920_v16 = vrot.slane %v11685_v11, 1 }
 0x3b9   : > { %v4896_v54 = vrot.slane %v4148_v4, 3  ;;  %v12361_v2 = vpop.f32.mrf.mxu1  ;;  %v4810_v55 = vrot.slane %v12371_v59, 3 }
 0x3ba   : > { %15915 = vst [vmem:[#allocation7_spill] sm:$0xff] %v12353_v30  ;;  %v4829_v29 = vsel %vm4776_vm10, %v15919_v21, %v4828_v46  ;;  %v4392_v4 = vsel %vm4359_vm7, %v15920_v16, %v15523_v5  ;;  %v15923_v21 = vld [vmem:[#allocation55_spill] sm:$0xff]  ;;  %v12401_v5 = vld [vmem:[#allocation2 + $0x9c] sm:$0xff]  }
 0x3bb   : > { %v4897_v31 = vsel %vm4776_vm10, %v15918_v34, %v4896_v54  ;;  %v15928_v30 = vld [vmem:[#allocation69_spill] sm:$0xff] }
 0x3bc   : > { %5727 = vmatmul.bf16.gmra.mxu3 %v4897_v31  ;;  %5821 = vmatmul.bf16.gmra.mxu1 %v4829_v29  ;;  %v9051_v31 = vld [vmem:[#allocation2 + $0x50] sm:$0xff]   ;;  %v15924_v29 = vld [vmem:[#allocation59_spill] sm:$0xff]  ;;  %v12398_v59 = vpop.f32.mrf.mxu3 }
 0x3bd   : > { %v4193_v11 = vsel %vm600_vm0, %v9051_v31, %v15923_v21  ;;  %15925 = vst [vmem:[#allocation21_spill] sm:$0xff] %v12398_v59  ;;  %v5511_v21 = vadd.f32 %v12016_v8, %v12282_v6 }
 0x3be   : > { %v12377_v36 = vpop.permute.xlu0 %3493  ;;  %v4261_v16 = vsel %vm3721_vm8, %v4193_v11, %v15924_v29 }
 0x3bf   : > { %3337 = vrot.lane.b32.xlu0 %v11354_v58, %s9186_s15  ;;  %4439 = vrot.lane.b32.xlu2 %v4392_v4, %s9187_s16  ;;  %v12388_v40 = vpop.f32.mrf.mxu2  ;;  %v4811_v58 = vsel %vm4776_vm10, %v4800_v32, %v4810_v55  ;;  %v3334_v29 = vpop.permute.xlu1 %3333 }
 0x3c0   : > { %15921 = vst [vmem:[#allocation56_spill] sm:$0xff] %v12388_v40  ;;  %3443 = vrot.lane.b32.xlu1 %v11871_v50, %s9188_s17  ;;  %v12406_v50 = vsel %vm3772_vm9, %v4261_v16, %v15926_v38  ;;  %v15927_v40 = vld [vmem:[#allocation66_spill] sm:$0xff]  ;;  %v9054_v38 = vld [vmem:[#allocation2 + $0xb0] sm:$0xff]  }
 0x3c1   : > { %v12392_v34 = vpop.f32.mrf.mxu1  ;;  %v4838_v32 = vrot.slane %v12406_v50, 3  ;;  %v3440_v50 = vpop.permute.xlu2 %3439 }
 0x3c2   : > { %15922 = vst [vmem:[#allocation13_spill] sm:$0xff] %v12392_v34  ;;  %v9053_v34 = vld [vmem:[#allocation2 + $0x5c] sm:$0xff]  }
 0x3c3   : > { %v4471_v31 = vsel %vm600_vm0, %v9053_v34, %v15927_v40  ;;  %v15930_v40 = vrot.slane %v12311_v47, 6 }
 0x3c4   : > { %8260 = vmatmul.msk.bf16.gmra.mxu2 %vm3721_vm8, %v4811_v58  ;;  %v15929_v58 = vrot.slane %v12401_v5, 6  ;;  %v4560_v34 = vrot.slane %v4471_v31, 5  ;;  %v484_v31 = vld [vmem:[%s15363_s1 + $0x18] sm:$0xff] }
 0x3c6   : > { %v3275_v11 = vpop.permute.xlu0 %3274  ;;  %v12424_v6 = vsel %vm3363_vm6, %v15930_v40, %v15929_v58  ;;  %v4839_v58 = vsel %vm4776_vm10, %v4828_v46, %v4838_v32  ;;  %v478_v40 = vld [vmem:[%s9286_s20 + $0x1f8] sm:$0xff]  ;;  %v485_v46 = vld [vmem:[%s15363_s1 + $0x20] sm:$0xff] }
 0x3c7   : > { %v4039_v4 = vsel %vm600_vm0, %v15928_v30, %v3275_v11  ;;  %3499 = vrot.lane.b32.xlu0 %v11517_v14, %s9187_s16  ;;  %3626 = vrot.lane.b32.xlu2 %v9054_v38, %s9188_s17  ;;  %v5639_v16 = vpop.f32.mrf.mxu2 }
 0x3c8   : > { %v4100_v30 = vsel %vm3721_vm8, %v4039_v4, %v3334_v29  ;;  %v12427_v11 = vadd.f32 %v5639_v16, %v5511_v21  ;;  %3565 = vrot.lane.b32.xlu1 %v12424_v6, %s9186_s15  ;;  %v4561_v4 = vsel %vm2639_vm5, %v4558_v62, %v4560_v34  ;;  %v483_v29 = vld [vmem:[%s15363_s1 + $0x10] sm:$0xff] }
 0x3c9   : > { %v12431_v38 = vpop.f32.mrf.mxu1  ;;  %v12434_v18 = vsel %vm3772_vm9, %v4100_v30, %v3440_v50  ;;  %v477_v16 = vld [vmem:[%s9286_s20 + $0x1f0] sm:$0xff]  ;;  %v12450_v50 = vpop.f32.mrf.mxu3  ;;  %v4820_v62 = vrot.slane %v4561_v4, 3  ;;  %v8378_v4 = vunpack.c.l.b16 %v12197_v45 }
 0x3ca   : > { %15931 = vst [vmem:[#allocation91_spill] sm:$0xff] %v12427_v11  ;;  %v15526_v9 = vrot.slane %v12434_v18, 3  ;;  %v578_v30 = vpack.c.bf16 %v478_v40, %v477_v16  ;;  %v15936_v16 = vld [vmem:[#allocation70_spill] sm:$0xff]  ;;  %v15937_v40 = vld [vmem:[#allocation71_spill] sm:$0xff] }
 0x3cb   : > { %15932 = vst [vmem:[#allocation51_spill] sm:$0xff] %v12450_v50  ;;  %v4821_v59 = vsel %vm4776_vm10, %v4810_v55, %v4820_v62  ;;  %v5516_v55 = vadd.f32 %v12016_v8, %v12361_v2 }
 0x3cc   : > { %5826 = vmatmul.bf16.gmra.mxu1 %v4839_v58  ;;  %v4907_v21 = vsel %vm4776_vm10, %v4896_v54, %v15526_v9  ;;  %v15934_v54 = vld [vmem:[#allocation61_spill] sm:$0xff]  ;;  %8112 = vmatmul.msk.bf16.gmra.mxu0 %vm600_vm0, %v578_v30  ;;  %v15938_v30 = vunpack.c.h.b16 %v12121_v51 }
 0x3cd   : > { %5732 = vmatmul.bf16.gmra.mxu3 %v4907_v21  ;;  %v4196_v9 = vsel %vm600_vm0, %v11667_v56, %v15934_v54  ;;  %v15935_v21 = vld [vmem:[#allocation60_spill] sm:$0xff] }
 0x3ce   : > { %v4263_v50 = vsel %vm3721_vm8, %v4196_v9, %v15935_v21  ;;  %v12476_v54 = vpack.c.b16 %v8378_v4, %v15938_v30  ;;  %v15527_v21 = vrot.slane %v11799_v12, 1  ;;  %v479_v4 = vld [vmem:[%s9286_s20 + $0x200] sm:$0xff] }
 0x3cf   : > { %957 = vperm.xlu0 %8998, %v484_v31   ;;  %952 = vperm.xlu2 %9000, %v483_v29   ;;  %v12455_v58 = vpop.f32.mrf.mxu2  ;;  %v4313_v31 = vsel %vm3772_vm9, %v4263_v50, %v15936_v16  ;;  %v9055_v29 = vld [vmem:[#allocation2 + $0x64] sm:$0xff]  }
 0x3d0   : > { %15933 = vst [vmem:[#allocation53_spill] sm:$0xff] %v12455_v58  ;;  %962 = vperm.xlu1 %8999, %v485_v46   ;;  %v4474_v56 = vsel %vm600_vm0, %v9055_v29, %v15937_v40  ;;  %v4848_v9 = vrot.slane %v4313_v31, 3  ;;  %v3002_v16 = vrot.slane %v12476_v54, 5  ;;  %v15940_v31 = vld [vmem:[#allocation49_spill] sm:$0xff]  ;;  %v480_v29 = vld [vmem:[%s9286_s20 + $0x208] sm:$0xff] }
 0x3d1   : > { %v12461_v11 = vpop.f32.mrf.mxu1  ;;  %v12472_v46 = vpop.f32.mrf.mxu3  ;;  %v4562_v45 = vrot.slane %v4474_v56, 5  ;;  %v579_v40 = vpack.c.bf16 %v480_v29, %v479_v4 }
 0x3d2   : > { %v4849_v2 = vsel %vm4776_vm10, %v4838_v32, %v4848_v9 }
 0x3d4   : > { %8261 = vmatmul.msk.bf16.gmra.mxu2 %vm3721_vm8, %v4821_v59 }
 0x3d7   : > { %3280 = vrot.lane.b32.xlu0 %v11720_v13, %s9187_s16  ;;  %3445 = vrot.lane.b32.xlu2 %v12189_v41, %s9188_s17  ;;  %v4563_v13 = vsel %vm2639_vm5, %v4560_v34, %v4562_v45  ;;  %v15528_v41 = vrot.slane %v15940_v31, 5  ;;  %v2370_v34 = vld [vmem:[#allocation3 + $0x2c] sm:$0x8] }
 0x3d8   : > { %v5644_v59 = vpop.f32.mrf.mxu2  ;;  %3339 = vrot.lane.b32.xlu1 %v15883_v1, %s9186_s15  ;;  %v15941_v1 = vrot.slane %v11732_v44, 1 }
 0x3d9   : > { %v12486_v51 = vadd.f32 %v5644_v59, %v5516_v55  ;;  %v12488_v50 = vpop.f32.mrf.mxu1  ;;  %v3004_v30 = vsel %vm2639_vm5, %v3002_v16, %v15528_v41  ;;  %v4830_v55 = vrot.slane %v4563_v13, 3  ;;  %v12505_v32 = vpop.f32.mrf.mxu3  ;;  %v15944_v13 = vld [vmem:[#allocation67_spill] sm:$0xff]  ;;  %v15946_v41 = vld [vmem:[#allocation48_spill] sm:$0xff] }
 0x3da   : > { %v4394_v56 = vsel %vm4359_vm7, %v15941_v1, %v15527_v21  ;;  %15942 = vst [vmem:[#allocation57_spill] sm:$0xff] %v12505_v32 }
 0x3db   : > { %15939 = vst [vmem:[#allocation64_spill] sm:$0xff] %v12486_v51  ;;  %v4831_v1 = vsel %vm4776_vm10, %v4820_v62, %v4830_v55  ;;  %v15947_v51 = vunpack.c.l.b16 %v15946_v41  ;;  %v15949_v62 = vld [vmem:[#allocation18_spill] sm:$0xff] }
 0x3dc   : > { %5831 = vmatmul.bf16.gmra.mxu1 %v4849_v2  ;;  %8113 = vmatmul.msk.bf16.gmra.mxu0 %vm600_vm0, %v579_v40  ;;  %v15943_v2 = vld [vmem:[#allocation62_spill] sm:$0xff]  ;;  %v9056_v40 = vld [vmem:[#allocation2 + $0x6c] sm:$0xff]  }
 0x3dd   : > { %v4199_v4 = vsel %vm600_vm0, %v11759_v39, %v15943_v2 }
 0x3de   : > { %v4265_v29 = vsel %vm3721_vm8, %v4199_v4, %v15944_v13  ;;  %v9057_v4 = vld [vmem:[#allocation3 + $0x34] sm:$0xff]  }
 0x3df   : > { %4441 = vrot.lane.b32.xlu0 %v4394_v56, %s9187_s16  ;;  %3051 = vrot.lane.b32.xlu2 %v3004_v30, %s9187_s16  ;;  %v3103_v56 = vunpack.c.l.b16 %v2370_v34  ;;  %v15945_v30 = vld [vmem:[#allocation72_spill] sm:$0xff] }
 0x3e0   : > { %3049 = vrot.lane.b32.xlu1 %v3002_v16, %s9187_s16  ;;  %v4315_v16 = vsel %vm3772_vm9, %v4265_v29, %v11561_v60  ;;  %v4477_v21 = vsel %vm600_vm0, %v9056_v40, %v15945_v30  ;;  %v12528_v39 = vpop.f32.mrf.mxu2  ;;  %v15951_v40 = vld [vmem:[#allocation23_spill] sm:$0xff] }
 0x3e1   : > { %v12511_v59 = vpop.permute.xlu2 %2689  ;;  %v12513_v44 = vpop.f32.mrf.mxu1  ;;  %v3107_v58 = vpack.c.b16 %v15947_v51, %v3103_v56  ;;  %v4858_v32 = vrot.slane %v4315_v16, 3  ;;  %15948 = vst [vmem:[#allocation68_spill] sm:$0xff] %v12528_v39  ;;  %v4564_v2 = vrot.slane %v4477_v21, 5  ;;  %v12541_v51 = vld [vmem:[#allocation2 + $0xa4] sm:$0xff]   ;;  %v15950_v21 = vrot.slane %v12401_v5, 6 }
 0x3e2   : > { %v15529_v29 = vrot.slane %v12541_v51, 6 }
 0x3e4   : > { %8262 = vmatmul.msk.bf16.gmra.mxu2 %vm3721_vm8, %v4831_v1  ;;  %v4565_v1 = vsel %vm2639_vm5, %v4562_v45, %v4564_v2  ;;  %v12553_v56 = vsel %vm3363_vm6, %v15950_v21, %v15529_v29  ;;  %v8803_v29 = vld [vmem:[#allocation3 + $0x14] sm:$0x8] }
 0x3e5   : > { %v4840_v16 = vrot.slane %v4565_v1, 3  ;;  %v9059_v1 = vld [vmem:[#allocation2 + $0x74] sm:$0xff]  }
 0x3e7   : > { %3110 = vrot.lane.b32.xlu0 %v3107_v58, %s9186_s15  ;;  %3175 = vrot.lane.b32.xlu2 %v15949_v62, %s9188_s17  ;;  %v5713_v34 = vpop.f32.mrf.mxu3  ;;  %v4859_v58 = vsel %vm4776_vm10, %v4848_v9, %v4858_v32  ;;  %v4202_v62 = vsel %vm600_vm0, %v11801_v42, %v12011_v37  ;;  %v12585_v37 = vld [vmem:[#allocation2 + $0xb8] sm:$0xff]  }
 0x3e8   : > { %v12534_v60 = vadd.f32 %v5713_v34, %v11644_v20  ;;  %3112 = vrot.lane.b32.xlu1 %v9057_v4, %s9186_s15  ;;  %v5521_v20 = vadd.f32 %v12016_v8, %v12431_v38  ;;  %v4267_v34 = vsel %vm3721_vm8, %v4202_v62, %v12048_v22  ;;  %v4841_v4 = vsel %vm4776_vm10, %v4830_v55, %v4840_v16  ;;  %v12592_v55 = vpop.permute.xlu0 %4435 }
 0x3e9   : > { %v12537_v13 = vpop.permute.xlu2 %2871  ;;  %v12539_v41 = vpop.f32.mrf.mxu1 }
 0x3ec   : > { %5836 = vmatmul.bf16.gmra.mxu1 %v4859_v58  ;;  %v12575_v58 = vsel %vm3772_vm9, %v4267_v34, %v12081_v48 }
 0x3ed   : > { %v4868_v42 = vrot.slane %v12575_v58, 3  ;;  %v15530_v58 = vrot.slane %v11878_v43, 1 }
 0x3ef   : > { %3177 = vrot.lane.b32.xlu0 %v15951_v40, %s9188_s17  ;;  %3567 = vrot.lane.b32.xlu2 %v12553_v56, %s9186_s15  ;;  %v5649_v9 = vpop.f32.mrf.mxu2  ;;  %v5523_v40 = vadd.f32 %v12016_v8, %v12461_v11 }
 0x3f0   : > { %v12559_v45 = vadd.f32 %v5649_v9, %v5521_v20  ;;  %3501 = vrot.lane.b32.xlu1 %v11594_v53, %s9187_s16  ;;  %v15953_v20 = vld [vmem:[#allocation74_spill] sm:$0xff] }
 0x3f1   : > { %v12563_v38 = vpop.permute.xlu2 %3561  ;;  %v12565_v30 = vpop.f32.mrf.mxu1  ;;  %v12580_v21 = vsel %vm600_vm0, %v9059_v1, %v15953_v20  ;;  %v4205_v1 = vsel %vm600_vm0, %v11919_v35, %v12182_v26  ;;  %v15955_v20 = vld [vmem:[#allocation27_spill] sm:$0xff] }
 0x3f2   : > { %15952 = vst [vmem:[#allocation55_spill] sm:$0xff] %v12559_v45  ;;  %v4566_v22 = vrot.slane %v12580_v21, 5  ;;  %v15956_v21 = vrot.slane %v15955_v20, 5  ;;  %v4269_v26 = vsel %vm3721_vm8, %v4205_v1, %v12150_v33  ;;  %v9061_v33 = vld [vmem:[#allocation2 + $0x7c] sm:$0xff]   ;;  %v15959_v1 = vld [vmem:[#allocation79_spill] sm:$0xff] }
 0x3f4   : > { %8263 = vmatmul.msk.bf16.gmra.mxu2 %vm3721_vm8, %v4841_v4  ;;  %v4869_v4 = vsel %vm4776_vm10, %v4858_v32, %v4868_v42  ;;  %v15958_v32 = vrot.slane %v11799_v12, 1  ;;  %v12636_v12 = vsel %vm3772_vm9, %v4269_v26, %v12134_v10 }
 0x3f6   : > { %v4396_v35 = vsel %vm4359_vm7, %v15958_v32, %v15530_v58  ;;  %v12642_v32 = vsel %vm600_vm0, %v9061_v33, %v15959_v1 }
 0x3f7   : > { %3628 = vrot.lane.b32.xlu0 %v12585_v37, %s9188_s17  ;;  %3341 = vrot.lane.b32.xlu2 %v15905_v27, %s9186_s15  ;;  %v5651_v48 = vpop.f32.mrf.mxu2  ;;  %v12605_v27 = vsel %vm2639_vm5, %v4564_v2, %v4566_v22  ;;  %v15534_v26 = vrot.slane %v12642_v32, 5 }
 0x3f8   : > { %v12594_v9 = vadd.f32 %v5651_v48, %v5523_v40  ;;  %3282 = vrot.lane.b32.xlu1 %v11817_v23, %s9187_s16  ;;  %v2688_v34 = vpop.permute.xlu1 %2687  ;;  %v15957_v23 = vrot.slane %v15940_v31, 5  ;;  %v15531_v48 = vrot.slane %v12605_v27, 3  ;;  %v8940_v31 = vld [vmem:[#allocation3 + $0x14] sm:$0xf0]  }
 0x3f9   : > { %v12598_v11 = vpop.permute.xlu2 %3335  ;;  %v12600_v62 = vpop.f32.mrf.mxu1  ;;  %v8804_v20 = vor.u32 %v8940_v31, %v8803_v29  ;;  %v8941_v31 = vld [vmem:[#allocation3 + $0x1c] sm:$0xff]  }
 0x3fa   : > { %15954 = vst [vmem:[#allocation59_spill] sm:$0xff] %v12594_v9  ;;  %v3006_v40 = vsel %vm2639_vm5, %v15957_v23, %v15956_v21  ;;  %v4851_v23 = vsel %vm4776_vm10, %v4840_v16, %v15531_v48  ;;  %v9062_v16 = vld [vmem:[#allocation3 + $0x3c] sm:$0xff]  }
 0x3fc   : > { %5841 = vmatmul.bf16.gmra.mxu1 %v4869_v4 }
 0x3ff   : > { %3447 = vrot.lane.b32.xlu0 %v12343_v63, %s9188_s17  ;;  %3053 = vrot.lane.b32.xlu2 %v3006_v40, %s9187_s16  ;;  %v3648_v40 = vsel %vm600_vm0, %v8804_v20, %v2688_v34  ;;  %v15535_v34 = vrot.slane %v12636_v12, 3  ;;  %v3651_v20 = vsel %vm600_vm0, %v8941_v31, %v12511_v59  ;;  %v12670_v59 = vld [vmem:[#allocation2 + $0xac] sm:$0xff]   ;;  %v12680_v31 = vsel %vm2639_vm5, %v4566_v22, %v15534_v26  ;;  %v12695_v22 = vpop.f32.mrf.mxu3 }
 0x400   : > { %4443 = vrot.lane.b32.xlu1 %v4396_v35, %s9187_s16  ;;  %v5526_v35 = vadd.f32 %v12016_v8, %v12488_v50  ;;  %v15961_v50 = vld [vmem:[#allocation26_spill] sm:$0xff]  ;;  %15963 = vst [vmem:[#allocation66_spill] sm:$0xff] %v12695_v22 }
 0x401   : > { %v2811_v2 = vpop.permute.xlu0 %2810  ;;  %v12627_v4 = vpop.permute.xlu2 %2691 }
 0x402   : > { %v12629_v21 = vpop.f32.mrf.mxu1  ;;  %v2813_v63 = vpop.permute.xlu1 %2812  ;;  %v3723_v29 = vsel %vm3721_vm8, %v3648_v40, %v2811_v2 }
 0x403   : > { %v3774_v2 = vsel %vm3772_vm9, %v3723_v29, %v12537_v13  ;;  %v3725_v40 = vsel %vm3721_vm8, %v3651_v20, %v2813_v63  ;;  %v15533_v13 = vrot.slane %v12670_v59, 6  ;;  %v4879_v63 = vsel %vm4776_vm10, %v4868_v42, %v15535_v34  ;;  %v9067_v34 = vld [vmem:[%s15366_s4 + $0xb0] sm:$0xff] }
 0x404   : > { %8264 = vmatmul.msk.bf16.gmra.mxu2 %vm3721_vm8, %v4851_v23  ;;  %v4777_v29 = vrot.slane %v3774_v2, 3  ;;  %v5528_v20 = vadd.f32 %v12016_v8, %v12513_v44  ;;  %v15962_v2 = vrot.slane %v12541_v51, 6 }
 0x406   : > { %v12692_v42 = vsel %vm3363_vm6, %v15962_v2, %v15533_v13 }
 0x407   : > { %3114 = vrot.lane.b32.xlu0 %v9062_v16, %s9186_s15  ;;  %3503 = vrot.lane.b32.xlu2 %v11655_v0, %s9187_s16  ;;  %v5654_v10 = vpop.f32.mrf.mxu2 }
 0x408   : > { %v12656_v23 = vadd.f32 %v5654_v10, %v5526_v35  ;;  %3179 = vrot.lane.b32.xlu1 %v15961_v50, %s9188_s17  ;;  %v15536_v50 = vrot.slane %v12680_v31, 3 }
 0x409   : > { %v2874_v33 = vpop.permute.xlu0 %2873  ;;  %v12661_v1 = vpop.permute.xlu2 %3497 }
 0x40a   : > { %15960 = vst [vmem:[#allocation65_spill] sm:$0xff] %v12656_v23  ;;  %v12664_v16 = vsel %vm3772_vm9, %v3725_v40, %v2874_v33  ;;  %v12666_v58 = vpop.f32.mrf.mxu1  ;;  %v12668_v48 = vpop.permute.xlu1 %3495  ;;  %v12699_v40 = vld [vmem:[#allocation2 + $0x98] sm:$0xff]   ;;  %v4208_v33 = vsel %vm600_vm0, %v12230_v7, %v12217_v49  ;;  %v9068_v7 = vld [vmem:[#allocation2 + $0x84] sm:$0xff]   ;;  %v9080_v23 = vld [vmem:[#allocation2 + $0x90] sm:$0xff]  }
 0x40b   : > { %v15532_v35 = vrot.slane %v12664_v16, 3  ;;  %v4271_v49 = vsel %vm3721_vm8, %v4208_v33, %v12227_v24  ;;  %v12739_v24 = vsel %vm600_vm0, %v9068_v7, %v11971_v25  ;;  %v15966_v33 = vld [vmem:[#allocation11_spill] sm:$0xff] }
 0x40c   : > { %5846 = vmatmul.bf16.gmra.mxu1 %v4879_v63  ;;  %v12708_v63 = vld [vmem:[#allocation2 + $0xc0] sm:$0xff]  }
 0x40d   : > { %v4779_v10 = vsel %vm4776_vm10, %v4777_v29, %v15532_v35 }
 0x40e   : > { %5414 = vmatmul.bf16.vlgmr.msrb.gmra.mxu0 %v4779_v10  ;;  %v9066_v10 = vld [vmem:[%s15366_s4 + $0xb8] sm:$0xff] }
 0x40f   : > { %3569 = vrot.lane.b32.xlu0 %v12692_v42, %s9186_s15  ;;  %3284 = vrot.lane.b32.xlu2 %v12699_v40, %s9187_s16  ;;  %v5656_v44 = vpop.f32.mrf.mxu2 }
 0x410   : > { %v12706_v29 = vadd.f32 %v5656_v44, %v5528_v20  ;;  %3630 = vrot.lane.b32.xlu1 %v12708_v63, %s9188_s17  ;;  %5664 = vmatpush.bf16.msrb.mxu0 %v9066_v10  ;;  %v15965_v20 = vrot.slane %v12605_v27, 3  ;;  %v12731_v10 = vsel %vm3772_vm9, %v4271_v49, %v12291_v3  ;;  %v5531_v27 = vadd.f32 %v12016_v8, %v12539_v41 }
 0x411   : > { %v12715_v2 = vpop.permute.xlu0 %3622  ;;  %v12717_v35 = vpop.permute.xlu2 %3278  ;;  %v15967_v3 = vrot.slane %v11950_v28, 1  ;;  %v15968_v49 = vrot.slane %v11878_v43, 1  ;;  %v15540_v41 = vrot.slane %v12739_v24, 5  ;;  %v9069_v43 = vld [vmem:[%s15366_s4 + $0xa8] sm:$0xff] }
 0x412   : > { %15964 = vst [vmem:[#allocation69_spill] sm:$0xff] %v12706_v29  ;;  %v12719_v13 = vpop.f32.mrf.mxu1  ;;  %v3277_v26 = vpop.permute.xlu1 %3276  ;;  %v4861_v44 = vsel %vm4776_vm10, %v15965_v20, %v15536_v50  ;;  %v15537_v50 = vrot.slane %v12731_v10, 3  ;;  %v4217_v29 = vsel %vm600_vm0, %v9080_v23, %v12661_v1 }
 0x413   : > { %v4042_v20 = vsel %vm600_vm0, %v15966_v33, %v3277_v26 }
 0x414   : > { %8265 = vmatmul.msk.bf16.gmra.mxu2 %vm3721_vm8, %v4861_v44  ;;  %5665 = vmatpush.bf16.msrb.mxu0 %v9067_v34  ;;  %v4398_v44 = vsel %vm4359_vm7, %v15968_v49, %v15967_v3  ;;  %v4102_v33 = vsel %vm3721_vm8, %v4042_v20, %v12598_v11  ;;  %v15971_v20 = vrot.slane %v12642_v32, 5  ;;  %v5533_v32 = vadd.f32 %v12016_v8, %v12565_v30  ;;  %v9074_v30 = vld [vmem:[%s15366_s4 + $0x98] sm:$0xff] }
 0x417   : > { %3343 = vrot.lane.b32.xlu0 %v11517_v14, %s9186_s15  ;;  %4445 = vrot.lane.b32.xlu2 %v4398_v44, %s9187_s16  ;;  %v5659_v25 = vpop.f32.mrf.mxu2  ;;  %v5718_v34 = vpop.f32.mrf.mxu3  ;;  %v15970_v44 = vrot.slane %v12636_v12, 3  ;;  %v15972_v12 = vrot.slane %v12434_v18, 3 }
 0x418   : > { %v12755_v7 = vadd.f32 %v5659_v25, %v5531_v27  ;;  %v12758_v26 = vadd.f32 %v5718_v34, %v11697_v61  ;;  %3449 = vrot.lane.b32.xlu1 %v12424_v6, %s9188_s17  ;;  %5666 = vmatpush.bf16.msrb.mxu0 %v9069_v43  ;;  %v12782_v34 = vld [vmem:[#allocation2 + $0xb4] sm:$0xff]   ;;  %v12790_v43 = vsel %vm2639_vm5, %v15971_v20, %v15540_v41  ;;  %v9073_v20 = vld [vmem:[#allocation2 + $0xc8] sm:$0xff]   ;;  %v15978_v41 = vld [vmem:[#allocation122_spill] sm:$0xff] }
 0x419   : > { %v3442_v14 = vpop.permute.xlu0 %3441  ;;  %v12767_v3 = vpop.permute.xlu2 %4439  ;;  %v4889_v25 = vsel %vm4776_vm10, %v15970_v44, %v15537_v50  ;;  %v15538_v11 = vrot.slane %v12782_v34, 6  ;;  %v9072_v44 = vld [vmem:[#allocation2 + $0x80] sm:$0xff]  }
 0x41a   : > { %15969 = vst [vmem:[#allocation61_spill] sm:$0xff] %v12755_v7  ;;  %v12770_v27 = vsel %vm3772_vm9, %v4102_v33, %v3442_v14  ;;  %v12772_v49 = vpop.f32.mrf.mxu1  ;;  %v12774_v61 = vpop.permute.xlu1 %4437  ;;  %v9071_v14 = vld [vmem:[%s15366_s4 + $0xa0] sm:$0xff]  ;;  %v4211_v50 = vsel %vm600_vm0, %v9072_v44, %v12377_v36  ;;  %v3654_v44 = vsel %vm600_vm0, %v12476_v54, %v12627_v4 }
 0x41b   : > { %v15539_v6 = vrot.slane %v12770_v27, 3 }
 0x41c   : > { %5851 = vmatmul.bf16.gmra.mxu1 %v4889_v25  ;;  %5667 = vmatpush.bf16.msrb.mxu0 %v9071_v14  ;;  %v15541_v25 = vrot.slane %v12790_v43, 3 }
 0x41d   : > { %v4917_v33 = vsel %vm4776_vm10, %v15972_v12, %v15539_v6  ;;  %v15974_v12 = vrot.slane %v12670_v59, 6 }
 0x41e   : > { %5737 = vmatmul.bf16.gmra.mxu3 %v4917_v33  ;;  %v4273_v33 = vsel %vm3721_vm8, %v4211_v50, %v12373_v17  ;;  %v15977_v50 = vld [vmem:[#allocation4_spill] sm:$0xff] }
 0x41f   : > { %3505 = vrot.lane.b32.xlu0 %v11711_v19, %s9187_s16  ;;  %3632 = vrot.lane.b32.xlu2 %v9073_v20, %s9188_s17  ;;  %v5661_v14 = vpop.f32.mrf.mxu2  ;;  %v12808_v18 = vpop.f32.mrf.mxu3  ;;  %v12815_v36 = vsel %vm3363_vm6, %v15974_v12, %v15538_v11  ;;  %v12844_v54 = vsel %vm3772_vm9, %v4273_v33, %v12375_v57  ;;  %v543_v57 = vld [vmem:[%s15363_s1 + $0x1f0] sm:$0xff] }
 0x420   : > { %15973 = vst [vmem:[#allocation60_spill] sm:$0xff] %v12808_v18  ;;  %v12817_v8 = vadd.f32 %v5661_v14, %v5533_v32  ;;  %3571 = vrot.lane.b32.xlu1 %v12815_v36, %s9186_s15  ;;  %5668 = vmatpush.bf16.msrb.mxu0 %v9074_v30  ;;  %v15976_v30 = vrot.slane %v12680_v31, 3  ;;  %v9075_v31 = vld [vmem:[%s15366_s4 + $0x90] sm:$0xff] }
 0x421   : > { %v2815_v20 = vpop.permute.xlu0 %2814  ;;  %v12829_v12 = vpop.permute.xlu2 %3626 }
 0x422   : > { %15975 = vst [vmem:[#allocation70_spill] sm:$0xff] %v12817_v8  ;;  %v3727_v32 = vsel %vm3721_vm8, %v3654_v44, %v2815_v20  ;;  %v12832_v14 = vpop.f32.mrf.mxu1  ;;  %v2876_v11 = vpop.permute.xlu1 %2875  ;;  %v4871_v17 = vsel %vm4776_vm10, %v15976_v30, %v15541_v25  ;;  %v715_v8 = vadd.f32 %v15978_v41, %v15977_v50  ;;  %v15979_v44 = vld [vmem:[#allocation41_spill] sm:$0xff]  ;;  %v15981_v20 = vld [vmem:[#allocation42_spill] sm:$0xff]  ;;  %v4898_v30 = vrot.slane %v12844_v54, 3 }
 0x423   : > { %v3778_v6 = vsel %vm3772_vm9, %v3727_v32, %v2876_v11  ;;  %v542_v11 = vld [vmem:[%s15363_s1 + $0x1e8] sm:$0xff]  ;;  %v12856_v41 = vsel %vm600_vm0, %v12163_v15, %v15979_v44 }
 0x424   : > { %v4792_v4 = vrot.slane %v3778_v6, 3  ;;  %8266 = vmatmul.msk.bf16.gmra.mxu2 %vm3721_vm8, %v4871_v17  ;;  %5669 = vmatpush.bf16.msrb.mxu0 %v9075_v31  ;;  %v15980_v6 = vrot.slane %v12664_v16, 3  ;;  %v876_v17 = vmax.f32 %v715_v8, 0.0  ;;  %v4572_v15 = vrot.slane %v12856_v41, 5  ;;  %v15982_v31 = vld [vmem:[#allocation107_spill] sm:$0xff]  ;;  %v15983_v8 = vld [vmem:[#allocation9_spill] sm:$0xff] }
 0x425   : > { %v15542_v41 = vrot.slane %v15983_v8, 1 }
 0x426   : > { %v4793_v33 = vsel %vm4776_vm10, %v15980_v6, %v4792_v4 }
 0x427   : > { %1247 = vperm.xlu0 %8998, %v542_v11   ;;  %3286 = vrot.lane.b32.xlu2 %v15981_v20, %s9187_s16  ;;  %v12866_v32 = vpop.f32.mrf.mxu2  ;;  %v9076_v11 = vld [vmem:[%s15366_s4 + $0x88] sm:$0xff] }
 0x428   : > { %5419 = vmatmul.bf16.gmra.mxu0 %v4793_v33  ;;  %1252 = vperm.xlu1 %8999, %v543_v57   ;;  %v5723_v50 = vpop.f32.mrf.mxu3  ;;  %v15984_v57 = vrot.slane %v12731_v10, 3 }
 0x429   : > { %v12871_v44 = vadd.f32 %v5723_v50, %v15982_v31  ;;  %v3564_v16 = vpop.permute.xlu0 %3563  ;;  %v953_v25 = vpop.permute.xlu2 %952  ;;  %5670 = vmatpush.bf16.msrb.mxu0 %v9076_v11  ;;  %v15985_v50 = vrot.slane %v12739_v24, 5 }
 0x42a   : > { %v1272_v6 = vmul.f32 %v953_v25, %v876_v17  ;;  %v12876_v20 = vpop.f32.mrf.mxu1  ;;  %v12878_v54 = vpop.permute.xlu1 %3624  ;;  %v4899_v33 = vsel %vm4776_vm10, %v15984_v57, %v4898_v30  ;;  %v9077_v25 = vld [vmem:[%s15366_s4 + $0x80] sm:$0xff]  ;;  %v15986_v17 = vrot.slane %v11950_v28, 1 }
 0x42b   : > { %v4573_v31 = vsel %vm2639_vm5, %v15985_v50, %v4572_v15 }
 0x42c   : > { %v1338_v7 = vpack.c.bf16 %v1272_v6, %v1272_v6  ;;  %5856 = vmatmul.bf16.gmra.mxu1 %v4899_v33  ;;  %v4400_v10 = vsel %vm4359_vm7, %v15986_v17, %v15542_v41  ;;  %v4880_v11 = vrot.slane %v4573_v31, 3  ;;  %v9078_v6 = vld [vmem:[#allocation2 + $0x88] sm:$0xff]  }
 0x42d   : > { %5671 = vmatpush.bf16.msrb.mxu0 %v9077_v25  ;;  %v4214_v57 = vsel %vm600_vm0, %v9078_v6, %v12668_v48  ;;  %v15988_v48 = vrot.slane %v12790_v43, 3  ;;  %v15989_v6 = vld [vmem:[#allocation40_spill] sm:$0xff] }
 0x42e   : > { %1405 = vst.msk [vmem:[#allocation2 + $0x8] sm:$0xf] %vm1402_vm1, %v1338_v7  ;;  %v15987_v7 = vld [vmem:[#allocation29_spill] sm:$0xff]  ;;  %v4275_v25 = vsel %vm3721_vm8, %v4214_v57, %v12563_v38  ;;  %v15990_v38 = vrot.slane %v12770_v27, 3  ;;  %v12943_v27 = vld [vmem:[%s15365_s3] ss:$0 sm:$0xff] }
 0x42f   : > { %3345 = vrot.lane.b32.xlu0 %v11594_v53, %s9186_s15  ;;  %4447 = vrot.lane.b32.xlu2 %v4400_v10, %s9187_s16  ;;  %v12899_v24 = vpop.f32.mrf.mxu2  ;;  %v4045_v28 = vsel %vm600_vm0, %v15987_v7, %v12717_v35  ;;  %v4325_v10 = vsel %vm3772_vm9, %v4275_v25, %v12715_v2  ;;  %v4492_v7 = vsel %vm600_vm0, %v12311_v47, %v15989_v6 }
 0x430   : > { %3451 = vrot.lane.b32.xlu1 %v12553_v56, %s9188_s17  ;;  %v4881_v56 = vsel %vm4776_vm10, %v15988_v48, %v4880_v11  ;;  %v4908_v43 = vrot.slane %v4325_v10, 3  ;;  %v4574_v25 = vrot.slane %v4492_v7, 5  ;;  %v15995_v10 = vld [vmem:[#allocation5_spill] sm:$0xff]  ;;  %v15996_v7 = vld [vmem:[#allocation6_spill] sm:$0xff] }
 0x431   : > { %v3338_v33 = vpop.permute.xlu0 %3337  ;;  %v3446_v48 = vpop.permute.xlu2 %3445 }
 0x432   : > { %v4104_v50 = vsel %vm3721_vm8, %v4045_v28, %v3338_v33  ;;  %v12909_v31 = vpop.f32.mrf.mxu1  ;;  %v3444_v53 = vpop.permute.xlu1 %3443  ;;  %v15992_v33 = vld [vmem:[#allocation50_spill] sm:$0xff] }
 0x433   : > { %v12914_v17 = vsel %vm3772_vm9, %v4104_v50, %v3444_v53  ;;  %v12931_v28 = vpop.f32.mrf.mxu3  ;;  %v15993_v50 = vrot.slane %v15992_v33, 3  ;;  %v720_v33 = vadd.f32 %v12943_v27, %v15996_v7 }
 0x434   : > { %v15543_v35 = vrot.slane %v12914_v17, 3  ;;  %8267 = vmatmul.msk.bf16.gmra.mxu2 %vm3721_vm8, %v4881_v56  ;;  %15991 = vst [vmem:[#allocation71_spill] sm:$0xff] %v12931_v28 }
 0x435   : > { %v4803_v2 = vsel %vm4776_vm10, %v4792_v4, %v15993_v50  ;;  %v4909_v4 = vsel %vm4776_vm10, %v4898_v30, %v4908_v43  ;;  %v878_v30 = vmax.f32 %v720_v33, 0.0  ;;  %v16000_v33 = vld [vmem:[#allocation87_spill] sm:$0xff] }
 0x436   : > { %v4927_v57 = vsel %vm4776_vm10, %v15990_v38, %v15543_v35  ;;  %v717_v38 = vadd.f32 %v12943_v27, %v15995_v10  ;;  %v15997_v10 = vld [vmem:[#allocation112_spill] sm:$0xff] }
 0x437   : > { %5742 = vmatmul.bf16.gmra.mxu3 %v4927_v57  ;;  %v12936_v53 = vpop.f32.mrf.mxu2  ;;  %v12949_v57 = vsel %vm2639_vm5, %v4572_v15, %v4574_v25  ;;  %v4277_v15 = vsel %vm3721_vm8, %v4217_v29, %v3564_v16  ;;  %v12976_v29 = vsel %vm600_vm0, %v12401_v5, %v12323_v52 }
 0x438   : > { %5424 = vmatmul.bf16.gmra.mxu0 %v4803_v2  ;;  %v877_v50 = vmax.f32 %v717_v38, 0.0  ;;  %v4890_v2 = vrot.slane %v12949_v57, 3  ;;  %v12969_v18 = vsel %vm3772_vm9, %v4277_v15, %v12878_v54  ;;  %v15999_v54 = vld [vmem:[#allocation88_spill] sm:$0xff] }
 0x439   : > { %v3500_v47 = vpop.permute.xlu0 %3499  ;;  %v12964_v7 = vpop.permute.xlu2 %3051  ;;  %v4918_v16 = vrot.slane %v12969_v18, 3 }
 0x43a   : > { %v12938_v56 = vpop.f32.mrf.mxu1  ;;  %v3566_v6 = vpop.permute.xlu1 %3565  ;;  %v4891_v28 = vsel %vm4776_vm10, %v4880_v11, %v4890_v2 }
 0x43b   : > { %15994 = vst [vmem:[#allocation49_spill] sm:$0xff] %v12938_v56  ;;  %v4919_v18 = vsel %vm4776_vm10, %v4908_v43, %v4918_v16  ;;  %v16016_v56 = vld [vmem:[#allocation100_spill] sm:$0xff] }
 0x43c   : > { %5861 = vmatmul.bf16.gmra.mxu1 %v4909_v4 }
 0x43f   : > { %v5728_v41 = vpop.f32.mrf.mxu3  ;;  %v12954_v35 = vpop.f32.mrf.mxu2 }
 0x440   : > { %v12959_v45 = vadd.f32 %v5728_v41, %v15997_v10 }
 0x441   : > { %v958_v4 = vpop.permute.xlu0 %957 }
 0x442   : > { %v1273_v9 = vmul.f32 %v958_v4, %v877_v50  ;;  %v12962_v39 = vpop.f32.mrf.mxu1  ;;  %v963_v38 = vpop.permute.xlu1 %962  ;;  %v16001_v50 = vld [vmem:[#allocation78_spill] sm:$0xff]  ;;  %v2378_v4 = vld [vmem:[#allocation2 + $0x8] sm:$0x8] }
 0x443   : > { %15998 = vst [vmem:[#allocation62_spill] sm:$0xff] %v12962_v39  ;;  %v1274_v57 = vmul.f32 %v963_v38, %v878_v30 }
 0x444   : > { %v1339_v23 = vpack.c.bf16 %v1273_v9, %v1273_v9  ;;  %8268 = vmatmul.msk.bf16.gmra.mxu2 %vm3721_vm8, %v4891_v28  ;;  %v5699_v9 = vadd.f32 %v16000_v33, %v15999_v54  ;;  %v4576_v28 = vrot.slane %v12976_v29, 5  ;;  %v3240_v54 = vunpack.c.l.b16 %v2378_v4 }
 0x445   : > { %v1340_v1 = vpack.c.bf16 %v1274_v57, %v1274_v57  ;;  %v4220_v33 = vsel %vm600_vm0, %v12699_v40, %v3500_v47 }
 0x446   : > { %1406 = vst.msk [vmem:[#allocation2 + $0xc] sm:$0xf] %vm1402_vm1, %v1339_v23  ;;  %v12992_v38 = vsel %vm2639_vm5, %v4574_v25, %v4576_v28  ;;  %v3176_v23 = vpop.permute.xlu2 %3175  ;;  %v4279_v40 = vsel %vm3721_vm8, %v4220_v33, %v3566_v6  ;;  %v13028_v6 = vsel %vm600_vm0, %v12541_v51, %v12592_v55 }
 0x447   : > { %1407 = vst.msk [vmem:[#allocation2 + $0x10] sm:$0xf] %vm1402_vm1, %v1340_v1  ;;  %v12980_v41 = vpop.f32.mrf.mxu2  ;;  %v15545_v43 = vrot.slane %v12992_v38, 3 }
 0x449   : > { %v3281_v11 = vpop.permute.xlu0 %3280 }
 0x44a   : > { %v4048_v10 = vsel %vm600_vm0, %v16001_v50, %v3281_v11  ;;  %v5827_v30 = vpop.f32.mrf.mxu1  ;;  %v3340_v15 = vpop.permute.xlu1 %3339 }
 0x44b   : > { %v12987_v52 = vadd.f32 %v5827_v30, %v5699_v9  ;;  %v4106_v5 = vsel %vm3721_vm8, %v4048_v10, %v3340_v15 }
 0x44c   : > { %v12995_v57 = vsel %vm3772_vm9, %v4106_v5, %v3446_v48  ;;  %5866 = vmatmul.bf16.gmra.mxu1 %v4919_v18  ;;  %v16002_v48 = vrot.slane %v12914_v17, 3  ;;  %v4901_v17 = vsel %vm4776_vm10, %v4890_v2, %v15545_v43 }
 0x44d   : > { %v15544_v1 = vrot.slane %v12995_v57, 3  ;;  %v2379_v29 = vld [vmem:[#allocation2 + $0xc] sm:$0xf] }
 0x44e   : > { %v2383_v11 = vld [vmem:[#allocation2 + $0xc] sm:$0xe]  ;;  %v8631_v9 = vld [vmem:[#allocation2 + $0x10] sm:$0xff]   ;;  %v3241_v50 = vunpack.c.l.b16 %v2379_v29 }
 0x44f   : > { %v3359_v10 = vunpack.c.l.b16 %v2383_v11  ;;  %3250 = vrot.lane.b32.xlu1 %v8631_v9, %s9187_s16  ;;  %v8574_v25 = vunpack.c.l.b16 %v8631_v9  ;;  %v4937_v30 = vsel %vm4776_vm10, %v16002_v48, %v15544_v1  ;;  %v13007_v15 = vpop.f32.mrf.mxu2  ;;  %v13018_v48 = vld [vmem:[#allocation2 + $0x14] sm:$0xff] }
 0x450   : > { %5747 = vmatmul.bf16.gmra.mxu3 %v4937_v30  ;;  %v3245_v4 = vpack.c.b16 %v3241_v50, %v3240_v54  ;;  %v13022_v54 = vsel %vm3772_vm9, %v4279_v40, %v12829_v12  ;;  %v15546_v12 = vrot.slane %v13018_v48, 5  ;;  %v16005_v40 = vld [vmem:[#allocation21_spill] sm:$0xff] }
 0x451   : > { %v3298_v47 = vpack.c.b16 %v8574_v25, %v3241_v50  ;;  %v3361_v5 = vpack.c.b16 %v8574_v25, %v3359_v10  ;;  %v13010_v18 = vpop.permute.xlu0 %4441  ;;  %v15548_v50 = vrot.slane %v13022_v54, 3  ;;  %v3568_v10 = vpop.permute.xlu2 %3567  ;;  %v4578_v25 = vrot.slane %v13028_v6, 5 }
 0x452   : > { %v13012_v29 = vpop.f32.mrf.mxu1  ;;  %v3050_v11 = vpop.permute.xlu1 %3049  ;;  %3248 = vrot.lane.b32.xlu0 %v3245_v4, %s9187_s16  ;;  %v16004_v4 = vld [vmem:[#allocation94_spill] sm:$0xff] }
 0x453   : > { %16003 = vst [vmem:[#allocation67_spill] sm:$0xff] %v13012_v29  ;;  %v3301_v9 = vrot.slane %v3298_v47, 5  ;;  %v3364_v33 = vrot.slane %v3361_v5, 6  ;;  %v5704_v47 = vadd.f32 %v16005_v40, %v16004_v4  ;;  %v4929_v6 = vsel %vm4776_vm10, %v4918_v16, %v15548_v50  ;;  %v16006_v4 = vld [vmem:[#allocation16_spill] sm:$0xff]  ;;  %v16009_v50 = vld [vmem:[#allocation106_spill] sm:$0xff] }
 0x454   : > { %8269 = vmatmul.msk.bf16.gmra.mxu2 %vm3721_vm8, %v4901_v17  ;;  %v15547_v17 = vrot.slane %v13018_v48, 6  ;;  %v13050_v43 = vsel %vm2639_vm5, %v4576_v28, %v4578_v25  ;;  %v3825_v40 = vsel %vm600_vm0, %v16006_v4, %v3050_v11  ;;  %v16007_v11 = vld [vmem:[#allocation17_spill] sm:$0xff] }
 0x455   : > { %3307 = vrot.lane.b32.xlu2 %v3301_v9, %s9186_s15  ;;  %v3303_v51 = vsel %vm2639_vm5, %v3301_v9, %v15546_v12  ;;  %v4910_v16 = vrot.slane %v13050_v43, 3  ;;  %v16010_v12 = vrot.slane %v12992_v38, 3 }
 0x456   : > { %v3366_v9 = vsel %vm3363_vm6, %v3364_v33, %v15547_v17 }
 0x457   : > { %3413 = vrot.lane.b32.xlu1 %v3364_v33, %s9188_s17  ;;  %v13033_v2 = vpop.f32.mrf.mxu2  ;;  %v13069_v33 = vld [vmem:[#allocation2 + $0xbc] sm:$0xff]  }
 0x459   : > { %v3111_v30 = vpop.permute.xlu0 %3110  ;;  %v3342_v17 = vpop.permute.xlu2 %3341 }
 0x45a   : > { %v5832_v55 = vpop.f32.mrf.mxu1  ;;  %v3113_v5 = vpop.permute.xlu1 %3112  ;;  %3309 = vrot.lane.b32.xlu0 %v3303_v51, %s9186_s15  ;;  %v3899_v51 = vsel %vm3721_vm8, %v3825_v40, %v3111_v30 }
 0x45b   : > { %v13044_v1 = vadd.f32 %v5832_v55, %v5704_v47  ;;  %v544_v47 = vld [vmem:[%s15363_s1 + $0x1f8] sm:$0xff]  ;;  %v3828_v55 = vsel %vm600_vm0, %v16007_v11, %v12964_v7  ;;  %v13080_v7 = vld [vmem:[#allocation2 + $0xe8] sm:$0xff]  }
 0x45c   : > { %5871 = vmatmul.bf16.gmra.mxu1 %v4929_v6  ;;  %v3949_v6 = vsel %vm3772_vm9, %v3899_v51, %v3176_v23  ;;  %v3901_v30 = vsel %vm3721_vm8, %v3828_v55, %v3113_v5  ;;  %v9180_v23 = vld [vmem:[#allocation2 + $0xe4] sm:$0xf0]   ;;  %v4911_v5 = vsel %vm4776_vm10, %v16010_v12, %v4910_v16  ;;  %v16011_v55 = vrot.slane %v13069_v33, 6  ;;  %v9083_v12 = vld [vmem:[#allocation2 + $0xa0] sm:$0xff]  }
 0x45d   : > { %3415 = vrot.lane.b32.xlu2 %v3366_v9, %s9188_s17  ;;  %v4780_v51 = vrot.slane %v3949_v6, 3 }
 0x45f   : > { %1257 = vperm.xlu1 %8999, %v544_v47   ;;  %v13063_v28 = vpop.f32.mrf.mxu2 }
 0x461   : > { %v3178_v40 = vpop.permute.xlu0 %3177 }
 0x462   : > { %v13074_v9 = vsel %vm3772_vm9, %v3901_v30, %v3178_v40  ;;  %v13076_v43 = vpop.f32.mrf.mxu1  ;;  %v3502_v47 = vpop.permute.xlu1 %3501  ;;  %3507 = vrot.lane.b32.xlu0 %v16009_v50, %s9187_s16  ;;  %v16012_v30 = vrot.slane %v12782_v34, 6 }
 0x463   : > { %16008 = vst [vmem:[#allocation72_spill] sm:$0xff] %v13076_v43  ;;  %v15549_v22 = vrot.slane %v13074_v9, 3  ;;  %v13097_v43 = vsel %vm600_vm0, %v12670_v59, %v12774_v61  ;;  %v4223_v6 = vsel %vm600_vm0, %v9083_v12, %v3502_v47 }
 0x464   : > { %8270 = vmatmul.msk.bf16.gmra.mxu2 %vm3721_vm8, %v4911_v5  ;;  %v13092_v40 = vsel %vm3363_vm6, %v16012_v30, %v16011_v55  ;;  %v16013_v5 = vld [vmem:[#allocation93_spill] sm:$0xff]  ;;  %v16014_v55 = vld [vmem:[#allocation43_spill] sm:$0xff]  ;;  %v4580_v59 = vrot.slane %v13097_v43, 5  ;;  %v4281_v29 = vsel %vm3721_vm8, %v4223_v6, %v3568_v10 }
 0x465   : > { %3573 = vrot.lane.b32.xlu2 %v13092_v40, %s9186_s15  ;;  %v4782_v38 = vsel %vm4776_vm10, %v4780_v51, %v15549_v22  ;;  %v13106_v39 = vor.u32 %v9180_v23, %v16013_v5  ;;  %v5709_v51 = vadd.f32 %v12472_v46, %v16016_v56  ;;  %v13119_v23 = vld [vmem:[#allocation2 + $0xd0] sm:$0xff]   ;;  %v3054_v5 = vpop.permute.xlu2 %3053  ;;  %v16017_v46 = vrot.slane %v13022_v54, 3 }
 0x466   : > { %5543 = vmatmul.bf16.vlgmr.msra.gmra.mxu0 %v4782_v38  ;;  %v13128_v10 = vsel %vm2639_vm5, %v4578_v25, %v4580_v59 }
 0x467   : > { %3288 = vrot.lane.b32.xlu1 %v16014_v55, %s9187_s16  ;;  %v13110_v30 = vpop.f32.mrf.mxu2  ;;  %v15550_v12 = vrot.slane %v13106_v39, 1 }
 0x468   : > { %16015 = vst [vmem:[#allocation48_spill] sm:$0xff] %v13110_v30 }
 0x469   : > { %v3629_v61 = vpop.permute.xlu0 %3628 }
 0x46a   : > { %v13117_v22 = vsel %vm3772_vm9, %v4281_v29, %v3629_v61  ;;  %v5837_v47 = vpop.f32.mrf.mxu1  ;;  %v3283_v38 = vpop.permute.xlu1 %3282  ;;  %3634 = vrot.lane.b32.xlu0 %v13119_v23, %s9188_s17  ;;  %v16018_v29 = vld [vmem:[#allocation80_spill] sm:$0xff]  ;;  %v16019_v61 = vrot.slane %v15983_v8, 1 }
 0x46b   : > { %v15553_v43 = vrot.slane %v13117_v22, 3  ;;  %v13125_v55 = vadd.f32 %v5837_v47, %v5709_v51  ;;  %v4051_v6 = vsel %vm600_vm0, %v16018_v29, %v3283_v38  ;;  %v4920_v51 = vrot.slane %v13128_v10, 3  ;;  %v13148_v47 = vld [vmem:[#allocation2 + $0x1c] sm:$0xff]  }
 0x46c   : > { %v4402_v25 = vsel %vm4359_vm7, %v16019_v61, %v15550_v12 }
 0x46d   : > { %3347 = vrot.lane.b32.xlu2 %v11655_v0, %s9186_s15  ;;  %v4939_v56 = vsel %vm4776_vm10, %v16017_v46, %v15553_v43  ;;  %v4108_v46 = vsel %vm3721_vm8, %v4051_v6, %v3342_v17  ;;  %v4921_v61 = vsel %vm4776_vm10, %v4910_v16, %v4920_v51  ;;  %v13167_v17 = vsel %vm600_vm0, %v12782_v34, %v12767_v3  ;;  %v3504_v6 = vpop.permute.xlu2 %3503 }
 0x46e   : > { %5876 = vmatmul.bf16.gmra.mxu1 %v4939_v56  ;;  %v16023_v16 = vrot.slane %v13018_v48, 6  ;;  %v15554_v34 = vrot.slane %v13148_v47, 5 }
 0x46f   : > { %4449 = vrot.lane.b32.xlu1 %v4402_v25, %s9187_s16  ;;  %v13146_v0 = vpop.f32.mrf.mxu2  ;;  %v15552_v25 = vrot.slane %v13148_v47, 6 }
 0x470   : > { %16020 = vst [vmem:[#allocation18_spill] sm:$0xff] %v13146_v0 }
 0x471   : > { %v3448_v54 = vpop.permute.xlu0 %3447 }
 0x472   : > { %v13152_v38 = vsel %vm3772_vm9, %v4108_v46, %v3448_v54  ;;  %v13154_v56 = vpop.f32.mrf.mxu1  ;;  %v13156_v29 = vpop.permute.xlu1 %4443  ;;  %3453 = vrot.lane.b32.xlu0 %v12692_v42, %s9188_s17  ;;  %v9085_v54 = vld [vmem:[#allocation2 + $0x18] sm:$0xff]   ;;  %v16022_v42 = vrot.slane %v12995_v57, 3  ;;  %v16025_v57 = vld [vmem:[#allocation20_spill] sm:$0xff] }
 0x473   : > { %16021 = vst [vmem:[#allocation23_spill] sm:$0xff] %v13154_v56  ;;  %v15551_v10 = vrot.slane %v13152_v38, 3 }
 0x474   : > { %8271 = vmatmul.msk.bf16.gmra.mxu2 %vm3721_vm8, %v4921_v61  ;;  %v3368_v61 = vsel %vm3363_vm6, %v16023_v16, %v15552_v25 }
 0x475   : > { %3252 = vrot.lane.b32.xlu2 %v9085_v54, %s9187_s16  ;;  %v4947_v46 = vsel %vm4776_vm10, %v16022_v42, %v15551_v10  ;;  %v4582_v54 = vrot.slane %v13167_v17, 5  ;;  %v3831_v42 = vsel %vm600_vm0, %v16025_v57, %v3054_v5  ;;  %v16026_v10 = vrot.slane %v13018_v48, 5  ;;  %v16027_v57 = vld [vmem:[#allocation111_spill] sm:$0xff] }
 0x476   : > { %5752 = vmatmul.bf16.gmra.mxu3 %v4947_v46  ;;  %v13204_v48 = vld [vmem:[#allocation2 + $0xc4] sm:$0xff]  }
 0x477   : > { %3417 = vrot.lane.b32.xlu1 %v3368_v61, %s9188_s17  ;;  %v5956_v3 = vpop.f32.mrf.mxu2  ;;  %v3305_v16 = vsel %vm2639_vm5, %v16026_v10, %v15554_v34  ;;  %v13200_v5 = vsel %vm2639_vm5, %v4580_v59, %v4582_v54  ;;  %v13207_v10 = vrot.slane %v13204_v48, 6 }
 0x478   : > { %v13184_v12 = vadd.f32 %v5956_v3, %v12987_v52 }
 0x479   : > { %v3115_v46 = vpop.permute.xlu0 %3114 }
 0x47a   : > { %16024 = vst [vmem:[#allocation74_spill] sm:$0xff] %v13184_v12  ;;  %v3903_v61 = vsel %vm3721_vm8, %v3831_v42, %v3115_v46  ;;  %v5842_v25 = vpop.f32.mrf.mxu1  ;;  %v3180_v43 = vpop.permute.xlu1 %3179  ;;  %3311 = vrot.lane.b32.xlu0 %v3305_v16, %s9186_s15  ;;  %v16028_v42 = vrot.slane %v13074_v9, 3  ;;  %v16030_v9 = vrot.slane %v13069_v33, 6 }
 0x47b   : > { %v13196_v17 = vadd.f32 %v5842_v25, %v12534_v60  ;;  %v3953_v52 = vsel %vm3772_vm9, %v3903_v61, %v3180_v43  ;;  %v4930_v60 = vrot.slane %v13200_v5, 3  ;;  %v3285_v25 = vpop.permute.xlu2 %3284  ;;  %v13213_v43 = vld [vmem:[#allocation2 + $0xd8] sm:$0xff]   ;;  %v861_v16 = vpop.f32.mrf.mxu0  ;;  %v9088_v61 = vld [vmem:[#allocation2 + $0xa8] sm:$0xff]  }
 0x47c   : > { %v4794_v3 = vrot.slane %v3953_v52, 3  ;;  %v4226_v52 = vsel %vm600_vm0, %v9088_v61, %v3504_v6  ;;  %v13234_v61 = vld [vmem:[#allocation2 + $0xec] sm:$0xff]  }
 0x47d   : > { %3509 = vrot.lane.b32.xlu2 %v16027_v57, %s9187_s16 }
 0x47e   : > { %v4795_v46 = vsel %vm4776_vm10, %v16028_v42, %v4794_v3  ;;  %v13224_v42 = vsel %vm3363_vm6, %v16030_v9, %v13207_v10  ;;  %v13239_v9 = vsel %vm600_vm0, %v13069_v33, %v13010_v18  ;;  %v15555_v18 = vrot.slane %v13234_v61, 1  ;;  %v16033_v33 = vld [vmem:[#allocation84_spill] sm:$0xff] }
 0x47f   : > { %5548 = vmatmul.bf16.gmra.mxu0 %v4795_v46  ;;  %3636 = vrot.lane.b32.xlu1 %v13213_v43, %s9188_s17  ;;  %v13217_v59 = vpop.f32.mrf.mxu2 }
 0x480   : > { %16029 = vst [vmem:[#allocation27_spill] sm:$0xff] %v13217_v59  ;;  %v4931_v59 = vsel %vm4776_vm10, %v4920_v51, %v4930_v60 }
 0x481   : > { %v3570_v34 = vpop.permute.xlu0 %3569 }
 0x482   : > { %v4283_v5 = vsel %vm3721_vm8, %v4226_v52, %v3570_v34  ;;  %v13227_v46 = vpop.f32.mrf.mxu1  ;;  %v3631_v56 = vpop.permute.xlu1 %3630  ;;  %3575 = vrot.lane.b32.xlu0 %v13224_v42, %s9186_s15  ;;  %v9089_v34 = vld [vmem:[#allocation2 + $0xb0] sm:$0xff]   ;;  %v16032_v52 = vrot.slane %v13117_v22, 3 }
 0x483   : > { %16031 = vst [vmem:[#allocation79_spill] sm:$0xff] %v13227_v46  ;;  %v4333_v0 = vsel %vm3772_vm9, %v4283_v5, %v3631_v56  ;;  %v864_v56 = vpop.f32.mrf.mxu0  ;;  %v4054_v5 = vsel %vm600_vm0, %v16033_v33, %v3285_v25  ;;  %v13254_v12 = vpop.permute.xlu2 %4445 }
 0x484   : > { %v4948_v6 = vrot.slane %v4333_v0, 3  ;;  %8272 = vmatmul.msk.bf16.gmra.mxu2 %vm3721_vm8, %v4931_v59  ;;  %v4584_v0 = vrot.slane %v13239_v9, 5 }
 0x485   : > { %3290 = vrot.lane.b32.xlu2 %v9089_v34, %s9187_s16 }
 0x486   : > { %v4949_v46 = vsel %vm4776_vm10, %v16032_v52, %v4948_v6  ;;  %v13266_v9 = vsel %vm2639_vm5, %v4582_v54, %v4584_v0 }
 0x487   : > { %5881 = vmatmul.bf16.gmra.mxu1 %v4949_v46  ;;  %3455 = vrot.lane.b32.xlu1 %v12815_v36, %s9188_s17  ;;  %v5961_v51 = vpop.f32.mrf.mxu2 }
 0x488   : > { %v13249_v59 = vadd.f32 %v5961_v51, %v13044_v1  ;;  %v16034_v51 = vrot.slane %v13106_v39, 1 }
 0x489   : > { %v3344_v22 = vpop.permute.xlu0 %3343 }
 0x48a   : > { %v4110_v46 = vsel %vm3721_vm8, %v4054_v5, %v3344_v22  ;;  %v5847_v52 = vpop.f32.mrf.mxu1  ;;  %v3450_v30 = vpop.permute.xlu1 %3449  ;;  %3349 = vrot.lane.b32.xlu0 %v11711_v19, %s9186_s15  ;;  %v4404_v33 = vsel %vm4359_vm7, %v16034_v51, %v15555_v18  ;;  %v16035_v19 = vld [vmem:[#allocation54_spill] sm:$0xff]  ;;  %v4940_v22 = vrot.slane %v13266_v9, 3  ;;  %v865_v9 = vadd.f32 %v12943_v27, %v864_v56 }
 0x48b   : > { %v13260_v36 = vadd.f32 %v5847_v52, %v12758_v26  ;;  %v13263_v1 = vsel %vm3772_vm9, %v4110_v46, %v3450_v30  ;;  %v16036_v5 = vrot.slane %v16035_v19, 3  ;;  %v16037_v30 = vrot.slane %v13152_v38, 3 }
 0x48c   : > { %v4956_v25 = vrot.slane %v13263_v1, 3  ;;  %v16038_v46 = vrot.slane %v13148_v47, 5  ;;  %v16041_v18 = vrot.slane %v13148_v47, 6  ;;  %v16046_v1 = vrot.slane %v13234_v61, 1 }
 0x48d   : > { %4451 = vrot.lane.b32.xlu2 %v4404_v33, %s9187_s16  ;;  %v4805_v26 = vsel %vm4776_vm10, %v4794_v3, %v16036_v5  ;;  %v9090_v5 = vld [vmem:[#allocation2 + $0x20] sm:$0xff]  }
 0x48e   : > { %v4957_v54 = vsel %vm4776_vm10, %v16037_v30, %v4956_v25  ;;  %v3306_v52 = vsel %vm2639_vm5, %v16038_v46, %v16006_v4  ;;  %v4941_v4 = vsel %vm4776_vm10, %v4930_v60, %v4940_v22  ;;  %v4510_v60 = vsel %vm600_vm0, %v13204_v48, %v13156_v29 }
 0x48f   : > { %5553 = vmatmul.bf16.gmra.mxu0 %v4805_v26  ;;  %5757 = vmatmul.bf16.gmra.mxu3 %v4957_v54  ;;  %v13288_v51 = vpop.f32.mrf.mxu2  ;;  %v3633_v26 = vpop.permute.xlu2 %3632  ;;  %v13298_v54 = vld [vmem:[#allocation2 + $0xcc] sm:$0xff]  }
 0x490   : > { %3313 = vrot.lane.b32.xlu1 %v3306_v52, %s9186_s15  ;;  %v15556_v46 = vrot.slane %v13298_v54, 6  ;;  %v862_v52 = vadd.f32 %v12943_v27, %v861_v16  ;;  %v936_v16 = vmax.f32 %v865_v9, 0.0 }
 0x491   : > { %v3506_v3 = vpop.permute.xlu0 %3505 }
 0x492   : > { %v4229_v33 = vsel %vm600_vm0, %v9089_v34, %v3506_v3  ;;  %v13292_v19 = vpop.f32.mrf.mxu1  ;;  %v3572_v38 = vpop.permute.xlu1 %3571  ;;  %3254 = vrot.lane.b32.xlu0 %v9090_v5, %s9187_s16  ;;  %v16039_v5 = vld [vmem:[#allocation15_spill] sm:$0xff] }
 0x493   : > { %v4285_v30 = vsel %vm3721_vm8, %v4229_v33, %v3572_v38  ;;  %v13302_v34 = vpop.f32.mrf.mxu0  ;;  %v16040_v56 = vrot.slane %v16039_v5, 6 }
 0x494   : > { %v13305_v3 = vsel %vm3772_vm9, %v4285_v30, %v3633_v26  ;;  %8273 = vmatmul.msk.bf16.gmra.mxu2 %vm3721_vm8, %v4941_v4  ;;  %v3528_v26 = vsel %vm3363_vm6, %v13207_v10, %v15556_v46  ;;  %v4586_v4 = vrot.slane %v4510_v60, 5 }
 0x495   : > { %v3370_v33 = vsel %vm3363_vm6, %v16041_v18, %v16040_v56  ;;  %v15557_v38 = vrot.slane %v13305_v3, 3  ;;  %v935_v18 = vmax.f32 %v862_v52, 0.0 }
 0x496   : > { %3419 = vrot.lane.b32.xlu2 %v3370_v33, %s9188_s17  ;;  %v16042_v33 = vld [vmem:[#allocation115_spill] sm:$0xff]  ;;  %v4587_v52 = vsel %vm2639_vm5, %v4584_v0, %v4586_v4 }
 0x497   : > { %v4959_v47 = vsel %vm4776_vm10, %v4948_v6, %v15557_v38  ;;  %v5966_v30 = vpop.f32.mrf.mxu2  ;;  %v3287_v38 = vpop.permute.xlu2 %3286 }
 0x498   : > { %3577 = vrot.lane.b32.xlu1 %v3528_v26, %s9186_s15  ;;  %5886 = vmatmul.bf16.gmra.mxu1 %v4959_v47  ;;  %v13327_v29 = vadd.f32 %v5966_v30, %v13125_v55  ;;  %v16043_v47 = vld [vmem:[#allocation92_spill] sm:$0xff]  ;;  %v4950_v30 = vrot.slane %v4587_v52, 3 }
 0x499   : > { %v1248_v48 = vpop.permute.xlu0 %1247 }
 0x49a   : > { %v1331_v9 = vmul.f32 %v1248_v48, %v935_v18  ;;  %v5852_v5 = vpop.f32.mrf.mxu1  ;;  %v1253_v56 = vpop.permute.xlu1 %1252  ;;  %3511 = vrot.lane.b32.xlu0 %v16042_v33, %s9187_s16  ;;  %v4951_v33 = vsel %vm4776_vm10, %v4940_v22, %v4950_v30 }
 0x49b   : > { %v13332_v46 = vadd.f32 %v5852_v5, %v12871_v44  ;;  %v1332_v6 = vmul.f32 %v1253_v56, %v936_v16  ;;  %v869_v55 = vpop.f32.mrf.mxu0  ;;  %v16044_v44 = vld [vmem:[#allocation89_spill] sm:$0xff] }
 0x49c   : > { %v1397_v60 = vpack.c.bf16 %v1331_v9, %v1331_v9  ;;  %v4057_v0 = vsel %vm600_vm0, %v16044_v44, %v3287_v38 }
 0x49d   : > { %v1398_v26 = vpack.c.bf16 %v1332_v6, %v1332_v6 }
 0x49e   : > { %3638 = vrot.lane.b32.xlu2 %v16043_v47, %s9188_s17  ;;  %1464 = vst.msk [vmem:[#allocation2 + $0xf4] sm:$0xf] %vm1402_vm1, %v1397_v60  ;;  %v9092_v47 = vld [vmem:[#allocation2 + $0x28] sm:$0xff]  }
 0x49f   : > { %1465 = vst.msk [vmem:[#allocation2 + $0xf8] sm:$0xf] %vm1402_vm1, %v1398_v26  ;;  %v13339_v18 = vpop.f32.mrf.mxu2  ;;  %v4448_v22 = vpop.permute.xlu2 %4447 }
 0x4a0   : > { %3351 = vrot.lane.b32.xlu1 %v16009_v50, %s9186_s15  ;;  %v4513_v50 = vsel %vm600_vm0, %v13298_v54, %v13254_v12 }
 0x4a1   : > { %v3346_v16 = vpop.permute.xlu0 %3345  ;;  %v4588_v60 = vrot.slane %v4513_v50, 5 }
 0x4a2   : > { %v4112_v48 = vsel %vm3721_vm8, %v4057_v0, %v3346_v16  ;;  %v13346_v9 = vpop.f32.mrf.mxu1  ;;  %v3452_v5 = vpop.permute.xlu1 %3451  ;;  %3292 = vrot.lane.b32.xlu0 %v12585_v37, %s9187_s16 }
 0x4a3   : > { %16045 = vst [vmem:[#allocation26_spill] sm:$0xff] %v13346_v9  ;;  %v13351_v56 = vsel %vm3772_vm9, %v4112_v48, %v3452_v5  ;;  %v871_v26 = vpop.f32.mrf.mxu0  ;;  %v4589_v0 = vsel %vm2639_vm5, %v4586_v4, %v4588_v60  ;;  %v16047_v5 = vld [vmem:[#allocation120_spill] sm:$0xff]  ;;  %v16053_v9 = vld [vmem:[#allocation25_spill] sm:$0xff] }
 0x4a4   : > { %v15558_v6 = vrot.slane %v13351_v56, 3  ;;  %8274 = vmatmul.msk.bf16.gmra.mxu2 %vm3721_vm8, %v4951_v33  ;;  %v9093_v33 = vld [vmem:[#allocation2 + $0xd4] sm:$0xff]  }
 0x4a5   : > { %v3529_v50 = vrot.slane %v9093_v33, 6  ;;  %v13399_v26 = vsel %vm600_vm0, %v9093_v33, %v4448_v22  ;;  %v2382_v33 = vld [vmem:[#allocation2 + $0xc8] sm:$0x7] }
 0x4a6   : > { %3457 = vrot.lane.b32.xlu2 %v13092_v40, %s9188_s17  ;;  %v4967_v37 = vsel %vm4776_vm10, %v4956_v25, %v15558_v6  ;;  %v13366_v38 = vld [vmem:[#allocation2 + $0xf4] sm:$0xff] }
 0x4a7   : > { %5762 = vmatmul.bf16.gmra.mxu3 %v4967_v37  ;;  %v5971_v52 = vpop.f32.mrf.mxu2  ;;  %v15561_v40 = vrot.slane %v13366_v38, 1 }
 0x4a8   : > { %3256 = vrot.lane.b32.xlu1 %v9092_v47, %s9187_s16  ;;  %v13370_v12 = vadd.f32 %v5971_v52, %v13196_v17  ;;  %v4960_v17 = vrot.slane %v4589_v0, 3 }
 0x4a9   : > { %v4406_v25 = vsel %vm4359_vm7, %v16046_v1, %v15561_v40  ;;  %v15560_v1 = vrot.slane %v13399_v26, 5  ;;  %v867_v40 = vadd.f32 %v12943_v27, %v13302_v34 }
 0x4aa   : > { %v5857_v55 = vpop.f32.mrf.mxu1  ;;  %4453 = vrot.lane.b32.xlu0 %v4406_v25, %s9187_s16  ;;  %v4961_v52 = vsel %vm4776_vm10, %v4950_v30, %v4960_v17 }
 0x4ab   : > { %v13379_v44 = vadd.f32 %v5857_v55, %v12959_v45  ;;  %v13389_v37 = vpop.f32.mrf.mxu0  ;;  %v16048_v45 = vld [vmem:[#allocation19_spill] sm:$0xff] }
 0x4ae   : > { %3315 = vrot.lane.b32.xlu2 %v16007_v11, %s9186_s15  ;;  %v16049_v11 = vrot.slane %v13298_v54, 6  ;;  %v13413_v54 = vsel %vm2639_vm5, %v4588_v60, %v15560_v1 }
 0x4af   : > { %v3308_v16 = vpop.permute.xlu2 %3307  ;;  %v13385_v48 = vpop.f32.mrf.mxu2  ;;  %v15559_v25 = vrot.slane %v13413_v54, 3 }
 0x4b0   : > { %3513 = vrot.lane.b32.xlu1 %v16047_v5, %s9187_s16  ;;  %v3530_v4 = vsel %vm3363_vm6, %v16049_v11, %v3529_v50 }
 0x4b2   : > { %3421 = vrot.lane.b32.xlu0 %v16048_v45, %s9188_s17  ;;  %v3531_v45 = vrot.slane %v15983_v8, 6 }
 0x4b3   : > { %v13415_v22 = vpop.f32.mrf.mxu0 }
 0x4b4   : > { %8275 = vmatmul.msk.bf16.gmra.mxu2 %vm3721_vm8, %v4961_v52 }
 0x4b6   : > { %3579 = vrot.lane.b32.xlu2 %v3530_v4, %s9186_s15  ;;  %v3244_v4 = vunpack.c.l.b16 %v2382_v33 }
 0x4b7   : > { %v3416_v47 = vpop.permute.xlu2 %3415  ;;  %v5976_v55 = vpop.f32.mrf.mxu2 }
 0x4b8   : > { %3294 = vrot.lane.b32.xlu1 %v12708_v63, %s9187_s16  ;;  %v13406_v30 = vadd.f32 %v5976_v55, %v13260_v36  ;;  %v16051_v55 = vld [vmem:[#allocation22_spill] sm:$0xff]  ;;  %v3247_v1 = vpack.c.b16 %v3244_v4, %v3244_v4 }
 0x4ba   : > { %3640 = vrot.lane.b32.xlu0 %v13080_v7, %s9188_s17  ;;  %v4971_v7 = vsel %vm4776_vm10, %v4960_v17, %v15559_v25  ;;  %v3532_v25 = vsel %vm3363_vm6, %v3529_v50, %v3531_v45 }
 0x4bb   : > { %v13427_v60 = vpop.f32.mrf.mxu0 }
 0x4be   : > { %3353 = vrot.lane.b32.xlu2 %v16027_v57, %s9186_s15  ;;  %v16050_v57 = vld [vmem:[#allocation34_spill] sm:$0xff] }
 0x4bf   : > { %v3574_v0 = vpop.permute.xlu2 %3573  ;;  %v13420_v63 = vpop.f32.mrf.mxu2 }
 0x4c1   : > { %v3251_v36 = vpop.permute.xlu1 %3250 }
 0x4c2   : > { %3459 = vrot.lane.b32.xlu0 %v13224_v42, %s9188_s17  ;;  %v4003_v33 = vsel %vm600_vm0, %v16053_v9, %v3251_v36  ;;  %v937_v9 = vmax.f32 %v867_v40, 0.0 }
 0x4c3   : > { %v13448_v50 = vpop.f32.mrf.mxu0 }
 0x4c4   : > { %v3249_v5 = vpop.permute.xlu0 %3248  ;;  %8276 = vmatmul.msk.bf16.gmra.mxu2 %vm3721_vm8, %v4971_v7 }
 0x4c5   : > { %v4000_v42 = vsel %vm600_vm0, %v16051_v55, %v3249_v5 }
 0x4c6   : > { %3515 = vrot.lane.b32.xlu2 %v16050_v57, %s9187_s16  ;;  %v4074_v7 = vsel %vm3721_vm8, %v4000_v42, %v3308_v16  ;;  %v2388_v57 = vld [vmem:[#allocation2 + $0xe4] sm:$0x1] }
 0x4c7   : > { %v3348_v52 = vpop.permute.xlu2 %3347  ;;  %v5981_v11 = vpop.f32.mrf.mxu2 }
 0x4c8   : > { %v13436_v6 = vadd.f32 %v5981_v11, %v13332_v46 }
 0x4c9   : > { %v3414_v17 = vpop.permute.xlu1 %3413 }
 0x4ca   : > { %16052 = vst [vmem:[#allocation11_spill] sm:$0xff] %v13436_v6  ;;  %3581 = vrot.lane.b32.xlu0 %v3532_v25, %s9186_s15  ;;  %v4124_v5 = vsel %vm3772_vm9, %v4074_v7, %v3414_v17  ;;  %v3522_v25 = vunpack.c.l.b16 %v2388_v57  ;;  %v16054_v7 = vld [vmem:[#allocation110_spill] sm:$0xff] }
 0x4cb   : > { %v4783_v11 = vrot.slane %v4124_v5, 3 }
 0x4cc   : > { %v3310_v55 = vpop.permute.xlu0 %3309 }
 0x4cd   : > { %v4076_v46 = vsel %vm3721_vm8, %v4003_v33, %v3310_v55  ;;  %v16055_v33 = vld [vmem:[#allocation30_spill] sm:$0xff] }
 0x4ce   : > { %3296 = vrot.lane.b32.xlu2 %v3247_v1, %s9187_s16  ;;  %v13451_v16 = vsel %vm3772_vm9, %v4076_v46, %v3416_v47  ;;  %v3524_v1 = vpack.c.b16 %v3522_v25, %v3522_v25  ;;  %v13464_v46 = vpop.f32.mrf.mxu0 }
 0x4cf   : > { %v15562_v4 = vrot.slane %v13451_v16, 3  ;;  %v3253_v27 = vpop.permute.xlu2 %3252  ;;  %v13454_v34 = vpop.f32.mrf.mxu2 }
 0x4d0   : > { %v3533_v5 = vrot.slane %v3524_v1, 6 }
 0x4d1   : > { %v1258_v36 = vpop.permute.xlu1 %1257  ;;  %v4785_v42 = vsel %vm4776_vm10, %v4783_v11, %v15562_v4 }
 0x4d2   : > { %v1333_v17 = vmul.f32 %v1258_v36, %v937_v9  ;;  %5672 = vmatmul.bf16.vlgmr.msrb.gmra.mxu0 %v4785_v42  ;;  %3355 = vrot.lane.b32.xlu0 %v16054_v7, %s9186_s15  ;;  %v9094_v9 = vld [vmem:[#allocation2 + $0xb8] sm:$0xff]   ;;  %v3534_v42 = vsel %vm3363_vm6, %v3531_v45, %v3533_v5 }
 0x4d3   : > { %v16057_v45 = vld [vmem:[#allocation97_spill] sm:$0xff] }
 0x4d4   : > { %v1399_v47 = vpack.c.bf16 %v1333_v17, %v1333_v17  ;;  %v3508_v57 = vpop.permute.xlu0 %3507 }
 0x4d5   : > { %v4232_v25 = vsel %vm600_vm0, %v9094_v9, %v3508_v57 }
 0x4d6   : > { %3517 = vrot.lane.b32.xlu2 %v16055_v33, %s9187_s16  ;;  %1466 = vst.msk [vmem:[#allocation2 + $0xfc] sm:$0xf] %vm1402_vm1, %v1399_v47  ;;  %v4287_v17 = vsel %vm3721_vm8, %v4232_v25, %v3574_v0  ;;  %v13484_v0 = vpop.f32.mrf.mxu0 }
 0x4d7   : > { %v3510_v40 = vpop.permute.xlu2 %3509  ;;  %v5986_v55 = vpop.f32.mrf.mxu2 }
 0x4d8   : > { %v13467_v11 = vadd.f32 %v5986_v55, %v13379_v44  ;;  %v16056_v55 = vrot.slane %v13305_v3, 3  ;;  %v16058_v3 = vrot.slane %v13366_v38, 1 }
 0x4d9   : > { %v3289_v36 = vpop.permute.xlu1 %3288 }
 0x4da   : > { %3583 = vrot.lane.b32.xlu0 %v3534_v42, %s9186_s15  ;;  %v4060_v5 = vsel %vm600_vm0, %v16057_v45, %v3289_v36  ;;  %v2384_v45 = vld [vmem:[#allocation2 + $0xcc] sm:$0x1]  ;;  %s8985_s15 = smul.u32 192, %s16278_s22 }
 0x4dc   : > { %v3635_v7 = vpop.permute.xlu0 %3634  ;;  %s15068_s18 = scalar_lea.vmem %s15374_s12, %s8985_s15 }
 0x4dd   : > { %v13474_v1 = vsel %vm3772_vm9, %v4287_v17, %v3635_v7  ;;  %v2395_v47 = vld [vmem:[#allocation2 + $0xfc] sm:$0x1] }
 0x4de   : > { %v4968_v33 = vrot.slane %v13474_v1, 3  ;;  %v4356_v4 = vunpack.c.l.b16 %v2395_v47  ;;  %v4114_v1 = vsel %vm3721_vm8, %v4060_v5, %v3348_v52  ;;  %v16061_v5 = vrot.slane %v13351_v56, 3 }
 0x4df   : > { %v13477_v44 = vpop.permute.xlu2 %3290 }
 0x4e0   : > { %v4969_v57 = vsel %vm4776_vm10, %v16056_v55, %v4968_v33  ;;  %v4358_v9 = vpack.c.b16 %v4356_v4, %v4356_v4  ;;  %v16059_v4 = vrot.slane %v13399_v26, 5 }
 0x4e1   : > { %v4450_v42 = vpop.permute.xlu1 %4449  ;;  %5891 = vmatmul.bf16.gmra.mxu1 %v4969_v57 }
 0x4e2   : > { %v4519_v25 = vsel %vm600_vm0, %v15983_v8, %v4450_v42  ;;  %v4407_v17 = vrot.slane %v4358_v9, 1  ;;  %v16060_v42 = vrot.slane %v13413_v54, 3 }
 0x4e3   : > { %v4592_v7 = vrot.slane %v4519_v25, 5 }
 0x4e4   : > { %v3454_v47 = vpop.permute.xlu0 %3453  ;;  %v4408_v55 = vsel %vm4359_vm7, %v16058_v3, %v4407_v17  ;;  %v3360_v17 = vunpack.c.l.b16 %v2384_v45  ;;  %v16062_v3 = vld [vmem:[#allocation28_spill] sm:$0xff] }
 0x4e5   : > { %v4593_v36 = vsel %vm2639_vm5, %v16059_v4, %v4592_v7  ;;  %v4164_v57 = vsel %vm3772_vm9, %v4114_v1, %v3454_v47  ;;  %4455 = vrot.lane.b32.xlu1 %v4408_v55, %s9187_s16  ;;  %v13504_v1 = vpop.f32.mrf.mxu0  ;;  %v4006_v54 = vsel %vm600_vm0, %v16062_v3, %v3253_v27  ;;  %v8632_v4 = vld [vmem:[#allocation2 + $0xf0] sm:$0xff]   ;;  %v16063_v27 = vrot.slane %v13451_v16, 3 }
 0x4e6   : > { %v4980_v6 = vrot.slane %v4593_v36, 3  ;;  %v4976_v8 = vrot.slane %v4164_v57, 3  ;;  %v3362_v36 = vpack.c.b16 %v3360_v17, %v3360_v17 }
 0x4e7   : > { %v4452_v9 = vpop.permute.xlu2 %4451 }
 0x4e8   : > { %v4981_v52 = vsel %vm4776_vm10, %v16060_v42, %v4980_v6  ;;  %v4977_v25 = vsel %vm4776_vm10, %v16061_v5, %v4976_v8  ;;  %v13508_v47 = vsel %vm600_vm0, %v13106_v39, %v4452_v9 }
 0x4e9   : > { %8277 = vmatmul.msk.bf16.gmra.mxu2 %vm3721_vm8, %v4981_v52  ;;  %v3418_v26 = vpop.permute.xlu1 %3417  ;;  %5767 = vmatmul.bf16.gmra.mxu3 %v4977_v25  ;;  %v15564_v56 = vrot.slane %v13508_v47, 5  ;;  %v3411_v52 = vrot.slane %v3362_v36, 6  ;;  %v9095_v25 = vld [vmem:[#allocation2 + $0xc0] sm:$0xff]  }
 0x4ea   : > { %v4235_v17 = vsel %vm600_vm0, %v9095_v25, %v3510_v40  ;;  %v9096_v36 = vld [vmem:[#allocation3 + $0xd8] sm:$0xff]  }
 0x4eb   : > { %v13519_v39 = vsel %vm2639_vm5, %v4592_v7, %v15564_v56 }
 0x4ec   : > { %v3312_v55 = vpop.permute.xlu0 %3311  ;;  %v15563_v3 = vrot.slane %v13519_v39, 3 }
 0x4ed   : > { %v4078_v57 = vsel %vm3721_vm8, %v4006_v54, %v3312_v55  ;;  %3642 = vrot.lane.b32.xlu1 %v8632_v4, %s9188_s17  ;;  %v13526_v54 = vpop.f32.mrf.mxu0  ;;  %v3412_v55 = vsel %vm3363_vm6, %v13207_v10, %v3411_v52  ;;  %v2392_v4 = vld [vmem:[#allocation2 + $0xf8] sm:$0x7]  ;;  %v16064_v52 = vld [vmem:[#allocation95_spill] sm:$0xff] }
 0x4ee   : > { %v4128_v45 = vsel %vm3772_vm9, %v4078_v57, %v3418_v26  ;;  %v3229_v57 = vrot.slane %v9096_v36, 5  ;;  %v4991_v40 = vsel %vm4776_vm10, %v4980_v6, %v15563_v3 }
 0x4ef   : > { %v4796_v42 = vrot.slane %v4128_v45, 3 }
 0x4f0   : > { %v3230_v25 = vsel %vm2639_vm5, %v16064_v52, %v3229_v57 }
 0x4f1   : > { %v3637_v9 = vpop.permute.xlu1 %3636  ;;  %v4797_v5 = vsel %vm4776_vm10, %v16063_v27, %v4796_v42  ;;  %v3592_v27 = vunpack.c.l.b16 %v2392_v4 }
 0x4f2   : > { %5677 = vmatmul.bf16.gmra.mxu0 %v4797_v5 }
 0x4f4   : > { %v3576_v26 = vpop.permute.xlu0 %3575 }
 0x4f5   : > { %v4289_v7 = vsel %vm3721_vm8, %v4235_v17, %v3576_v26  ;;  %3461 = vrot.lane.b32.xlu1 %v3412_v55, %s9188_s17  ;;  %v3595_v17 = vpack.c.b16 %v3592_v27, %v3592_v27 }
 0x4f6   : > { %v4339_v16 = vsel %vm3772_vm9, %v4289_v7, %v3637_v9  ;;  %v4063_v9 = vsel %vm600_vm0, %v3230_v25, %v13477_v44 }
 0x4f7   : > { %v4978_v45 = vrot.slane %v4339_v16, 3  ;;  %v3420_v16 = vpop.permute.xlu2 %3419 }
 0x4f9   : > { %v3456_v5 = vpop.permute.xlu1 %3455  ;;  %8278 = vmatmul.msk.bf16.gmra.mxu2 %vm3721_vm8, %v4991_v40  ;;  %v4979_v10 = vsel %vm4776_vm10, %v4968_v33, %v4978_v45 }
 0x4fa   : > { %5896 = vmatmul.bf16.gmra.mxu1 %v4979_v10  ;;  %v16065_v10 = vld [vmem:[#allocation32_spill] sm:$0xff] }
 0x4fc   : > { %v13542_v26 = vpop.f32.mrf.mxu0  ;;  %v3350_v55 = vpop.permute.xlu0 %3349 }
 0x4fd   : > { %v4116_v4 = vsel %vm3721_vm8, %v4063_v9, %v3350_v55  ;;  %3644 = vrot.lane.b32.xlu1 %v3595_v17, %s9188_s17 }
 0x4fe   : > { %v4166_v6 = vsel %vm3772_vm9, %v4116_v4, %v3456_v5  ;;  %v13557_v5 = vld [vmem:[%s15367_s5] ss:$0 sm:$0xff] }
 0x4ff   : > { %v4986_v7 = vrot.slane %v4166_v6, 3  ;;  %v3639_v4 = vpop.permute.xlu2 %3638 }
 0x501   : > { %v4987_v33 = vsel %vm4776_vm10, %v4976_v8, %v4986_v7  ;;  %v5426_v8 = vadd.f32 %v13557_v5, %v13464_v46  ;;  %v5428_v46 = vadd.f32 %v13557_v5, %v13484_v0 }
 0x502   : > { %v3314_v36 = vpop.permute.xlu1 %3313  ;;  %5772 = vmatmul.bf16.gmra.mxu3 %v4987_v33 }
 0x504   : > { %v13548_v40 = vpop.f32.mrf.mxu0  ;;  %v3255_v27 = vpop.permute.xlu0 %3254 }
 0x505   : > { %v4009_v44 = vsel %vm600_vm0, %v16065_v10, %v3255_v27  ;;  %v9098_v27 = vld [vmem:[#allocation2 + $0xc8] sm:$0xff]  }
 0x506   : > { %v4080_v52 = vsel %vm3721_vm8, %v4009_v44, %v3314_v36 }
 0x507   : > { %v4130_v25 = vsel %vm3772_vm9, %v4080_v52, %v3420_v16 }
 0x508   : > { %v4806_v9 = vrot.slane %v4130_v25, 3 }
 0x50a   : > { %v3578_v17 = vpop.permute.xlu1 %3577  ;;  %v4807_v55 = vsel %vm4776_vm10, %v4796_v42, %v4806_v9 }
 0x50b   : > { %5682 = vmatmul.bf16.gmra.mxu0 %v4807_v55 }
 0x50c   : > { %v5554_v6 = vpop.f32.mrf.mxu0  ;;  %v3512_v36 = vpop.permute.xlu0 %3511 }
 0x50d   : > { %v13562_v33 = vadd.f32 %v5554_v6, %v5426_v8  ;;  %v4238_v16 = vsel %vm600_vm0, %v9098_v27, %v3512_v36  ;;  %v16066_v8 = vld [vmem:[#allocation10_spill] sm:$0xff]  ;;  %v3458_v27 = vpop.permute.xlu2 %3457 }
 0x50e   : > { %v4291_v10 = vsel %vm3721_vm8, %v4238_v16, %v3578_v17  ;;  %v16067_v6 = vrot.slane %v16066_v8, 5 }
 0x50f   : > { %v4341_v44 = vsel %vm3772_vm9, %v4291_v10, %v3639_v4 }
 0x510   : > { %v4988_v52 = vrot.slane %v4341_v44, 3  ;;  %v3232_v56 = vsel %vm2639_vm5, %v3229_v57, %v16067_v6  ;;  %v16068_v57 = vrot.slane %v13508_v47, 5 }
 0x512   : > { %v3352_v25 = vpop.permute.xlu1 %3351  ;;  %v4989_v42 = vsel %vm4776_vm10, %v4978_v45, %v4988_v52 }
 0x513   : > { %5901 = vmatmul.bf16.gmra.mxu1 %v4989_v42 }
 0x514   : > { %v5556_v55 = vpop.f32.mrf.mxu0  ;;  %v3293_v36 = vpop.permute.xlu0 %3292 }
 0x515   : > { %v13570_v3 = vadd.f32 %v5556_v55, %v5428_v46  ;;  %v4066_v17 = vsel %vm600_vm0, %v3232_v56, %v3293_v36  ;;  %v3316_v55 = vpop.permute.xlu2 %3315  ;;  %v16069_v56 = vld [vmem:[#allocation39_spill] sm:$0xff]  ;;  %v16070_v36 = vrot.slane %v13519_v39, 3 }
 0x516   : > { %v4118_v4 = vsel %vm3721_vm8, %v4066_v17, %v3352_v25 }
 0x517   : > { %v4168_v16 = vsel %vm3772_vm9, %v4118_v4, %v3458_v27 }
 0x518   : > { %v4996_v10 = vrot.slane %v4168_v16, 3 }
 0x51a   : > { %v3257_v0 = vpop.permute.xlu1 %3256  ;;  %v4997_v45 = vsel %vm4776_vm10, %v4986_v7, %v4996_v10 }
 0x51b   : > { %5777 = vmatmul.bf16.gmra.mxu3 %v4997_v45  ;;  %v4012_v25 = vsel %vm600_vm0, %v16069_v56, %v3257_v0  ;;  %v16071_v56 = vld [vmem:[#allocation76_spill] sm:$0xff] }
 0x51c   : > { %v4454_v44 = vpop.permute.xlu0 %4453  ;;  %v4082_v17 = vsel %vm3721_vm8, %v4012_v25, %v3316_v55 }
 0x51d   : > { %v4525_v46 = vsel %vm600_vm0, %v13234_v61, %v4454_v44  ;;  %v3580_v45 = vpop.permute.xlu2 %3579 }
 0x51e   : > { %v4596_v42 = vrot.slane %v4525_v46, 5 }
 0x520   : > { %v4597_v8 = vsel %vm2639_vm5, %v16068_v57, %v4596_v42 }
 0x521   : > { %v5000_v6 = vrot.slane %v4597_v8, 3 }
 0x522   : > { %v3514_v7 = vpop.permute.xlu1 %3513 }
 0x523   : > { %v5001_v27 = vsel %vm4776_vm10, %v16070_v36, %v5000_v6  ;;  %v4241_v0 = vsel %vm600_vm0, %v13119_v23, %v3514_v7 }
 0x524   : > { %8279 = vmatmul.msk.bf16.gmra.mxu2 %vm3721_vm8, %v5001_v27  ;;  %v3422_v61 = vpop.permute.xlu0 %3421  ;;  %v4293_v39 = vsel %vm3721_vm8, %v4241_v0, %v3580_v45 }
 0x525   : > { %v4132_v4 = vsel %vm3772_vm9, %v4082_v17, %v3422_v61  ;;  %v3354_v36 = vpop.permute.xlu2 %3353  ;;  %v16072_v17 = vld [vmem:[#allocation45_spill] sm:$0xff] }
 0x526   : > { %v4816_v16 = vrot.slane %v4132_v4, 3  ;;  %v16073_v61 = vrot.slane %v16072_v17, 3 }
 0x528   : > { %v4817_v47 = vsel %vm4776_vm10, %v4806_v9, %v4816_v16  ;;  %v4827_v4 = vsel %vm4776_vm10, %v4816_v16, %v16073_v61 }
 0x529   : > { %5687 = vmatmul.bf16.gmra.mxu0 %v4817_v47 }
 0x52a   : > { %v3295_v57 = vpop.permute.xlu1 %3294 }
 0x52b   : > { %v4069_v25 = vsel %vm600_vm0, %v16071_v56, %v3295_v57 }
 0x52c   : > { %v3641_v44 = vpop.permute.xlu0 %3640  ;;  %v4120_v9 = vsel %vm3721_vm8, %v4069_v25, %v3354_v36 }
 0x52d   : > { %v4343_v46 = vsel %vm3772_vm9, %v4293_v39, %v3641_v44 }
 0x52e   : > { %v4998_v8 = vrot.slane %v4343_v46, 3  ;;  %v5418_v46 = vadd.f32 %v13557_v5, %v13415_v22 }
 0x530   : > { %v4999_v55 = vsel %vm4776_vm10, %v4988_v52, %v4998_v8  ;;  %v5416_v52 = vadd.f32 %v13557_v5, %v13389_v37  ;;  %v5547_v16 = vadd.f32 %v13526_v54, %v5418_v46 }
 0x531   : > { %5906 = vmatmul.bf16.gmra.mxu1 %v4999_v55  ;;  %v3516_v55 = vpop.permute.xlu2 %3515 }
 0x532   : > { %v5545_v45 = vadd.f32 %v13504_v1, %v5416_v52  ;;  %v16074_v52 = vld [vmem:[#allocation73_spill] sm:$0xff] }
 0x534   : > { %v3460_v27 = vpop.permute.xlu0 %3459 }
 0x535   : > { %v4170_v23 = vsel %vm3772_vm9, %v4120_v9, %v3460_v27  ;;  %v4244_v27 = vsel %vm600_vm0, %v13213_v43, %v3516_v55  ;;  %v2386_v43 = vld [vmem:[#allocation2 + $0xe0] sm:$0x7] }
 0x536   : > { %v5006_v7 = vrot.slane %v4170_v23, 3 }
 0x538   : > { %v5007_v47 = vsel %vm4776_vm10, %v4996_v10, %v5006_v7 }
 0x539   : > { %5692 = vmatmul.bf16.gmra.mxu0 %v4827_v4  ;;  %5782 = vmatmul.bf16.gmra.mxu3 %v5007_v47 }
 0x53c   : > { %v3582_v36 = vpop.permute.xlu0 %3581 }
 0x54f   : > { %v5673_v0 = vpop.f32.mrf.mxu0 }
 0x550   : > { %v5674_v39 = vadd.f32 %v5673_v0, %v5545_v45  ;;  %v16075_v45 = vrot.slane %v16074_v52, 5 }
 0x552   : > { %v5803_v44 = vadd.f32 %v12600_v62, %v5674_v39 }
 0x554   : > { %v5932_v57 = vadd.f32 %v12866_v32, %v5803_v44  ;;  %v3466_v44 = vunpack.c.l.b16 %v2386_v43 }
 0x556   : > { %v13614_v10 = vmax.f32 %v5932_v57, 0.0 }
 0x557   : > { %v4456_v56 = vpop.permute.xlu1 %4455  ;;  %v5675_v25 = vpop.f32.mrf.mxu0 }
 0x558   : > { %v4528_v37 = vsel %vm600_vm0, %v13366_v38, %v4456_v56  ;;  %v5676_v1 = vadd.f32 %v5675_v25, %v5547_v16  ;;  %6195 = vrot.lane.b32.xlu2 %v13614_v10, %s9188_s17  ;;  %v4295_v38 = vsel %vm3721_vm8, %v4244_v27, %v3582_v36  ;;  %v13640_v25 = vpop.f32.mrf.mxu3  ;;  %v3468_v36 = vpack.c.b16 %v3466_v44, %v3466_v44 }
 0x559   : > { %v4598_v62 = vrot.slane %v4528_v37, 5 }
 0x55a   : > { %v5805_v22 = vadd.f32 %v12629_v21, %v5676_v1  ;;  %v3297_v21 = vpop.permute.xlu2 %3296  ;;  %v13644_v1 = vpop.f32.mrf.mxu2 }
 0x55b   : > { %v4599_v32 = vsel %vm2639_vm5, %v4596_v42, %v4598_v62  ;;  %v5020_v16 = vrot.slane %v4598_v62, 3 }
 0x55c   : > { %v5010_v9 = vrot.slane %v4599_v32, 3  ;;  %v5934_v54 = vadd.f32 %v12899_v24, %v5805_v22  ;;  %v3356_v24 = vpop.permute.xlu0 %3355 }
 0x55e   : > { %v13625_v23 = vmax.f32 %v5934_v54, 0.0  ;;  %v5011_v17 = vsel %vm4776_vm10, %v5000_v6, %v5010_v9  ;;  %v4072_v6 = vsel %vm600_vm0, %v16075_v45, %v3297_v21  ;;  %v5021_v54 = vsel %vm4776_vm10, %v5010_v9, %v5020_v16  ;;  %v13656_v21 = vpop.f32.mrf.mxu1  ;;  %v16078_v16 = vld [vmem:[#allocation77_spill] sm:$0xff] }
 0x55f   : > { %v3643_v61 = vpop.permute.xlu1 %3642  ;;  %8280 = vmatmul.msk.bf16.gmra.mxu2 %vm3721_vm8, %v5011_v17  ;;  %v4122_v0 = vsel %vm3721_vm8, %v4072_v6, %v3356_v24 }
 0x560   : > { %v4345_v4 = vsel %vm3772_vm9, %v4295_v38, %v3643_v61  ;;  %6197 = vrot.lane.b32.xlu0 %v13625_v23, %s9188_s17 }
 0x561   : > { %v5008_v42 = vrot.slane %v4345_v4, 3 }
 0x562   : > { %v3518_v55 = vpop.permute.xlu2 %3517 }
 0x563   : > { %v5009_v47 = vsel %vm4776_vm10, %v4998_v8, %v5008_v42  ;;  %v5421_v8 = vadd.f32 %v13557_v5, %v13427_v60  ;;  %v4247_v32 = vsel %vm600_vm0, %v3468_v36, %v3518_v55 }
 0x564   : > { %5911 = vmatmul.bf16.gmra.mxu1 %v5009_v47  ;;  %v3584_v37 = vpop.permute.xlu0 %3583 }
 0x565   : > { %v5550_v22 = vadd.f32 %v13542_v26, %v5421_v8  ;;  %v4297_v62 = vsel %vm3721_vm8, %v4247_v32, %v3584_v37  ;;  %v5423_v26 = vadd.f32 %v13557_v5, %v13448_v50 }
 0x567   : > { %v3462_v39 = vpop.permute.xlu1 %3461  ;;  %v5552_v24 = vadd.f32 %v13548_v40, %v5423_v26  ;;  %v16085_v26 = vld [vmem:[#allocation48_spill] sm:$0xff] }
 0x568   : > { %v4172_v46 = vsel %vm3772_vm9, %v4122_v0, %v3462_v39 }
 0x569   : > { %v5016_v57 = vrot.slane %v4172_v46, 3 }
 0x56b   : > { %v5017_v56 = vsel %vm4776_vm10, %v5006_v7, %v5016_v57 }
 0x56c   : > { %5787 = vmatmul.bf16.gmra.mxu3 %v5017_v56  ;;  %v16079_v56 = vld [vmem:[#allocation82_spill] sm:$0xff] }
 0x56f   : > { %v3645_v27 = vpop.permute.xlu1 %3644  ;;  %v5678_v7 = vpop.f32.mrf.mxu0  ;;  %8281 = vmatmul.msk.bf16.gmra.mxu2 %vm3721_vm8, %v5021_v54 }
 0x570   : > { %v4347_v17 = vsel %vm3772_vm9, %v4297_v62, %v3645_v27  ;;  %v5679_v60 = vadd.f32 %v5678_v7, %v5550_v22  ;;  %v16080_v62 = vld [vmem:[#allocation86_spill] sm:$0xff]  ;;  %v13702_v27 = vpop.f32.mrf.mxu1  ;;  %v16081_v7 = vld [vmem:[#allocation83_spill] sm:$0xff] }
 0x571   : > { %v5018_v38 = vrot.slane %v4347_v17, 3 }
 0x572   : > { %v5808_v61 = vadd.f32 %v12666_v58, %v5679_v60  ;;  %v16082_v60 = vld [vmem:[#allocation38_spill] sm:$0xff] }
 0x573   : > { %v5019_v4 = vsel %vm4776_vm10, %v5008_v42, %v5018_v38 }
 0x574   : > { %v5937_v9 = vadd.f32 %v12936_v53, %v5808_v61  ;;  %5916 = vmatmul.bf16.gmra.mxu1 %v5019_v4 }
 0x576   : > { %v13660_v47 = vmax.f32 %v5937_v9, 0.0 }
 0x577   : > { %v5680_v43 = vpop.f32.mrf.mxu0 }
 0x578   : > { %16076 = vst [vmem:[#allocation4_spill] sm:$0xff] %v13660_v47  ;;  %v5681_v52 = vadd.f32 %v5680_v43, %v5552_v24  ;;  %6199 = vrot.lane.b32.xlu1 %v13660_v47, %s9188_s17  ;;  %v16086_v24 = vld [vmem:[#allocation85_spill] sm:$0xff] }
 0x57a   : > { %v5810_v58 = vadd.f32 %v12719_v13, %v5681_v52  ;;  %v16087_v52 = vld [vmem:[#allocation58_spill] sm:$0xff] }
 0x57c   : > { %v5939_v42 = vadd.f32 %v12954_v35, %v5810_v58 }
 0x57e   : > { %v13666_v45 = vmax.f32 %v5939_v42, 0.0  ;;  %v16088_v42 = vld [vmem:[#allocation74_spill] sm:$0xff] }
 0x580   : > { %6201 = vrot.lane.b32.xlu2 %v13666_v45, %s9188_s17 }
 0x588   : > { %v5683_v53 = vpop.f32.mrf.mxu0 }
 0x589   : > { %v5684_v50 = vadd.f32 %v5683_v53, %v13562_v33  ;;  %v16077_v33 = vld [vmem:[#allocation75_spill] sm:$0xff]  ;;  %v13715_v53 = vmax.f32 %v16088_v42, 0.0 }
 0x58b   : > { %v5813_v40 = vadd.f32 %v12772_v49, %v5684_v50 }
 0x58d   : > { %v5942_v6 = vadd.f32 %v12980_v41, %v5813_v40  ;;  %v13719_v40 = vpop.f32.mrf.mxu3 }
 0x58f   : > { %v13673_v0 = vmax.f32 %v5942_v6, 0.0 }
 0x590   : > { %v5685_v39 = vpop.f32.mrf.mxu0 }
 0x591   : > { %v5686_v44 = vadd.f32 %v5685_v39, %v13570_v3  ;;  %6203 = vrot.lane.b32.xlu0 %v13673_v0, %s9188_s17  ;;  %v5433_v3 = vadd.f32 %v13557_v5, %v16078_v16  ;;  %v16089_v39 = vld [vmem:[#allocation67_spill] sm:$0xff] }
 0x593   : > { %v5815_v13 = vadd.f32 %v12832_v14, %v5686_v44  ;;  %v5562_v8 = vadd.f32 %v16079_v56, %v5433_v3  ;;  %v16092_v3 = vld [vmem:[#allocation18_spill] sm:$0xff]  ;;  %v6100_v56 = vld [vmem:[%s15363_s1 + $0x50] sm:$0xff] }
 0x595   : > { %v5944_v35 = vadd.f32 %v13007_v15, %v5815_v13 }
 0x597   : > { %v13680_v46 = vmax.f32 %v5944_v35, 0.0 }
 0x599   : > { %6205 = vrot.lane.b32.xlu1 %v13680_v46, %s9188_s17 }
 0x5a6   : > { %v5688_v49 = vpop.f32.mrf.mxu0 }
 0x5a7   : > { %v5689_v41 = vadd.f32 %v5688_v49, %v16077_v33  ;;  %v16090_v49 = vld [vmem:[#allocation27_spill] sm:$0xff] }
 0x5a9   : > { %v5818_v57 = vadd.f32 %v12876_v20, %v5689_v41  ;;  %v13698_v20 = vpop.f32.mrf.mxu2  ;;  %v13729_v41 = vpop.f32.mrf.mxu1 }
 0x5ab   : > { %v5947_v55 = vadd.f32 %v13033_v2, %v5818_v57  ;;  %v5443_v2 = vadd.f32 %v13557_v5, %v16080_v62  ;;  %v16091_v57 = vld [vmem:[#allocation62_spill] sm:$0xff]  ;;  %v6103_v62 = vld [vmem:[%s15363_s1 + $0x68] sm:$0xff] }
 0x5ad   : > { %v13690_v14 = vmax.f32 %v5947_v55, 0.0  ;;  %v5572_v38 = vadd.f32 %v16082_v60, %v5443_v2  ;;  %v6099_v2 = vld [vmem:[%s15363_s1 + $0x48] sm:$0xff]  ;;  %v6104_v60 = vld [vmem:[%s15363_s1 + $0x70] sm:$0xff] }
 0x5ae   : > { %v5690_v15 = vpop.f32.mrf.mxu0 }
 0x5af   : > { %v5691_v36 = vadd.f32 %v5690_v15, %v5562_v8  ;;  %6207 = vrot.lane.b32.xlu2 %v13690_v14, %s9188_s17  ;;  %v5701_v58 = vadd.f32 %v16087_v52, %v5572_v38  ;;  %v6106_v38 = vld [vmem:[%s15363_s1 + $0x80] sm:$0xff] }
 0x5b0   : > { %v16098_v52 = vld [vmem:[#allocation98_spill] sm:$0xff] }
 0x5b1   : > { %v5820_v37 = vadd.f32 %v12909_v31, %v5691_v36  ;;  %v16083_v31 = vld [vmem:[#allocation49_spill] sm:$0xff]  ;;  %v5830_v44 = vadd.f32 %v16089_v39, %v5701_v58  ;;  %v13726_v35 = vpop.f32.mrf.mxu2  ;;  %v13742_v36 = vpop.f32.mrf.mxu3 }
 0x5b3   : > { %v5949_v22 = vadd.f32 %v13063_v28, %v5820_v37  ;;  %v16084_v28 = vld [vmem:[#allocation81_spill] sm:$0xff]  ;;  %v5959_v33 = vadd.f32 %v16090_v49, %v5830_v44  ;;  %v13784_v44 = vmax.f32 %v13249_v59, 0.0 }
 0x5b4   : > { %v5438_v4 = vadd.f32 %v13557_v5, %v16084_v28  ;;  %v16095_v28 = vld [vmem:[#allocation96_spill] sm:$0xff]  ;;  %v6105_v49 = vld [vmem:[%s15363_s1 + $0x78] sm:$0xff] }
 0x5b5   : > { %v13696_v32 = vmax.f32 %v5949_v22, 0.0  ;;  %v13736_v8 = vmax.f32 %v5959_v33, 0.0  ;;  %v13748_v22 = vpop.f32.mrf.mxu1  ;;  %v6779_v33 = vld [vmem:[%s15368_s6 + $0x18] sm:$0xff] }
 0x5b6   : > { %v5693_v54 = vpop.f32.mrf.mxu0  ;;  %v5567_v43 = vadd.f32 %v16086_v24, %v5438_v4  ;;  %v5453_v4 = vadd.f32 %v13557_v5, %v16095_v28  ;;  %v16097_v24 = vld [vmem:[#allocation101_spill] sm:$0xff]  ;;  %6796 = vmatpush.msrb.mxu3 %v6779_v33  ;;  %v16110_v33 = vld [vmem:[#allocation66_spill] sm:$0xff] }
 0x5b7   : > { %v5694_v17 = vadd.f32 %v5693_v54, %v16081_v7  ;;  %6209 = vrot.lane.b32.xlu0 %v13696_v32, %s9188_s17  ;;  %16093 = vst [vmem:[#allocation122_spill] sm:$0xff] %v13736_v8  ;;  %v6101_v54 = vld [vmem:[%s15363_s1 + $0x58] sm:$0xff] }
 0x5b9   : > { %v5823_v61 = vadd.f32 %v16083_v31, %v5694_v17  ;;  %v13746_v37 = vpop.f32.mrf.mxu2  ;;  %v13759_v7 = vpop.f32.mrf.mxu3 }
 0x5bb   : > { %v5952_v9 = vadd.f32 %v16085_v26, %v5823_v61  ;;  %v6102_v61 = vld [vmem:[%s15363_s1 + $0x60] sm:$0xff] }
 0x5bc   : > { %v16096_v26 = vld [vmem:[#allocation90_spill] sm:$0xff] }
 0x5bd   : > { %v13717_v50 = vmax.f32 %v5952_v9, 0.0  ;;  %v13769_v31 = vpop.f32.mrf.mxu1  ;;  %v5448_v9 = vadd.f32 %v13557_v5, %v16096_v26  ;;  %v16107_v26 = vld [vmem:[#allocation102_spill] sm:$0xff] }
 0x5be   : > { %v5695_v6 = vpop.f32.mrf.mxu0 }
 0x5bf   : > { %v5696_v13 = vadd.f32 %v5695_v6, %v5567_v43  ;;  %6211 = vrot.lane.b32.xlu1 %v13717_v50, %s9188_s17  ;;  %6215 = vrot.lane.b32.xlu0 %v13715_v53, %s9188_s17  ;;  %v5582_v43 = vadd.f32 %v16097_v24, %v5453_v4  ;;  %v5577_v58 = vadd.f32 %v16098_v52, %v5448_v9  ;;  %v16099_v6 = vld [vmem:[#allocation57_spill] sm:$0xff] }
 0x5c0   : > { %v5463_v9 = vadd.f32 %v13557_v5, %v16107_v26 }
 0x5c1   : > { %v5825_v16 = vadd.f32 %v16091_v57, %v5696_v13  ;;  %v13761_v17 = vpop.f32.mrf.mxu2  ;;  %v13780_v42 = vpop.f32.mrf.mxu3  ;;  %v5711_v39 = vadd.f32 %v16099_v6, %v5582_v43  ;;  %v13787_v13 = vmax.f32 %v13327_v29, 0.0  ;;  %v16101_v57 = vld [vmem:[#allocation51_spill] sm:$0xff]  ;;  %v16103_v29 = vld [vmem:[#allocation72_spill] sm:$0xff] }
 0x5c2   : > { %v16108_v43 = vld [vmem:[#allocation103_spill] sm:$0xff] }
 0x5c3   : > { %v5954_v55 = vadd.f32 %v16092_v3, %v5825_v16  ;;  %16100 = vst [vmem:[#allocation42_spill] sm:$0xff] %v13787_v13  ;;  %v5706_v16 = vadd.f32 %v16101_v57, %v5577_v58  ;;  %v16109_v58 = vld [vmem:[#allocation44_spill] sm:$0xff] }
 0x5c4   : > { %v5592_v6 = vadd.f32 %v16109_v58, %v5463_v9 }
 0x5c5   : > { %v13738_v15 = vmax.f32 %v5954_v55, 0.0  ;;  %v16102_v55 = vld [vmem:[#allocation23_spill] sm:$0xff]  ;;  %v13799_v59 = vpop.f32.mrf.mxu1 }
 0x5c7   : > { %16094 = vst [vmem:[#allocation41_spill] sm:$0xff] %v13738_v15  ;;  %6217 = vrot.lane.b32.xlu1 %v13736_v8, %s9188_s17  ;;  %6394 = vperm.xlu0 %8998, %v6100_v56   ;;  %v5840_v56 = vadd.f32 %v16102_v55, %v5711_v39 }
 0x5c8   : > { %6213 = vrot.lane.b32.xlu2 %v13738_v15, %s9188_s17  ;;  %v16168_v15 = vld [vmem:[#allocation91_spill] sm:$0xff] }
 0x5c9   : > { %v13796_v3 = vpop.f32.mrf.mxu2 }
 0x5cd   : > { %v13827_v24 = vpop.f32.mrf.mxu1 }
 0x5cf   : > { %6399 = vperm.xlu1 %8999, %v6101_v54   ;;  %6409 = vperm.xlu0 %8998, %v6103_v62   ;;  %v5835_v54 = vadd.f32 %v16103_v29, %v5706_v16  ;;  %v5969_v62 = vadd.f32 %v13339_v18, %v5840_v56  ;;  %v16111_v16 = vld [vmem:[#allocation60_spill] sm:$0xff]  ;;  %v13839_v56 = vmax.f32 %v13370_v12, 0.0  ;;  %v6107_v29 = vld [vmem:[%s15363_s1 + $0x88] sm:$0xff] }
 0x5d0   : > { %6389 = vperm.xlu2 %9000, %v6099_v2   ;;  %v5721_v55 = vadd.f32 %v16111_v16, %v5592_v6 }
 0x5d1   : > { %v5964_v2 = vadd.f32 %v13288_v51, %v5835_v54  ;;  %v13819_v4 = vpop.f32.mrf.mxu2  ;;  %v16106_v51 = vld [vmem:[#allocation99_spill] sm:$0xff]  ;;  %16112 = vst [vmem:[#allocation29_spill] sm:$0xff] %v13839_v56 }
 0x5d2   : > { %v5458_v18 = vadd.f32 %v13557_v5, %v16106_v51  ;;  %v16113_v54 = vld [vmem:[#allocation79_spill] sm:$0xff] }
 0x5d3   : > { %v13815_v28 = vmax.f32 %v5964_v2, 0.0  ;;  %v5850_v2 = vadd.f32 %v13292_v19, %v5721_v55  ;;  %v6110_v19 = vld [vmem:[%s15363_s1 + $0xa0] sm:$0xff] }
 0x5d4   : > { %v5587_v52 = vadd.f32 %v16108_v43, %v5458_v18 }
 0x5d5   : > { %16105 = vst [vmem:[#allocation9_spill] sm:$0xff] %v13815_v28  ;;  %v5979_v51 = vadd.f32 %v13420_v63, %v5850_v2  ;;  %v13852_v12 = vpop.f32.mrf.mxu1 }
 0x5d6   : > { %v5716_v57 = vadd.f32 %v16110_v33, %v5587_v52  ;;  %v16117_v52 = vld [vmem:[#allocation108_spill] sm:$0xff]  ;;  %v6113_v33 = vld [vmem:[%s15363_s1 + $0xb8] sm:$0xff] }
 0x5d7   : > { %6414 = vperm.xlu1 %8999, %v6104_v60   ;;  %6424 = vperm.xlu0 %8998, %v6106_v38   ;;  %v13808_v60 = vpop.f32.mrf.mxu3  ;;  %v6108_v38 = vld [vmem:[%s15363_s1 + $0x90] sm:$0xff]  ;;  %v13858_v43 = vmax.f32 %v5979_v51, 0.0  ;;  %v6114_v51 = vld [vmem:[%s15363_s1 + $0xc0] sm:$0xff] }
 0x5d8   : > { %6404 = vperm.xlu2 %9000, %v6102_v61   ;;  %v13813_v61 = vmax.f32 %v5969_v62, 0.0  ;;  %v5845_v62 = vadd.f32 %v16113_v54, %v5716_v57  ;;  %v16118_v57 = vld [vmem:[#allocation71_spill] sm:$0xff] }
 0x5d9   : > { %v13850_v18 = vpop.f32.mrf.mxu2  ;;  %16115 = vst [vmem:[#allocation50_spill] sm:$0xff] %v13858_v43 }
 0x5da   : > { %16104 = vst [vmem:[#allocation107_spill] sm:$0xff] %v13813_v61 }
 0x5dd   : > { %v13879_v55 = vpop.f32.mrf.mxu1 }
 0x5df   : > { %6219 = vrot.lane.b32.xlu1 %v13784_v44, %s9188_s17  ;;  %6223 = vrot.lane.b32.xlu0 %v13787_v13, %s9188_s17  ;;  %v13831_v39 = vpop.f32.mrf.mxu3 }
 0x5e0   : > { %6419 = vperm.xlu2 %9000, %v6105_v49   ;;  %v6109_v49 = vld [vmem:[%s15363_s1 + $0x98] sm:$0xff] }
 0x5e1   : > { %v13870_v6 = vpop.f32.mrf.mxu2 }
 0x5e7   : > { %6225 = vrot.lane.b32.xlu1 %v13813_v61, %s9188_s17  ;;  %6434 = vperm.xlu0 %8998, %v6108_v38   ;;  %v5974_v38 = vadd.f32 %v13385_v48, %v5845_v62  ;;  %v13854_v26 = vpop.f32.mrf.mxu3  ;;  %v16116_v48 = vld [vmem:[#allocation104_spill] sm:$0xff]  ;;  %v16120_v62 = vld [vmem:[#allocation26_spill] sm:$0xff] }
 0x5e8   : > { %6221 = vrot.lane.b32.xlu2 %v13815_v28, %s9188_s17  ;;  %v5468_v63 = vadd.f32 %v13557_v5, %v16116_v48  ;;  %v13895_v48 = vpop.f32.mrf.mxu1 }
 0x5e9   : > { %v13856_v9 = vmax.f32 %v5974_v38, 0.0 }
 0x5ea   : > { %v5597_v58 = vadd.f32 %v16117_v52, %v5468_v63  ;;  %v13902_v52 = vpop.f32.mrf.mxu2 }
 0x5eb   : > { %16114 = vst [vmem:[#allocation40_spill] sm:$0xff] %v13856_v9 }
 0x5ec   : > { %v5726_v16 = vadd.f32 %v16118_v57, %v5597_v58 }
 0x5ee   : > { %v5855_v2 = vadd.f32 %v16120_v62, %v5726_v16  ;;  %v6115_v16 = vld [vmem:[%s15363_s1 + $0xc8] sm:$0xff]  ;;  %v13915_v62 = vmax.f32 %v13467_v11, 0.0 }
 0x5ef   : > { %6439 = vperm.xlu1 %8999, %v6109_v49   ;;  %6227 = vrot.lane.b32.xlu0 %v13839_v56, %s9188_s17  ;;  %v6111_v49 = vld [vmem:[%s15363_s1 + $0xa8] sm:$0xff]  ;;  %v13884_v54 = vpop.f32.mrf.mxu3 }
 0x5f0   : > { %6429 = vperm.xlu2 %9000, %v6107_v29   ;;  %v13882_v29 = vmax.f32 %v13406_v30, 0.0  ;;  %v5984_v38 = vadd.f32 %v13454_v34, %v5855_v2  ;;  %v6112_v30 = vld [vmem:[%s15363_s1 + $0xb0] sm:$0xff]  ;;  %v16122_v34 = vld [vmem:[#allocation105_spill] sm:$0xff]  ;;  %16124 = vst [vmem:[#allocation112_spill] sm:$0xff] %v13915_v62 }
 0x5f1   : > { %v5473_v58 = vadd.f32 %v13557_v5, %v16122_v34 }
 0x5f2   : > { %16119 = vst [vmem:[#allocation5_spill] sm:$0xff] %v13882_v29 }
 0x5f7   : > { %6229 = vrot.lane.b32.xlu1 %v13856_v9, %s9188_s17  ;;  %6233 = vrot.lane.b32.xlu0 %v13858_v43, %s9188_s17  ;;  %v13900_v63 = vpop.f32.mrf.mxu3  ;;  %v16130_v43 = vld [vmem:[#allocation114_spill] sm:$0xff] }
 0x5f8   : > { %6444 = vperm.xlu2 %9000, %v6110_v19   ;;  %v13893_v19 = vmax.f32 %v5984_v38, 0.0  ;;  %v16125_v38 = vld [vmem:[#allocation11_spill] sm:$0xff]  ;;  %v5483_v9 = vadd.f32 %v13557_v5, %v16130_v43 }
 0x5fa   : > { %16121 = vst [vmem:[#allocation6_spill] sm:$0xff] %v13893_v19 }
 0x5ff   : > { %6449 = vperm.xlu1 %8999, %v6111_v49   ;;  %6459 = vperm.xlu0 %8998, %v6113_v33   ;;  %v13908_v49 = vpop.permute.xlu2 %6195  ;;  %v16123_v33 = vld [vmem:[#allocation113_spill] sm:$0xff] }
 0x600   : > { %6231 = vrot.lane.b32.xlu2 %v13882_v29, %s9188_s17  ;;  %v5602_v57 = vadd.f32 %v16123_v33, %v5473_v58  ;;  %v13926_v58 = vpop.f32.mrf.mxu3  ;;  %v13928_v33 = vpop.f32.mrf.mxu2 }
 0x602   : > { %v5731_v2 = vadd.f32 %v13640_v25, %v5602_v57  ;;  %v6116_v57 = vld [vmem:[%s15363_s1 + $0xd0] sm:$0xff] }
 0x604   : > { %v5860_v34 = vadd.f32 %v13656_v21, %v5731_v2  ;;  %v16127_v21 = vld [vmem:[#allocation116_spill] sm:$0xff] }
 0x605   : > { %v5734_v2 = vadd.f32 %v13719_v40, %v16127_v21  ;;  %v13959_v21 = vpop.permute.xlu0 %6197 }
 0x606   : > { %v5989_v11 = vadd.f32 %v13644_v1, %v5860_v34 }
 0x607   : > { %6464 = vperm.xlu1 %8999, %v6114_v51   ;;  %6237 = vrot.lane.b32.xlu0 %v13893_v19, %s9188_s17  ;;  %v13919_v51 = vmax.f32 %v16125_v38, 0.0  ;;  %v13933_v25 = vpop.permute.xlu2 %6201  ;;  %v16128_v38 = vld [vmem:[#allocation118_spill] sm:$0xff]  ;;  %v5863_v1 = vadd.f32 %v13702_v27, %v5734_v2  ;;  %v16131_v27 = vld [vmem:[#allocation109_spill] sm:$0xff] }
 0x608   : > { %6454 = vperm.xlu2 %9000, %v6112_v30   ;;  %v13921_v30 = vpop.f32.mrf.mxu1  ;;  %v13945_v19 = vmax.f32 %v5989_v11, 0.0 }
 0x609   : > { %16126 = vst [vmem:[#allocation88_spill] sm:$0xff] %v13919_v51  ;;  %v5992_v40 = vadd.f32 %v13698_v20, %v5863_v1  ;;  %v6117_v1 = vld [vmem:[%s15363_s1 + $0xd8] sm:$0xff] }
 0x60a   : > { %16129 = vst [vmem:[#allocation87_spill] sm:$0xff] %v13945_v19 }
 0x60b   : > { %v13970_v20 = vmax.f32 %v5992_v40, 0.0  ;;  %v13985_v40 = vpop.permute.xlu1 %6199 }
 0x60d   : > { %16134 = vst [vmem:[#allocation78_spill] sm:$0xff] %v13970_v20 }
 0x60f   : > { %6239 = vrot.lane.b32.xlu1 %v13915_v62, %s9188_s17  ;;  %6469 = vperm.xlu0 %8998, %v6115_v16   ;;  %v6118_v16 = vld [vmem:[%s15363_s1 + $0xe0] sm:$0xff]  ;;  %v5739_v62 = vadd.f32 %v13759_v7, %v16128_v38  ;;  %v16133_v38 = vld [vmem:[#allocation117_spill] sm:$0xff] }
 0x610   : > { %6235 = vrot.lane.b32.xlu2 %v13919_v51, %s9188_s17  ;;  %v13949_v51 = vpop.f32.mrf.mxu3  ;;  %v13957_v11 = vpop.f32.mrf.mxu1 }
 0x611   : > { %v5868_v34 = vadd.f32 %v13748_v22, %v5739_v62  ;;  %v5478_v22 = vadd.f32 %v13557_v5, %v16131_v27  ;;  %v13963_v62 = vpop.f32.mrf.mxu2 }
 0x613   : > { %v5997_v7 = vadd.f32 %v13746_v37, %v5868_v34 }
 0x615   : > { %v13972_v37 = vmax.f32 %v5997_v7, 0.0  ;;  %v13987_v7 = vpop.permute.xlu0 %6203 }
 0x617   : > { %6474 = vperm.xlu1 %8999, %v6116_v57   ;;  %6484 = vperm.xlu0 %8998, %v6118_v16   ;;  %v13965_v57 = vpop.permute.xlu2 %6207  ;;  %v16132_v16 = vld [vmem:[#allocation121_spill] sm:$0xff]  ;;  %16135 = vst [vmem:[#allocation94_spill] sm:$0xff] %v13972_v37 }
 0x618   : > { %6241 = vrot.lane.b32.xlu2 %v13945_v19, %s9188_s17  ;;  %v5612_v2 = vadd.f32 %v16132_v16, %v5483_v9  ;;  %v5607_v19 = vadd.f32 %v16133_v38, %v5478_v22 }
 0x619   : > { %v13996_v16 = vpop.f32.mrf.mxu2 }
 0x61a   : > { %v5741_v43 = vadd.f32 %v13780_v42, %v5612_v2  ;;  %v5736_v34 = vadd.f32 %v13742_v36, %v5607_v19  ;;  %v13990_v36 = vpop.f32.mrf.mxu3  ;;  %v13994_v19 = vpop.f32.mrf.mxu1  ;;  %v16137_v2 = vld [vmem:[#allocation8_spill] sm:$0xff] }
 0x61c   : > { %v5870_v27 = vadd.f32 %v13769_v31, %v5741_v43  ;;  %v5865_v42 = vadd.f32 %v13729_v41, %v5736_v34  ;;  %v6120_v41 = vld [vmem:[%s15363_s1 + $0xf0] sm:$0xff] }
 0x61e   : > { %v5999_v9 = vadd.f32 %v13761_v17, %v5870_v27  ;;  %v5994_v22 = vadd.f32 %v13726_v35, %v5865_v42  ;;  %v5744_v17 = vadd.f32 %v13808_v60, %v16137_v2  ;;  %v16141_v27 = vld [vmem:[#allocation14_spill] sm:$0xff] }
 0x61f   : > { %6243 = vrot.lane.b32.xlu1 %v13970_v20, %s9188_s17  ;;  %6247 = vrot.lane.b32.xlu0 %v13972_v37, %s9188_s17  ;;  %v5493_v42 = vadd.f32 %v13557_v5, %v16141_v27 }
 0x620   : > { %6479 = vperm.xlu2 %9000, %v6117_v1   ;;  %v14003_v38 = vmax.f32 %v5999_v9, 0.0  ;;  %v14005_v43 = vmax.f32 %v5994_v22, 0.0  ;;  %v5873_v35 = vadd.f32 %v13799_v59, %v5744_v17  ;;  %v16140_v1 = vld [vmem:[#allocation119_spill] sm:$0xff]  ;;  %v14017_v9 = vpop.permute.xlu1 %6205 }
 0x621   : > { %v5488_v34 = vadd.f32 %v13557_v5, %v16140_v1  ;;  %v6121_v1 = vld [vmem:[%s15363_s1 + $0xf8] sm:$0xff]  ;;  %v14039_v61 = vpop.f32.mrf.mxu2 }
 0x622   : > { %v13992_v31 = vpop.permute.xlu2 %6213  ;;  %16138 = vst [vmem:[#allocation16_spill] sm:$0xff] %v14003_v38  ;;  %v6002_v60 = vadd.f32 %v13796_v3, %v5873_v35  ;;  %v14021_v59 = vpop.f32.mrf.mxu3 }
 0x623   : > { %16136 = vst [vmem:[#allocation21_spill] sm:$0xff] %v13992_v31  ;;  %v14027_v20 = vpop.f32.mrf.mxu1 }
 0x624   : > { %16139 = vst [vmem:[#allocation17_spill] sm:$0xff] %v14005_v43  ;;  %v14034_v27 = vmax.f32 %v6002_v60, 0.0 }
 0x626   : > { %16144 = vst [vmem:[#allocation106_spill] sm:$0xff] %v14034_v27 }
 0x627   : > { %6249 = vrot.lane.b32.xlu1 %v14003_v38, %s9188_s17  ;;  %6494 = vperm.xlu0 %8998, %v6120_v41   ;;  %v16142_v41 = vld [vmem:[#allocation36_spill] sm:$0xff]  ;;  %v16143_v38 = vld [vmem:[#allocation31_spill] sm:$0xff] }
 0x628   : > { %6245 = vrot.lane.b32.xlu2 %v14005_v43, %s9188_s17  ;;  %v5617_v17 = vadd.f32 %v16142_v41, %v5488_v34  ;;  %v5622_v37 = vadd.f32 %v16143_v38, %v5493_v42  ;;  %v6119_v43 = vld [vmem:[%s15363_s1 + $0xe8] sm:$0xff]  ;;  %v6778_v38 = vld [vmem:[%s15368_s6 + $0x10] sm:$0xff] }
 0x629   : > { %v14019_v22 = vpop.permute.xlu0 %6209  ;;  %6797 = vmatpush.msrb.mxu3 %v6778_v38  ;;  %v16149_v38 = vld [vmem:[#allocation33_spill] sm:$0xff] }
 0x62a   : > { %v14023_v2 = vpop.permute.xlu2 %6389  ;;  %v5746_v3 = vadd.f32 %v13831_v39, %v5617_v17  ;;  %v5751_v35 = vadd.f32 %v13884_v54, %v5622_v37  ;;  %v14056_v17 = vpop.f32.mrf.mxu3 }
 0x62c   : > { %v5875_v34 = vadd.f32 %v13827_v24, %v5746_v3  ;;  %v5880_v42 = vadd.f32 %v13879_v55, %v5751_v35  ;;  %v14074_v35 = vpop.f32.mrf.mxu2 }
 0x62e   : > { %v6004_v39 = vadd.f32 %v13819_v4, %v5875_v34  ;;  %v6009_v54 = vadd.f32 %v13870_v6, %v5880_v42  ;;  %v14067_v6 = vpop.f32.mrf.mxu1  ;;  %v5498_v34 = vadd.f32 %v13557_v5, %v16149_v38 }
 0x62f   : > { %6499 = vperm.xlu1 %8999, %v6121_v1   ;;  %6251 = vrot.lane.b32.xlu0 %v14034_v27, %s9188_s17  ;;  %v16148_v1 = vld [vmem:[#allocation37_spill] sm:$0xff] }
 0x630   : > { %6489 = vperm.xlu2 %9000, %v6119_v43   ;;  %v14058_v24 = vmax.f32 %v6004_v39, 0.0  ;;  %v14060_v55 = vmax.f32 %v6009_v54, 0.0  ;;  %v6122_v43 = vld [vmem:[%s15363_s1 + $0x100] sm:$0xff]  ;;  %v5749_v4 = vadd.f32 %v13854_v26, %v16148_v1  ;;  %v16152_v1 = vld [vmem:[#allocation47_spill] sm:$0xff] }
 0x631   : > { %v14050_v37 = vpop.permute.xlu1 %6211  ;;  %v14052_v60 = vpop.permute.xlu0 %6215 }
 0x632   : > { %v14054_v41 = vpop.permute.xlu2 %6404  ;;  %16146 = vst [vmem:[#allocation43_spill] sm:$0xff] %v14058_v24  ;;  %v5878_v3 = vadd.f32 %v13852_v12, %v5749_v4  ;;  %v14086_v27 = vpop.f32.mrf.mxu3  ;;  %v6123_v12 = vld [vmem:[%s15363_s1 + $0x108] sm:$0xff] }
 0x633   : > { %16145 = vst [vmem:[#allocation93_spill] sm:$0xff] %v14054_v41 }
 0x634   : > { %16147 = vst [vmem:[#allocation100_spill] sm:$0xff] %v14060_v55  ;;  %v6007_v26 = vadd.f32 %v13850_v18, %v5878_v3  ;;  %v14100_v3 = vpop.f32.mrf.mxu2 }
 0x636   : > { %v14095_v38 = vmax.f32 %v6007_v26, 0.0  ;;  %v6124_v26 = vld [vmem:[%s15363_s1 + $0x110] sm:$0xff] }
 0x637   : > { %6253 = vrot.lane.b32.xlu1 %v14058_v24, %s9188_s17  ;;  %6257 = vrot.lane.b32.xlu0 %v14060_v55, %s9188_s17  ;;  %v5627_v24 = vadd.f32 %v16152_v1, %v5498_v34  ;;  %v14097_v55 = vpop.f32.mrf.mxu1 }
 0x638   : > { %6504 = vperm.xlu2 %9000, %v6122_v43   ;;  %v6125_v43 = vld [vmem:[%s15363_s1 + $0x118] sm:$0xff]  ;;  %16153 = vst [vmem:[#allocation111_spill] sm:$0xff] %v14095_v38 }
 0x639   : > { %v14078_v42 = vpop.permute.xlu1 %6217  ;;  %v14080_v39 = vpop.permute.xlu0 %6394  ;;  %v5756_v4 = vadd.f32 %v13926_v58, %v5627_v24  ;;  %v6126_v24 = vld [vmem:[%s15363_s1 + $0x120] sm:$0xff] }
 0x63a   : > { %16150 = vst [vmem:[#allocation80_spill] sm:$0xff] %v14078_v42  ;;  %v14083_v54 = vpop.permute.xlu2 %6419 }
 0x63b   : > { %16151 = vst [vmem:[#allocation20_spill] sm:$0xff] %v14080_v39  ;;  %v5885_v18 = vadd.f32 %v13921_v30, %v5756_v4 }
 0x63c   : > { %v14133_v39 = vpop.f32.mrf.mxu2 }
 0x63d   : > { %v6014_v34 = vadd.f32 %v13928_v33, %v5885_v18  ;;  %v14121_v33 = vpop.f32.mrf.mxu3 }
 0x63f   : > { %6509 = vperm.xlu1 %8999, %v6123_v12   ;;  %6519 = vperm.xlu0 %8998, %v6125_v43   ;;  %v14114_v30 = vmax.f32 %v6014_v34, 0.0  ;;  %v16156_v12 = vld [vmem:[#allocation12_spill] sm:$0xff]  ;;  %v14126_v18 = vpop.f32.mrf.mxu1 }
 0x640   : > { %6255 = vrot.lane.b32.xlu2 %v14095_v38, %s9188_s17  ;;  %v5754_v43 = vadd.f32 %v13900_v63, %v16156_v12  ;;  %v16159_v12 = vld [vmem:[#allocation24_spill] sm:$0xff] }
 0x641   : > { %v14105_v1 = vpop.permute.xlu1 %6399  ;;  %v14107_v28 = vpop.permute.xlu0 %6409  ;;  %16155 = vst [vmem:[#allocation54_spill] sm:$0xff] %v14114_v30 }
 0x642   : > { %v14109_v58 = vpop.permute.xlu2 %6221  ;;  %v5883_v4 = vadd.f32 %v13895_v48, %v5754_v43  ;;  %v6128_v48 = vld [vmem:[%s15363_s1 + $0x130] sm:$0xff] }
 0x643   : > { %16154 = vst [vmem:[#allocation84_spill] sm:$0xff] %v14109_v58 }
 0x644   : > { %v6012_v58 = vadd.f32 %v13902_v52, %v5883_v4 }
 0x646   : > { %v14145_v43 = vmax.f32 %v6012_v58, 0.0  ;;  %v14161_v58 = vpop.f32.mrf.mxu2 }
 0x647   : > { %6524 = vperm.xlu1 %8999, %v6126_v24   ;;  %6261 = vrot.lane.b32.xlu0 %v14114_v30, %s9188_s17  ;;  %v5759_v24 = vadd.f32 %v13949_v51, %v16159_v12  ;;  %v14147_v30 = vpop.f32.mrf.mxu3  ;;  %v14150_v4 = vpop.f32.mrf.mxu1 }
 0x648   : > { %6514 = vperm.xlu2 %9000, %v6124_v26   ;;  %v6127_v26 = vld [vmem:[%s15363_s1 + $0x128] sm:$0xff]  ;;  %16160 = vst [vmem:[#allocation92_spill] sm:$0xff] %v14145_v43 }
 0x649   : > { %v14128_v34 = vpop.permute.xlu1 %6414  ;;  %v14130_v38 = vpop.permute.xlu0 %6424  ;;  %v5888_v52 = vadd.f32 %v13957_v11, %v5759_v24  ;;  %v6130_v11 = vld [vmem:[%s15363_s1 + $0x140] sm:$0xff] }
 0x64a   : > { %16157 = vst [vmem:[#allocation15_spill] sm:$0xff] %v14128_v34  ;;  %v14135_v63 = vpop.permute.xlu2 %6429  ;;  %v16167_v34 = vld [vmem:[#allocation7_spill] sm:$0xff] }
 0x64b   : > { %16158 = vst [vmem:[#allocation115_spill] sm:$0xff] %v14130_v38  ;;  %v6017_v51 = vadd.f32 %v13963_v62, %v5888_v52  ;;  %v16163_v62 = vld [vmem:[#allocation35_spill] sm:$0xff] }
 0x64d   : > { %v14166_v24 = vmax.f32 %v6017_v51, 0.0  ;;  %v16166_v51 = vld [vmem:[#allocation63_spill] sm:$0xff] }
 0x64f   : > { %6534 = vperm.xlu1 %8999, %v6128_v48   ;;  %6529 = vperm.xlu0 %8998, %v6127_v26   ;;  %16162 = vst [vmem:[#allocation120_spill] sm:$0xff] %v14166_v24  ;;  %v6129_v48 = vld [vmem:[%s15363_s1 + $0x138] sm:$0xff]  ;;  %v5503_v26 = vadd.f32 %v13557_v5, %v16163_v62  ;;  %v14175_v52 = vpop.f32.mrf.mxu3  ;;  %v14182_v42 = vpop.f32.mrf.mxu1 }
 0x650   : > { %6259 = vrot.lane.b32.xlu2 %v14145_v43, %s9188_s17  ;;  %v6133_v62 = vld [vmem:[%s15363_s1 + $0x158] sm:$0xff] }
 0x651   : > { %v14155_v12 = vpop.permute.xlu1 %6219  ;;  %v14157_v41 = vpop.permute.xlu0 %6223  ;;  %v5632_v38 = vadd.f32 %v16166_v51, %v5503_v26  ;;  %v6131_v26 = vld [vmem:[%s15363_s1 + $0x148] sm:$0xff] }
 0x652   : > { %v14159_v56 = vpop.permute.xlu2 %6444  ;;  %v14199_v51 = vpop.f32.mrf.mxu2 }
 0x653   : > { %16161 = vst [vmem:[#allocation89_spill] sm:$0xff] %v14159_v56 }
 0x657   : > { %6263 = vrot.lane.b32.xlu1 %v14166_v24, %s9188_s17  ;;  %6544 = vperm.xlu0 %8998, %v6130_v11   ;;  %v5764_v24 = vadd.f32 %v14021_v59, %v16167_v34  ;;  %v5761_v11 = vadd.f32 %v13990_v36, %v5632_v38  ;;  %v14202_v59 = vpop.f32.mrf.mxu3 }
 0x658   : > { %6539 = vperm.xlu2 %9000, %v6129_v48   ;;  %v6132_v48 = vld [vmem:[%s15363_s1 + $0x150] sm:$0xff] }
 0x659   : > { %v14177_v43 = vpop.permute.xlu1 %6225  ;;  %v14179_v56 = vpop.permute.xlu0 %6434  ;;  %v5890_v36 = vadd.f32 %v13994_v19, %v5761_v11  ;;  %v6137_v19 = vld [vmem:[%s15363_s1 + $0x178] sm:$0xff] }
 0x65a   : > { %16164 = vst [vmem:[#allocation19_spill] sm:$0xff] %v14177_v43  ;;  %v14184_v8 = vpop.permute.xlu2 %6231 }
 0x65b   : > { %16165 = vst [vmem:[#allocation34_spill] sm:$0xff] %v14179_v56  ;;  %v5893_v56 = vadd.f32 %v14027_v20, %v5764_v24  ;;  %v6019_v20 = vadd.f32 %v13996_v16, %v5890_v36  ;;  %v14208_v24 = vpop.f32.mrf.mxu1  ;;  %v16172_v16 = vld [vmem:[#allocation52_spill] sm:$0xff] }
 0x65d   : > { %v6022_v38 = vadd.f32 %v14039_v61, %v5893_v56  ;;  %v14220_v56 = vmax.f32 %v6019_v20, 0.0 }
 0x65f   : > { %6559 = vperm.xlu1 %8999, %v6133_v62   ;;  %6554 = vperm.xlu0 %8998, %v6132_v48   ;;  %v5769_v62 = vadd.f32 %v14086_v27, %v16168_v15  ;;  %v14217_v11 = vmax.f32 %v6022_v38, 0.0  ;;  %16170 = vst [vmem:[#allocation25_spill] sm:$0xff] %v14220_v56  ;;  %v14222_v48 = vpop.f32.mrf.mxu2 }
 0x660   : > { %6549 = vperm.xlu2 %9000, %v6131_v26   ;;  %16171 = vst [vmem:[#allocation110_spill] sm:$0xff] %v14222_v48  ;;  %v5508_v26 = vadd.f32 %v13557_v5, %v16172_v16 }
 0x661   : > { %v6440_v34 = vpop.permute.xlu1 %6439  ;;  %v14205_v43 = vpop.permute.xlu0 %6227  ;;  %16169 = vst [vmem:[#allocation22_spill] sm:$0xff] %v14217_v11  ;;  %v5898_v61 = vadd.f32 %v14097_v55, %v5769_v62  ;;  %v16173_v55 = vld [vmem:[#allocation56_spill] sm:$0xff] }
 0x662   : > { %v14210_v31 = vpop.permute.xlu2 %6454  ;;  %v5637_v38 = vadd.f32 %v16173_v55, %v5508_v26  ;;  %v14238_v62 = vpop.f32.mrf.mxu3  ;;  %v6134_v26 = vld [vmem:[%s15363_s1 + $0x160] sm:$0xff]  ;;  %v16176_v55 = vld [vmem:[#allocation53_spill] sm:$0xff] }
 0x663   : > { %v6027_v15 = vadd.f32 %v14100_v3, %v5898_v61  ;;  %v14243_v48 = vpop.f32.mrf.mxu1  ;;  %v6135_v3 = vld [vmem:[%s15363_s1 + $0x168] sm:$0xff] }
 0x664   : > { %v5766_v16 = vadd.f32 %v14056_v17, %v5637_v38 }
 0x665   : > { %v14248_v61 = vmax.f32 %v6027_v15, 0.0  ;;  %v16177_v15 = vld [vmem:[#allocation64_spill] sm:$0xff] }
 0x666   : > { %v5774_v38 = vadd.f32 %v14147_v30, %v16177_v15 }
 0x667   : > { %6267 = vrot.lane.b32.xlu1 %v14217_v11, %s9188_s17  ;;  %6579 = vperm.xlu0 %8998, %v6137_v19   ;;  %v16175_v11 = vld [vmem:[#allocation46_spill] sm:$0xff] }
 0x668   : > { %6265 = vrot.lane.b32.xlu2 %v14220_v56, %s9188_s17  ;;  %v5513_v19 = vadd.f32 %v13557_v5, %v16175_v11  ;;  %v6341_v5 = vadd.f32 %v13985_v40, %v13660_v47  ;;  %v14260_v11 = vpop.f32.mrf.mxu2 }
 0x669   : > { %v14231_v27 = vpop.permute.xlu1 %6229  ;;  %v14233_v36 = vpop.permute.xlu0 %6233 }
 0x66a   : > { %v14236_v20 = vpop.permute.xlu2 %6235  ;;  %v5642_v56 = vadd.f32 %v16176_v55, %v5513_v19  ;;  %v6345_v19 = vadd.f32 %v13965_v57, %v13690_v14  ;;  %v6629_v40 = vmul.f32 %v14105_v1, %v6341_v5  ;;  %v14274_v47 = vpop.f32.mrf.mxu3  ;;  %v6353_v57 = vadd.f32 %v14157_v41, %v13787_v13  ;;  %v9099_v1 = vld [vmem:[%s15367_s5] ss:$0 sm:$0xff]  ;;  %v16178_v5 = vld [vmem:[#allocation13_spill] sm:$0xff] }
 0x66b   : > { %16174 = vst [vmem:[#allocation30_spill] sm:$0xff] %v14236_v20  ;;  %v5895_v20 = vadd.f32 %v14067_v6, %v5766_v16  ;;  %v6349_v6 = vadd.f32 %v14052_v60, %v13715_v53 }
 0x66c   : > { %v5771_v17 = vadd.f32 %v14121_v33, %v5642_v56  ;;  %v6633_v30 = vmul.f32 %v14083_v54, %v6345_v19  ;;  %v6139_v54 = vld [vmem:[%s15363_s1 + $0x188] sm:$0xff]  ;;  %v6343_v19 = vadd.f32 %v13987_v7, %v13673_v0  ;;  %v6347_v7 = vadd.f32 %v14050_v37, %v13717_v50 }
 0x66d   : > { %v6024_v55 = vadd.f32 %v14074_v35, %v5895_v20  ;;  %v6637_v60 = vmul.f32 %v6440_v34, %v6349_v6  ;;  %v5518_v35 = vadd.f32 %v9099_v1, %v16178_v5  ;;  %v14283_v20 = vpop.f32.mrf.mxu1  ;;  %v16179_v34 = vld [vmem:[#allocation68_spill] sm:$0xff]  ;;  %v6777_v6 = vld [vmem:[%s15368_s6 + $0x8] sm:$0xff]  ;;  %v6339_v5 = vadd.f32 %v13908_v49, %v13614_v10 }
 0x66e   : > { %v5900_v33 = vadd.f32 %v14126_v18, %v5771_v17  ;;  %v6138_v18 = vld [vmem:[%s15363_s1 + $0x180] sm:$0xff]  ;;  %6798 = vmatpush.msrb.mxu3 %v6777_v6  ;;  %v6635_v37 = vmul.f32 %v14135_v63, %v6347_v7  ;;  %v6344_v6 = vadd.f32 %v14017_v9, %v13680_v46 }
 0x66f   : > { %6569 = vperm.xlu1 %8999, %v6135_v3   ;;  %6271 = vrot.lane.b32.xlu0 %v14248_v61, %s9188_s17  ;;  %v5647_v17 = vadd.f32 %v16179_v34, %v5518_v35  ;;  %v14293_v15 = vmax.f32 %v6024_v55, 0.0 }
 0x670   : > { %6564 = vperm.xlu2 %9000, %v6134_v26   ;;  %v5903_v26 = vadd.f32 %v14150_v4, %v5774_v38  ;;  %v6677_v4 = vsel %vm600_vm0, %v6629_v40, -inf  ;;  %v6029_v38 = vadd.f32 %v14133_v39, %v5900_v33  ;;  %v6683_v40 = vsel %vm600_vm0, %v6633_v30, -inf  ;;  %v14306_v55 = vpop.f32.mrf.mxu2 }
 0x671   : > { %v6450_v16 = vpop.permute.xlu1 %6449  ;;  %v6460_v3 = vpop.permute.xlu0 %6459  ;;  %v6684_v39 = vmax.f32 %v6677_v4, %v6683_v40  ;;  %v6631_v33 = vmul.f32 %v14107_v28, %v6343_v19  ;;  %v5776_v49 = vadd.f32 %v14175_v52, %v5647_v17  ;;  %v6351_v28 = vadd.f32 %v14155_v12, %v13784_v44 }
 0x672   : > { %v14271_v56 = vpop.permute.xlu2 %6241  ;;  %v6641_v41 = vmul.f32 %v6460_v3, %v6353_v57  ;;  %v6032_v1 = vadd.f32 %v14161_v58, %v5903_v26  ;;  %v6691_v3 = vsel %vm600_vm0, %v6637_v60, -inf  ;;  %v6357_v58 = vadd.f32 %v14184_v8, %v13882_v29  ;;  %v14331_v63 = vpop.f32.mrf.mxu3 }
 0x673   : > { %v6627_v60 = vmul.f32 %v14023_v2, %v6339_v5  ;;  %v6692_v35 = vmax.f32 %v6684_v39, %v6691_v3  ;;  %v5905_v8 = vadd.f32 %v14182_v42, %v5776_v49  ;;  %v6679_v17 = vsel %vm600_vm0, %v6631_v33, -inf  ;;  %v16182_v3 = vld [vmem:[#allocation21_spill] sm:$0xff]  ;;  %v16183_v39 = vld [vmem:[#allocation15_spill] sm:$0xff]  ;;  %v16184_v49 = vld [vmem:[#allocation122_spill] sm:$0xff] }
 0x674   : > { %v6699_v26 = vsel %vm600_vm0, %v6641_v41, -inf  ;;  %v14325_v52 = vmax.f32 %v6032_v1, 0.0  ;;  %v16180_v41 = vld [vmem:[#allocation59_spill] sm:$0xff]  ;;  %v6639_v2 = vmul.f32 %v6450_v16, %v6351_v28  ;;  %v6340_v12 = vadd.f32 %v13959_v21, %v13625_v23 }
 0x675   : > { %v5781_v34 = vadd.f32 %v14238_v62, %v16180_v41  ;;  %v6700_v19 = vmax.f32 %v6692_v35, %v6699_v26  ;;  %v6136_v62 = vld [vmem:[%s15363_s1 + $0x170] sm:$0xff]  ;;  %v14343_v1 = vpop.f32.mrf.mxu1  ;;  %v6675_v16 = vsel %vm600_vm0, %v6627_v60, -inf  ;;  %v6346_v5 = vadd.f32 %v14019_v22, %v13696_v32  ;;  %v16186_v22 = vld [vmem:[#allocation115_spill] sm:$0xff] }
 0x676   : > { %v6687_v21 = vsel %vm600_vm0, %v6635_v37, -inf  ;;  %v6680_v7 = vmax.f32 %v6675_v16, %v6679_v17  ;;  %v6632_v33 = vmul.f32 %v16183_v39, %v6344_v6  ;;  %v16187_v37 = vld [vmem:[#allocation29_spill] sm:$0xff]  ;;  %v6695_v35 = vsel %vm600_vm0, %v6639_v2, -inf  ;;  %v16189_v41 = vld [vmem:[#allocation20_spill] sm:$0xff] }
 0x677   : > { %6584 = vperm.xlu1 %8999, %v6138_v18   ;;  %6589 = vperm.xlu0 %8998, %v6139_v54   ;;  %v14323_v54 = vmax.f32 %v6029_v38, 0.0  ;;  %v6342_v38 = vadd.f32 %v13933_v25, %v13666_v45  ;;  %v16181_v25 = vld [vmem:[#allocation41_spill] sm:$0xff]  ;;  %v6634_v60 = vmul.f32 %v16186_v22, %v6346_v5  ;;  %v6355_v28 = vadd.f32 %v14205_v43, %v16187_v37  ;;  %v16191_v6 = vld [vmem:[#allocation84_spill] sm:$0xff]  ;;  %v16193_v5 = vld [vmem:[#allocation107_spill] sm:$0xff] }
 0x678   : > { %6269 = vrot.lane.b32.xlu2 %v14293_v15, %s9188_s17  ;;  %v6348_v9 = vadd.f32 %v16182_v3, %v16181_v25  ;;  %v6628_v17 = vmul.f32 %v16189_v41, %v6340_v12  ;;  %v6688_v16 = vmax.f32 %v6680_v7, %v6687_v21  ;;  %v16194_v22 = vld [vmem:[#allocation19_spill] sm:$0xff]  ;;  %v16195_v43 = vld [vmem:[#allocation34_spill] sm:$0xff]  ;;  %v6043_v41 = vpop.f32.mrf.mxu2  ;;  %v6681_v21 = vsel %vm600_vm0, %v6632_v33, -inf }
 0x679   : > { %v6465_v30 = vpop.permute.xlu1 %6464  ;;  %v14317_v57 = vpop.permute.xlu0 %6237  ;;  %v6354_v13 = vadd.f32 %v16194_v22, %v16193_v5 }
 0x67a   : > { %v6480_v18 = vpop.permute.xlu2 %6479  ;;  %v6636_v37 = vmul.f32 %v16195_v43, %v6348_v9  ;;  %v6696_v7 = vmax.f32 %v6688_v16, %v6695_v35  ;;  %v6140_v9 = vld [vmem:[%s15363_s1 + $0x190] sm:$0xff]  ;;  %v5788_v33 = vpop.f32.mrf.mxu3 }
 0x67b   : > { %v6645_v4 = vmul.f32 %v6480_v18, %v6357_v58  ;;  %v16185_v58 = vld [vmem:[#allocation80_spill] sm:$0xff]  ;;  %v16188_v18 = vld [vmem:[#allocation93_spill] sm:$0xff] }
 0x67c   : > { %v6350_v26 = vadd.f32 %v16185_v58, %v16184_v49  ;;  %v16192_v58 = vld [vmem:[#allocation89_spill] sm:$0xff]  ;;  %v6689_v35 = vsel %vm600_vm0, %v6636_v37, -inf }
 0x67d   : > { %v6707_v42 = vsel %vm600_vm0, %v6645_v4, -inf  ;;  %v6630_v4 = vmul.f32 %v16188_v18, %v6342_v38  ;;  %v16196_v38 = vld [vmem:[#allocation55_spill] sm:$0xff]  ;;  %v5910_v18 = vadd.f32 %v14243_v48, %v5781_v34  ;;  %v6034_v48 = vadd.f32 %v14199_v51, %v5905_v8 }
 0x67e   : > { %v14349_v40 = vmax.f32 %v6700_v19, %v6707_v42  ;;  %v16190_v19 = vld [vmem:[#allocation9_spill] sm:$0xff]  ;;  %v6638_v29 = vmul.f32 %v16192_v58, %v6350_v26  ;;  %v5779_v12 = vadd.f32 %v14202_v59, %v16196_v38  ;;  %v6642_v58 = vmul.f32 %v6465_v30, %v6354_v13  ;;  %v6142_v59 = vld [vmem:[%s15363_s1 + $0x1a0] sm:$0xff]  ;;  %v16199_v38 = vld [vmem:[#allocation88_spill] sm:$0xff] }
 0x67f   : > { %6273 = vrot.lane.b32.xlu1 %v14323_v54, %s9188_s17  ;;  %6275 = vrot.lane.b32.xlu0 %v14325_v52, %s9188_s17  ;;  %v6352_v42 = vadd.f32 %v16191_v6, %v16190_v19  ;;  %v6685_v6 = vsel %vm600_vm0, %v6634_v60, -inf  ;;  %v6141_v13 = vld [vmem:[%s15363_s1 + $0x198] sm:$0xff]  ;;  %v6676_v30 = vsel %vm600_vm0, %v6628_v17, -inf }
 0x680   : > { %6574 = vperm.xlu2 %9000, %v6136_v62   ;;  %v5908_v34 = vadd.f32 %v14208_v24, %v5779_v12  ;;  %v6693_v60 = vsel %vm600_vm0, %v6638_v29, -inf  ;;  %v6682_v51 = vmax.f32 %v6676_v30, %v6681_v21  ;;  %v5917_v24 = vpop.f32.mrf.mxu1  ;;  %v6701_v17 = vsel %vm600_vm0, %v6642_v58, -inf }
 0x681   : > { %v14368_v3 = vpop.permute.xlu1 %6239  ;;  %v6470_v39 = vpop.permute.xlu0 %6469  ;;  %v6640_v26 = vmul.f32 %v14210_v31, %v6352_v42  ;;  %v6678_v31 = vsel %vm600_vm0, %v6630_v4, -inf  ;;  %v6039_v42 = vadd.f32 %v14260_v11, %v5910_v18  ;;  %v16200_v11 = vld [vmem:[#allocation30_spill] sm:$0xff] }
 0x682   : > { %v14374_v2 = vpop.permute.xlu2 %6245  ;;  %v6643_v62 = vmul.f32 %v6470_v39, %v6355_v28  ;;  %v6686_v8 = vmax.f32 %v6678_v31, %v6685_v6  ;;  %v16197_v39 = vld [vmem:[#allocation40_spill] sm:$0xff]  ;;  %v6690_v37 = vmax.f32 %v6682_v51, %v6689_v35  ;;  %v6359_v12 = vadd.f32 %v16200_v11, %v16199_v38  ;;  %v16201_v6 = vld [vmem:[#allocation110_spill] sm:$0xff]  ;;  %v16205_v11 = vld [vmem:[#allocation87_spill] sm:$0xff] }
 0x683   : > { %v6697_v16 = vsel %vm600_vm0, %v6640_v26, -inf  ;;  %v6356_v43 = vadd.f32 %v14231_v27, %v16197_v39  ;;  %v6037_v26 = vadd.f32 %v16201_v6, %v5908_v34  ;;  %v14414_v30 = vmax.f32 %v6039_v42, 0.0  ;;  %v16206_v6 = vld [vmem:[#allocation70_spill] sm:$0xff] }
 0x684   : > { %v6703_v22 = vsel %vm600_vm0, %v6643_v62, -inf  ;;  %v16198_v62 = vld [vmem:[#allocation50_spill] sm:$0xff]  ;;  %v6694_v29 = vmax.f32 %v6686_v8, %v6693_v60  ;;  %v6698_v31 = vmax.f32 %v6690_v37, %v6697_v16  ;;  %v16203_v60 = vld [vmem:[#allocation65_spill] sm:$0xff]  ;;  %v6046_v8 = vpop.f32.mrf.mxu2 }
 0x685   : > { %v14391_v28 = vmax.f32 %v6696_v7, %v6703_v22  ;;  %v6358_v4 = vadd.f32 %v14233_v36, %v16198_v62  ;;  %v14409_v7 = vmax.f32 %v6034_v48, 0.0  ;;  %v5784_v35 = vadd.f32 %v14274_v47, %v16203_v60 }
 0x686   : > { %v6702_v58 = vmax.f32 %v6694_v29, %v6701_v17  ;;  %v14426_v16 = vmax.f32 %v6037_v26, 0.0  ;;  %v5790_v17 = vpop.f32.mrf.mxu3  ;;  %v16204_v29 = vld [vmem:[#allocation61_spill] sm:$0xff] }
 0x687   : > { %6594 = vperm.xlu1 %8999, %v6140_v9   ;;  %6604 = vperm.xlu0 %8998, %v6142_v59   ;;  %v16202_v59 = vld [vmem:[#allocation69_spill] sm:$0xff]  ;;  %v5913_v42 = vadd.f32 %v14283_v20, %v5784_v35  ;;  %v5789_v37 = vadd.f32 %v5788_v33, %v16204_v29  ;;  %v5791_v26 = vadd.f32 %v5790_v17, %v16206_v6 }
 0x688   : > { %6599 = vperm.xlu2 %9000, %v6141_v13   ;;  %v5786_v36 = vadd.f32 %v14331_v63, %v16202_v59  ;;  %v6143_v59 = vld [vmem:[%s15363_s1 + $0x1a8] sm:$0xff] }
 0x689   : > { %v6475_v18 = vpop.permute.xlu1 %6474  ;;  %v6485_v21 = vpop.permute.xlu0 %6484 }
 0x68a   : > { %v6644_v22 = vmul.f32 %v6475_v18, %v6356_v43  ;;  %v6490_v9 = vpop.permute.xlu2 %6489  ;;  %v6646_v27 = vmul.f32 %v6485_v21, %v6358_v4  ;;  %v5915_v34 = vadd.f32 %v14343_v1, %v5786_v36  ;;  %v6042_v21 = vadd.f32 %v14306_v55, %v5913_v42 }
 0x68b   : > { %v6647_v13 = vmul.f32 %v6490_v9, %v6359_v12  ;;  %v6362_v12 = vadd.f32 %v14271_v56, %v16205_v11  ;;  %v5919_v9 = vpop.f32.mrf.mxu1 }
 0x68c   : > { %v6705_v51 = vsel %vm600_vm0, %v6644_v22, -inf  ;;  %v6709_v48 = vsel %vm600_vm0, %v6646_v27, -inf  ;;  %v6044_v1 = vadd.f32 %v6043_v41, %v5915_v34  ;;  %v5918_v41 = vadd.f32 %v5917_v24, %v5789_v37 }
 0x68d   : > { %v6706_v43 = vmax.f32 %v6698_v31, %v6705_v51  ;;  %v14422_v4 = vsel %vm600_vm0, %v6647_v13, -inf  ;;  %v14424_v63 = vmax.f32 %v6702_v58, %v6709_v48  ;;  %v14450_v56 = vmax.f32 %v6042_v21, 0.0  ;;  %v6048_v58 = vpop.f32.mrf.mxu2  ;;  %v16207_v13 = vld [vmem:[#allocation6_spill] sm:$0xff] }
 0x68e   : > { %v6712_v47 = vmax.f32 %v14391_v28, %v14422_v4  ;;  %v14445_v36 = vmax.f32 %v6044_v1, 0.0  ;;  %v5920_v31 = vadd.f32 %v5919_v9, %v5791_v26  ;;  %v6360_v60 = vadd.f32 %v14317_v57, %v16207_v13  ;;  %v16208_v57 = vld [vmem:[#allocation112_spill] sm:$0xff]  ;;  %v16216_v4 = vld [vmem:[#allocation43_spill] sm:$0xff] }
 0x68f   : > { %6277 = vrot.lane.b32.xlu1 %v14409_v7, %s9188_s17  ;;  %6281 = vrot.lane.b32.xlu0 %v14414_v30, %s9188_s17  ;;  %v6047_v24 = vadd.f32 %v6046_v8, %v5918_v41  ;;  %v6361_v8 = vadd.f32 %v14368_v3, %v16208_v57 }
 0x690   : > { %6279 = vrot.lane.b32.xlu2 %v14426_v16, %s9188_s17  ;;  %v6049_v48 = vadd.f32 %v6048_v58, %v5920_v31 }
 0x691   : > { %v6244_v20 = vpop.permute.xlu1 %6243  ;;  %v6248_v18 = vpop.permute.xlu0 %6247  ;;  %v14464_v1 = vmax.f32 %v6047_v24, 0.0  ;;  %v16210_v24 = vld [vmem:[#allocation78_spill] sm:$0xff] }
 0x692   : > { %v6505_v22 = vpop.permute.xlu2 %6504  ;;  %v14466_v37 = vmax.f32 %v6049_v48, 0.0  ;;  %v16211_v48 = vld [vmem:[#allocation94_spill] sm:$0xff] }
 0x693   : > { %v6650_v27 = vmul.f32 %v6505_v22, %v6362_v12  ;;  %v16209_v12 = vld [vmem:[#allocation17_spill] sm:$0xff] }
 0x694   : > { %v6364_v21 = vadd.f32 %v14374_v2, %v16209_v12 }
 0x695   : > { %v14448_v33 = vsel %vm600_vm0, %v6650_v27, -inf }
 0x696   : > { %v6718_v55 = vmax.f32 %v14424_v63, %v14448_v33  ;;  %v6145_v63 = vld [vmem:[%s15363_s1 + $0x1b8] sm:$0xff]  ;;  %v6144_v33 = vld [vmem:[%s15363_s1 + $0x1b0] sm:$0xff] }
 0x697   : > { %6609 = vperm.xlu1 %8999, %v6143_v59   ;;  %6285 = vrot.lane.b32.xlu0 %v14445_v36, %s9188_s17  ;;  %v6146_v59 = vld [vmem:[%s15363_s1 + $0x1c0] sm:$0xff] }
 0x698   : > { %6283 = vrot.lane.b32.xlu2 %v14450_v56, %s9188_s17 }
 0x699   : > { %v6250_v35 = vpop.permute.xlu1 %6249  ;;  %v6495_v51 = vpop.permute.xlu0 %6494 }
 0x69a   : > { %v6256_v34 = vpop.permute.xlu2 %6255  ;;  %v6648_v42 = vmul.f32 %v6495_v51, %v6360_v60  ;;  %v6363_v51 = vadd.f32 %v6244_v20, %v16210_v24 }
 0x69c   : > { %v6713_v17 = vsel %vm600_vm0, %v6648_v42, -inf  ;;  %v6365_v42 = vadd.f32 %v6248_v18, %v16211_v48 }
 0x69d   : > { %v6714_v29 = vmax.f32 %v6706_v43, %v6713_v17  ;;  %v16212_v17 = vld [vmem:[#allocation111_spill] sm:$0xff] }
 0x69f   : > { %6619 = vperm.xlu0 %8998, %v6145_v63   ;;  %6287 = vrot.lane.b32.xlu1 %v14464_v1, %s9188_s17  ;;  %v6369_v63 = vadd.f32 %v6256_v34, %v16212_v17 }
 0x6a0   : > { %6289 = vrot.lane.b32.xlu2 %v14466_v37, %s9188_s17 }
 0x6a1   : > { %v6500_v6 = vpop.permute.xlu1 %6499  ;;  %v6252_v26 = vpop.permute.xlu0 %6251 }
 0x6a2   : > { %v6649_v22 = vmul.f32 %v6500_v6, %v6361_v8  ;;  %v6515_v9 = vpop.permute.xlu2 %6514 }
 0x6a3   : > { %v6652_v43 = vmul.f32 %v6515_v9, %v6364_v21 }
 0x6a4   : > { %v6715_v27 = vsel %vm600_vm0, %v6649_v22, -inf }
 0x6a5   : > { %v6716_v41 = vmax.f32 %v14349_v40, %v6715_v27  ;;  %v6721_v3 = vsel %vm600_vm0, %v6652_v43, -inf }
 0x6a6   : > { %v14485_v2 = vmax.f32 %v6714_v29, %v6721_v3  ;;  %v16213_v3 = vld [vmem:[#allocation16_spill] sm:$0xff] }
 0x6a7   : > { %6624 = vperm.xlu1 %8999, %v6146_v59   ;;  %v6366_v34 = vadd.f32 %v6250_v35, %v16213_v3 }
 0x6a8   : > { %6614 = vperm.xlu2 %9000, %v6144_v33   ;;  %v16214_v33 = vld [vmem:[#allocation92_spill] sm:$0xff] }
 0x6a9   : > { %v6254_v31 = vpop.permute.xlu1 %6253  ;;  %v6258_v58 = vpop.permute.xlu0 %6257 }
 0x6aa   : > { %v6260_v60 = vpop.permute.xlu2 %6259 }
 0x6ab   : > { %v6371_v17 = vadd.f32 %v6260_v60, %v16214_v33 }
 0x6b1   : > { %v6510_v40 = vpop.permute.xlu1 %6509  ;;  %v6520_v8 = vpop.permute.xlu0 %6519 }
 0x6b2   : > { %v6651_v21 = vmul.f32 %v6510_v40, %v6363_v51  ;;  %v6540_v6 = vpop.permute.xlu2 %6539  ;;  %v6653_v22 = vmul.f32 %v6520_v8, %v6365_v42 }
 0x6b3   : > { %v6657_v9 = vmul.f32 %v6540_v6, %v6369_v63 }
 0x6b4   : > { %v6719_v29 = vsel %vm600_vm0, %v6651_v21, -inf  ;;  %v6723_v43 = vsel %vm600_vm0, %v6653_v22, -inf  ;;  %v16215_v22 = vld [vmem:[#allocation106_spill] sm:$0xff] }
 0x6b5   : > { %v6720_v27 = vmax.f32 %v6712_v47, %v6719_v29  ;;  %v6724_v59 = vmax.f32 %v6716_v41, %v6723_v43  ;;  %v6731_v20 = vsel %vm600_vm0, %v6657_v9, -inf  ;;  %v6367_v28 = vadd.f32 %v6252_v26, %v16215_v22  ;;  %v6776_v26 = vld [vmem:[%s15368_s6] sm:$0xff] }
 0x6b6   : > { %v6368_v47 = vadd.f32 %v6254_v31, %v16216_v4  ;;  %v16217_v31 = vld [vmem:[#allocation100_spill] sm:$0xff]  ;;  %6799 = vmatpush.msrb.mxu3 %v6776_v26 }
 0x6b7   : > { %v6732_v18 = vmax.f32 %v6724_v59, %v6731_v20 }
 0x6b9   : > { %v6525_v51 = vpop.permute.xlu1 %6524  ;;  %v6262_v40 = vpop.permute.xlu0 %6261 }
 0x6ba   : > { %v6654_v42 = vmul.f32 %v6525_v51, %v6366_v34  ;;  %v6550_v63 = vpop.permute.xlu2 %6549  ;;  %v6370_v51 = vadd.f32 %v6258_v58, %v16217_v31 }
 0x6bb   : > { %v6659_v8 = vmul.f32 %v6550_v63, %v6371_v17 }
 0x6bc   : > { %v6725_v21 = vsel %vm600_vm0, %v6654_v42, -inf }
 0x6bd   : > { %v14499_v6 = vmax.f32 %v6718_v55, %v6725_v21  ;;  %v6735_v55 = vsel %vm600_vm0, %v6659_v8, -inf }
 0x6c1   : > { %v6535_v41 = vpop.permute.xlu1 %6534  ;;  %v6530_v9 = vpop.permute.xlu0 %6529 }
 0x6c2   : > { %v6656_v29 = vmul.f32 %v6535_v41, %v6368_v47  ;;  %v14503_v43 = vpop.permute.xlu2 %6265  ;;  %v6655_v35 = vmul.f32 %v6530_v9, %v6367_v28  ;;  %v16219_v41 = vld [vmem:[#allocation120_spill] sm:$0xff] }
 0x6c4   : > { %v6729_v60 = vsel %vm600_vm0, %v6656_v29, -inf  ;;  %v6727_v59 = vsel %vm600_vm0, %v6655_v35, -inf }
 0x6c5   : > { %v6730_v17 = vmax.f32 %v14485_v2, %v6729_v60  ;;  %v6728_v20 = vmax.f32 %v6720_v27, %v6727_v59  ;;  %v16218_v27 = vld [vmem:[#allocation54_spill] sm:$0xff] }
 0x6c6   : > { %v6372_v8 = vadd.f32 %v6262_v40, %v16218_v27 }
 0x6c7   : > { %v6736_v34 = vmax.f32 %v6728_v20, %v6735_v55 }
 0x6c9   : > { %v6264_v42 = vpop.permute.xlu1 %6263  ;;  %v6545_v63 = vpop.permute.xlu0 %6544 }
 0x6ca   : > { %v14513_v21 = vpop.permute.xlu2 %6564  ;;  %v6658_v28 = vmul.f32 %v6545_v63, %v6370_v51  ;;  %v6373_v9 = vadd.f32 %v6264_v42, %v16219_v41 }
 0x6cc   : > { %v14516_v47 = vsel %vm600_vm0, %v6658_v28, -inf }
 0x6d1   : > { %v6560_v29 = vpop.permute.xlu1 %6559  ;;  %v6555_v35 = vpop.permute.xlu0 %6554 }
 0x6d2   : > { %v6661_v60 = vmul.f32 %v6560_v29, %v6373_v9  ;;  %v6270_v58 = vpop.permute.xlu2 %6269  ;;  %v6660_v59 = vmul.f32 %v6555_v35, %v6372_v8 }
 0x6d4   : > { %v6739_v20 = vsel %vm600_vm0, %v6661_v60, -inf  ;;  %v6737_v55 = vsel %vm600_vm0, %v6660_v59, -inf }
 0x6d5   : > { %v14524_v26 = vmax.f32 %v6732_v18, %v6739_v20  ;;  %v6738_v51 = vmax.f32 %v6730_v17, %v6737_v55  ;;  %v6376_v18 = vadd.f32 %v6270_v58, %v14293_v15  ;;  %v16220_v17 = vld [vmem:[#allocation22_spill] sm:$0xff] }
 0x6d9   : > { %v6268_v63 = vpop.permute.xlu1 %6267  ;;  %v6580_v28 = vpop.permute.xlu0 %6579 }
 0x6da   : > { %v6575_v33 = vpop.permute.xlu2 %6574  ;;  %v6375_v20 = vadd.f32 %v6268_v63, %v16220_v17 }
 0x6db   : > { %v6664_v3 = vmul.f32 %v6575_v33, %v6376_v18 }
 0x6dd   : > { %v6745_v11 = vsel %vm600_vm0, %v6664_v3, -inf }
 0x6e1   : > { %v6570_v2 = vpop.permute.xlu1 %6569  ;;  %v6272_v31 = vpop.permute.xlu0 %6271 }
 0x6e2   : > { %v6600_v40 = vpop.permute.xlu2 %6599  ;;  %v6663_v24 = vmul.f32 %v6570_v2, %v6375_v20 }
 0x6e4   : > { %v6743_v38 = vsel %vm600_vm0, %v6663_v24, -inf  ;;  %v6377_v24 = vadd.f32 %v6272_v31, %v14248_v61 }
 0x6e5   : > { %v6744_v33 = vmax.f32 %v6736_v34, %v6743_v38 }
 0x6e6   : > { %v6665_v31 = vmul.f32 %v6580_v28, %v6377_v24 }
 0x6e9   : > { %v6585_v27 = vpop.permute.xlu1 %6584  ;;  %v6590_v42 = vpop.permute.xlu0 %6589 }
 0x6ea   : > { %v6280_v41 = vpop.permute.xlu2 %6279 }
 0x6f1   : > { %v6274_v22 = vpop.permute.xlu1 %6273  ;;  %v6276_v9 = vpop.permute.xlu0 %6275 }
 0x6f2   : > { %v6284_v29 = vpop.permute.xlu2 %6283  ;;  %v6379_v55 = vadd.f32 %v6276_v9, %v14325_v52 }
 0x6f3   : > { %v6383_v13 = vadd.f32 %v6284_v29, %v14450_v56  ;;  %v6378_v29 = vadd.f32 %v6274_v22, %v14323_v54 }
 0x6f4   : > { %v6667_v12 = vmul.f32 %v6590_v42, %v6379_v55 }
 0x6f6   : > { %v6751_v58 = vsel %vm600_vm0, %v6667_v12, -inf }
 0x6f9   : > { %v6595_v8 = vpop.permute.xlu1 %6594  ;;  %v6605_v35 = vpop.permute.xlu0 %6604 }
 0x6fa   : > { %v6290_v60 = vpop.permute.xlu2 %6289 }
 0x701   : > { %v6278_v4 = vpop.permute.xlu1 %6277  ;;  %v6282_v59 = vpop.permute.xlu0 %6281 }
 0x702   : > { %v6380_v48 = vadd.f32 %v6278_v4, %v14409_v7  ;;  %v6746_v4 = vmax.f32 %v6738_v51, %v6745_v11  ;;  %v6615_v2 = vpop.permute.xlu2 %6614  ;;  %v6381_v11 = vadd.f32 %v6280_v41, %v14426_v16  ;;  %v6666_v51 = vmul.f32 %v6585_v27, %v6378_v29 }
 0x703   : > { %v6386_v27 = vadd.f32 %v6290_v60, %v14466_v37 }
 0x704   : > { %v6668_v57 = vmul.f32 %v6595_v8, %v6380_v48  ;;  %v6752_v8 = vmax.f32 %v6744_v33, %v6751_v58  ;;  %v6669_v55 = vmul.f32 %v6600_v40, %v6381_v11  ;;  %v6749_v41 = vsel %vm600_vm0, %v6666_v51, -inf }
 0x706   : > { %v6753_v63 = vsel %vm600_vm0, %v6668_v57, -inf }
 0x707   : > { %v6754_v3 = vmax.f32 %v6746_v4, %v6753_v63 }
 0x709   : > { %v6610_v62 = vpop.permute.xlu1 %6609  ;;  %v6286_v39 = vpop.permute.xlu0 %6285 }
 0x70a   : > { %v6671_v17 = vmul.f32 %v6610_v62, %v6383_v13  ;;  %v6384_v9 = vadd.f32 %v6286_v39, %v14445_v36  ;;  %v6806_v39 = vld [vmem:[%s15370_s8 + $0x8] sm:$0xff]  ;;  %v16221_v62 = vld [vmem:[#allocation25_spill] sm:$0xff]  ;;  %v6382_v13 = vadd.f32 %v6282_v59, %v14414_v30  ;;  %v16222_v59 = vmax.f32 %v14499_v6, %v14516_v47 }
 0x70b   : > { %v6374_v38 = vadd.f32 %v14503_v43, %v16221_v62  ;;  %6826 = vmatpush.msra.mxu3 %v6806_v39  ;;  %v6747_v43 = vsel %vm600_vm0, %v6665_v31, -inf  ;;  %v6807_v31 = vld [vmem:[%s15371_s9] sm:$0x1] }
 0x70c   : > { %v6759_v48 = vsel %vm600_vm0, %v6671_v17, -inf  ;;  %v6672_v42 = vmul.f32 %v6615_v2, %v6384_v9  ;;  %v6670_v58 = vmul.f32 %v6605_v35, %v6382_v13  ;;  %v6748_v40 = vmax.f32 %v14524_v26, %v6747_v43  ;;  %v6805_v26 = vld [vmem:[%s15370_s8] sm:$0xff] }
 0x70d   : > { %v6760_v12 = vmax.f32 %v6752_v8, %v6759_v48  ;;  %v6662_v22 = vmul.f32 %v14513_v21, %v6374_v38  ;;  %v6755_v21 = vsel %vm600_vm0, %v6669_v55, -inf  ;;  %6827 = vmatpush.msra.mxu3 %v6805_v26  ;;  %v6780_v13 = vld [vmem:[%s15369_s7] sm:$0x1] }
 0x70e   : > { %v6761_v18 = vsel %vm600_vm0, %v6672_v42, -inf  ;;  %v6757_v28 = vsel %vm600_vm0, %v6670_v58, -inf  ;;  %v9107_v26 = vld [vmem:[%s9286_s20 + $0x80] sm:$0xff] }
 0x70f   : > { %v6762_v20 = vmax.f32 %v6754_v3, %v6761_v18  ;;  %v6741_v9 = vsel %vm600_vm0, %v6662_v22, -inf  ;;  %v6756_v3 = vmax.f32 %v6748_v40, %v6755_v21  ;;  %v9102_v40 = vld [vmem:[%s9286_s20 + $0x58] sm:$0xff] }
 0x710   : > { %v6742_v33 = vmax.f32 %v16222_v59, %v6741_v9 }
 0x711   : > { %v6767_v57 = vmax.f32 %v6760_v12, %v6762_v20  ;;  %v6288_v34 = vpop.permute.xlu1 %6287  ;;  %v6620_v63 = vpop.permute.xlu0 %6619 }
 0x712   : > { %v6385_v17 = vadd.f32 %v6288_v34, %v14464_v1  ;;  %v6750_v35 = vmax.f32 %v6742_v33, %v6749_v41  ;;  %v9101_v33 = vld [vmem:[%s9286_s20 + $0x50] sm:$0xff] }
 0x713   : > { %v7246_v21 = vpack.c.bf16 %v9101_v33, %v9101_v33 }
 0x714   : > { %v6673_v4 = vmul.f32 %v6620_v63, %v6385_v17  ;;  %v6758_v8 = vmax.f32 %v6750_v35, %v6757_v28  ;;  %v7247_v35 = vpack.c.bf16 %v9102_v40, %v9102_v40 }
 0x715   : > { %v7462_v28 = vunpack.c.l.b16 %v7246_v21  ;;  %v9110_v21 = vld [vmem:[%s9286_s20 + $0x98] sm:$0xff] }
 0x716   : > { %v6763_v48 = vsel %vm600_vm0, %v6673_v4, -inf  ;;  %v9100_v4 = vld [vmem:[%s9286_s20 + $0x48] sm:$0xff] }
 0x717   : > { %v6764_v29 = vmax.f32 %v6756_v3, %v6763_v48  ;;  %v7245_v59 = vpack.c.bf16 %v9100_v4, %v9100_v4  ;;  %v7463_v3 = vunpack.c.l.b16 %v7247_v35 }
 0x719   : > { %v6625_v2 = vpop.permute.xlu1 %6624 }
 0x71a   : > { %v6674_v42 = vmul.f32 %v6625_v2, %v6386_v27  ;;  %v7461_v27 = vunpack.c.l.b16 %v7245_v59  ;;  %v9103_v2 = vld [vmem:[%s9286_s20 + $0x60] sm:$0xff] }
 0x71b   : > { %v7248_v48 = vpack.c.bf16 %v9103_v2, %v9103_v2 }
 0x71c   : > { %v6765_v24 = vsel %vm600_vm0, %v6674_v42, -inf  ;;  %v7509_v42 = vpack.c.b16 %v7462_v28, %v7461_v27  ;;  %v7255_v27 = vpack.c.bf16 %v9110_v21, %v9110_v21  ;;  %v9111_v28 = vld [vmem:[%s9286_s20 + $0xa0] sm:$0xff] }
 0x71d   : > { %v6766_v6 = vmax.f32 %v6758_v8, %v6765_v24  ;;  %v7464_v8 = vunpack.c.l.b16 %v7248_v48  ;;  %v9104_v24 = vld [vmem:[%s9286_s20 + $0x68] sm:$0xff]  ;;  %v7256_v40 = vpack.c.bf16 %v9111_v28, %v9111_v28 }
 0x71e   : > { %v7471_v48 = vunpack.c.l.b16 %v7255_v27  ;;  %v9120_v27 = vld [vmem:[%s9286_s20 + $0xe8] sm:$0xff] }
 0x71f   : > { %v6768_v47 = vmax.f32 %v6764_v29, %v6766_v6  ;;  %v7249_v29 = vpack.c.bf16 %v9104_v24, %v9104_v24  ;;  %v9105_v6 = vld [vmem:[%s9286_s20 + $0x70] sm:$0xff]  ;;  %v7265_v28 = vpack.c.bf16 %v9120_v27, %v9120_v27 }
 0x721   : > { %v6769_v18 = vmax.f32 %v6767_v57, %v6768_v47  ;;  %v7250_v47 = vpack.c.bf16 %v9105_v6, %v9105_v6 }
 0x723   : > { %v6770_v12 = vrot.slane %v6769_v18, 4 }
 0x725   : > { %v6771_v20 = vmax.f32 %v6769_v18, %v6770_v12  ;;  %v7510_v12 = vpack.c.b16 %v7464_v8, %v7463_v3  ;;  %v7472_v3 = vunpack.c.l.b16 %v7256_v40  ;;  %v9112_v8 = vld [vmem:[%s9286_s20 + $0xa8] sm:$0xff]  ;;  %v9121_v40 = vld [vmem:[%s9286_s20 + $0xf0] sm:$0xff] }
 0x726   : > { %v7257_v24 = vpack.c.bf16 %v9112_v8, %v9112_v8 }
 0x727   : > { %v6772_v60 = vrot.slane %v6771_v20, 2 }
 0x729   : > { %v6773_v39 = vmax.f32 %v6771_v20, %v6772_v60  ;;  %v7465_v20 = vunpack.c.l.b16 %v7249_v29  ;;  %v7466_v60 = vunpack.c.l.b16 %v7250_v47  ;;  %v9113_v29 = vld [vmem:[%s9286_s20 + $0xb0] sm:$0xff]  ;;  %v7514_v47 = vpack.c.b16 %v7472_v3, %v7471_v48 }
 0x72a   : > { %v7258_v6 = vpack.c.bf16 %v9113_v29, %v9113_v29  ;;  %v7481_v48 = vunpack.c.l.b16 %v7265_v28  ;;  %v9130_v28 = vld [vmem:[%s9286_s20 + $0x138] sm:$0xff] }
 0x72b   : > { %v6774_v38 = vrot.slane %v6773_v39, 1 }
 0x72d   : > { %v6775_v11 = vmax.f32 %v6773_v39, %v6774_v38  ;;  %v9106_v38 = vld [vmem:[%s9286_s20 + $0x78] sm:$0xff] }
 0x72f   : > { %8282 = vmatmul.msk.f32.vlgmr.msrb.gmra.mxu3 %vm600_vm0, %v6775_v11  ;;  %v7251_v11 = vpack.c.bf16 %v9106_v38, %v9106_v38 }
 0x7b2   : > { %v6801_v34 = vpop.f32.mrf.mxu3 }
 0x7b3   : > { %v6802_v22 = vadd.f32 %v6801_v34, %v6780_v13  ;;  %v7252_v13 = vpack.c.bf16 %v9107_v26, %v9107_v26  ;;  %v7511_v34 = vpack.c.b16 %v7466_v60, %v7465_v20  ;;  %v7474_v20 = vunpack.c.l.b16 %v7258_v6 }
 0x7b5   : > { %v6804_v57 = vmax.f32 %v6802_v22, 0.0  ;;  %v7467_v22 = vunpack.c.l.b16 %v7251_v11  ;;  %v9115_v11 = vld [vmem:[%s9286_s20 + $0xc0] sm:$0xff] }
 0x7b6   : > { %v7260_v26 = vpack.c.bf16 %v9115_v11, %v9115_v11  ;;  %v9125_v11 = vld [vmem:[%s9286_s20 + $0x110] sm:$0xff] }
 0x7b7   : > { %8283 = vmatmul.msk.f32.vlgmr.msra.gmra.mxu3 %vm6808_vm11, %v6804_v57  ;;  %v7468_v57 = vunpack.c.l.b16 %v7252_v13 }
 0x83a   : > { %v6829_v51 = vpop.f32.mrf.mxu3 }
 0x83b   : > { %v6830_v17 = vadd.f32 %v6829_v51, %v6807_v31 }
 0x83d   : > { %6833 = vrot.lane.b32.xlu2 %v6830_v17, %s9188_s17 }
 0x897   : > { %v6834_v55 = vpop.permute.xlu2 %6833 }
 0x898   : > { %v6836_v58 = vmax.f32 %v6830_v17, %v6834_v55 }
 0x89a   : > { %6841 = vrot.lane.b32.xlu0 %v6836_v58, %s9187_s16  ;;  %v6837_v18 = vsub.f32 %v6830_v17, %v6836_v58 }
 0x89c   : > { %v6838_v39 = vmul.f32 1.442695, %v6837_v18  ;;  %v7473_v18 = vunpack.c.l.b16 %v7257_v24  ;;  %v9122_v24 = vld [vmem:[%s9286_s20 + $0xf8] sm:$0xff] }
 0x89d   : > { %v7267_v29 = vpack.c.bf16 %v9122_v24, %v9122_v24 }
 0x89e   : > { %v7515_v60 = vpack.c.b16 %v7474_v20, %v7473_v18 }
 0x89f   : > { %v7483_v18 = vunpack.c.l.b16 %v7267_v29 }
 0x90c   : > { %v6842_v63 = vpop.permute.xlu0 %6841 }
 0x90d   : > { %v6844_v9 = vsub.f32 %v6830_v17, %v6842_v63  ;;  %v9108_v17 = vld [vmem:[%s9286_s20 + $0x88] sm:$0xff]  ;;  %v9109_v63 = vld [vmem:[%s9286_s20 + $0x90] sm:$0xff] }
 0x90e   : > { %v7253_v58 = vpack.c.bf16 %v9108_v17, %v9108_v17 }
 0x90f   : > { %v6845_v43 = vmul.f32 1.442695, %v6844_v9  ;;  %v7254_v9 = vpack.c.bf16 %v9109_v63, %v9109_v63  ;;  %v9118_v63 = vld [vmem:[%s9286_s20 + $0xd8] sm:$0xff] }
 0x910   : > { %v7469_v4 = vunpack.c.l.b16 %v7253_v58 }
 0x911   : > { %9004 = vpow2.f32 %v6845_v43  ;;  %v7512_v43 = vpack.c.b16 %v7468_v57, %v7467_v22  ;;  %v7470_v59 = vunpack.c.l.b16 %v7254_v9  ;;  %v7476_v22 = vunpack.c.l.b16 %v7260_v26 }
 0x912   : > { %9006 = vpow2.f32 %v6838_v39  ;;  %v9114_v39 = vld [vmem:[%s9286_s20 + $0xb8] sm:$0xff]  ;;  %v7263_v9 = vpack.c.bf16 %v9118_v63, %v9118_v63  ;;  %v7270_v26 = vpack.c.bf16 %v9125_v11, %v9125_v11 }
 0x913   : > { %v7513_v2 = vpack.c.b16 %v7470_v59, %v7469_v4  ;;  %v7259_v38 = vpack.c.bf16 %v9114_v39, %v9114_v39  ;;  %v9119_v4 = vld [vmem:[%s9286_s20 + $0xe0] sm:$0xff]  ;;  %v9124_v39 = vld [vmem:[%s9286_s20 + $0x108] sm:$0xff] }
 0x914   : > { %v7264_v59 = vpack.c.bf16 %v9119_v4, %v9119_v4 }
 0x915   : > { %v7475_v13 = vunpack.c.l.b16 %v7259_v38  ;;  %v7269_v38 = vpack.c.bf16 %v9124_v39, %v9124_v39 }
 0x917   : > { %v14573_v41 = vpop.eup %9004  ;;  %v7516_v57 = vpack.c.b16 %v7476_v22, %v7475_v13  ;;  %v7485_v13 = vunpack.c.l.b16 %v7269_v38  ;;  %v7486_v22 = vunpack.c.l.b16 %v7270_v26 }
 0x918   : > { %6848 = vrot.lane.b32.xlu1 %v14573_v41, %s9188_s17  ;;  %v9007_v31 = vpop.eup %9006 }
 0x98a   : > { %v6849_v51 = vpop.permute.xlu1 %6848 }
 0x98b   : > { %v6851_v55 = vadd.f32 %v9007_v31, %v6849_v51  ;;  %v9117_v51 = vld [vmem:[%s9286_s20 + $0xd0] sm:$0xff] }
 0x98d   : > { %9008 = vrcp.f32 %v6851_v55  ;;  %v7262_v55 = vpack.c.bf16 %v9117_v51, %v9117_v51  ;;  %v9127_v51 = vld [vmem:[%s9286_s20 + $0x120] sm:$0xff] }
 0x98f   : > { %v7478_v17 = vunpack.c.l.b16 %v7262_v55  ;;  %v7272_v55 = vpack.c.bf16 %v9127_v51, %v9127_v51 }
 0x993   : > { %v9009_v33 = vpop.eup %9008 }
 0x994   : > { %v14589_v35 = vmul.f32 %v9009_v33, %v9007_v31  ;;  %6904 = vrot.lane.b32.xlu2 %v9009_v33, %s9187_s16  ;;  %v9116_v31 = vld [vmem:[%s9286_s20 + $0xc8] sm:$0xff]  ;;  %v7480_v33 = vunpack.c.l.b16 %v7264_v59  ;;  %v9129_v59 = vld [vmem:[%s9286_s20 + $0x130] sm:$0xff] }
 0x99c   : > { %7533 = vrot.lane.b32.xlu2 %v7509_v42, %s9187_s16  ;;  %v7261_v42 = vpack.c.bf16 %v9116_v31, %v9116_v31  ;;  %v9126_v31 = vld [vmem:[%s9286_s20 + $0x118] sm:$0xff] }
 0x9a4   : > { %7535 = vrot.lane.b32.xlu2 %v7510_v12, %s9187_s16  ;;  %v7477_v12 = vunpack.c.l.b16 %v7261_v42  ;;  %v7271_v42 = vpack.c.bf16 %v9126_v31, %v9126_v31 }
 0x9a6   : > { %v7517_v58 = vpack.c.b16 %v7478_v17, %v7477_v12  ;;  %v7487_v12 = vunpack.c.l.b16 %v7271_v42  ;;  %v7488_v17 = vunpack.c.l.b16 %v7272_v55  ;;  %v9135_v42 = vld [vmem:[%s9286_s20 + $0x160] sm:$0xff] }
 0x9a7   : > { %v7280_v51 = vpack.c.bf16 %v9135_v42, %v9135_v42 }
 0x9a8   : > { %v7522_v63 = vpack.c.b16 %v7488_v17, %v7487_v12  ;;  %v16223_v12 = vld [vmem:[#allocation4_spill] sm:$0xff] }
 0x9ac   : > { %7537 = vrot.lane.b32.xlu2 %v7511_v34, %s9187_s16  ;;  %v7479_v34 = vunpack.c.l.b16 %v7263_v9  ;;  %v9128_v9 = vld [vmem:[%s9286_s20 + $0x128] sm:$0xff] }
 0x9ad   : > { %v7273_v4 = vpack.c.bf16 %v9128_v9, %v9128_v9 }
 0x9ae   : > { %v7518_v21 = vpack.c.b16 %v7480_v33, %v7479_v34  ;;  %v7274_v34 = vpack.c.bf16 %v9129_v59, %v9129_v59 }
 0x9b0   : > { %v7490_v33 = vunpack.c.l.b16 %v7274_v34  ;;  %v9136_v34 = vld [vmem:[%s9286_s20 + $0x168] sm:$0xff] }
 0x9b4   : > { %7539 = vrot.lane.b32.xlu2 %v7512_v43, %s9187_s16  ;;  %v7266_v43 = vpack.c.bf16 %v9121_v40, %v9121_v40  ;;  %v7275_v40 = vpack.c.bf16 %v9130_v28, %v9130_v28 }
 0x9b6   : > { %v7482_v3 = vunpack.c.l.b16 %v7266_v43  ;;  %v9131_v43 = vld [vmem:[%s9286_s20 + $0x140] sm:$0xff] }
 0x9b8   : > { %v7519_v8 = vpack.c.b16 %v7482_v3, %v7481_v48  ;;  %v7276_v48 = vpack.c.bf16 %v9131_v43, %v9131_v43  ;;  %v14623_v3 = vunpack.c.l.b16 %v7275_v40 }
 0x9ba   : > { %v7492_v24 = vunpack.c.l.b16 %v7276_v48 }
 0x9bc   : > { %7541 = vrot.lane.b32.xlu2 %v7513_v2, %s9187_s16  ;;  %v9123_v2 = vld [vmem:[%s9286_s20 + $0x100] sm:$0xff] }
 0x9bd   : > { %v7268_v6 = vpack.c.bf16 %v9123_v2, %v9123_v2  ;;  %v7524_v2 = vpack.c.b16 %v7492_v24, %v14623_v3  ;;  %v9138_v24 = vld [vmem:[%s9286_s20 + $0x178] sm:$0xff] }
 0x9bf   : > { %v7484_v20 = vunpack.c.l.b16 %v7268_v6  ;;  %v9132_v6 = vld [vmem:[%s9286_s20 + $0x148] sm:$0xff] }
 0x9c4   : > { %7543 = vrot.lane.b32.xlu2 %v7514_v47, %s9187_s16  ;;  %v7520_v47 = vpack.c.b16 %v7484_v20, %v7483_v18  ;;  %v7277_v18 = vpack.c.bf16 %v9132_v6, %v9132_v6  ;;  %v9133_v20 = vld [vmem:[%s9286_s20 + $0x150] sm:$0xff]  ;;  %v9139_v6 = vld [vmem:[%s9286_s20 + $0x180] sm:$0xff] }
 0x9c5   : > { %v7278_v39 = vpack.c.bf16 %v9133_v20, %v9133_v20 }
 0x9c6   : > { %v7493_v11 = vunpack.c.l.b16 %v7277_v18  ;;  %v7284_v18 = vpack.c.bf16 %v9139_v6, %v9139_v6 }
 0x9c7   : > { %v7494_v26 = vunpack.c.l.b16 %v7278_v39 }
 0x9cc   : > { %7545 = vrot.lane.b32.xlu2 %v7515_v60, %s9187_s16  ;;  %v7521_v60 = vpack.c.b16 %v7486_v22, %v7485_v13  ;;  %v7525_v13 = vpack.c.b16 %v7494_v26, %v7493_v11  ;;  %v9134_v22 = vld [vmem:[%s9286_s20 + $0x158] sm:$0xff]  ;;  %v9140_v26 = vld [vmem:[%s9286_s20 + $0x188] sm:$0xff] }
 0x9cd   : > { %v7279_v31 = vpack.c.bf16 %v9134_v22, %v9134_v22  ;;  %v7285_v22 = vpack.c.bf16 %v9140_v26, %v9140_v26 }
 0x9cf   : > { %v7495_v9 = vunpack.c.l.b16 %v7279_v31  ;;  %v9141_v31 = vld [vmem:[%s9286_s20 + $0x190] sm:$0xff] }
 0x9d0   : > { %v7286_v42 = vpack.c.bf16 %v9141_v31, %v9141_v31  ;;  %v9146_v31 = vld [vmem:[%s9286_s20 + $0x1b8] sm:$0xff] }
 0x9d4   : > { %7547 = vrot.lane.b32.xlu2 %v7516_v57, %s9187_s16  ;;  %v7489_v57 = vunpack.c.l.b16 %v7273_v4  ;;  %v7496_v4 = vunpack.c.l.b16 %v7280_v51 }
 0x9d6   : > { %v7523_v27 = vpack.c.b16 %v7490_v33, %v7489_v57  ;;  %v7526_v59 = vpack.c.b16 %v7496_v4, %v7495_v9  ;;  %v7281_v57 = vpack.c.bf16 %v9136_v34, %v9136_v34  ;;  %v9137_v33 = vld [vmem:[%s9286_s20 + $0x170] sm:$0xff]  ;;  %v7502_v9 = vunpack.c.l.b16 %v7286_v42  ;;  %v9142_v34 = vld [vmem:[%s9286_s20 + $0x198] sm:$0xff] }
 0x9d7   : > { %v7282_v28 = vpack.c.bf16 %v9137_v33, %v9137_v33  ;;  %v9143_v33 = vld [vmem:[%s9286_s20 + $0x1a0] sm:$0xff]  ;;  %v7291_v42 = vpack.c.bf16 %v9146_v31, %v9146_v31 }
 0x9d8   : > { %v7497_v48 = vunpack.c.l.b16 %v7281_v57  ;;  %v7287_v57 = vpack.c.bf16 %v9142_v34, %v9142_v34 }
 0x9dc   : > { %7549 = vrot.lane.b32.xlu2 %v7517_v58, %s9187_s16 }
 0x9e4   : > { %7551 = vrot.lane.b32.xlu2 %v7518_v21, %s9187_s16 }
 0x9ec   : > { %7553 = vrot.lane.b32.xlu2 %v7519_v8, %s9187_s16 }
 0x9ee   : > { %v6905_v58 = vpop.permute.xlu2 %6904 }
 0x9ef   : > { %v6907_v29 = vmul.f32 %v14573_v41, %v6905_v58  ;;  %v7498_v58 = vunpack.c.l.b16 %v7282_v28  ;;  %v7288_v28 = vpack.c.bf16 %v9143_v33, %v9143_v33 }
 0x9f1   : > { %v14627_v21 = vperm.slane %v6907_v29, 0  ;;  %v7527_v3 = vpack.c.b16 %v7498_v58, %v7497_v48  ;;  %v7283_v29 = vpack.c.bf16 %v9138_v24, %v9138_v24  ;;  %v7503_v48 = vunpack.c.l.b16 %v7287_v57 }
 0x9f2   : > { %v7504_v58 = vunpack.c.l.b16 %v7288_v28  ;;  %v7507_v57 = vunpack.c.l.b16 %v7291_v42 }
 0x9f3   : > { %v6910_v38 = vmul.f32 %v14627_v21, %v13625_v23  ;;  %v6909_v8 = vmul.f32 %v14627_v21, %v13614_v10  ;;  %v6912_v55 = vmul.f32 %v14627_v21, %v13666_v45  ;;  %v6914_v40 = vmul.f32 %v14627_v21, %v13680_v46 }
 0x9f4   : > { %7555 = vrot.lane.b32.xlu2 %v7520_v47, %s9187_s16  ;;  %v6911_v47 = vmul.f32 %v14627_v21, %v16223_v12  ;;  %v6916_v20 = vmul.f32 %v14627_v21, %v13696_v32  ;;  %v6918_v51 = vmul.f32 %v14627_v21, %v16181_v25  ;;  %v7530_v24 = vpack.c.b16 %v7504_v58, %v7503_v48  ;;  %v16227_v48 = vld [vmem:[#allocation29_spill] sm:$0xff] }
 0x9f5   : > { %7007 = vrot.lane.b32.xlu1 %v6910_v38, %s9188_s17  ;;  %7005 = vrot.lane.b32.xlu0 %v6909_v8, %s9188_s17  ;;  %v7499_v38 = vunpack.c.l.b16 %v7283_v29  ;;  %v7500_v8 = vunpack.c.l.b16 %v7284_v18  ;;  %v9144_v29 = vld [vmem:[%s9286_s20 + $0x1a8] sm:$0xff]  ;;  %v9145_v18 = vld [vmem:[%s9286_s20 + $0x1b0] sm:$0xff]  ;;  %v6925_v58 = vmul.f32 %v14627_v21, %v16227_v48 }
 0x9f6   : > { %v14638_v41 = vpop.permute.xlu2 %7533  ;;  %v7289_v6 = vpack.c.bf16 %v9144_v29, %v9144_v29  ;;  %v16229_v29 = vld [vmem:[#allocation50_spill] sm:$0xff] }
 0x9f7   : > { %v7528_v11 = vpack.c.b16 %v7500_v8, %v7499_v38 }
 0x9f8   : > { %v7505_v8 = vunpack.c.l.b16 %v7289_v6  ;;  %v6928_v6 = vmul.f32 %v14627_v21, %v16229_v29 }
 0x9fc   : > { %7557 = vrot.lane.b32.xlu2 %v7521_v60, %s9187_s16  ;;  %v6913_v60 = vmul.f32 %v14627_v21, %v13673_v0 }
 0x9fd   : > { %7011 = vrot.lane.b32.xlu1 %v6912_v55, %s9188_s17  ;;  %7009 = vrot.lane.b32.xlu0 %v6911_v47, %s9188_s17  ;;  %v7501_v47 = vunpack.c.l.b16 %v7285_v22 }
 0x9fe   : > { %v14649_v17 = vpop.permute.xlu2 %7535 }
 0x9ff   : > { %v7529_v4 = vpack.c.b16 %v7502_v9, %v7501_v47  ;;  %v6924_v47 = vmul.f32 %v14627_v21, %v16193_v5  ;;  %v16224_v9 = vld [vmem:[#allocation42_spill] sm:$0xff] }
 0xa00   : > { %v6923_v34 = vmul.f32 %v14627_v21, %v16224_v9 }
 0xa04   : > { %7559 = vrot.lane.b32.xlu2 %v7522_v63, %s9187_s16  ;;  %v6915_v63 = vmul.f32 %v14627_v21, %v13690_v14 }
 0xa05   : > { %7015 = vrot.lane.b32.xlu1 %v6914_v40, %s9188_s17  ;;  %7013 = vrot.lane.b32.xlu0 %v6913_v60, %s9188_s17  ;;  %v6920_v40 = vmul.f32 %v14627_v21, %v16184_v49 }
 0xa06   : > { %v14660_v43 = vpop.permute.xlu2 %7537 }
 0xa0c   : > { %7561 = vrot.lane.b32.xlu2 %v7523_v27, %s9187_s16  ;;  %v6917_v27 = vmul.f32 %v14627_v21, %v13717_v50 }
 0xa0d   : > { %7019 = vrot.lane.b32.xlu1 %v6916_v20, %s9188_s17  ;;  %7017 = vrot.lane.b32.xlu0 %v6915_v63, %s9188_s17  ;;  %v7290_v20 = vpack.c.bf16 %v9145_v18, %v9145_v18  ;;  %v6922_v63 = vmul.f32 %v14627_v21, %v16190_v19  ;;  %v16230_v18 = vld [vmem:[#allocation5_spill] sm:$0xff] }
 0xa0e   : > { %v14671_v39 = vpop.permute.xlu2 %7539 }
 0xa0f   : > { %v7506_v26 = vunpack.c.l.b16 %v7290_v20  ;;  %v6927_v20 = vmul.f32 %v14627_v21, %v16230_v18 }
 0xa11   : > { %v7531_v22 = vpack.c.b16 %v7506_v26, %v7505_v8  ;;  %v16233_v26 = vld [vmem:[#allocation88_spill] sm:$0xff] }
 0xa12   : > { %v6929_v31 = vmul.f32 %v14627_v21, %v16233_v26 }
 0xa14   : > { %7563 = vrot.lane.b32.xlu2 %v7524_v2, %s9187_s16  ;;  %v6919_v2 = vmul.f32 %v14627_v21, %v13715_v53 }
 0xa15   : > { %7023 = vrot.lane.b32.xlu1 %v6918_v51, %s9188_s17  ;;  %7021 = vrot.lane.b32.xlu0 %v6917_v27, %s9188_s17  ;;  %v9147_v51 = vld [vmem:[%s9286_s20 + $0x1c0] sm:$0xff] }
 0xa16   : > { %v14682_v55 = vpop.permute.xlu2 %7541  ;;  %v7292_v27 = vpack.c.bf16 %v9147_v51, %v9147_v51  ;;  %v16235_v51 = vld [vmem:[#allocation87_spill] sm:$0xff] }
 0xa18   : > { %v7508_v33 = vunpack.c.l.b16 %v7292_v27  ;;  %v6932_v27 = vmul.f32 %v14627_v21, %v16235_v51 }
 0xa1a   : > { %v7532_v28 = vpack.c.b16 %v7508_v33, %v7507_v57  ;;  %v8365_v57 = vld [vmem:[%s15372_s10 + $0x8] sm:$0xff]  ;;  %v8364_v33 = vld [vmem:[%s15372_s10] sm:$0xff] }
 0xa1c   : > { %7565 = vrot.lane.b32.xlu2 %v7525_v13, %s9187_s16  ;;  %v6921_v13 = vmul.f32 %v14627_v21, %v13784_v44 }
 0xa1d   : > { %7027 = vrot.lane.b32.xlu1 %v6920_v40, %s9188_s17  ;;  %7025 = vrot.lane.b32.xlu0 %v6919_v2, %s9188_s17  ;;  %v16226_v40 = vld [vmem:[#allocation40_spill] sm:$0xff] }
 0xa1e   : > { %v14693_v60 = vpop.permute.xlu2 %7543  ;;  %v6926_v2 = vmul.f32 %v14627_v21, %v16226_v40 }
 0xa24   : > { %7567 = vrot.lane.b32.xlu2 %v7526_v59, %s9187_s16 }
 0xa25   : > { %7031 = vrot.lane.b32.xlu1 %v6922_v63, %s9188_s17  ;;  %7029 = vrot.lane.b32.xlu0 %v6921_v13, %s9188_s17  ;;  %v16232_v13 = vld [vmem:[#allocation6_spill] sm:$0xff] }
 0xa26   : > { %v14704_v38 = vpop.permute.xlu2 %7545  ;;  %v6930_v8 = vmul.f32 %v14627_v21, %v16232_v13 }
 0xa2c   : > { %7569 = vrot.lane.b32.xlu2 %v7527_v3, %s9187_s16 }
 0xa2d   : > { %7035 = vrot.lane.b32.xlu1 %v6924_v47, %s9188_s17  ;;  %7033 = vrot.lane.b32.xlu0 %v6923_v34, %s9188_s17  ;;  %v16236_v47 = vld [vmem:[#allocation112_spill] sm:$0xff] }
 0xa2e   : > { %v14715_v59 = vpop.permute.xlu2 %7547  ;;  %v6931_v34 = vmul.f32 %v14627_v21, %v16236_v47 }
 0xa2f   : > { %16225 = vst [vmem:[#allocation97_spill] sm:$0xff] %v14715_v59 }
 0xa34   : > { %7571 = vrot.lane.b32.xlu2 %v7528_v11, %s9187_s16  ;;  %v8367_v11 = vld [vmem:[%s15372_s10 + $0x18] sm:$0xff] }
 0xa35   : > { %7039 = vrot.lane.b32.xlu1 %v6926_v2, %s9188_s17  ;;  %7037 = vrot.lane.b32.xlu0 %v6925_v58, %s9188_s17  ;;  %v16238_v2 = vld [vmem:[#allocation17_spill] sm:$0xff] }
 0xa36   : > { %v14724_v3 = vpop.permute.xlu2 %7549  ;;  %7741 = vmatpush.bf16.msrb.mxu3 %v8367_v11  ;;  %v6934_v58 = vmul.f32 %v14627_v21, %v16238_v2  ;;  %v545_v11 = vld [vmem:[%s15363_s1 + $0x200] sm:$0xff] }
 0xa37   : > { %16228 = vst [vmem:[#allocation28_spill] sm:$0xff] %v14724_v3  ;;  %v16247_v3 = vld [vmem:[#allocation100_spill] sm:$0xff] }
 0xa38   : > { %v6940_v59 = vmul.f32 %v14627_v21, %v16247_v3 }
 0xa3c   : > { %7573 = vrot.lane.b32.xlu2 %v7529_v4, %s9187_s16  ;;  %v8366_v4 = vld [vmem:[%s15372_s10 + $0x10] sm:$0xff] }
 0xa3d   : > { %7043 = vrot.lane.b32.xlu1 %v6928_v6, %s9188_s17  ;;  %7041 = vrot.lane.b32.xlu0 %v6927_v20, %s9188_s17  ;;  %v16239_v6 = vld [vmem:[#allocation78_spill] sm:$0xff] }
 0xa3e   : > { %v14733_v63 = vpop.permute.xlu2 %7551  ;;  %7742 = vmatpush.bf16.msrb.mxu3 %v8366_v4  ;;  %v16242_v4 = vld [vmem:[#allocation94_spill] sm:$0xff] }
 0xa3f   : > { %16231 = vst [vmem:[#allocation95_spill] sm:$0xff] %v14733_v63 }
 0xa42   : > { %7743 = vmatpush.bf16.msrb.mxu3 %v8365_v57  ;;  %v16244_v57 = vld [vmem:[#allocation43_spill] sm:$0xff] }
 0xa44   : > { %7575 = vrot.lane.b32.xlu2 %v7530_v24, %s9187_s16 }
 0xa45   : > { %7047 = vrot.lane.b32.xlu1 %v6930_v8, %s9188_s17  ;;  %7045 = vrot.lane.b32.xlu0 %v6929_v31, %s9188_s17  ;;  %v16241_v8 = vld [vmem:[#allocation16_spill] sm:$0xff] }
 0xa46   : > { %v14748_v42 = vpop.permute.xlu2 %7553  ;;  %7744 = vmatpush.bf16.msrb.mxu3 %v8364_v33  ;;  %v6936_v31 = vmul.f32 %v14627_v21, %v16241_v8  ;;  %v6938_v33 = vmul.f32 %v14627_v21, %v16244_v57 }
 0xa47   : > { %16234 = vst [vmem:[#allocation32_spill] sm:$0xff] %v14748_v42 }
 0xa4c   : > { %7577 = vrot.lane.b32.xlu2 %v7531_v22, %s9187_s16  ;;  %v6933_v22 = vmul.f32 %v14627_v21, %v16239_v6 }
 0xa4d   : > { %7051 = vrot.lane.b32.xlu1 %v6932_v27, %s9188_s17  ;;  %7049 = vrot.lane.b32.xlu0 %v6931_v34, %s9188_s17  ;;  %v6935_v27 = vmul.f32 %v14627_v21, %v16242_v4  ;;  %v14786_v34 = vperm.slane %v14589_v35, 0 }
 0xa4e   : > { %v14757_v24 = vpop.permute.xlu2 %7555 }
 0xa4f   : > { %16237 = vst [vmem:[#allocation10_spill] sm:$0xff] %v14757_v24 }
 0xa54   : > { %7579 = vrot.lane.b32.xlu2 %v7532_v28, %s9187_s16 }
 0xa55   : > { %7055 = vrot.lane.b32.xlu1 %v6934_v58, %s9188_s17  ;;  %7053 = vrot.lane.b32.xlu0 %v6933_v22, %s9188_s17  ;;  %v16245_v58 = vld [vmem:[#allocation106_spill] sm:$0xff] }
 0xa56   : > { %v14772_v20 = vpop.permute.xlu2 %7557  ;;  %v6937_v22 = vmul.f32 %v14627_v21, %v16245_v58 }
 0xa57   : > { %16240 = vst [vmem:[#allocation39_spill] sm:$0xff] %v14772_v20 }
 0xa5c   : > { %1262 = vperm.xlu2 %9000, %v545_v11  }
 0xa5d   : > { %7059 = vrot.lane.b32.xlu1 %v6936_v31, %s9188_s17  ;;  %7057 = vrot.lane.b32.xlu0 %v6935_v27, %s9188_s17  ;;  %v6856_v31 = vmul.f32 %v14786_v34, %v13625_v23  ;;  %v6855_v27 = vmul.f32 %v14786_v34, %v13614_v10 }
 0xa5e   : > { %v14783_v28 = vpop.permute.xlu2 %7559 }
 0xa5f   : > { %16243 = vst [vmem:[#allocation76_spill] sm:$0xff] %v14783_v28 }
 0xa65   : > { %7063 = vrot.lane.b32.xlu1 %v6938_v33, %s9188_s17  ;;  %7061 = vrot.lane.b32.xlu0 %v6937_v22, %s9188_s17  ;;  %v16248_v33 = vld [vmem:[#allocation111_spill] sm:$0xff] }
 0xa66   : > { %v14794_v11 = vpop.permute.xlu2 %7561  ;;  %v6939_v22 = vmul.f32 %v14627_v21, %v16248_v33 }
 0xa67   : > { %16246 = vst [vmem:[#allocation45_spill] sm:$0xff] %v14794_v11  ;;  %v7008_v35 = vpop.permute.xlu1 %7007  ;;  %v7006_v28 = vpop.permute.xlu0 %7005 }
 0xa68   : > { %v7150_v20 = vadd.f32 %v7008_v35, %v6856_v31  ;;  %v7149_v24 = vadd.f32 %v7006_v28, %v6855_v27  ;;  %v6858_v28 = vmul.f32 %v14786_v34, %v13666_v45 }
 0xa6a   : > { %v7198_v42 = vpack.c.bf16 %v7150_v20, %v7150_v20  ;;  %v7197_v63 = vpack.c.bf16 %v7149_v24, %v7149_v24  ;;  %v6857_v24 = vmul.f32 %v14786_v34, %v16223_v12 }
 0xa6c   : > { %v7342_v58 = vunpack.c.l.b16 %v7198_v42  ;;  %v7341_v11 = vunpack.c.l.b16 %v7197_v63 }
 0xa6d   : > { %7067 = vrot.lane.b32.xlu1 %v6940_v59, %s9188_s17  ;;  %7065 = vrot.lane.b32.xlu0 %v6939_v22, %s9188_s17  ;;  %v16250_v59 = vld [vmem:[#allocation54_spill] sm:$0xff] }
 0xa6e   : > { %v7389_v23 = vpack.c.b16 %v7342_v58, %v7341_v11  ;;  %v14806_v10 = vpop.permute.xlu2 %7563  ;;  %v6942_v58 = vmul.f32 %v14627_v21, %v16250_v59  ;;  %v16251_v11 = vld [vmem:[#allocation92_spill] sm:$0xff] }
 0xa6f   : > { %16249 = vst [vmem:[#allocation73_spill] sm:$0xff] %v14806_v10  ;;  %v7012_v20 = vpop.permute.xlu1 %7011  ;;  %v7010_v31 = vpop.permute.xlu0 %7009  ;;  %v6941_v35 = vmul.f32 %v14627_v21, %v16251_v11 }
 0xa70   : > { %v7583_v27 = vsel %vm600_vm0, %v7389_v23, %v14638_v41  ;;  %v7152_v42 = vadd.f32 %v7012_v20, %v6858_v28  ;;  %v7151_v63 = vadd.f32 %v7010_v31, %v6857_v24  ;;  %v6944_v24 = vmul.f32 %v14627_v21, %v16221_v62  ;;  %v16253_v20 = vld [vmem:[#allocation120_spill] sm:$0xff] }
 0xa71   : > { %8300 = vmatmul.msk.bf16.vlgmr.msrb.gmra.mxu3 %vm3721_vm8, %v7583_v27  ;;  %v6943_v31 = vmul.f32 %v14627_v21, %v16253_v20 }
 0xa72   : > { %v7200_v22 = vpack.c.bf16 %v7152_v42, %v7152_v42  ;;  %v7199_v45 = vpack.c.bf16 %v7151_v63, %v7151_v63  ;;  %v6860_v42 = vmul.f32 %v14786_v34, %v13680_v46  ;;  %v6859_v63 = vmul.f32 %v14786_v34, %v13673_v0 }
 0xa74   : > { %v7344_v23 = vunpack.c.l.b16 %v7200_v22  ;;  %v7343_v28 = vunpack.c.l.b16 %v7199_v45 }
 0xa75   : > { %7071 = vrot.lane.b32.xlu1 %v6942_v58, %s9188_s17  ;;  %7069 = vrot.lane.b32.xlu0 %v6941_v35, %s9188_s17 }
 0xa76   : > { %v14821_v12 = vpop.permute.xlu2 %7565  ;;  %v7390_v27 = vpack.c.b16 %v7344_v23, %v7343_v28  ;;  %v6946_v23 = vmul.f32 %v14627_v21, %v14293_v15  ;;  %v16254_v28 = vld [vmem:[#allocation22_spill] sm:$0xff] }
 0xa77   : > { %16252 = vst [vmem:[#allocation75_spill] sm:$0xff] %v14821_v12  ;;  %v7016_v10 = vpop.permute.xlu1 %7015  ;;  %v7014_v41 = vpop.permute.xlu0 %7013  ;;  %v6945_v46 = vmul.f32 %v14627_v21, %v16254_v28 }
 0xa78   : > { %v7154_v45 = vadd.f32 %v7016_v10, %v6860_v42  ;;  %v7153_v12 = vadd.f32 %v7014_v41, %v6859_v63  ;;  %v7586_v20 = vsel %vm600_vm0, %v7390_v27, %v14649_v17  ;;  %v6947_v27 = vmul.f32 %v14627_v21, %v14248_v61 }
 0xa7d   : > { %7075 = vrot.lane.b32.xlu1 %v6944_v24, %s9188_s17  ;;  %7073 = vrot.lane.b32.xlu0 %v6943_v31, %s9188_s17  ;;  %v7202_v24 = vpack.c.bf16 %v7154_v45, %v7154_v45  ;;  %v7201_v31 = vpack.c.bf16 %v7153_v12, %v7153_v12  ;;  %v6862_v12 = vmul.f32 %v14786_v34, %v13696_v32 }
 0xa7e   : > { %v14833_v58 = vpop.permute.xlu2 %7567  ;;  %v6861_v45 = vmul.f32 %v14786_v34, %v13690_v14  ;;  %v6949_v32 = vmul.f32 %v14627_v21, %v14325_v52 }
 0xa7f   : > { %v7020_v35 = vpop.permute.xlu1 %7019  ;;  %v7018_v22 = vpop.permute.xlu0 %7017  ;;  %v7346_v42 = vunpack.c.l.b16 %v7202_v24  ;;  %v7345_v17 = vunpack.c.l.b16 %v7201_v31 }
 0xa80   : > { %v7156_v31 = vadd.f32 %v7020_v35, %v6862_v12  ;;  %v6952_v12 = vmul.f32 %v14627_v21, %v14414_v30 }
 0xa81   : > { %8301 = vmatmul.msk.bf16.gmra.mxu3 %vm3721_vm8, %v7586_v20  ;;  %v6948_v20 = vmul.f32 %v14627_v21, %v14323_v54  ;;  %v7391_v63 = vpack.c.b16 %v7346_v42, %v7345_v17  ;;  %v6950_v17 = vmul.f32 %v14627_v21, %v14409_v7 }
 0xa83   : > { %v7589_v42 = vsel %vm600_vm0, %v7391_v63, %v14660_v43 }
 0xa85   : > { %7079 = vrot.lane.b32.xlu1 %v6946_v23, %s9188_s17  ;;  %7077 = vrot.lane.b32.xlu0 %v6945_v46, %s9188_s17 }
 0xa86   : > { %v14844_v0 = vpop.permute.xlu2 %7569 }
 0xa87   : > { %16255 = vst [vmem:[#allocation77_spill] sm:$0xff] %v14844_v0  ;;  %v7024_v10 = vpop.permute.xlu1 %7023  ;;  %v7022_v41 = vpop.permute.xlu0 %7021  ;;  %v7155_v0 = vadd.f32 %v7018_v22, %v6861_v45  ;;  %v6951_v45 = vmul.f32 %v14627_v21, %v14426_v16 }
 0xa89   : > { %v7203_v14 = vpack.c.bf16 %v7155_v0, %v7155_v0  ;;  %v6864_v0 = vmul.f32 %v14786_v34, %v16181_v25  ;;  %v6953_v25 = vmul.f32 %v14627_v21, %v14450_v56 }
 0xa8b   : > { %v7347_v63 = vunpack.c.l.b16 %v7203_v14  ;;  %v7158_v14 = vadd.f32 %v7024_v10, %v6864_v0  ;;  %v6872_v10 = vmul.f32 %v14786_v34, %v16226_v40 }
 0xa8d   : > { %7083 = vrot.lane.b32.xlu1 %v6948_v20, %s9188_s17  ;;  %7081 = vrot.lane.b32.xlu0 %v6947_v27, %s9188_s17  ;;  %v7204_v20 = vpack.c.bf16 %v7156_v31, %v7156_v31 }
 0xa8e   : > { %v14856_v23 = vpop.permute.xlu2 %7571 }
 0xa8f   : > { %16256 = vst [vmem:[#allocation82_spill] sm:$0xff] %v14856_v23  ;;  %v7028_v46 = vpop.permute.xlu1 %7027  ;;  %v14858_v24 = vpop.permute.xlu0 %7025  ;;  %v7348_v43 = vunpack.c.l.b16 %v7204_v20 }
 0xa91   : > { %8302 = vmatmul.msk.bf16.gmra.mxu3 %vm3721_vm8, %v7589_v42  ;;  %v7392_v31 = vpack.c.b16 %v7348_v43, %v7347_v63  ;;  %v6863_v42 = vmul.f32 %v14786_v34, %v13717_v50  ;;  %v6954_v63 = vmul.f32 %v14627_v21, %v14445_v36  ;;  %v7206_v50 = vpack.c.bf16 %v7158_v14, %v7158_v14 }
 0xa93   : > { %v7592_v43 = vsel %vm600_vm0, %v7392_v31, %v14671_v39  ;;  %v6871_v39 = vmul.f32 %v14786_v34, %v16227_v48  ;;  %v7350_v0 = vunpack.c.l.b16 %v7206_v50  ;;  %v6866_v48 = vmul.f32 %v14786_v34, %v16184_v49 }
 0xa95   : > { %7087 = vrot.lane.b32.xlu1 %v6950_v17, %s9188_s17  ;;  %7085 = vrot.lane.b32.xlu0 %v6949_v32, %s9188_s17 }
 0xa96   : > { %v14869_v27 = vpop.permute.xlu2 %7573 }
 0xa97   : > { %16257 = vst [vmem:[#allocation86_spill] sm:$0xff] %v14869_v27  ;;  %v14871_v35 = vpop.permute.xlu1 %7031  ;;  %v14873_v22 = vpop.permute.xlu0 %7029  ;;  %v7157_v27 = vadd.f32 %v7022_v41, %v6863_v42 }
 0xa9d   : > { %7091 = vrot.lane.b32.xlu1 %v6952_v12, %s9188_s17  ;;  %7089 = vrot.lane.b32.xlu0 %v6951_v45, %s9188_s17  ;;  %v7205_v12 = vpack.c.bf16 %v7157_v27, %v7157_v27 }
 0xa9e   : > { %v14885_v17 = vpop.permute.xlu2 %7575 }
 0xa9f   : > { %16258 = vst [vmem:[#allocation83_spill] sm:$0xff] %v14885_v17  ;;  %v14887_v32 = vpop.permute.xlu1 %7035  ;;  %v14889_v20 = vpop.permute.xlu0 %7033  ;;  %v7349_v42 = vunpack.c.l.b16 %v7205_v12 }
 0xaa1   : > { %8303 = vmatmul.msk.bf16.gmra.mxu3 %vm3721_vm8, %v7592_v43 }
 0xaa5   : > { %7095 = vrot.lane.b32.xlu1 %v6954_v63, %s9188_s17  ;;  %7093 = vrot.lane.b32.xlu0 %v6953_v25, %s9188_s17  ;;  %v6956_v63 = vmul.f32 %v14627_v21, %v14466_v37  ;;  %v6955_v25 = vmul.f32 %v14627_v21, %v14464_v1  ;;  %v6874_v21 = vmul.f32 %v14786_v34, %v16229_v29  ;;  %v482_v29 = vld [vmem:[%s15363_s1 + $0x8] sm:$0xff] }
 0xaa6   : > { %v14900_v45 = vpop.permute.xlu2 %7577 }
 0xaa7   : > { %16259 = vst [vmem:[#allocation38_spill] sm:$0xff] %v14900_v45  ;;  %v7040_v41 = vpop.permute.xlu1 %7039  ;;  %v7038_v31 = vpop.permute.xlu0 %7037  ;;  %v7393_v45 = vpack.c.b16 %v7350_v0, %v7349_v42 }
 0xaa8   : > { %v7166_v43 = vadd.f32 %v7040_v41, %v6872_v10  ;;  %v7165_v17 = vadd.f32 %v7038_v31, %v6871_v39  ;;  %v6873_v10 = vmul.f32 %v14786_v34, %v16230_v18  ;;  %v7160_v39 = vadd.f32 %v7028_v46, %v6866_v48  ;;  %v481_v18 = vld [vmem:[%s15363_s1] sm:$0xff] }
 0xaa9   : > { %v6875_v48 = vmul.f32 %v14786_v34, %v16233_v26  ;;  %v6867_v26 = vmul.f32 %v14786_v34, %v13784_v44 }
 0xaaa   : > { %v7214_v14 = vpack.c.bf16 %v7166_v43, %v7166_v43  ;;  %v7213_v27 = vpack.c.bf16 %v7165_v17, %v7165_v17  ;;  %v6865_v17 = vmul.f32 %v14786_v34, %v13715_v53  ;;  %v7595_v53 = vsel %vm600_vm0, %v7393_v45, %v14682_v55 }
 0xaab   : > { %v7208_v46 = vpack.c.bf16 %v7160_v39, %v7160_v39 }
 0xaac   : > { %v14910_v23 = vunpack.c.l.b16 %v7214_v14  ;;  %v14912_v40 = vunpack.c.l.b16 %v7213_v27  ;;  %v7159_v31 = vadd.f32 %v14858_v24, %v6865_v17 }
 0xaad   : > { %7099 = vrot.lane.b32.xlu1 %v6956_v63, %s9188_s17  ;;  %7097 = vrot.lane.b32.xlu0 %v6955_v25, %s9188_s17  ;;  %v6876_v25 = vmul.f32 %v14786_v34, %v16232_v13  ;;  %v6868_v13 = vmul.f32 %v14786_v34, %v16190_v19 }
 0xaae   : > { %v7397_v50 = vpack.c.b16 %v14910_v23, %v14912_v40  ;;  %v14922_v12 = vpop.permute.xlu2 %7579  ;;  %v7207_v27 = vpack.c.bf16 %v7159_v31, %v7159_v31  ;;  %v6892_v40 = vmul.f32 %v14786_v34, %v14293_v15 }
 0xaaf   : > { %v7044_v49 = vpop.permute.xlu1 %7043  ;;  %v7042_v41 = vpop.permute.xlu0 %7041 }
 0xab0   : > { %v7168_v0 = vadd.f32 %v7044_v49, %v6874_v21  ;;  %v7167_v42 = vadd.f32 %v7042_v41, %v6873_v10  ;;  %v7352_v10 = vunpack.c.l.b16 %v7208_v46  ;;  %v7351_v39 = vunpack.c.l.b16 %v7207_v27 }
 0xab1   : > { %8304 = vmatmul.msk.bf16.gmra.mxu3 %vm3721_vm8, %v7595_v53  ;;  %v6877_v46 = vmul.f32 %v14786_v34, %v16236_v47  ;;  %v7162_v27 = vadd.f32 %v14871_v35, %v6868_v13 }
 0xab2   : > { %v7216_v43 = vpack.c.bf16 %v7168_v0, %v7168_v0  ;;  %v7215_v14 = vpack.c.bf16 %v7167_v42, %v7167_v42  ;;  %v546_v42 = vld [vmem:[%s15363_s1 + $0x208] sm:$0xff]  ;;  %v7394_v53 = vpack.c.b16 %v7352_v10, %v7351_v39 }
 0xab3   : > { %v7210_v39 = vpack.c.bf16 %v7162_v27, %v7162_v27 }
 0xab4   : > { %v14938_v24 = vunpack.c.l.b16 %v7216_v43  ;;  %v14940_v63 = vunpack.c.l.b16 %v7215_v14  ;;  %v7598_v44 = vsel %vm600_vm0, %v7394_v53, %v14693_v60 }
 0xab5   : > { %947 = vperm.xlu1 %8999, %v482_v29   ;;  %942 = vperm.xlu0 %8998, %v481_v18   ;;  %v6878_v18 = vmul.f32 %v14786_v34, %v16235_v51 }
 0xab6   : > { %v7398_v55 = vpack.c.b16 %v14938_v24, %v14940_v63  ;;  %v1263_v45 = vpop.permute.xlu2 %1262  ;;  %v6896_v63 = vmul.f32 %v14786_v34, %v14409_v7 }
 0xab7   : > { %v7048_v17 = vpop.permute.xlu1 %7047  ;;  %v7046_v21 = vpop.permute.xlu0 %7045 }
 0xab8   : > { %v7170_v49 = vadd.f32 %v7048_v17, %v6876_v25  ;;  %v7169_v41 = vadd.f32 %v7046_v21, %v6875_v48  ;;  %v7161_v48 = vadd.f32 %v14873_v22, %v6867_v26  ;;  %v6880_v22 = vmul.f32 %v14786_v34, %v16238_v2 }
 0xab9   : > { %v6869_v2 = vmul.f32 %v14786_v34, %v16224_v9 }
 0xaba   : > { %v7218_v31 = vpack.c.bf16 %v7170_v49, %v7170_v49  ;;  %v7217_v0 = vpack.c.bf16 %v7169_v41, %v7169_v41  ;;  %v7209_v51 = vpack.c.bf16 %v7161_v48, %v7161_v48  ;;  %v6879_v41 = vmul.f32 %v14786_v34, %v16239_v6 }
 0xabb   : > { %v6882_v48 = vmul.f32 %v14786_v34, %v16241_v8 }
 0xabc   : > { %v14951_v43 = vunpack.c.l.b16 %v7218_v31  ;;  %v14953_v14 = vunpack.c.l.b16 %v7217_v0  ;;  %v7354_v0 = vunpack.c.l.b16 %v7210_v39 }
 0xabd   : > { %1267 = vperm.xlu0 %8998, %v546_v42   ;;  %v7353_v42 = vunpack.c.l.b16 %v7209_v51 }
 0xabe   : > { %v7399_v29 = vpack.c.b16 %v14951_v43, %v14953_v14  ;;  %v6900_v14 = vmul.f32 %v14786_v34, %v14445_v36 }
 0xabf   : > { %v7052_v45 = vpop.permute.xlu1 %7051  ;;  %v7050_v25 = vpop.permute.xlu0 %7049 }
 0xac0   : > { %v7172_v19 = vadd.f32 %v7052_v45, %v6878_v18  ;;  %v7171_v17 = vadd.f32 %v7050_v25, %v6877_v46  ;;  %v7395_v46 = vpack.c.b16 %v7354_v0, %v7353_v42  ;;  %v6870_v25 = vmul.f32 %v14786_v34, %v16193_v5 }
 0xac1   : > { %8305 = vmatmul.msk.bf16.gmra.mxu3 %vm3721_vm8, %v7598_v44 }
 0xac2   : > { %v7220_v21 = vpack.c.bf16 %v7172_v19, %v7172_v19  ;;  %v7219_v10 = vpack.c.bf16 %v7171_v17, %v7171_v17  ;;  %v6881_v19 = vmul.f32 %v14786_v34, %v16242_v4  ;;  %v7164_v17 = vadd.f32 %v14887_v32, %v6870_v25 }
 0xac3   : > { %v7601_v9 = vsel %vm600_vm0, %v7395_v46, %v14704_v38 }
 0xac4   : > { %v14970_v49 = vunpack.c.l.b16 %v7220_v21  ;;  %v14972_v47 = vunpack.c.l.b16 %v7219_v10  ;;  %v7163_v10 = vadd.f32 %v14889_v20, %v6869_v2  ;;  %v6884_v20 = vmul.f32 %v14786_v34, %v16244_v57 }
 0xac5   : > { %v6886_v57 = vmul.f32 %v14786_v34, %v16247_v3 }
 0xac6   : > { %v7400_v35 = vpack.c.b16 %v14970_v49, %v14972_v47  ;;  %v7211_v8 = vpack.c.bf16 %v7163_v10, %v7163_v10 }
 0xac7   : > { %v7056_v60 = vpop.permute.xlu1 %7055  ;;  %v7054_v31 = vpop.permute.xlu0 %7053 }
 0xac8   : > { %v7174_v53 = vadd.f32 %v7056_v60, %v6880_v22  ;;  %v7173_v13 = vadd.f32 %v7054_v31, %v6879_v41  ;;  %v7212_v41 = vpack.c.bf16 %v7164_v17, %v7164_v17  ;;  %v16260_v31 = vld [vmem:[#allocation106_spill] sm:$0xff] }
 0xac9   : > { %v6883_v0 = vmul.f32 %v14786_v34, %v16260_v31  ;;  %v6887_v31 = vmul.f32 %v14786_v34, %v16251_v11 }
 0xaca   : > { %v7222_v26 = vpack.c.bf16 %v7174_v53, %v7174_v53  ;;  %v7221_v18 = vpack.c.bf16 %v7173_v13, %v7173_v13  ;;  %v7356_v53 = vunpack.c.l.b16 %v7212_v41  ;;  %v7355_v13 = vunpack.c.l.b16 %v7211_v8 }
 0xacc   : > { %v14980_v27 = vunpack.c.l.b16 %v7222_v26  ;;  %v14982_v45 = vunpack.c.l.b16 %v7221_v18  ;;  %v7396_v2 = vpack.c.b16 %v7356_v53, %v7355_v13 }
 0xace   : > { %v7401_v6 = vpack.c.b16 %v14980_v27, %v14982_v45  ;;  %v16268_v45 = vld [vmem:[#allocation76_spill] sm:$0xff] }
 0xacf   : > { %v7060_v44 = vpop.permute.xlu1 %7059  ;;  %v7058_v21 = vpop.permute.xlu0 %7057 }
 0xad0   : > { %v7176_v39 = vadd.f32 %v7060_v44, %v6882_v48  ;;  %v7175_v5 = vadd.f32 %v7058_v21, %v6881_v19  ;;  %v6885_v44 = vmul.f32 %v14786_v34, %v16248_v33  ;;  %v6888_v33 = vmul.f32 %v14786_v34, %v16250_v59 }
 0xad1   : > { %8306 = vmatmul.msk.bf16.gmra.mxu3 %vm3721_vm8, %v7601_v9  ;;  %v16261_v9 = vld [vmem:[#allocation97_spill] sm:$0xff]  ;;  %v6890_v59 = vmul.f32 %v14786_v34, %v16221_v62 }
 0xad2   : > { %v7224_v51 = vpack.c.bf16 %v7176_v39, %v7176_v39  ;;  %v7223_v22 = vpack.c.bf16 %v7175_v5, %v7175_v5 }
 0xad4   : > { %v14999_v60 = vunpack.c.l.b16 %v7224_v51  ;;  %v15001_v4 = vunpack.c.l.b16 %v7223_v22  ;;  %v7604_v51 = vsel %vm600_vm0, %v7396_v2, %v16261_v9  ;;  %v16262_v2 = vld [vmem:[#allocation120_spill] sm:$0xff]  ;;  %v15051_v9 = vld [vmem:[%s15373_s11] ss:$0 sm:$0xff] }
 0xad5   : > { %v6889_v11 = vmul.f32 %v14786_v34, %v16262_v2 }
 0xad6   : > { %v7402_v32 = vpack.c.b16 %v14999_v60, %v15001_v4  ;;  %v16269_v4 = vld [vmem:[#allocation45_spill] sm:$0xff] }
 0xad7   : > { %v7064_v38 = vpop.permute.xlu1 %7063  ;;  %v7062_v42 = vpop.permute.xlu0 %7061 }
 0xad8   : > { %v7178_v26 = vadd.f32 %v7064_v38, %v6884_v20  ;;  %v7177_v18 = vadd.f32 %v7062_v42, %v6883_v0 }
 0xada   : > { %v7226_v46 = vpack.c.bf16 %v7178_v26, %v7178_v26  ;;  %v7225_v25 = vpack.c.bf16 %v7177_v18, %v7177_v18 }
 0xadc   : > { %v15009_v48 = vunpack.c.l.b16 %v7226_v46  ;;  %v15011_v19 = vunpack.c.l.b16 %v7225_v25 }
 0xade   : > { %v7403_v17 = vpack.c.b16 %v15009_v48, %v15011_v19  ;;  %v16270_v19 = vld [vmem:[#allocation73_spill] sm:$0xff] }
 0xadf   : > { %v7068_v21 = vpop.permute.xlu1 %7067  ;;  %v7066_v10 = vpop.permute.xlu0 %7065 }
 0xae0   : > { %v7180_v39 = vadd.f32 %v7068_v21, %v6886_v57  ;;  %v7179_v5 = vadd.f32 %v7066_v10, %v6885_v44 }
 0xae1   : > { %8307 = vmatmul.msk.bf16.gmra.mxu3 %vm3721_vm8, %v7604_v51 }
 0xae2   : > { %v7228_v22 = vpack.c.bf16 %v7180_v39, %v7180_v39  ;;  %v7227_v41 = vpack.c.bf16 %v7179_v5, %v7179_v5  ;;  %v16263_v39 = vld [vmem:[#allocation28_spill] sm:$0xff] }
 0xae3   : > { %v7607_v5 = vsel %vm600_vm0, %v7397_v50, %v16263_v39  ;;  %v6891_v50 = vmul.f32 %v14786_v34, %v16254_v28 }
 0xae4   : > { %v15022_v8 = vunpack.c.l.b16 %v7228_v22  ;;  %v15024_v20 = vunpack.c.l.b16 %v7227_v41 }
 0xae6   : > { %v7404_v3 = vpack.c.b16 %v15022_v8, %v15024_v20  ;;  %v16271_v20 = vld [vmem:[#allocation75_spill] sm:$0xff] }
 0xae7   : > { %v7072_v0 = vpop.permute.xlu1 %7071  ;;  %v7070_v38 = vpop.permute.xlu0 %7069 }
 0xae8   : > { %v7182_v42 = vadd.f32 %v7072_v0, %v6888_v33  ;;  %v7181_v53 = vadd.f32 %v7070_v38, %v6887_v31 }
 0xaea   : > { %v7230_v13 = vpack.c.bf16 %v7182_v42, %v7182_v42  ;;  %v7229_v26 = vpack.c.bf16 %v7181_v53, %v7181_v53 }
 0xaec   : > { %v15032_v18 = vunpack.c.l.b16 %v7230_v13  ;;  %v15034_v46 = vunpack.c.l.b16 %v7229_v26 }
 0xaee   : > { %v7405_v25 = vpack.c.b16 %v15032_v18, %v15034_v46 }
 0xaef   : > { %v7076_v57 = vpop.permute.xlu1 %7075  ;;  %v7074_v44 = vpop.permute.xlu0 %7073 }
 0xaf0   : > { %v7184_v21 = vadd.f32 %v7076_v57, %v6890_v59  ;;  %v7183_v10 = vadd.f32 %v7074_v44, %v6889_v11 }
 0xaf1   : > { %8308 = vmatmul.msk.bf16.gmra.mxu3 %vm3721_vm8, %v7607_v5 }
 0xaf2   : > { %v7232_v62 = vpack.c.bf16 %v7184_v21, %v7184_v21  ;;  %v7231_v51 = vpack.c.bf16 %v7183_v10, %v7183_v10  ;;  %v6894_v21 = vmul.f32 %v14786_v34, %v14323_v54  ;;  %v6893_v10 = vmul.f32 %v14786_v34, %v14248_v61 }
 0xaf4   : > { %v15053_v22 = vunpack.c.l.b16 %v7232_v62  ;;  %v15055_v41 = vunpack.c.l.b16 %v7231_v51  ;;  %v7746_v33 = vpop.f32.mrf.mxu3 }
 0xaf5   : > { %v7747_v31 = vadd.f32 %v15051_v9, %v7746_v33 }
 0xaf6   : > { %v7406_v23 = vpack.c.b16 %v15053_v22, %v15055_v41  ;;  %v16272_v41 = vld [vmem:[#allocation77_spill] sm:$0xff] }
 0xaf7   : > { %v7866_v0 = vmax.f32 %v7747_v31, 0.0  ;;  %v7080_v38 = vpop.permute.xlu1 %7079  ;;  %v7078_v42 = vpop.permute.xlu0 %7077  ;;  %v16264_v31 = vld [vmem:[#allocation95_spill] sm:$0xff] }
 0xaf8   : > { %v7186_v53 = vadd.f32 %v7080_v38, %v6892_v40  ;;  %v7185_v13 = vadd.f32 %v7078_v42, %v6891_v50  ;;  %v7610_v40 = vsel %vm600_vm0, %v7398_v55, %v16264_v31  ;;  %v6895_v55 = vmul.f32 %v14786_v34, %v14325_v52 }
 0xaf9   : > { %v7914_v26 = vpack.c.bf16 %v7866_v0, %v7866_v0  ;;  %v7634_v46 = vsel %vm600_vm0, %v7406_v23, %v14833_v58 }
 0xafa   : > { %v7234_v59 = vpack.c.bf16 %v7186_v53, %v7186_v53  ;;  %v7233_v2 = vpack.c.bf16 %v7185_v13, %v7185_v13 }
 0xafb   : > { %7963 = vst.msk [vmem:[%s15068_s18] sm:$0xf] %vm7962_vm12, %v7914_v26 }
 0xafc   : > { %v15072_v15 = vunpack.c.l.b16 %v7234_v59  ;;  %v15074_v28 = vunpack.c.l.b16 %v7233_v2  ;;  %v7748_v11 = vpop.f32.mrf.mxu3 }
 0xafd   : > { %v7749_v57 = vadd.f32 %v15051_v9, %v7748_v11 }
 0xafe   : > { %v7407_v44 = vpack.c.b16 %v15072_v15, %v15074_v28  ;;  %v16273_v28 = vld [vmem:[#allocation82_spill] sm:$0xff] }
 0xaff   : > { %v7867_v39 = vmax.f32 %v7749_v57, 0.0  ;;  %v7084_v5 = vpop.permute.xlu1 %7083  ;;  %v7082_v62 = vpop.permute.xlu0 %7081 }
 0xb00   : > { %v7188_v51 = vadd.f32 %v7084_v5, %v6894_v21  ;;  %v7187_v33 = vadd.f32 %v7082_v62, %v6893_v10  ;;  %v7637_v58 = vsel %vm600_vm0, %v7407_v44, %v16272_v41 }
 0xb01   : > { %v7915_v50 = vpack.c.bf16 %v7867_v39, %v7867_v39  ;;  %8309 = vmatmul.msk.bf16.gmra.mxu3 %vm3721_vm8, %v7610_v40 }
 0xb02   : > { %v7236_v0 = vpack.c.bf16 %v7188_v51, %v7188_v51  ;;  %v7235_v38 = vpack.c.bf16 %v7187_v33, %v7187_v33  ;;  %v6898_v51 = vmul.f32 %v14786_v34, %v14414_v30  ;;  %v6897_v33 = vmul.f32 %v14786_v34, %v14426_v16 }
 0xb03   : > { %7964 = vst.msk [vmem:[%s15068_s18 + $0x4] sm:$0xf] %vm7962_vm12, %v7915_v50 }
 0xb04   : > { %v15091_v61 = vunpack.c.l.b16 %v7236_v0  ;;  %v15093_v54 = vunpack.c.l.b16 %v7235_v38  ;;  %v7751_v42 = vpop.f32.mrf.mxu3 }
 0xb05   : > { %v7752_v53 = vadd.f32 %v15051_v9, %v7751_v42  ;;  %v16265_v42 = vld [vmem:[#allocation32_spill] sm:$0xff] }
 0xb06   : > { %v7408_v24 = vpack.c.b16 %v15091_v61, %v15093_v54  ;;  %v16274_v54 = vld [vmem:[#allocation86_spill] sm:$0xff] }
 0xb07   : > { %v7868_v13 = vmax.f32 %v7752_v53, 0.0  ;;  %v7088_v26 = vpop.permute.xlu1 %7087  ;;  %v7086_v59 = vpop.permute.xlu0 %7085  ;;  %v7613_v53 = vsel %vm600_vm0, %v7399_v29, %v16265_v42  ;;  %v6899_v29 = vmul.f32 %v14786_v34, %v14450_v56 }
 0xb08   : > { %v7190_v2 = vadd.f32 %v7088_v26, %v6896_v63  ;;  %v7189_v11 = vadd.f32 %v7086_v59, %v6895_v55  ;;  %v7640_v44 = vsel %vm600_vm0, %v7408_v24, %v16273_v28 }
 0xb09   : > { %v7916_v57 = vpack.c.bf16 %v7868_v13, %v7868_v13 }
 0xb0a   : > { %v7238_v21 = vpack.c.bf16 %v7190_v2, %v7190_v2  ;;  %v7237_v10 = vpack.c.bf16 %v7189_v11, %v7189_v11 }
 0xb0b   : > { %7965 = vst.msk [vmem:[%s15068_s18 + $0x8] sm:$0xf] %vm7962_vm12, %v7916_v57 }
 0xb0c   : > { %v15104_v39 = vunpack.c.l.b16 %v7238_v21  ;;  %v15106_v5 = vunpack.c.l.b16 %v7237_v10  ;;  %v7753_v62 = vpop.f32.mrf.mxu3 }
 0xb0d   : > { %v7754_v7 = vadd.f32 %v15051_v9, %v7753_v62 }
 0xb0e   : > { %v7409_v52 = vpack.c.b16 %v15104_v39, %v15106_v5  ;;  %v16275_v5 = vld [vmem:[#allocation83_spill] sm:$0xff] }
 0xb0f   : > { %v7869_v31 = vmax.f32 %v7754_v7, 0.0  ;;  %v7092_v40 = vpop.permute.xlu1 %7091  ;;  %v7090_v50 = vpop.permute.xlu0 %7089 }
 0xb10   : > { %v7192_v0 = vadd.f32 %v7092_v40, %v6898_v51  ;;  %v7191_v38 = vadd.f32 %v7090_v50, %v6897_v33  ;;  %v6902_v50 = vmul.f32 %v14786_v34, %v14466_v37  ;;  %v7643_v24 = vsel %vm600_vm0, %v7409_v52, %v16274_v54 }
 0xb11   : > { %v7917_v63 = vpack.c.bf16 %v7869_v31, %v7869_v31  ;;  %8310 = vmatmul.msk.bf16.gmra.mxu3 %vm3721_vm8, %v7613_v53 }
 0xb12   : > { %v7240_v55 = vpack.c.bf16 %v7192_v0, %v7192_v0  ;;  %v7239_v13 = vpack.c.bf16 %v7191_v38, %v7191_v38  ;;  %v6901_v0 = vmul.f32 %v14786_v34, %v14464_v1 }
 0xb13   : > { %7966 = vst.msk [vmem:[%s15068_s18 + $0xc] sm:$0xf] %vm7962_vm12, %v7917_v63 }
 0xb14   : > { %v15123_v30 = vunpack.c.l.b16 %v7240_v55  ;;  %v15125_v16 = vunpack.c.l.b16 %v7239_v13  ;;  %v7756_v26 = vpop.f32.mrf.mxu3  ;;  %v16266_v13 = vld [vmem:[#allocation10_spill] sm:$0xff] }
 0xb15   : > { %v7757_v59 = vadd.f32 %v15051_v9, %v7756_v26  ;;  %v7616_v26 = vsel %vm600_vm0, %v7400_v35, %v16266_v13 }
 0xb16   : > { %v7410_v43 = vpack.c.b16 %v15123_v30, %v15125_v16  ;;  %v16276_v16 = vld [vmem:[#allocation38_spill] sm:$0xff] }
 0xb17   : > { %v7870_v2 = vmax.f32 %v7757_v59, 0.0  ;;  %v7096_v11 = vpop.permute.xlu1 %7095  ;;  %v7094_v57 = vpop.permute.xlu0 %7093 }
 0xb18   : > { %v7194_v21 = vadd.f32 %v7096_v11, %v6900_v14  ;;  %v7193_v10 = vadd.f32 %v7094_v57, %v6899_v29  ;;  %v7646_v52 = vsel %vm600_vm0, %v7410_v43, %v16275_v5 }
 0xb19   : > { %v7918_v62 = vpack.c.bf16 %v7870_v2, %v7870_v2 }
 0xb1a   : > { %v7242_v7 = vpack.c.bf16 %v7194_v21, %v7194_v21  ;;  %v7241_v51 = vpack.c.bf16 %v7193_v10, %v7193_v10 }
 0xb1b   : > { %7967 = vst.msk [vmem:[%s15068_s18 + $0x10] sm:$0xf] %vm7962_vm12, %v7918_v62 }
 0xb1c   : > { %v15136_v33 = vunpack.c.l.b16 %v7242_v7  ;;  %v15138_v31 = vunpack.c.l.b16 %v7241_v51  ;;  %v7758_v40 = vpop.f32.mrf.mxu3  ;;  %v16267_v51 = vld [vmem:[#allocation39_spill] sm:$0xff] }
 0xb1d   : > { %v7759_v36 = vadd.f32 %v15051_v9, %v7758_v40  ;;  %v7619_v40 = vsel %vm600_vm0, %v7401_v6, %v16267_v51  ;;  %v7622_v6 = vsel %vm600_vm0, %v7402_v32, %v16268_v45  ;;  %v7625_v32 = vsel %vm600_vm0, %v7403_v17, %v16269_v4 }
 0xb1e   : > { %v7411_v56 = vpack.c.b16 %v15136_v33, %v15138_v31  ;;  %v7628_v17 = vsel %vm600_vm0, %v7404_v3, %v16270_v19  ;;  %v7631_v3 = vsel %vm600_vm0, %v7405_v25, %v16271_v20 }
 0xb1f   : > { %v7871_v38 = vmax.f32 %v7759_v36, 0.0  ;;  %v7100_v42 = vpop.permute.xlu1 %7099  ;;  %v7098_v53 = vpop.permute.xlu0 %7097 }
 0xb20   : > { %v7196_v63 = vadd.f32 %v7100_v42, %v6902_v50  ;;  %v7195_v55 = vadd.f32 %v7098_v53, %v6901_v0  ;;  %v7649_v43 = vsel %vm600_vm0, %v7411_v56, %v16276_v16 }
 0xb21   : > { %v7919_v59 = vpack.c.bf16 %v7871_v38, %v7871_v38  ;;  %8311 = vmatmul.msk.bf16.gmra.mxu3 %vm3721_vm8, %v7616_v26 }
 0xb22   : > { %v7244_v14 = vpack.c.bf16 %v7196_v63, %v7196_v63  ;;  %v7243_v37 = vpack.c.bf16 %v7195_v55, %v7195_v55 }
 0xb23   : > { %7968 = vst.msk [vmem:[%s15068_s18 + $0x14] sm:$0xf] %vm7962_vm12, %v7919_v59 }
 0xb24   : > { %v15155_v1 = vunpack.c.l.b16 %v7244_v14  ;;  %v15157_v34 = vunpack.c.l.b16 %v7243_v37  ;;  %v7761_v29 = vpop.f32.mrf.mxu3 }
 0xb25   : > { %v7762_v2 = vadd.f32 %v15051_v9, %v7761_v29 }
 0xb26   : > { %v7412_v49 = vpack.c.b16 %v15155_v1, %v15157_v34 }
 0xb27   : > { %v7872_v47 = vmax.f32 %v7762_v2, 0.0  ;;  %v948_v35 = vpop.permute.xlu1 %947  ;;  %v943_v11 = vpop.permute.xlu0 %942 }
 0xb28   : > { %v7652_v56 = vsel %vm600_vm0, %v7412_v49, %v14922_v12 }
 0xb29   : > { %v7920_v57 = vpack.c.bf16 %v7872_v47, %v7872_v47 }
 0xb2b   : > { %7969 = vst.msk [vmem:[%s15068_s18 + $0x18] sm:$0xf] %vm7962_vm12, %v7920_v57 }
 0xb2c   : > { %v7763_v21 = vpop.f32.mrf.mxu3 }
 0xb2d   : > { %v7764_v10 = vadd.f32 %v15051_v9, %v7763_v21 }
 0xb2f   : > { %v7873_v62 = vmax.f32 %v7764_v10, 0.0  ;;  %v1268_v7 = vpop.permute.xlu0 %1267 }
 0xb31   : > { %v7921_v36 = vpack.c.bf16 %v7873_v62, %v7873_v62  ;;  %8312 = vmatmul.msk.bf16.gmra.mxu3 %vm3721_vm8, %v7619_v40 }
 0xb33   : > { %7970 = vst.msk [vmem:[%s15068_s18 + $0x1c] sm:$0xf] %vm7962_vm12, %v7921_v36 }
 0xb34   : > { %v7766_v50 = vpop.f32.mrf.mxu3 }
 0xb35   : > { %v7767_v0 = vadd.f32 %v15051_v9, %v7766_v50 }
 0xb37   : > { %v7874_v38 = vmax.f32 %v7767_v0, 0.0 }
 0xb39   : > { %v7922_v42 = vpack.c.bf16 %v7874_v38, %v7874_v38 }
 0xb3b   : > { %7971 = vst.msk [vmem:[%s15068_s18 + $0x20] sm:$0xf] %vm7962_vm12, %v7922_v42 }
 0xb3c   : > { %v7768_v53 = vpop.f32.mrf.mxu3 }
 0xb3d   : > { %v7769_v63 = vadd.f32 %v15051_v9, %v7768_v53 }
 0xb3f   : > { %v7875_v27 = vmax.f32 %v7769_v63, 0.0 }
 0xb41   : > { %v7923_v55 = vpack.c.bf16 %v7875_v27, %v7875_v27  ;;  %8313 = vmatmul.msk.bf16.gmra.mxu3 %vm3721_vm8, %v7622_v6 }
 0xb43   : > { %7972 = vst.msk [vmem:[%s15068_s18 + $0x24] sm:$0xf] %vm7962_vm12, %v7923_v55 }
 0xb44   : > { %v7771_v13 = vpop.f32.mrf.mxu3 }
 0xb45   : > { %v7772_v26 = vadd.f32 %v15051_v9, %v7771_v13 }
 0xb47   : > { %v7876_v59 = vmax.f32 %v7772_v26, 0.0 }
 0xb49   : > { %v7924_v14 = vpack.c.bf16 %v7876_v59, %v7876_v59 }
 0xb4b   : > { %7973 = vst.msk [vmem:[%s15068_s18 + $0x28] sm:$0xf] %vm7962_vm12, %v7924_v14 }
 0xb4c   : > { %v7773_v37 = vpop.f32.mrf.mxu3 }
 0xb4d   : > { %v7774_v29 = vadd.f32 %v15051_v9, %v7773_v37 }
 0xb4f   : > { %v7877_v60 = vmax.f32 %v7774_v29, 0.0 }
 0xb51   : > { %v7925_v2 = vpack.c.bf16 %v7877_v60, %v7877_v60  ;;  %8314 = vmatmul.msk.bf16.gmra.mxu3 %vm3721_vm8, %v7625_v32 }
 0xb53   : > { %7974 = vst.msk [vmem:[%s15068_s18 + $0x2c] sm:$0xf] %vm7962_vm12, %v7925_v2 }
 0xb54   : > { %v7776_v47 = vpop.f32.mrf.mxu3 }
 0xb55   : > { %v7777_v35 = vadd.f32 %v15051_v9, %v7776_v47 }
 0xb57   : > { %v7878_v11 = vmax.f32 %v7777_v35, 0.0 }
 0xb59   : > { %v7926_v57 = vpack.c.bf16 %v7878_v11, %v7878_v11 }
 0xb5b   : > { %7975 = vst.msk [vmem:[%s15068_s18 + $0x30] sm:$0xf] %vm7962_vm12, %v7926_v57 }
 0xb5c   : > { %v7778_v21 = vpop.f32.mrf.mxu3 }
 0xb5d   : > { %v7779_v10 = vadd.f32 %v15051_v9, %v7778_v21 }
 0xb5f   : > { %v7879_v48 = vmax.f32 %v7779_v10, 0.0 }
 0xb61   : > { %v7927_v62 = vpack.c.bf16 %v7879_v48, %v7879_v48  ;;  %8315 = vmatmul.msk.bf16.gmra.mxu3 %vm3721_vm8, %v7628_v17 }
 0xb63   : > { %7976 = vst.msk [vmem:[%s15068_s18 + $0x34] sm:$0xf] %vm7962_vm12, %v7927_v62 }
 0xb64   : > { %v7781_v7 = vpop.f32.mrf.mxu3 }
 0xb65   : > { %v7782_v51 = vadd.f32 %v15051_v9, %v7781_v7 }
 0xb67   : > { %v7880_v40 = vmax.f32 %v7782_v51, 0.0 }
 0xb69   : > { %v7928_v36 = vpack.c.bf16 %v7880_v40, %v7880_v40 }
 0xb6b   : > { %7977 = vst.msk [vmem:[%s15068_s18 + $0x38] sm:$0xf] %vm7962_vm12, %v7928_v36 }
 0xb6c   : > { %v7783_v50 = vpop.f32.mrf.mxu3 }
 0xb6d   : > { %v7784_v0 = vadd.f32 %v15051_v9, %v7783_v50 }
 0xb6f   : > { %v7881_v8 = vmax.f32 %v7784_v0, 0.0 }
 0xb71   : > { %v7929_v38 = vpack.c.bf16 %v7881_v8, %v7881_v8  ;;  %8316 = vmatmul.msk.bf16.gmra.mxu3 %vm3721_vm8, %v7631_v3 }
 0xb73   : > { %7978 = vst.msk [vmem:[%s15068_s18 + $0x3c] sm:$0xf] %vm7962_vm12, %v7929_v38 }
 0xb74   : > { %v7786_v42 = vpop.f32.mrf.mxu3 }
 0xb75   : > { %v7787_v53 = vadd.f32 %v15051_v9, %v7786_v42 }
 0xb77   : > { %v7882_v63 = vmax.f32 %v7787_v53, 0.0 }
 0xb79   : > { %v7930_v27 = vpack.c.bf16 %v7882_v63, %v7882_v63 }
 0xb7b   : > { %7979 = vst.msk [vmem:[%s15068_s18 + $0x40] sm:$0xf] %vm7962_vm12, %v7930_v27 }
 0xb7c   : > { %v7788_v45 = vpop.f32.mrf.mxu3 }
 0xb7d   : > { %v7789_v6 = vadd.f32 %v15051_v9, %v7788_v45 }
 0xb7f   : > { %v7883_v18 = vmax.f32 %v7789_v6, 0.0 }
 0xb81   : > { %v7931_v25 = vpack.c.bf16 %v7883_v18, %v7883_v18  ;;  %8317 = vmatmul.msk.bf16.gmra.mxu3 %vm3721_vm8, %v7634_v46 }
 0xb83   : > { %7980 = vst.msk [vmem:[%s15068_s18 + $0x44] sm:$0xf] %vm7962_vm12, %v7931_v25 }
 0xb84   : > { %v7791_v55 = vpop.f32.mrf.mxu3 }
 0xb85   : > { %v7792_v13 = vadd.f32 %v15051_v9, %v7791_v55 }
 0xb87   : > { %v7884_v26 = vmax.f32 %v7792_v13, 0.0 }
 0xb89   : > { %v7932_v59 = vpack.c.bf16 %v7884_v26, %v7884_v26 }
 0xb8b   : > { %7981 = vst.msk [vmem:[%s15068_s18 + $0x48] sm:$0xf] %vm7962_vm12, %v7932_v59 }
 0xb8c   : > { %v7793_v14 = vpop.f32.mrf.mxu3 }
 0xb8d   : > { %v7794_v37 = vadd.f32 %v15051_v9, %v7793_v14 }
 0xb8f   : > { %v7885_v22 = vmax.f32 %v7794_v37, 0.0 }
 0xb91   : > { %v7933_v23 = vpack.c.bf16 %v7885_v22, %v7885_v22  ;;  %8318 = vmatmul.msk.bf16.gmra.mxu3 %vm3721_vm8, %v7637_v58 }
 0xb93   : > { %7982 = vst.msk [vmem:[%s15068_s18 + $0x4c] sm:$0xf] %vm7962_vm12, %v7933_v23 }
 0xb94   : > { %v7796_v29 = vpop.f32.mrf.mxu3 }
 0xb95   : > { %v7797_v60 = vadd.f32 %v15051_v9, %v7796_v29 }
 0xb97   : > { %v7886_v4 = vmax.f32 %v7797_v60, 0.0 }
 0xb99   : > { %v7934_v32 = vpack.c.bf16 %v7886_v4, %v7886_v4 }
 0xb9b   : > { %7983 = vst.msk [vmem:[%s15068_s18 + $0x50] sm:$0xf] %vm7962_vm12, %v7934_v32 }
 0xb9c   : > { %v7798_v2 = vpop.f32.mrf.mxu3 }
 0xb9d   : > { %v7799_v47 = vadd.f32 %v15051_v9, %v7798_v2 }
 0xb9f   : > { %v7887_v15 = vmax.f32 %v7799_v47, 0.0 }
 0xba1   : > { %v7935_v35 = vpack.c.bf16 %v7887_v15, %v7887_v15  ;;  %8319 = vmatmul.msk.bf16.gmra.mxu3 %vm3721_vm8, %v7640_v44 }
 0xba3   : > { %7984 = vst.msk [vmem:[%s15068_s18 + $0x54] sm:$0xf] %vm7962_vm12, %v7935_v35 }
 0xba4   : > { %v7801_v11 = vpop.f32.mrf.mxu3 }
 0xba5   : > { %v7802_v57 = vadd.f32 %v15051_v9, %v7801_v11 }
 0xba7   : > { %v7888_v21 = vmax.f32 %v7802_v57, 0.0 }
 0xba9   : > { %v7936_v10 = vpack.c.bf16 %v7888_v21, %v7888_v21 }
 0xbab   : > { %7985 = vst.msk [vmem:[%s15068_s18 + $0x58] sm:$0xf] %vm7962_vm12, %v7936_v10 }
 0xbac   : > { %v7803_v48 = vpop.f32.mrf.mxu3 }
 0xbad   : > { %v7804_v19 = vadd.f32 %v15051_v9, %v7803_v48 }
 0xbaf   : > { %v7889_v61 = vmax.f32 %v7804_v19, 0.0 }
 0xbb1   : > { %v7937_v17 = vpack.c.bf16 %v7889_v61, %v7889_v61  ;;  %8320 = vmatmul.msk.bf16.gmra.mxu3 %vm3721_vm8, %v7643_v24 }
 0xbb3   : > { %7986 = vst.msk [vmem:[%s15068_s18 + $0x5c] sm:$0xf] %vm7962_vm12, %v7937_v17 }
 0xbb4   : > { %v7806_v62 = vpop.f32.mrf.mxu3 }
 0xbb5   : > { %v7807_v7 = vadd.f32 %v15051_v9, %v7806_v62 }
 0xbb7   : > { %v7890_v51 = vmax.f32 %v7807_v7, 0.0 }
 0xbb9   : > { %v7938_v40 = vpack.c.bf16 %v7890_v51, %v7890_v51 }
 0xbbb   : > { %7987 = vst.msk [vmem:[%s15068_s18 + $0x60] sm:$0xf] %vm7962_vm12, %v7938_v40 }
 0xbbc   : > { %v7808_v36 = vpop.f32.mrf.mxu3 }
 0xbbd   : > { %v7809_v50 = vadd.f32 %v15051_v9, %v7808_v36 }
 0xbbf   : > { %v7891_v39 = vmax.f32 %v7809_v50, 0.0 }
 0xbc1   : > { %v7939_v0 = vpack.c.bf16 %v7891_v39, %v7891_v39  ;;  %8321 = vmatmul.msk.bf16.gmra.mxu3 %vm3721_vm8, %v7646_v52 }
 0xbc3   : > { %7988 = vst.msk [vmem:[%s15068_s18 + $0x64] sm:$0xf] %vm7962_vm12, %v7939_v0 }
 0xbc4   : > { %v7811_v8 = vpop.f32.mrf.mxu3 }
 0xbc5   : > { %v7812_v20 = vadd.f32 %v15051_v9, %v7811_v8 }
 0xbc7   : > { %v7892_v3 = vmax.f32 %v7812_v20, 0.0 }
 0xbc9   : > { %v7940_v38 = vpack.c.bf16 %v7892_v3, %v7892_v3 }
 0xbcb   : > { %7989 = vst.msk [vmem:[%s15068_s18 + $0x68] sm:$0xf] %vm7962_vm12, %v7940_v38 }
 0xbcc   : > { %v7813_v42 = vpop.f32.mrf.mxu3 }
 0xbcd   : > { %v7814_v53 = vadd.f32 %v15051_v9, %v7813_v42 }
 0xbcf   : > { %v7893_v30 = vmax.f32 %v7814_v53, 0.0 }
 0xbd1   : > { %v7941_v63 = vpack.c.bf16 %v7893_v30, %v7893_v30  ;;  %8322 = vmatmul.msk.bf16.gmra.mxu3 %vm3721_vm8, %v7649_v43 }
 0xbd3   : > { %7990 = vst.msk [vmem:[%s15068_s18 + $0x6c] sm:$0xf] %vm7962_vm12, %v7941_v63 }
 0xbd4   : > { %v7816_v27 = vpop.f32.mrf.mxu3 }
 0xbd5   : > { %v7817_v45 = vadd.f32 %v15051_v9, %v7816_v27 }
 0xbd7   : > { %v7894_v6 = vmax.f32 %v7817_v45, 0.0 }
 0xbd9   : > { %v7942_v18 = vpack.c.bf16 %v7894_v6, %v7894_v6 }
 0xbdb   : > { %7991 = vst.msk [vmem:[%s15068_s18 + $0x70] sm:$0xf] %vm7962_vm12, %v7942_v18 }
 0xbdc   : > { %v7818_v46 = vpop.f32.mrf.mxu3 }
 0xbdd   : > { %v7819_v33 = vadd.f32 %v15051_v9, %v7818_v46 }
 0xbdf   : > { %v7895_v31 = vmax.f32 %v7819_v33, 0.0 }
 0xbe1   : > { %v7943_v25 = vpack.c.bf16 %v7895_v31, %v7895_v31  ;;  %8323 = vmatmul.msk.bf16.gmra.mxu3 %vm3721_vm8, %v7652_v56 }
 0xbe3   : > { %7992 = vst.msk [vmem:[%s15068_s18 + $0x74] sm:$0xf] %vm7962_vm12, %v7943_v25 }
 0xbe4   : > { %v7821_v55 = vpop.f32.mrf.mxu3 }
 0xbe5   : > { %v7822_v13 = vadd.f32 %v15051_v9, %v7821_v55 }
 0xbe7   : > { %v7896_v26 = vmax.f32 %v7822_v13, 0.0 }
 0xbe9   : > { %v7944_v59 = vpack.c.bf16 %v7896_v26, %v7896_v26 }
 0xbeb   : > { %7993 = vst.msk [vmem:[%s15068_s18 + $0x78] sm:$0xf] %vm7962_vm12, %v7944_v59 }
 0xbec   : > { %v7823_v14 = vpop.f32.mrf.mxu3 }
 0xbed   : > { %v7824_v37 = vadd.f32 %v15051_v9, %v7823_v14 }
 0xbef   : > { %v7897_v1 = vmax.f32 %v7824_v37, 0.0 }
 0xbf1   : > { %v7945_v34 = vpack.c.bf16 %v7897_v1, %v7897_v1 }
 0xbf3   : > { %7994 = vst.msk [vmem:[%s15068_s18 + $0x7c] sm:$0xf] %vm7962_vm12, %v7945_v34 }
 0xbf4   : > { %v7826_v12 = vpop.f32.mrf.mxu3 }
 0xbf5   : > { %v7827_v49 = vadd.f32 %v15051_v9, %v7826_v12 }
 0xbf7   : > { %v7898_v22 = vmax.f32 %v7827_v49, 0.0 }
 0xbf9   : > { %v7946_v41 = vpack.c.bf16 %v7898_v22, %v7898_v22 }
 0xbfb   : > { %7995 = vst.msk [vmem:[%s15068_s18 + $0x80] sm:$0xf] %vm7962_vm12, %v7946_v41 }
 0xbfc   : > { %v7828_v58 = vpop.f32.mrf.mxu3 }
 0xbfd   : > { %v7829_v23 = vadd.f32 %v15051_v9, %v7828_v58 }
 0xbff   : > { %v7899_v29 = vmax.f32 %v7829_v23, 0.0 }
 0xc01   : > { %v7947_v60 = vpack.c.bf16 %v7899_v29, %v7899_v29 }
 0xc03   : > { %7996 = vst.msk [vmem:[%s15068_s18 + $0x84] sm:$0xf] %vm7962_vm12, %v7947_v60 }
 0xc04   : > { %v7831_v4 = vpop.f32.mrf.mxu3 }
 0xc05   : > { %v7832_v32 = vadd.f32 %v15051_v9, %v7831_v4 }
 0xc07   : > { %v7900_v2 = vmax.f32 %v7832_v32, 0.0 }
 0xc09   : > { %v7948_v47 = vpack.c.bf16 %v7900_v2, %v7900_v2 }
 0xc0b   : > { %7997 = vst.msk [vmem:[%s15068_s18 + $0x88] sm:$0xf] %vm7962_vm12, %v7948_v47 }
 0xc0c   : > { %v7833_v15 = vpop.f32.mrf.mxu3 }
 0xc0d   : > { %v7834_v28 = vadd.f32 %v15051_v9, %v7833_v15 }
 0xc0f   : > { %v7901_v44 = vmax.f32 %v7834_v28, 0.0 }
 0xc11   : > { %v7949_v35 = vpack.c.bf16 %v7901_v44, %v7901_v44 }
 0xc13   : > { %7998 = vst.msk [vmem:[%s15068_s18 + $0x8c] sm:$0xf] %vm7962_vm12, %v7949_v35 }
 0xc14   : > { %v7836_v11 = vpop.f32.mrf.mxu3 }
 0xc15   : > { %v7837_v57 = vadd.f32 %v15051_v9, %v7836_v11 }
 0xc17   : > { %v7902_v21 = vmax.f32 %v7837_v57, 0.0 }
 0xc19   : > { %v7950_v10 = vpack.c.bf16 %v7902_v21, %v7902_v21 }
 0xc1b   : > { %7999 = vst.msk [vmem:[%s15068_s18 + $0x90] sm:$0xf] %vm7962_vm12, %v7950_v10 }
 0xc1c   : > { %v7838_v48 = vpop.f32.mrf.mxu3 }
 0xc1d   : > { %v7839_v19 = vadd.f32 %v15051_v9, %v7838_v48 }
 0xc1f   : > { %v7903_v61 = vmax.f32 %v7839_v19, 0.0 }
 0xc21   : > { %v7951_v54 = vpack.c.bf16 %v7903_v61, %v7903_v61 }
 0xc23   : > { %8000 = vst.msk [vmem:[%s15068_s18 + $0x94] sm:$0xf] %vm7962_vm12, %v7951_v54 }
 0xc24   : > { %v7841_v24 = vpop.f32.mrf.mxu3 }
 0xc25   : > { %v7842_v17 = vadd.f32 %v15051_v9, %v7841_v24 }
 0xc27   : > { %v7904_v62 = vmax.f32 %v7842_v17, 0.0 }
 0xc29   : > { %v7952_v7 = vpack.c.bf16 %v7904_v62, %v7904_v62 }
 0xc2b   : > { %8001 = vst.msk [vmem:[%s15068_s18 + $0x98] sm:$0xf] %vm7962_vm12, %v7952_v7 }
 0xc2c   : > { %v7843_v51 = vpop.f32.mrf.mxu3 }
 0xc2d   : > { %v7844_v40 = vadd.f32 %v15051_v9, %v7843_v51 }
 0xc2f   : > { %v7905_v36 = vmax.f32 %v7844_v40, 0.0 }
 0xc31   : > { %v7953_v50 = vpack.c.bf16 %v7905_v36, %v7905_v36 }
 0xc33   : > { %8002 = vst.msk [vmem:[%s15068_s18 + $0x9c] sm:$0xf] %vm7962_vm12, %v7953_v50 }
 0xc34   : > { %v7846_v39 = vpop.f32.mrf.mxu3 }
 0xc35   : > { %v7847_v5 = vadd.f32 %v15051_v9, %v7846_v39 }
 0xc37   : > { %v7906_v52 = vmax.f32 %v7847_v5, 0.0 }
 0xc39   : > { %v7954_v0 = vpack.c.bf16 %v7906_v52, %v7906_v52 }
 0xc3b   : > { %8003 = vst.msk [vmem:[%s15068_s18 + $0xa0] sm:$0xf] %vm7962_vm12, %v7954_v0 }
 0xc3c   : > { %v7848_v8 = vpop.f32.mrf.mxu3 }
 0xc3d   : > { %v7849_v20 = vadd.f32 %v15051_v9, %v7848_v8 }
 0xc3f   : > { %v7907_v3 = vmax.f32 %v7849_v20, 0.0 }
 0xc41   : > { %v7955_v38 = vpack.c.bf16 %v7907_v3, %v7907_v3 }
 0xc43   : > { %8004 = vst.msk [vmem:[%s15068_s18 + $0xa4] sm:$0xf] %vm7962_vm12, %v7955_v38 }
 0xc44   : > { %v7851_v42 = vpop.f32.mrf.mxu3 }
 0xc45   : > { %v7852_v53 = vadd.f32 %v15051_v9, %v7851_v42 }
 0xc47   : > { %v7908_v30 = vmax.f32 %v7852_v53, 0.0 }
 0xc49   : > { %v7956_v16 = vpack.c.bf16 %v7908_v30, %v7908_v30 }
 0xc4b   : > { %8005 = vst.msk [vmem:[%s15068_s18 + $0xa8] sm:$0xf] %vm7962_vm12, %v7956_v16 }
 0xc4c   : > { %v7853_v43 = vpop.f32.mrf.mxu3 }
 0xc4d   : > { %v7854_v63 = vadd.f32 %v15051_v9, %v7853_v43 }
 0xc4f   : > { %v7909_v27 = vmax.f32 %v7854_v63, 0.0 }
 0xc51   : > { %v7957_v45 = vpack.c.bf16 %v7909_v27, %v7909_v27 }
 0xc53   : > { %8006 = vst.msk [vmem:[%s15068_s18 + $0xac] sm:$0xf] %vm7962_vm12, %v7957_v45 }
 0xc54   : > { %v7856_v6 = vpop.f32.mrf.mxu3 }
 0xc55   : > { %v7857_v18 = vadd.f32 %v15051_v9, %v7856_v6 }
 0xc57   : > { %v7910_v46 = vmax.f32 %v7857_v18, 0.0 }
 0xc59   : > { %v7958_v33 = vpack.c.bf16 %v7910_v46, %v7910_v46 }
 0xc5b   : > { %8007 = vst.msk [vmem:[%s15068_s18 + $0xb0] sm:$0xf] %vm7962_vm12, %v7958_v33 }
 0xc5c   : > { %v7858_v31 = vpop.f32.mrf.mxu3 }
 0xc5d   : > { %v7859_v56 = vadd.f32 %v15051_v9, %v7858_v31 }
 0xc5f   : > { %v7911_v25 = vmax.f32 %v7859_v56, 0.0 }
 0xc61   : > { %v7959_v55 = vpack.c.bf16 %v7911_v25, %v7911_v25 }
 0xc63   : > { %8008 = vst.msk [vmem:[%s15068_s18 + $0xb4] sm:$0xf] %vm7962_vm12, %v7959_v55 }
 0xc64   : > { %v7861_v13 = vpop.f32.mrf.mxu3 }
 0xc65   : > { %v7862_v26 = vadd.f32 %v15051_v9, %v7861_v13 }
 0xc67   : > { %v7912_v59 = vmax.f32 %v7862_v26, 0.0 }
 0xc69   : > { %v7960_v14 = vpack.c.bf16 %v7912_v59, %v7912_v59 }
 0xc6b   : > { %8009 = vst.msk [vmem:[%s15068_s18 + $0xb8] sm:$0xf] %vm7962_vm12, %v7960_v14 }
 0xc6c   : > { %v7863_v37 = vpop.f32.mrf.mxu3 }
 0xc6d   : > { %v7864_v1 = vadd.f32 %v15051_v9, %v7863_v37 }
 0xc6f   : > { %v7913_v34 = vmax.f32 %v7864_v1, 0.0 }
 0xc71   : > { %v7961_v12 = vpack.c.bf16 %v7913_v34, %v7913_v34 }
 0xc73   : > { %8010 = vst.msk [vmem:[%s15068_s18 + $0xbc] sm:$0xf] %vm7962_vm12, %v7961_v12 }
 0xc74 PF: > { %s22_s21 = sadd.s32 1, %s9183_s21  }
 0xc75   : > { %p19_p4 = scmp.ge.s32.totalorder %s22_s21, 4  }
 0xc77   :  { %21 = sbr.rel (!%p19_p4) target bundleno = 1 (0x1), region = 98 }

</bundles_post_ra>
